<compile_context>
chip_gen: v5e
topology: v5e:2x2
jax: 0.10.0
libtpu: 0.0.40
codegen_flags: <defaults>
</compile_context>

<pallas_src>
import numpy as np
import jax
import jax.numpy as jnp
from jax.experimental import pallas as pl
from jax.experimental.pallas import tpu as pltpu

N_FEATURES = 7
N_HIDDEN = 128
N_LAYERS = 3
SEQ_LEN = 8
BATCH = 2
B_PAD = 8   # sublane-aligned per-timestep row block (padded batch rows)


# ----------------------------------------------------------------------------
# Fused kernel: 3 wavefront-scheduled LSTM layers + Linear, all in VMEM/vregs.
# ----------------------------------------------------------------------------
def _lstm_cell(gates, c):
    """PyTorch LSTM cell update from pre-activation gates (i, f, g, o)."""
    H = N_HIDDEN
    i_g = jax.nn.sigmoid(gates[:, 0:H])
    f_g = jax.nn.sigmoid(gates[:, H:2 * H])
    g_g = jnp.tanh(gates[:, 2 * H:3 * H])
    o_g = jax.nn.sigmoid(gates[:, 3 * H:4 * H])
    c_new = f_g * c + i_g * g_g
    h_new = o_g * jnp.tanh(c_new)
    return h_new, c_new


def _make_fused_kernel(T, H):
    BP = B_PAD

    def kernel(x_ref,
               wih0_ref, whh0_ref, b0_ref,
               w1_ref, b1_ref,
               w2_ref, b2_ref,
               wlin_ref, blin_ref,
               out_ref):
        # ---- hoisted loads / broadcasts (kept out of the unrolled loop) ----
        whh0 = whh0_ref[...]                              # (H, 4H)  bf16
        w1 = w1_ref[...]                                  # (2H, 4H) bf16
        w2 = w2_ref[...]                                  # (2H, 4H) bf16
        b1 = jnp.broadcast_to(b1_ref[...], (BP, 4 * H))   # hoisted broadcasts
        b2 = jnp.broadcast_to(b2_ref[...], (BP, 4 * H))
        wlin = wlin_ref[...]                              # (T, H)   f32

        # ---- layer-0 input projection, hoisted over all timesteps ---------
        # (T*8, F) @ (F, 4H) -> (T*8, 4H), f32 accumulation.
        gates0_in = (jnp.dot(x_ref[...].astype(jnp.bfloat16), wih0_ref[...],
                             preferred_element_type=jnp.float32)
                     + b0_ref[...])

        zeros = jnp.zeros((BP, H), jnp.float32)
        h0, c0 = zeros, zeros
        h1, c1 = zeros, zeros
        h2, c2 = zeros, zeros
        acc = jnp.zeros((BP, 1), jnp.float32)

        # ---- wavefront: step s runs (L0,t=s), (L1,t=s-1), (L2,t=s-2) ------
        # Cross-layer inputs are the *beginning-of-step* h values, so the
        # three blocks below are independent within a step (ILP for MXU/EUP).
        for s in range(T + N_LAYERS - 1):
            h0_in = h0      # layer-0 output at time s-1  -> layer 1's input
            h1_in = h1      # layer-1 output at time s-2  -> layer 2's input

            if s < T:                                   # layer 0, t = s
                g0 = gates0_in[s * BP:(s + 1) * BP, :] + jnp.dot(
                    h0.astype(jnp.bfloat16), whh0,
                    preferred_element_type=jnp.float32)
                h0, c0 = _lstm_cell(g0, c0)

            if 1 <= s <= T:                             # layer 1, t = s - 1
                inp1 = jnp.concatenate([h0_in, h1],
                                       axis=1).astype(jnp.bfloat16)  # (8, 2H)
                g1 = jnp.dot(inp1, w1, preferred_element_type=jnp.float32) + b1
                h1, c1 = _lstm_cell(g1, c1)

            if 2 <= s:                                  # layer 2, t = s - 2
                t2 = s - 2
                inp2 = jnp.concatenate([h1_in, h2],
                                       axis=1).astype(jnp.bfloat16)  # (8, 2H)
                g2 = jnp.dot(inp2, w2, preferred_element_type=jnp.float32) + b2
                h2, c2 = _lstm_cell(g2, c2)
                # Folded final Linear(T*H -> 1): PyTorch flatten order t*H + h
                # matched by wlin stored as (T, H).
                acc = acc + jnp.sum(h2 * wlin[t2:t2 + 1, :],
                                    axis=-1, keepdims=True)

        out_ref[...] = acc + blin_ref[...]

    return kernel


def mv_lstm_forward(x, params):
    """x: (B, T, n_features) float32 -> (B, 1) float32."""
    B, T, F = x.shape
    H = N_HIDDEN

    # Time-major, 8-sublane padded layout: rows [t*8, t*8+B) hold x[:, t, :],
    # remaining rows zero (padded batch rows never mix into real rows).
    x_tm = jnp.pad(jnp.transpose(x, (1, 0, 2)),
                   ((0, 0), (0, B_PAD - B), (0, 0))).reshape(T * B_PAD, F)

    # K=256 concat fusion for layers 1 and 2: stack [W_ih ; W_hh] row-wise so
    # the per-step recurrence is a single (8, 256) x (256, 512) matmul.
    w1 = jnp.concatenate([params["wih1"], params["whh1"]], axis=0)
    w2 = jnp.concatenate([params["wih2"], params["whh2"]], axis=0)

    vmem = pl.BlockSpec(memory_space=pltpu.MemorySpace.VMEM)
    out = pl.pallas_call(
        _make_fused_kernel(T, H),
        out_shape=jax.ShapeDtypeStruct((B_PAD, 1), jnp.float32),
        in_specs=[vmem] * 10,
        out_specs=vmem,
    )(x_tm,
      params["wih0"], params["whh0"], params["b0"],
      w1, params["b1"],
      w2, params["b2"],
      params["wlin"], params["blin"])
    return out[:B]


# ----------------------------------------------------------------------------
# Parameters (PyTorch-style uniform(-1/sqrt(fan), 1/sqrt(fan)) init).
# LSTM matmul weights stored bf16 (MXU-friendly); biases / linear weight f32.
# NOTE: if importing real PyTorch weights, transpose (4H, In) -> (In, 4H)
# keeping i,f,g,o block order, and reshape the Linear weight (1, T*H) -> (T, H).
# ----------------------------------------------------------------------------
def init_params(key):
    params = {}
    k = 1.0 / np.sqrt(N_HIDDEN)
    in_dim = N_FEATURES
    for l in range(N_LAYERS):
        key, k1, k2, k3, k4 = jax.random.split(key, 5)
        params[f"wih{l}"] = jax.random.uniform(
            k1, (in_dim, 4 * N_HIDDEN), jnp.float32, -k, k).astype(jnp.bfloat16)
        params[f"whh{l}"] = jax.random.uniform(
            k2, (N_HIDDEN, 4 * N_HIDDEN), jnp.float32, -k, k).astype(jnp.bfloat16)
        b_ih = jax.random.uniform(k3, (4 * N_HIDDEN,), jnp.float32, -k, k)
        b_hh = jax.random.uniform(k4, (4 * N_HIDDEN,), jnp.float32, -k, k)
        params[f"b{l}"] = (b_ih + b_hh).reshape(1, 4 * N_HIDDEN)
        in_dim = N_HIDDEN
    key, k1, k2 = jax.random.split(key, 3)
    d = N_HIDDEN * SEQ_LEN
    kl = 1.0 / np.sqrt(d)
    # stored as (T, H): row t = Linear weights for timestep t's hidden vector
    params["wlin"] = jax.random.uniform(
        k1, (SEQ_LEN, N_HIDDEN), jnp.float32, -kl, kl)
    params["blin"] = jax.random.uniform(k2, (1, 1), jnp.float32, -kl, kl)
    return params


# ----------------------------------------------------------------------------
# Pure-JAX reference (same bf16 weights, f32 accumulation) for correctness.
# ----------------------------------------------------------------------------
def ref_forward(x, params):
    B, T, _ = x.shape
    H = N_HIDDEN
    h_seq = x
    for l in range(N_LAYERS):
        wih, whh, b = params[f"wih{l}"], params[f"whh{l}"], params[f"b{l}"]
        h = jnp.zeros((B, H), jnp.float32)
        c = jnp.zeros((B, H), jnp.float32)
        outs = []
        for t in range(T):
            g = (jnp.dot(h_seq[:, t, :].astype(jnp.bfloat16), wih,
                         preferred_element_type=jnp.float32)
                 + jnp.dot(h.astype(jnp.bfloat16), whh,
                           preferred_element_type=jnp.float32)
                 + b)
            i_g = jax.nn.sigmoid(g[:, 0:H])
            f_g = jax.nn.sigmoid(g[:, H:2 * H])
            g_g = jnp.tanh(g[:, 2 * H:3 * H])
            o_g = jax.nn.sigmoid(g[:, 3 * H:4 * H])
            c = f_g * c + i_g * g_g
            h = o_g * jnp.tanh(c)
            outs.append(h)
        h_seq = jnp.stack(outs, axis=1)
    flat = h_seq.reshape(B, T * H)
    return flat @ params["wlin"].reshape(T * H, 1) + params["blin"]


if __name__ == "__main__":
    key = jax.random.PRNGKey(0)
    pkey, xkey = jax.random.split(key)
    params = init_params(pkey)
    x = jax.random.normal(xkey, (BATCH, SEQ_LEN, N_FEATURES), jnp.float32)

    out = jax.block_until_ready(mv_lstm_forward(x, params))
    ref = jax.block_until_ready(ref_forward(x, params))

    assert out.shape == (BATCH, 1)
    np.testing.assert_allclose(np.asarray(out), np.asarray(ref),
                               rtol=2e-3, atol=2e-3)
    print("KERNEL_OK")
</pallas_src>

<mosaic_0001>
module attributes {stable_mosaic.version = 11 : i64} {
  func.func @kernel(%arg0: memref<64x7xf32, #tpu.memory_space<vmem>>, %arg1: memref<7x512xbf16, #tpu.memory_space<vmem>>, %arg2: memref<128x512xbf16, #tpu.memory_space<vmem>>, %arg3: memref<1x512xf32, #tpu.memory_space<vmem>>, %arg4: memref<256x512xbf16, #tpu.memory_space<vmem>>, %arg5: memref<1x512xf32, #tpu.memory_space<vmem>>, %arg6: memref<256x512xbf16, #tpu.memory_space<vmem>>, %arg7: memref<1x512xf32, #tpu.memory_space<vmem>>, %arg8: memref<8x128xf32, #tpu.memory_space<vmem>>, %arg9: memref<1x1xf32, #tpu.memory_space<vmem>>, %arg10: memref<8x1xf32, #tpu.memory_space<vmem>>) attributes {dimension_semantics = [], scalar_prefetch = 0 : i64, scratch_operands = 0 : i64, tpu.core_type = #tpu.core_type<tc>} {
    %c0 = arith.constant 0 : index
    %c0_0 = arith.constant 0 : index
    %0 = vector.load %arg2[%c0, %c0_0] : memref<128x512xbf16, #tpu.memory_space<vmem>>, vector<128x512xbf16>
    %c0_1 = arith.constant 0 : index
    %c0_2 = arith.constant 0 : index
    %1 = vector.load %arg4[%c0_1, %c0_2] : memref<256x512xbf16, #tpu.memory_space<vmem>>, vector<256x512xbf16>
    %c0_3 = arith.constant 0 : index
    %c0_4 = arith.constant 0 : index
    %2 = vector.load %arg6[%c0_3, %c0_4] : memref<256x512xbf16, #tpu.memory_space<vmem>>, vector<256x512xbf16>
    %c0_5 = arith.constant 0 : index
    %c0_6 = arith.constant 0 : index
    %3 = vector.load %arg5[%c0_5, %c0_6] : memref<1x512xf32, #tpu.memory_space<vmem>>, vector<1x512xf32>
    %4 = vector.shape_cast %3 : vector<1x512xf32> to vector<1x512xf32>
    %5 = vector.broadcast %4 : vector<1x512xf32> to vector<8x512xf32>
    %c0_7 = arith.constant 0 : index
    %c0_8 = arith.constant 0 : index
    %6 = vector.load %arg7[%c0_7, %c0_8] : memref<1x512xf32, #tpu.memory_space<vmem>>, vector<1x512xf32>
    %7 = vector.shape_cast %6 : vector<1x512xf32> to vector<1x512xf32>
    %8 = vector.broadcast %7 : vector<1x512xf32> to vector<8x512xf32>
    %c0_9 = arith.constant 0 : index
    %c0_10 = arith.constant 0 : index
    %9 = vector.load %arg8[%c0_9, %c0_10] : memref<8x128xf32, #tpu.memory_space<vmem>>, vector<8x128xf32>
    %c0_11 = arith.constant 0 : index
    %c0_12 = arith.constant 0 : index
    %10 = vector.load %arg0[%c0_11, %c0_12] : memref<64x7xf32, #tpu.memory_space<vmem>>, vector<64x7xf32>
    %11 = arith.truncf %10 : vector<64x7xf32> to vector<64x7xbf16>
    %c0_13 = arith.constant 0 : index
    %c0_14 = arith.constant 0 : index
    %12 = vector.load %arg1[%c0_13, %c0_14] : memref<7x512xbf16, #tpu.memory_space<vmem>>, vector<7x512xbf16>
    %cst = arith.constant dense<0.000000e+00> : vector<64x512xf32>
    %13 = tpu.matmul %11, %12, %cst {dimension_numbers = #tpu.dot_dimension_numbers<[1], [0], [0], [1], [0, 0, 1, 1], [], []>} : vector<64x7xbf16>, vector<7x512xbf16>, vector<64x512xf32> -> vector<64x512xf32>
    %c0_15 = arith.constant 0 : index
    %c0_16 = arith.constant 0 : index
    %14 = vector.load %arg3[%c0_15, %c0_16] : memref<1x512xf32, #tpu.memory_space<vmem>>, vector<1x512xf32>
    %15 = vector.broadcast %14 : vector<1x512xf32> to vector<64x512xf32>
    %16 = arith.addf %13, %15 : vector<64x512xf32>
    %cst_17 = arith.constant 0.000000e+00 : f32
    %17 = vector.broadcast %cst_17 : f32 to vector<8x128xf32>
    %cst_18 = arith.constant 0.000000e+00 : f32
    %18 = vector.broadcast %cst_18 : f32 to vector<8x1xf32>
    %19 = vector.extract_strided_slice %16 {offsets = [0, 0], sizes = [8, 512], strides = [1, 1]} : vector<64x512xf32> to vector<8x512xf32>
    %20 = arith.truncf %17 : vector<8x128xf32> to vector<8x128xbf16>
    %cst_19 = arith.constant dense<0.000000e+00> : vector<8x512xf32>
    %21 = tpu.matmul %20, %0, %cst_19 {dimension_numbers = #tpu.dot_dimension_numbers<[1], [0], [0], [1], [0, 0, 1, 1], [], []>} : vector<8x128xbf16>, vector<128x512xbf16>, vector<8x512xf32> -> vector<8x512xf32>
    %22 = arith.addf %19, %21 : vector<8x512xf32>
    %23 = vector.extract_strided_slice %22 {offsets = [0, 0], sizes = [8, 128], strides = [1, 1]} : vector<8x512xf32> to vector<8x128xf32>
    %24 = arith.negf %23 : vector<8x128xf32>
    %25 = math.exp %24 : vector<8x128xf32>
    %cst_20 = arith.constant 1.000000e+00 : f32
    %26 = vector.broadcast %cst_20 : f32 to vector<8x128xf32>
    %27 = arith.addf %26, %25 : vector<8x128xf32>
    %28 = arith.divf %26, %27 : vector<8x128xf32>
    %29 = vector.extract_strided_slice %22 {offsets = [0, 128], sizes = [8, 128], strides = [1, 1]} : vector<8x512xf32> to vector<8x128xf32>
    %30 = arith.negf %29 : vector<8x128xf32>
    %31 = math.exp %30 : vector<8x128xf32>
    %cst_21 = arith.constant 1.000000e+00 : f32
    %32 = vector.broadcast %cst_21 : f32 to vector<8x128xf32>
    %33 = arith.addf %32, %31 : vector<8x128xf32>
    %34 = arith.divf %32, %33 : vector<8x128xf32>
    %35 = vector.extract_strided_slice %22 {offsets = [0, 256], sizes = [8, 128], strides = [1, 1]} : vector<8x512xf32> to vector<8x128xf32>
    %36 = math.tanh %35 : vector<8x128xf32>
    %37 = vector.extract_strided_slice %22 {offsets = [0, 384], sizes = [8, 128], strides = [1, 1]} : vector<8x512xf32> to vector<8x128xf32>
    %38 = arith.negf %37 : vector<8x128xf32>
    %39 = math.exp %38 : vector<8x128xf32>
    %cst_22 = arith.constant 1.000000e+00 : f32
    %40 = vector.broadcast %cst_22 : f32 to vector<8x128xf32>
    %41 = arith.addf %40, %39 : vector<8x128xf32>
    %42 = arith.divf %40, %41 : vector<8x128xf32>
    %43 = arith.mulf %34, %17 : vector<8x128xf32>
    %44 = arith.mulf %28, %36 : vector<8x128xf32>
    %45 = arith.addf %43, %44 : vector<8x128xf32>
    %46 = math.tanh %45 : vector<8x128xf32>
    %47 = arith.mulf %42, %46 : vector<8x128xf32>
    %48 = vector.extract_strided_slice %16 {offsets = [8, 0], sizes = [8, 512], strides = [1, 1]} : vector<64x512xf32> to vector<8x512xf32>
    %49 = arith.truncf %47 : vector<8x128xf32> to vector<8x128xbf16>
    %cst_23 = arith.constant dense<0.000000e+00> : vector<8x512xf32>
    %50 = tpu.matmul %49, %0, %cst_23 {dimension_numbers = #tpu.dot_dimension_numbers<[1], [0], [0], [1], [0, 0, 1, 1], [], []>} : vector<8x128xbf16>, vector<128x512xbf16>, vector<8x512xf32> -> vector<8x512xf32>
    %51 = arith.addf %48, %50 : vector<8x512xf32>
    %52 = vector.extract_strided_slice %51 {offsets = [0, 0], sizes = [8, 128], strides = [1, 1]} : vector<8x512xf32> to vector<8x128xf32>
    %53 = arith.negf %52 : vector<8x128xf32>
    %54 = math.exp %53 : vector<8x128xf32>
    %cst_24 = arith.constant 1.000000e+00 : f32
    %55 = vector.broadcast %cst_24 : f32 to vector<8x128xf32>
    %56 = arith.addf %55, %54 : vector<8x128xf32>
    %57 = arith.divf %55, %56 : vector<8x128xf32>
    %58 = vector.extract_strided_slice %51 {offsets = [0, 128], sizes = [8, 128], strides = [1, 1]} : vector<8x512xf32> to vector<8x128xf32>
    %59 = arith.negf %58 : vector<8x128xf32>
    %60 = math.exp %59 : vector<8x128xf32>
    %cst_25 = arith.constant 1.000000e+00 : f32
    %61 = vector.broadcast %cst_25 : f32 to vector<8x128xf32>
    %62 = arith.addf %61, %60 : vector<8x128xf32>
    %63 = arith.divf %61, %62 : vector<8x128xf32>
    %64 = vector.extract_strided_slice %51 {offsets = [0, 256], sizes = [8, 128], strides = [1, 1]} : vector<8x512xf32> to vector<8x128xf32>
    %65 = math.tanh %64 : vector<8x128xf32>
    %66 = vector.extract_strided_slice %51 {offsets = [0, 384], sizes = [8, 128], strides = [1, 1]} : vector<8x512xf32> to vector<8x128xf32>
    %67 = arith.negf %66 : vector<8x128xf32>
    %68 = math.exp %67 : vector<8x128xf32>
    %cst_26 = arith.constant 1.000000e+00 : f32
    %69 = vector.broadcast %cst_26 : f32 to vector<8x128xf32>
    %70 = arith.addf %69, %68 : vector<8x128xf32>
    %71 = arith.divf %69, %70 : vector<8x128xf32>
    %72 = arith.mulf %63, %45 : vector<8x128xf32>
    %73 = arith.mulf %57, %65 : vector<8x128xf32>
    %74 = arith.addf %72, %73 : vector<8x128xf32>
    %75 = math.tanh %74 : vector<8x128xf32>
    %76 = arith.mulf %71, %75 : vector<8x128xf32>
    %77 = tpu.concatenate %47, %17 in 1 : vector<8x128xf32>, vector<8x128xf32> -> vector<8x256xf32>
    %78 = arith.truncf %77 : vector<8x256xf32> to vector<8x256xbf16>
    %cst_27 = arith.constant dense<0.000000e+00> : vector<8x512xf32>
    %79 = tpu.matmul %78, %1, %cst_27 {dimension_numbers = #tpu.dot_dimension_numbers<[1], [0], [0], [1], [0, 0, 1, 1], [], []>} : vector<8x256xbf16>, vector<256x512xbf16>, vector<8x512xf32> -> vector<8x512xf32>
    %80 = arith.addf %79, %5 : vector<8x512xf32>
    %81 = vector.extract_strided_slice %80 {offsets = [0, 0], sizes = [8, 128], strides = [1, 1]} : vector<8x512xf32> to vector<8x128xf32>
    %82 = arith.negf %81 : vector<8x128xf32>
    %83 = math.exp %82 : vector<8x128xf32>
    %cst_28 = arith.constant 1.000000e+00 : f32
    %84 = vector.broadcast %cst_28 : f32 to vector<8x128xf32>
    %85 = arith.addf %84, %83 : vector<8x128xf32>
    %86 = arith.divf %84, %85 : vector<8x128xf32>
    %87 = vector.extract_strided_slice %80 {offsets = [0, 128], sizes = [8, 128], strides = [1, 1]} : vector<8x512xf32> to vector<8x128xf32>
    %88 = arith.negf %87 : vector<8x128xf32>
    %89 = math.exp %88 : vector<8x128xf32>
    %cst_29 = arith.constant 1.000000e+00 : f32
    %90 = vector.broadcast %cst_29 : f32 to vector<8x128xf32>
    %91 = arith.addf %90, %89 : vector<8x128xf32>
    %92 = arith.divf %90, %91 : vector<8x128xf32>
    %93 = vector.extract_strided_slice %80 {offsets = [0, 256], sizes = [8, 128], strides = [1, 1]} : vector<8x512xf32> to vector<8x128xf32>
    %94 = math.tanh %93 : vector<8x128xf32>
    %95 = vector.extract_strided_slice %80 {offsets = [0, 384], sizes = [8, 128], strides = [1, 1]} : vector<8x512xf32> to vector<8x128xf32>
    %96 = arith.negf %95 : vector<8x128xf32>
    %97 = math.exp %96 : vector<8x128xf32>
    %cst_30 = arith.constant 1.000000e+00 : f32
    %98 = vector.broadcast %cst_30 : f32 to vector<8x128xf32>
    %99 = arith.addf %98, %97 : vector<8x128xf32>
    %100 = arith.divf %98, %99 : vector<8x128xf32>
    %101 = arith.mulf %92, %17 : vector<8x128xf32>
    %102 = arith.mulf %86, %94 : vector<8x128xf32>
    %103 = arith.addf %101, %102 : vector<8x128xf32>
    %104 = math.tanh %103 : vector<8x128xf32>
    %105 = arith.mulf %100, %104 : vector<8x128xf32>
    %106 = vector.extract_strided_slice %16 {offsets = [16, 0], sizes = [8, 512], strides = [1, 1]} : vector<64x512xf32> to vector<8x512xf32>
    %107 = arith.truncf %76 : vector<8x128xf32> to vector<8x128xbf16>
    %cst_31 = arith.constant dense<0.000000e+00> : vector<8x512xf32>
    %108 = tpu.matmul %107, %0, %cst_31 {dimension_numbers = #tpu.dot_dimension_numbers<[1], [0], [0], [1], [0, 0, 1, 1], [], []>} : vector<8x128xbf16>, vector<128x512xbf16>, vector<8x512xf32> -> vector<8x512xf32>
    %109 = arith.addf %106, %108 : vector<8x512xf32>
    %110 = vector.extract_strided_slice %109 {offsets = [0, 0], sizes = [8, 128], strides = [1, 1]} : vector<8x512xf32> to vector<8x128xf32>
    %111 = arith.negf %110 : vector<8x128xf32>
    %112 = math.exp %111 : vector<8x128xf32>
    %cst_32 = arith.constant 1.000000e+00 : f32
    %113 = vector.broadcast %cst_32 : f32 to vector<8x128xf32>
    %114 = arith.addf %113, %112 : vector<8x128xf32>
    %115 = arith.divf %113, %114 : vector<8x128xf32>
    %116 = vector.extract_strided_slice %109 {offsets = [0, 128], sizes = [8, 128], strides = [1, 1]} : vector<8x512xf32> to vector<8x128xf32>
    %117 = arith.negf %116 : vector<8x128xf32>
    %118 = math.exp %117 : vector<8x128xf32>
    %cst_33 = arith.constant 1.000000e+00 : f32
    %119 = vector.broadcast %cst_33 : f32 to vector<8x128xf32>
    %120 = arith.addf %119, %118 : vector<8x128xf32>
    %121 = arith.divf %119, %120 : vector<8x128xf32>
    %122 = vector.extract_strided_slice %109 {offsets = [0, 256], sizes = [8, 128], strides = [1, 1]} : vector<8x512xf32> to vector<8x128xf32>
    %123 = math.tanh %122 : vector<8x128xf32>
    %124 = vector.extract_strided_slice %109 {offsets = [0, 384], sizes = [8, 128], strides = [1, 1]} : vector<8x512xf32> to vector<8x128xf32>
    %125 = arith.negf %124 : vector<8x128xf32>
    %126 = math.exp %125 : vector<8x128xf32>
    %cst_34 = arith.constant 1.000000e+00 : f32
    %127 = vector.broadcast %cst_34 : f32 to vector<8x128xf32>
    %128 = arith.addf %127, %126 : vector<8x128xf32>
    %129 = arith.divf %127, %128 : vector<8x128xf32>
    %130 = arith.mulf %121, %74 : vector<8x128xf32>
    %131 = arith.mulf %115, %123 : vector<8x128xf32>
    %132 = arith.addf %130, %131 : vector<8x128xf32>
    %133 = math.tanh %132 : vector<8x128xf32>
    %134 = arith.mulf %129, %133 : vector<8x128xf32>
    %135 = tpu.concatenate %76, %105 in 1 : vector<8x128xf32>, vector<8x128xf32> -> vector<8x256xf32>
    %136 = arith.truncf %135 : vector<8x256xf32> to vector<8x256xbf16>
    %cst_35 = arith.constant dense<0.000000e+00> : vector<8x512xf32>
    %137 = tpu.matmul %136, %1, %cst_35 {dimension_numbers = #tpu.dot_dimension_numbers<[1], [0], [0], [1], [0, 0, 1, 1], [], []>} : vector<8x256xbf16>, vector<256x512xbf16>, vector<8x512xf32> -> vector<8x512xf32>
    %138 = arith.addf %137, %5 : vector<8x512xf32>
    %139 = vector.extract_strided_slice %138 {offsets = [0, 0], sizes = [8, 128], strides = [1, 1]} : vector<8x512xf32> to vector<8x128xf32>
    %140 = arith.negf %139 : vector<8x128xf32>
    %141 = math.exp %140 : vector<8x128xf32>
    %cst_36 = arith.constant 1.000000e+00 : f32
    %142 = vector.broadcast %cst_36 : f32 to vector<8x128xf32>
    %143 = arith.addf %142, %141 : vector<8x128xf32>
    %144 = arith.divf %142, %143 : vector<8x128xf32>
    %145 = vector.extract_strided_slice %138 {offsets = [0, 128], sizes = [8, 128], strides = [1, 1]} : vector<8x512xf32> to vector<8x128xf32>
    %146 = arith.negf %145 : vector<8x128xf32>
    %147 = math.exp %146 : vector<8x128xf32>
    %cst_37 = arith.constant 1.000000e+00 : f32
    %148 = vector.broadcast %cst_37 : f32 to vector<8x128xf32>
    %149 = arith.addf %148, %147 : vector<8x128xf32>
    %150 = arith.divf %148, %149 : vector<8x128xf32>
    %151 = vector.extract_strided_slice %138 {offsets = [0, 256], sizes = [8, 128], strides = [1, 1]} : vector<8x512xf32> to vector<8x128xf32>
    %152 = math.tanh %151 : vector<8x128xf32>
    %153 = vector.extract_strided_slice %138 {offsets = [0, 384], sizes = [8, 128], strides = [1, 1]} : vector<8x512xf32> to vector<8x128xf32>
    %154 = arith.negf %153 : vector<8x128xf32>
    %155 = math.exp %154 : vector<8x128xf32>
    %cst_38 = arith.constant 1.000000e+00 : f32
    %156 = vector.broadcast %cst_38 : f32 to vector<8x128xf32>
    %157 = arith.addf %156, %155 : vector<8x128xf32>
    %158 = arith.divf %156, %157 : vector<8x128xf32>
    %159 = arith.mulf %150, %103 : vector<8x128xf32>
    %160 = arith.mulf %144, %152 : vector<8x128xf32>
    %161 = arith.addf %159, %160 : vector<8x128xf32>
    %162 = math.tanh %161 : vector<8x128xf32>
    %163 = arith.mulf %158, %162 : vector<8x128xf32>
    %164 = tpu.concatenate %105, %17 in 1 : vector<8x128xf32>, vector<8x128xf32> -> vector<8x256xf32>
    %165 = arith.truncf %164 : vector<8x256xf32> to vector<8x256xbf16>
    %cst_39 = arith.constant dense<0.000000e+00> : vector<8x512xf32>
    %166 = tpu.matmul %165, %2, %cst_39 {dimension_numbers = #tpu.dot_dimension_numbers<[1], [0], [0], [1], [0, 0, 1, 1], [], []>} : vector<8x256xbf16>, vector<256x512xbf16>, vector<8x512xf32> -> vector<8x512xf32>
    %167 = arith.addf %166, %8 : vector<8x512xf32>
    %168 = vector.extract_strided_slice %167 {offsets = [0, 0], sizes = [8, 128], strides = [1, 1]} : vector<8x512xf32> to vector<8x128xf32>
    %169 = arith.negf %168 : vector<8x128xf32>
    %170 = math.exp %169 : vector<8x128xf32>
    %cst_40 = arith.constant 1.000000e+00 : f32
    %171 = vector.broadcast %cst_40 : f32 to vector<8x128xf32>
    %172 = arith.addf %171, %170 : vector<8x128xf32>
    %173 = arith.divf %171, %172 : vector<8x128xf32>
    %174 = vector.extract_strided_slice %167 {offsets = [0, 128], sizes = [8, 128], strides = [1, 1]} : vector<8x512xf32> to vector<8x128xf32>
    %175 = arith.negf %174 : vector<8x128xf32>
    %176 = math.exp %175 : vector<8x128xf32>
    %cst_41 = arith.constant 1.000000e+00 : f32
    %177 = vector.broadcast %cst_41 : f32 to vector<8x128xf32>
    %178 = arith.addf %177, %176 : vector<8x128xf32>
    %179 = arith.divf %177, %178 : vector<8x128xf32>
    %180 = vector.extract_strided_slice %167 {offsets = [0, 256], sizes = [8, 128], strides = [1, 1]} : vector<8x512xf32> to vector<8x128xf32>
    %181 = math.tanh %180 : vector<8x128xf32>
    %182 = vector.extract_strided_slice %167 {offsets = [0, 384], sizes = [8, 128], strides = [1, 1]} : vector<8x512xf32> to vector<8x128xf32>
    %183 = arith.negf %182 : vector<8x128xf32>
    %184 = math.exp %183 : vector<8x128xf32>
    %cst_42 = arith.constant 1.000000e+00 : f32
    %185 = vector.broadcast %cst_42 : f32 to vector<8x128xf32>
    %186 = arith.addf %185, %184 : vector<8x128xf32>
    %187 = arith.divf %185, %186 : vector<8x128xf32>
    %188 = arith.mulf %179, %17 : vector<8x128xf32>
    %189 = arith.mulf %173, %181 : vector<8x128xf32>
    %190 = arith.addf %188, %189 : vector<8x128xf32>
    %191 = math.tanh %190 : vector<8x128xf32>
    %192 = arith.mulf %187, %191 : vector<8x128xf32>
    %193 = vector.extract_strided_slice %9 {offsets = [0, 0], sizes = [1, 128], strides = [1, 1]} : vector<8x128xf32> to vector<1x128xf32>
    %194 = vector.broadcast %193 : vector<1x128xf32> to vector<8x128xf32>
    %195 = arith.mulf %192, %194 : vector<8x128xf32>
    %cst_43 = arith.constant dense<0.000000e+00> : vector<8xf32>
    %196 = vector.multi_reduction <add>, %195, %cst_43 [1] : vector<8x128xf32> to vector<8xf32>
    %197 = vector.shape_cast %196 : vector<8xf32> to vector<8x1xf32>
    %198 = arith.addf %18, %197 : vector<8x1xf32>
    %199 = vector.extract_strided_slice %16 {offsets = [24, 0], sizes = [8, 512], strides = [1, 1]} : vector<64x512xf32> to vector<8x512xf32>
    %200 = arith.truncf %134 : vector<8x128xf32> to vector<8x128xbf16>
    %cst_44 = arith.constant dense<0.000000e+00> : vector<8x512xf32>
    %201 = tpu.matmul %200, %0, %cst_44 {dimension_numbers = #tpu.dot_dimension_numbers<[1], [0], [0], [1], [0, 0, 1, 1], [], []>} : vector<8x128xbf16>, vector<128x512xbf16>, vector<8x512xf32> -> vector<8x512xf32>
    %202 = arith.addf %199, %201 : vector<8x512xf32>
    %203 = vector.extract_strided_slice %202 {offsets = [0, 0], sizes = [8, 128], strides = [1, 1]} : vector<8x512xf32> to vector<8x128xf32>
    %204 = arith.negf %203 : vector<8x128xf32>
    %205 = math.exp %204 : vector<8x128xf32>
    %cst_45 = arith.constant 1.000000e+00 : f32
    %206 = vector.broadcast %cst_45 : f32 to vector<8x128xf32>
    %207 = arith.addf %206, %205 : vector<8x128xf32>
    %208 = arith.divf %206, %207 : vector<8x128xf32>
    %209 = vector.extract_strided_slice %202 {offsets = [0, 128], sizes = [8, 128], strides = [1, 1]} : vector<8x512xf32> to vector<8x128xf32>
    %210 = arith.negf %209 : vector<8x128xf32>
    %211 = math.exp %210 : vector<8x128xf32>
    %cst_46 = arith.constant 1.000000e+00 : f32
    %212 = vector.broadcast %cst_46 : f32 to vector<8x128xf32>
    %213 = arith.addf %212, %211 : vector<8x128xf32>
    %214 = arith.divf %212, %213 : vector<8x128xf32>
    %215 = vector.extract_strided_slice %202 {offsets = [0, 256], sizes = [8, 128], strides = [1, 1]} : vector<8x512xf32> to vector<8x128xf32>
    %216 = math.tanh %215 : vector<8x128xf32>
    %217 = vector.extract_strided_slice %202 {offsets = [0, 384], sizes = [8, 128], strides = [1, 1]} : vector<8x512xf32> to vector<8x128xf32>
    %218 = arith.negf %217 : vector<8x128xf32>
    %219 = math.exp %218 : vector<8x128xf32>
    %cst_47 = arith.constant 1.000000e+00 : f32
    %220 = vector.broadcast %cst_47 : f32 to vector<8x128xf32>
    %221 = arith.addf %220, %219 : vector<8x128xf32>
    %222 = arith.divf %220, %221 : vector<8x128xf32>
    %223 = arith.mulf %214, %132 : vector<8x128xf32>
    %224 = arith.mulf %208, %216 : vector<8x128xf32>
    %225 = arith.addf %223, %224 : vector<8x128xf32>
    %226 = math.tanh %225 : vector<8x128xf32>
    %227 = arith.mulf %222, %226 : vector<8x128xf32>
    %228 = tpu.concatenate %134, %163 in 1 : vector<8x128xf32>, vector<8x128xf32> -> vector<8x256xf32>
    %229 = arith.truncf %228 : vector<8x256xf32> to vector<8x256xbf16>
    %cst_48 = arith.constant dense<0.000000e+00> : vector<8x512xf32>
    %230 = tpu.matmul %229, %1, %cst_48 {dimension_numbers = #tpu.dot_dimension_numbers<[1], [0], [0], [1], [0, 0, 1, 1], [], []>} : vector<8x256xbf16>, vector<256x512xbf16>, vector<8x512xf32> -> vector<8x512xf32>
    %231 = arith.addf %230, %5 : vector<8x512xf32>
    %232 = vector.extract_strided_slice %231 {offsets = [0, 0], sizes = [8, 128], strides = [1, 1]} : vector<8x512xf32> to vector<8x128xf32>
    %233 = arith.negf %232 : vector<8x128xf32>
    %234 = math.exp %233 : vector<8x128xf32>
    %cst_49 = arith.constant 1.000000e+00 : f32
    %235 = vector.broadcast %cst_49 : f32 to vector<8x128xf32>
    %236 = arith.addf %235, %234 : vector<8x128xf32>
    %237 = arith.divf %235, %236 : vector<8x128xf32>
    %238 = vector.extract_strided_slice %231 {offsets = [0, 128], sizes = [8, 128], strides = [1, 1]} : vector<8x512xf32> to vector<8x128xf32>
    %239 = arith.negf %238 : vector<8x128xf32>
    %240 = math.exp %239 : vector<8x128xf32>
    %cst_50 = arith.constant 1.000000e+00 : f32
    %241 = vector.broadcast %cst_50 : f32 to vector<8x128xf32>
    %242 = arith.addf %241, %240 : vector<8x128xf32>
    %243 = arith.divf %241, %242 : vector<8x128xf32>
    %244 = vector.extract_strided_slice %231 {offsets = [0, 256], sizes = [8, 128], strides = [1, 1]} : vector<8x512xf32> to vector<8x128xf32>
    %245 = math.tanh %244 : vector<8x128xf32>
    %246 = vector.extract_strided_slice %231 {offsets = [0, 384], sizes = [8, 128], strides = [1, 1]} : vector<8x512xf32> to vector<8x128xf32>
    %247 = arith.negf %246 : vector<8x128xf32>
    %248 = math.exp %247 : vector<8x128xf32>
    %cst_51 = arith.constant 1.000000e+00 : f32
    %249 = vector.broadcast %cst_51 : f32 to vector<8x128xf32>
    %250 = arith.addf %249, %248 : vector<8x128xf32>
    %251 = arith.divf %249, %250 : vector<8x128xf32>
    %252 = arith.mulf %243, %161 : vector<8x128xf32>
    %253 = arith.mulf %237, %245 : vector<8x128xf32>
    %254 = arith.addf %252, %253 : vector<8x128xf32>
    %255 = math.tanh %254 : vector<8x128xf32>
    %256 = arith.mulf %251, %255 : vector<8x128xf32>
    %257 = tpu.concatenate %163, %192 in 1 : vector<8x128xf32>, vector<8x128xf32> -> vector<8x256xf32>
    %258 = arith.truncf %257 : vector<8x256xf32> to vector<8x256xbf16>
    %cst_52 = arith.constant dense<0.000000e+00> : vector<8x512xf32>
    %259 = tpu.matmul %258, %2, %cst_52 {dimension_numbers = #tpu.dot_dimension_numbers<[1], [0], [0], [1], [0, 0, 1, 1], [], []>} : vector<8x256xbf16>, vector<256x512xbf16>, vector<8x512xf32> -> vector<8x512xf32>
    %260 = arith.addf %259, %8 : vector<8x512xf32>
    %261 = vector.extract_strided_slice %260 {offsets = [0, 0], sizes = [8, 128], strides = [1, 1]} : vector<8x512xf32> to vector<8x128xf32>
    %262 = arith.negf %261 : vector<8x128xf32>
    %263 = math.exp %262 : vector<8x128xf32>
    %cst_53 = arith.constant 1.000000e+00 : f32
    %264 = vector.broadcast %cst_53 : f32 to vector<8x128xf32>
    %265 = arith.addf %264, %263 : vector<8x128xf32>
    %266 = arith.divf %264, %265 : vector<8x128xf32>
    %267 = vector.extract_strided_slice %260 {offsets = [0, 128], sizes = [8, 128], strides = [1, 1]} : vector<8x512xf32> to vector<8x128xf32>
    %268 = arith.negf %267 : vector<8x128xf32>
    %269 = math.exp %268 : vector<8x128xf32>
    %cst_54 = arith.constant 1.000000e+00 : f32
    %270 = vector.broadcast %cst_54 : f32 to vector<8x128xf32>
    %271 = arith.addf %270, %269 : vector<8x128xf32>
    %272 = arith.divf %270, %271 : vector<8x128xf32>
    %273 = vector.extract_strided_slice %260 {offsets = [0, 256], sizes = [8, 128], strides = [1, 1]} : vector<8x512xf32> to vector<8x128xf32>
    %274 = math.tanh %273 : vector<8x128xf32>
    %275 = vector.extract_strided_slice %260 {offsets = [0, 384], sizes = [8, 128], strides = [1, 1]} : vector<8x512xf32> to vector<8x128xf32>
    %276 = arith.negf %275 : vector<8x128xf32>
    %277 = math.exp %276 : vector<8x128xf32>
    %cst_55 = arith.constant 1.000000e+00 : f32
    %278 = vector.broadcast %cst_55 : f32 to vector<8x128xf32>
    %279 = arith.addf %278, %277 : vector<8x128xf32>
    %280 = arith.divf %278, %279 : vector<8x128xf32>
    %281 = arith.mulf %272, %190 : vector<8x128xf32>
    %282 = arith.mulf %266, %274 : vector<8x128xf32>
    %283 = arith.addf %281, %282 : vector<8x128xf32>
    %284 = math.tanh %283 : vector<8x128xf32>
    %285 = arith.mulf %280, %284 : vector<8x128xf32>
    %286 = vector.extract_strided_slice %9 {offsets = [1, 0], sizes = [1, 128], strides = [1, 1]} : vector<8x128xf32> to vector<1x128xf32>
    %287 = vector.broadcast %286 : vector<1x128xf32> to vector<8x128xf32>
    %288 = arith.mulf %285, %287 : vector<8x128xf32>
    %cst_56 = arith.constant dense<0.000000e+00> : vector<8xf32>
    %289 = vector.multi_reduction <add>, %288, %cst_56 [1] : vector<8x128xf32> to vector<8xf32>
    %290 = vector.shape_cast %289 : vector<8xf32> to vector<8x1xf32>
    %291 = arith.addf %198, %290 : vector<8x1xf32>
    %292 = vector.extract_strided_slice %16 {offsets = [32, 0], sizes = [8, 512], strides = [1, 1]} : vector<64x512xf32> to vector<8x512xf32>
    %293 = arith.truncf %227 : vector<8x128xf32> to vector<8x128xbf16>
    %cst_57 = arith.constant dense<0.000000e+00> : vector<8x512xf32>
    %294 = tpu.matmul %293, %0, %cst_57 {dimension_numbers = #tpu.dot_dimension_numbers<[1], [0], [0], [1], [0, 0, 1, 1], [], []>} : vector<8x128xbf16>, vector<128x512xbf16>, vector<8x512xf32> -> vector<8x512xf32>
    %295 = arith.addf %292, %294 : vector<8x512xf32>
    %296 = vector.extract_strided_slice %295 {offsets = [0, 0], sizes = [8, 128], strides = [1, 1]} : vector<8x512xf32> to vector<8x128xf32>
    %297 = arith.negf %296 : vector<8x128xf32>
    %298 = math.exp %297 : vector<8x128xf32>
    %cst_58 = arith.constant 1.000000e+00 : f32
    %299 = vector.broadcast %cst_58 : f32 to vector<8x128xf32>
    %300 = arith.addf %299, %298 : vector<8x128xf32>
    %301 = arith.divf %299, %300 : vector<8x128xf32>
    %302 = vector.extract_strided_slice %295 {offsets = [0, 128], sizes = [8, 128], strides = [1, 1]} : vector<8x512xf32> to vector<8x128xf32>
    %303 = arith.negf %302 : vector<8x128xf32>
    %304 = math.exp %303 : vector<8x128xf32>
    %cst_59 = arith.constant 1.000000e+00 : f32
    %305 = vector.broadcast %cst_59 : f32 to vector<8x128xf32>
    %306 = arith.addf %305, %304 : vector<8x128xf32>
    %307 = arith.divf %305, %306 : vector<8x128xf32>
    %308 = vector.extract_strided_slice %295 {offsets = [0, 256], sizes = [8, 128], strides = [1, 1]} : vector<8x512xf32> to vector<8x128xf32>
    %309 = math.tanh %308 : vector<8x128xf32>
    %310 = vector.extract_strided_slice %295 {offsets = [0, 384], sizes = [8, 128], strides = [1, 1]} : vector<8x512xf32> to vector<8x128xf32>
    %311 = arith.negf %310 : vector<8x128xf32>
    %312 = math.exp %311 : vector<8x128xf32>
    %cst_60 = arith.constant 1.000000e+00 : f32
    %313 = vector.broadcast %cst_60 : f32 to vector<8x128xf32>
    %314 = arith.addf %313, %312 : vector<8x128xf32>
    %315 = arith.divf %313, %314 : vector<8x128xf32>
    %316 = arith.mulf %307, %225 : vector<8x128xf32>
    %317 = arith.mulf %301, %309 : vector<8x128xf32>
    %318 = arith.addf %316, %317 : vector<8x128xf32>
    %319 = math.tanh %318 : vector<8x128xf32>
    %320 = arith.mulf %315, %319 : vector<8x128xf32>
    %321 = tpu.concatenate %227, %256 in 1 : vector<8x128xf32>, vector<8x128xf32> -> vector<8x256xf32>
    %322 = arith.truncf %321 : vector<8x256xf32> to vector<8x256xbf16>
    %cst_61 = arith.constant dense<0.000000e+00> : vector<8x512xf32>
    %323 = tpu.matmul %322, %1, %cst_61 {dimension_numbers = #tpu.dot_dimension_numbers<[1], [0], [0], [1], [0, 0, 1, 1], [], []>} : vector<8x256xbf16>, vector<256x512xbf16>, vector<8x512xf32> -> vector<8x512xf32>
    %324 = arith.addf %323, %5 : vector<8x512xf32>
    %325 = vector.extract_strided_slice %324 {offsets = [0, 0], sizes = [8, 128], strides = [1, 1]} : vector<8x512xf32> to vector<8x128xf32>
    %326 = arith.negf %325 : vector<8x128xf32>
    %327 = math.exp %326 : vector<8x128xf32>
    %cst_62 = arith.constant 1.000000e+00 : f32
    %328 = vector.broadcast %cst_62 : f32 to vector<8x128xf32>
    %329 = arith.addf %328, %327 : vector<8x128xf32>
    %330 = arith.divf %328, %329 : vector<8x128xf32>
    %331 = vector.extract_strided_slice %324 {offsets = [0, 128], sizes = [8, 128], strides = [1, 1]} : vector<8x512xf32> to vector<8x128xf32>
    %332 = arith.negf %331 : vector<8x128xf32>
    %333 = math.exp %332 : vector<8x128xf32>
    %cst_63 = arith.constant 1.000000e+00 : f32
    %334 = vector.broadcast %cst_63 : f32 to vector<8x128xf32>
    %335 = arith.addf %334, %333 : vector<8x128xf32>
    %336 = arith.divf %334, %335 : vector<8x128xf32>
    %337 = vector.extract_strided_slice %324 {offsets = [0, 256], sizes = [8, 128], strides = [1, 1]} : vector<8x512xf32> to vector<8x128xf32>
    %338 = math.tanh %337 : vector<8x128xf32>
    %339 = vector.extract_strided_slice %324 {offsets = [0, 384], sizes = [8, 128], strides = [1, 1]} : vector<8x512xf32> to vector<8x128xf32>
    %340 = arith.negf %339 : vector<8x128xf32>
    %341 = math.exp %340 : vector<8x128xf32>
    %cst_64 = arith.constant 1.000000e+00 : f32
    %342 = vector.broadcast %cst_64 : f32 to vector<8x128xf32>
    %343 = arith.addf %342, %341 : vector<8x128xf32>
    %344 = arith.divf %342, %343 : vector<8x128xf32>
    %345 = arith.mulf %336, %254 : vector<8x128xf32>
    %346 = arith.mulf %330, %338 : vector<8x128xf32>
    %347 = arith.addf %345, %346 : vector<8x128xf32>
    %348 = math.tanh %347 : vector<8x128xf32>
    %349 = arith.mulf %344, %348 : vector<8x128xf32>
    %350 = tpu.concatenate %256, %285 in 1 : vector<8x128xf32>, vector<8x128xf32> -> vector<8x256xf32>
    %351 = arith.truncf %350 : vector<8x256xf32> to vector<8x256xbf16>
    %cst_65 = arith.constant dense<0.000000e+00> : vector<8x512xf32>
    %352 = tpu.matmul %351, %2, %cst_65 {dimension_numbers = #tpu.dot_dimension_numbers<[1], [0], [0], [1], [0, 0, 1, 1], [], []>} : vector<8x256xbf16>, vector<256x512xbf16>, vector<8x512xf32> -> vector<8x512xf32>
    %353 = arith.addf %352, %8 : vector<8x512xf32>
    %354 = vector.extract_strided_slice %353 {offsets = [0, 0], sizes = [8, 128], strides = [1, 1]} : vector<8x512xf32> to vector<8x128xf32>
    %355 = arith.negf %354 : vector<8x128xf32>
    %356 = math.exp %355 : vector<8x128xf32>
    %cst_66 = arith.constant 1.000000e+00 : f32
    %357 = vector.broadcast %cst_66 : f32 to vector<8x128xf32>
    %358 = arith.addf %357, %356 : vector<8x128xf32>
    %359 = arith.divf %357, %358 : vector<8x128xf32>
    %360 = vector.extract_strided_slice %353 {offsets = [0, 128], sizes = [8, 128], strides = [1, 1]} : vector<8x512xf32> to vector<8x128xf32>
    %361 = arith.negf %360 : vector<8x128xf32>
    %362 = math.exp %361 : vector<8x128xf32>
    %cst_67 = arith.constant 1.000000e+00 : f32
    %363 = vector.broadcast %cst_67 : f32 to vector<8x128xf32>
    %364 = arith.addf %363, %362 : vector<8x128xf32>
    %365 = arith.divf %363, %364 : vector<8x128xf32>
    %366 = vector.extract_strided_slice %353 {offsets = [0, 256], sizes = [8, 128], strides = [1, 1]} : vector<8x512xf32> to vector<8x128xf32>
    %367 = math.tanh %366 : vector<8x128xf32>
    %368 = vector.extract_strided_slice %353 {offsets = [0, 384], sizes = [8, 128], strides = [1, 1]} : vector<8x512xf32> to vector<8x128xf32>
    %369 = arith.negf %368 : vector<8x128xf32>
    %370 = math.exp %369 : vector<8x128xf32>
    %cst_68 = arith.constant 1.000000e+00 : f32
    %371 = vector.broadcast %cst_68 : f32 to vector<8x128xf32>
    %372 = arith.addf %371, %370 : vector<8x128xf32>
    %373 = arith.divf %371, %372 : vector<8x128xf32>
    %374 = arith.mulf %365, %283 : vector<8x128xf32>
    %375 = arith.mulf %359, %367 : vector<8x128xf32>
    %376 = arith.addf %374, %375 : vector<8x128xf32>
    %377 = math.tanh %376 : vector<8x128xf32>
    %378 = arith.mulf %373, %377 : vector<8x128xf32>
    %379 = vector.extract_strided_slice %9 {offsets = [2, 0], sizes = [1, 128], strides = [1, 1]} : vector<8x128xf32> to vector<1x128xf32>
    %380 = vector.broadcast %379 : vector<1x128xf32> to vector<8x128xf32>
    %381 = arith.mulf %378, %380 : vector<8x128xf32>
    %cst_69 = arith.constant dense<0.000000e+00> : vector<8xf32>
    %382 = vector.multi_reduction <add>, %381, %cst_69 [1] : vector<8x128xf32> to vector<8xf32>
    %383 = vector.shape_cast %382 : vector<8xf32> to vector<8x1xf32>
    %384 = arith.addf %291, %383 : vector<8x1xf32>
    %385 = vector.extract_strided_slice %16 {offsets = [40, 0], sizes = [8, 512], strides = [1, 1]} : vector<64x512xf32> to vector<8x512xf32>
    %386 = arith.truncf %320 : vector<8x128xf32> to vector<8x128xbf16>
    %cst_70 = arith.constant dense<0.000000e+00> : vector<8x512xf32>
    %387 = tpu.matmul %386, %0, %cst_70 {dimension_numbers = #tpu.dot_dimension_numbers<[1], [0], [0], [1], [0, 0, 1, 1], [], []>} : vector<8x128xbf16>, vector<128x512xbf16>, vector<8x512xf32> -> vector<8x512xf32>
    %388 = arith.addf %385, %387 : vector<8x512xf32>
    %389 = vector.extract_strided_slice %388 {offsets = [0, 0], sizes = [8, 128], strides = [1, 1]} : vector<8x512xf32> to vector<8x128xf32>
    %390 = arith.negf %389 : vector<8x128xf32>
    %391 = math.exp %390 : vector<8x128xf32>
    %cst_71 = arith.constant 1.000000e+00 : f32
    %392 = vector.broadcast %cst_71 : f32 to vector<8x128xf32>
    %393 = arith.addf %392, %391 : vector<8x128xf32>
    %394 = arith.divf %392, %393 : vector<8x128xf32>
    %395 = vector.extract_strided_slice %388 {offsets = [0, 128], sizes = [8, 128], strides = [1, 1]} : vector<8x512xf32> to vector<8x128xf32>
    %396 = arith.negf %395 : vector<8x128xf32>
    %397 = math.exp %396 : vector<8x128xf32>
    %cst_72 = arith.constant 1.000000e+00 : f32
    %398 = vector.broadcast %cst_72 : f32 to vector<8x128xf32>
    %399 = arith.addf %398, %397 : vector<8x128xf32>
    %400 = arith.divf %398, %399 : vector<8x128xf32>
    %401 = vector.extract_strided_slice %388 {offsets = [0, 256], sizes = [8, 128], strides = [1, 1]} : vector<8x512xf32> to vector<8x128xf32>
    %402 = math.tanh %401 : vector<8x128xf32>
    %403 = vector.extract_strided_slice %388 {offsets = [0, 384], sizes = [8, 128], strides = [1, 1]} : vector<8x512xf32> to vector<8x128xf32>
    %404 = arith.negf %403 : vector<8x128xf32>
    %405 = math.exp %404 : vector<8x128xf32>
    %cst_73 = arith.constant 1.000000e+00 : f32
    %406 = vector.broadcast %cst_73 : f32 to vector<8x128xf32>
    %407 = arith.addf %406, %405 : vector<8x128xf32>
    %408 = arith.divf %406, %407 : vector<8x128xf32>
    %409 = arith.mulf %400, %318 : vector<8x128xf32>
    %410 = arith.mulf %394, %402 : vector<8x128xf32>
    %411 = arith.addf %409, %410 : vector<8x128xf32>
    %412 = math.tanh %411 : vector<8x128xf32>
    %413 = arith.mulf %408, %412 : vector<8x128xf32>
    %414 = tpu.concatenate %320, %349 in 1 : vector<8x128xf32>, vector<8x128xf32> -> vector<8x256xf32>
    %415 = arith.truncf %414 : vector<8x256xf32> to vector<8x256xbf16>
    %cst_74 = arith.constant dense<0.000000e+00> : vector<8x512xf32>
    %416 = tpu.matmul %415, %1, %cst_74 {dimension_numbers = #tpu.dot_dimension_numbers<[1], [0], [0], [1], [0, 0, 1, 1], [], []>} : vector<8x256xbf16>, vector<256x512xbf16>, vector<8x512xf32> -> vector<8x512xf32>
    %417 = arith.addf %416, %5 : vector<8x512xf32>
    %418 = vector.extract_strided_slice %417 {offsets = [0, 0], sizes = [8, 128], strides = [1, 1]} : vector<8x512xf32> to vector<8x128xf32>
    %419 = arith.negf %418 : vector<8x128xf32>
    %420 = math.exp %419 : vector<8x128xf32>
    %cst_75 = arith.constant 1.000000e+00 : f32
    %421 = vector.broadcast %cst_75 : f32 to vector<8x128xf32>
    %422 = arith.addf %421, %420 : vector<8x128xf32>
    %423 = arith.divf %421, %422 : vector<8x128xf32>
    %424 = vector.extract_strided_slice %417 {offsets = [0, 128], sizes = [8, 128], strides = [1, 1]} : vector<8x512xf32> to vector<8x128xf32>
    %425 = arith.negf %424 : vector<8x128xf32>
    %426 = math.exp %425 : vector<8x128xf32>
    %cst_76 = arith.constant 1.000000e+00 : f32
    %427 = vector.broadcast %cst_76 : f32 to vector<8x128xf32>
    %428 = arith.addf %427, %426 : vector<8x128xf32>
    %429 = arith.divf %427, %428 : vector<8x128xf32>
    %430 = vector.extract_strided_slice %417 {offsets = [0, 256], sizes = [8, 128], strides = [1, 1]} : vector<8x512xf32> to vector<8x128xf32>
    %431 = math.tanh %430 : vector<8x128xf32>
    %432 = vector.extract_strided_slice %417 {offsets = [0, 384], sizes = [8, 128], strides = [1, 1]} : vector<8x512xf32> to vector<8x128xf32>
    %433 = arith.negf %432 : vector<8x128xf32>
    %434 = math.exp %433 : vector<8x128xf32>
    %cst_77 = arith.constant 1.000000e+00 : f32
    %435 = vector.broadcast %cst_77 : f32 to vector<8x128xf32>
    %436 = arith.addf %435, %434 : vector<8x128xf32>
    %437 = arith.divf %435, %436 : vector<8x128xf32>
    %438 = arith.mulf %429, %347 : vector<8x128xf32>
    %439 = arith.mulf %423, %431 : vector<8x128xf32>
    %440 = arith.addf %438, %439 : vector<8x128xf32>
    %441 = math.tanh %440 : vector<8x128xf32>
    %442 = arith.mulf %437, %441 : vector<8x128xf32>
    %443 = tpu.concatenate %349, %378 in 1 : vector<8x128xf32>, vector<8x128xf32> -> vector<8x256xf32>
    %444 = arith.truncf %443 : vector<8x256xf32> to vector<8x256xbf16>
    %cst_78 = arith.constant dense<0.000000e+00> : vector<8x512xf32>
    %445 = tpu.matmul %444, %2, %cst_78 {dimension_numbers = #tpu.dot_dimension_numbers<[1], [0], [0], [1], [0, 0, 1, 1], [], []>} : vector<8x256xbf16>, vector<256x512xbf16>, vector<8x512xf32> -> vector<8x512xf32>
    %446 = arith.addf %445, %8 : vector<8x512xf32>
    %447 = vector.extract_strided_slice %446 {offsets = [0, 0], sizes = [8, 128], strides = [1, 1]} : vector<8x512xf32> to vector<8x128xf32>
    %448 = arith.negf %447 : vector<8x128xf32>
    %449 = math.exp %448 : vector<8x128xf32>
    %cst_79 = arith.constant 1.000000e+00 : f32
    %450 = vector.broadcast %cst_79 : f32 to vector<8x128xf32>
    %451 = arith.addf %450, %449 : vector<8x128xf32>
    %452 = arith.divf %450, %451 : vector<8x128xf32>
    %453 = vector.extract_strided_slice %446 {offsets = [0, 128], sizes = [8, 128], strides = [1, 1]} : vector<8x512xf32> to vector<8x128xf32>
    %454 = arith.negf %453 : vector<8x128xf32>
    %455 = math.exp %454 : vector<8x128xf32>
    %cst_80 = arith.constant 1.000000e+00 : f32
    %456 = vector.broadcast %cst_80 : f32 to vector<8x128xf32>
    %457 = arith.addf %456, %455 : vector<8x128xf32>
    %458 = arith.divf %456, %457 : vector<8x128xf32>
    %459 = vector.extract_strided_slice %446 {offsets = [0, 256], sizes = [8, 128], strides = [1, 1]} : vector<8x512xf32> to vector<8x128xf32>
    %460 = math.tanh %459 : vector<8x128xf32>
    %461 = vector.extract_strided_slice %446 {offsets = [0, 384], sizes = [8, 128], strides = [1, 1]} : vector<8x512xf32> to vector<8x128xf32>
    %462 = arith.negf %461 : vector<8x128xf32>
    %463 = math.exp %462 : vector<8x128xf32>
    %cst_81 = arith.constant 1.000000e+00 : f32
    %464 = vector.broadcast %cst_81 : f32 to vector<8x128xf32>
    %465 = arith.addf %464, %463 : vector<8x128xf32>
    %466 = arith.divf %464, %465 : vector<8x128xf32>
    %467 = arith.mulf %458, %376 : vector<8x128xf32>
    %468 = arith.mulf %452, %460 : vector<8x128xf32>
    %469 = arith.addf %467, %468 : vector<8x128xf32>
    %470 = math.tanh %469 : vector<8x128xf32>
    %471 = arith.mulf %466, %470 : vector<8x128xf32>
    %472 = vector.extract_strided_slice %9 {offsets = [3, 0], sizes = [1, 128], strides = [1, 1]} : vector<8x128xf32> to vector<1x128xf32>
    %473 = vector.broadcast %472 : vector<1x128xf32> to vector<8x128xf32>
    %474 = arith.mulf %471, %473 : vector<8x128xf32>
    %cst_82 = arith.constant dense<0.000000e+00> : vector<8xf32>
    %475 = vector.multi_reduction <add>, %474, %cst_82 [1] : vector<8x128xf32> to vector<8xf32>
    %476 = vector.shape_cast %475 : vector<8xf32> to vector<8x1xf32>
    %477 = arith.addf %384, %476 : vector<8x1xf32>
    %478 = vector.extract_strided_slice %16 {offsets = [48, 0], sizes = [8, 512], strides = [1, 1]} : vector<64x512xf32> to vector<8x512xf32>
    %479 = arith.truncf %413 : vector<8x128xf32> to vector<8x128xbf16>
    %cst_83 = arith.constant dense<0.000000e+00> : vector<8x512xf32>
    %480 = tpu.matmul %479, %0, %cst_83 {dimension_numbers = #tpu.dot_dimension_numbers<[1], [0], [0], [1], [0, 0, 1, 1], [], []>} : vector<8x128xbf16>, vector<128x512xbf16>, vector<8x512xf32> -> vector<8x512xf32>
    %481 = arith.addf %478, %480 : vector<8x512xf32>
    %482 = vector.extract_strided_slice %481 {offsets = [0, 0], sizes = [8, 128], strides = [1, 1]} : vector<8x512xf32> to vector<8x128xf32>
    %483 = arith.negf %482 : vector<8x128xf32>
    %484 = math.exp %483 : vector<8x128xf32>
    %cst_84 = arith.constant 1.000000e+00 : f32
    %485 = vector.broadcast %cst_84 : f32 to vector<8x128xf32>
    %486 = arith.addf %485, %484 : vector<8x128xf32>
    %487 = arith.divf %485, %486 : vector<8x128xf32>
    %488 = vector.extract_strided_slice %481 {offsets = [0, 128], sizes = [8, 128], strides = [1, 1]} : vector<8x512xf32> to vector<8x128xf32>
    %489 = arith.negf %488 : vector<8x128xf32>
    %490 = math.exp %489 : vector<8x128xf32>
    %cst_85 = arith.constant 1.000000e+00 : f32
    %491 = vector.broadcast %cst_85 : f32 to vector<8x128xf32>
    %492 = arith.addf %491, %490 : vector<8x128xf32>
    %493 = arith.divf %491, %492 : vector<8x128xf32>
    %494 = vector.extract_strided_slice %481 {offsets = [0, 256], sizes = [8, 128], strides = [1, 1]} : vector<8x512xf32> to vector<8x128xf32>
    %495 = math.tanh %494 : vector<8x128xf32>
    %496 = vector.extract_strided_slice %481 {offsets = [0, 384], sizes = [8, 128], strides = [1, 1]} : vector<8x512xf32> to vector<8x128xf32>
    %497 = arith.negf %496 : vector<8x128xf32>
    %498 = math.exp %497 : vector<8x128xf32>
    %cst_86 = arith.constant 1.000000e+00 : f32
    %499 = vector.broadcast %cst_86 : f32 to vector<8x128xf32>
    %500 = arith.addf %499, %498 : vector<8x128xf32>
    %501 = arith.divf %499, %500 : vector<8x128xf32>
    %502 = arith.mulf %493, %411 : vector<8x128xf32>
    %503 = arith.mulf %487, %495 : vector<8x128xf32>
    %504 = arith.addf %502, %503 : vector<8x128xf32>
    %505 = math.tanh %504 : vector<8x128xf32>
    %506 = arith.mulf %501, %505 : vector<8x128xf32>
    %507 = tpu.concatenate %413, %442 in 1 : vector<8x128xf32>, vector<8x128xf32> -> vector<8x256xf32>
    %508 = arith.truncf %507 : vector<8x256xf32> to vector<8x256xbf16>
    %cst_87 = arith.constant dense<0.000000e+00> : vector<8x512xf32>
    %509 = tpu.matmul %508, %1, %cst_87 {dimension_numbers = #tpu.dot_dimension_numbers<[1], [0], [0], [1], [0, 0, 1, 1], [], []>} : vector<8x256xbf16>, vector<256x512xbf16>, vector<8x512xf32> -> vector<8x512xf32>
    %510 = arith.addf %509, %5 : vector<8x512xf32>
    %511 = vector.extract_strided_slice %510 {offsets = [0, 0], sizes = [8, 128], strides = [1, 1]} : vector<8x512xf32> to vector<8x128xf32>
    %512 = arith.negf %511 : vector<8x128xf32>
    %513 = math.exp %512 : vector<8x128xf32>
    %cst_88 = arith.constant 1.000000e+00 : f32
    %514 = vector.broadcast %cst_88 : f32 to vector<8x128xf32>
    %515 = arith.addf %514, %513 : vector<8x128xf32>
    %516 = arith.divf %514, %515 : vector<8x128xf32>
    %517 = vector.extract_strided_slice %510 {offsets = [0, 128], sizes = [8, 128], strides = [1, 1]} : vector<8x512xf32> to vector<8x128xf32>
    %518 = arith.negf %517 : vector<8x128xf32>
    %519 = math.exp %518 : vector<8x128xf32>
    %cst_89 = arith.constant 1.000000e+00 : f32
    %520 = vector.broadcast %cst_89 : f32 to vector<8x128xf32>
    %521 = arith.addf %520, %519 : vector<8x128xf32>
    %522 = arith.divf %520, %521 : vector<8x128xf32>
    %523 = vector.extract_strided_slice %510 {offsets = [0, 256], sizes = [8, 128], strides = [1, 1]} : vector<8x512xf32> to vector<8x128xf32>
    %524 = math.tanh %523 : vector<8x128xf32>
    %525 = vector.extract_strided_slice %510 {offsets = [0, 384], sizes = [8, 128], strides = [1, 1]} : vector<8x512xf32> to vector<8x128xf32>
    %526 = arith.negf %525 : vector<8x128xf32>
    %527 = math.exp %526 : vector<8x128xf32>
    %cst_90 = arith.constant 1.000000e+00 : f32
    %528 = vector.broadcast %cst_90 : f32 to vector<8x128xf32>
    %529 = arith.addf %528, %527 : vector<8x128xf32>
    %530 = arith.divf %528, %529 : vector<8x128xf32>
    %531 = arith.mulf %522, %440 : vector<8x128xf32>
    %532 = arith.mulf %516, %524 : vector<8x128xf32>
    %533 = arith.addf %531, %532 : vector<8x128xf32>
    %534 = math.tanh %533 : vector<8x128xf32>
    %535 = arith.mulf %530, %534 : vector<8x128xf32>
    %536 = tpu.concatenate %442, %471 in 1 : vector<8x128xf32>, vector<8x128xf32> -> vector<8x256xf32>
    %537 = arith.truncf %536 : vector<8x256xf32> to vector<8x256xbf16>
    %cst_91 = arith.constant dense<0.000000e+00> : vector<8x512xf32>
    %538 = tpu.matmul %537, %2, %cst_91 {dimension_numbers = #tpu.dot_dimension_numbers<[1], [0], [0], [1], [0, 0, 1, 1], [], []>} : vector<8x256xbf16>, vector<256x512xbf16>, vector<8x512xf32> -> vector<8x512xf32>
    %539 = arith.addf %538, %8 : vector<8x512xf32>
    %540 = vector.extract_strided_slice %539 {offsets = [0, 0], sizes = [8, 128], strides = [1, 1]} : vector<8x512xf32> to vector<8x128xf32>
    %541 = arith.negf %540 : vector<8x128xf32>
    %542 = math.exp %541 : vector<8x128xf32>
    %cst_92 = arith.constant 1.000000e+00 : f32
    %543 = vector.broadcast %cst_92 : f32 to vector<8x128xf32>
    %544 = arith.addf %543, %542 : vector<8x128xf32>
    %545 = arith.divf %543, %544 : vector<8x128xf32>
    %546 = vector.extract_strided_slice %539 {offsets = [0, 128], sizes = [8, 128], strides = [1, 1]} : vector<8x512xf32> to vector<8x128xf32>
    %547 = arith.negf %546 : vector<8x128xf32>
    %548 = math.exp %547 : vector<8x128xf32>
    %cst_93 = arith.constant 1.000000e+00 : f32
    %549 = vector.broadcast %cst_93 : f32 to vector<8x128xf32>
    %550 = arith.addf %549, %548 : vector<8x128xf32>
    %551 = arith.divf %549, %550 : vector<8x128xf32>
    %552 = vector.extract_strided_slice %539 {offsets = [0, 256], sizes = [8, 128], strides = [1, 1]} : vector<8x512xf32> to vector<8x128xf32>
    %553 = math.tanh %552 : vector<8x128xf32>
    %554 = vector.extract_strided_slice %539 {offsets = [0, 384], sizes = [8, 128], strides = [1, 1]} : vector<8x512xf32> to vector<8x128xf32>
    %555 = arith.negf %554 : vector<8x128xf32>
    %556 = math.exp %555 : vector<8x128xf32>
    %cst_94 = arith.constant 1.000000e+00 : f32
    %557 = vector.broadcast %cst_94 : f32 to vector<8x128xf32>
    %558 = arith.addf %557, %556 : vector<8x128xf32>
    %559 = arith.divf %557, %558 : vector<8x128xf32>
    %560 = arith.mulf %551, %469 : vector<8x128xf32>
    %561 = arith.mulf %545, %553 : vector<8x128xf32>
    %562 = arith.addf %560, %561 : vector<8x128xf32>
    %563 = math.tanh %562 : vector<8x128xf32>
    %564 = arith.mulf %559, %563 : vector<8x128xf32>
    %565 = vector.extract_strided_slice %9 {offsets = [4, 0], sizes = [1, 128], strides = [1, 1]} : vector<8x128xf32> to vector<1x128xf32>
    %566 = vector.broadcast %565 : vector<1x128xf32> to vector<8x128xf32>
    %567 = arith.mulf %564, %566 : vector<8x128xf32>
    %cst_95 = arith.constant dense<0.000000e+00> : vector<8xf32>
    %568 = vector.multi_reduction <add>, %567, %cst_95 [1] : vector<8x128xf32> to vector<8xf32>
    %569 = vector.shape_cast %568 : vector<8xf32> to vector<8x1xf32>
    %570 = arith.addf %477, %569 : vector<8x1xf32>
    %571 = vector.extract_strided_slice %16 {offsets = [56, 0], sizes = [8, 512], strides = [1, 1]} : vector<64x512xf32> to vector<8x512xf32>
    %572 = arith.truncf %506 : vector<8x128xf32> to vector<8x128xbf16>
    %cst_96 = arith.constant dense<0.000000e+00> : vector<8x512xf32>
    %573 = tpu.matmul %572, %0, %cst_96 {dimension_numbers = #tpu.dot_dimension_numbers<[1], [0], [0], [1], [0, 0, 1, 1], [], []>} : vector<8x128xbf16>, vector<128x512xbf16>, vector<8x512xf32> -> vector<8x512xf32>
    %574 = arith.addf %571, %573 : vector<8x512xf32>
    %575 = vector.extract_strided_slice %574 {offsets = [0, 0], sizes = [8, 128], strides = [1, 1]} : vector<8x512xf32> to vector<8x128xf32>
    %576 = arith.negf %575 : vector<8x128xf32>
    %577 = math.exp %576 : vector<8x128xf32>
    %cst_97 = arith.constant 1.000000e+00 : f32
    %578 = vector.broadcast %cst_97 : f32 to vector<8x128xf32>
    %579 = arith.addf %578, %577 : vector<8x128xf32>
    %580 = arith.divf %578, %579 : vector<8x128xf32>
    %581 = vector.extract_strided_slice %574 {offsets = [0, 128], sizes = [8, 128], strides = [1, 1]} : vector<8x512xf32> to vector<8x128xf32>
    %582 = arith.negf %581 : vector<8x128xf32>
    %583 = math.exp %582 : vector<8x128xf32>
    %cst_98 = arith.constant 1.000000e+00 : f32
    %584 = vector.broadcast %cst_98 : f32 to vector<8x128xf32>
    %585 = arith.addf %584, %583 : vector<8x128xf32>
    %586 = arith.divf %584, %585 : vector<8x128xf32>
    %587 = vector.extract_strided_slice %574 {offsets = [0, 256], sizes = [8, 128], strides = [1, 1]} : vector<8x512xf32> to vector<8x128xf32>
    %588 = math.tanh %587 : vector<8x128xf32>
    %589 = vector.extract_strided_slice %574 {offsets = [0, 384], sizes = [8, 128], strides = [1, 1]} : vector<8x512xf32> to vector<8x128xf32>
    %590 = arith.negf %589 : vector<8x128xf32>
    %591 = math.exp %590 : vector<8x128xf32>
    %cst_99 = arith.constant 1.000000e+00 : f32
    %592 = vector.broadcast %cst_99 : f32 to vector<8x128xf32>
    %593 = arith.addf %592, %591 : vector<8x128xf32>
    %594 = arith.divf %592, %593 : vector<8x128xf32>
    %595 = arith.mulf %586, %504 : vector<8x128xf32>
    %596 = arith.mulf %580, %588 : vector<8x128xf32>
    %597 = arith.addf %595, %596 : vector<8x128xf32>
    %598 = math.tanh %597 : vector<8x128xf32>
    %599 = arith.mulf %594, %598 : vector<8x128xf32>
    %600 = tpu.concatenate %506, %535 in 1 : vector<8x128xf32>, vector<8x128xf32> -> vector<8x256xf32>
    %601 = arith.truncf %600 : vector<8x256xf32> to vector<8x256xbf16>
    %cst_100 = arith.constant dense<0.000000e+00> : vector<8x512xf32>
    %602 = tpu.matmul %601, %1, %cst_100 {dimension_numbers = #tpu.dot_dimension_numbers<[1], [0], [0], [1], [0, 0, 1, 1], [], []>} : vector<8x256xbf16>, vector<256x512xbf16>, vector<8x512xf32> -> vector<8x512xf32>
    %603 = arith.addf %602, %5 : vector<8x512xf32>
    %604 = vector.extract_strided_slice %603 {offsets = [0, 0], sizes = [8, 128], strides = [1, 1]} : vector<8x512xf32> to vector<8x128xf32>
    %605 = arith.negf %604 : vector<8x128xf32>
    %606 = math.exp %605 : vector<8x128xf32>
    %cst_101 = arith.constant 1.000000e+00 : f32
    %607 = vector.broadcast %cst_101 : f32 to vector<8x128xf32>
    %608 = arith.addf %607, %606 : vector<8x128xf32>
    %609 = arith.divf %607, %608 : vector<8x128xf32>
    %610 = vector.extract_strided_slice %603 {offsets = [0, 128], sizes = [8, 128], strides = [1, 1]} : vector<8x512xf32> to vector<8x128xf32>
    %611 = arith.negf %610 : vector<8x128xf32>
    %612 = math.exp %611 : vector<8x128xf32>
    %cst_102 = arith.constant 1.000000e+00 : f32
    %613 = vector.broadcast %cst_102 : f32 to vector<8x128xf32>
    %614 = arith.addf %613, %612 : vector<8x128xf32>
    %615 = arith.divf %613, %614 : vector<8x128xf32>
    %616 = vector.extract_strided_slice %603 {offsets = [0, 256], sizes = [8, 128], strides = [1, 1]} : vector<8x512xf32> to vector<8x128xf32>
    %617 = math.tanh %616 : vector<8x128xf32>
    %618 = vector.extract_strided_slice %603 {offsets = [0, 384], sizes = [8, 128], strides = [1, 1]} : vector<8x512xf32> to vector<8x128xf32>
    %619 = arith.negf %618 : vector<8x128xf32>
    %620 = math.exp %619 : vector<8x128xf32>
    %cst_103 = arith.constant 1.000000e+00 : f32
    %621 = vector.broadcast %cst_103 : f32 to vector<8x128xf32>
    %622 = arith.addf %621, %620 : vector<8x128xf32>
    %623 = arith.divf %621, %622 : vector<8x128xf32>
    %624 = arith.mulf %615, %533 : vector<8x128xf32>
    %625 = arith.mulf %609, %617 : vector<8x128xf32>
    %626 = arith.addf %624, %625 : vector<8x128xf32>
    %627 = math.tanh %626 : vector<8x128xf32>
    %628 = arith.mulf %623, %627 : vector<8x128xf32>
    %629 = tpu.concatenate %535, %564 in 1 : vector<8x128xf32>, vector<8x128xf32> -> vector<8x256xf32>
    %630 = arith.truncf %629 : vector<8x256xf32> to vector<8x256xbf16>
    %cst_104 = arith.constant dense<0.000000e+00> : vector<8x512xf32>
    %631 = tpu.matmul %630, %2, %cst_104 {dimension_numbers = #tpu.dot_dimension_numbers<[1], [0], [0], [1], [0, 0, 1, 1], [], []>} : vector<8x256xbf16>, vector<256x512xbf16>, vector<8x512xf32> -> vector<8x512xf32>
    %632 = arith.addf %631, %8 : vector<8x512xf32>
    %633 = vector.extract_strided_slice %632 {offsets = [0, 0], sizes = [8, 128], strides = [1, 1]} : vector<8x512xf32> to vector<8x128xf32>
    %634 = arith.negf %633 : vector<8x128xf32>
    %635 = math.exp %634 : vector<8x128xf32>
    %cst_105 = arith.constant 1.000000e+00 : f32
    %636 = vector.broadcast %cst_105 : f32 to vector<8x128xf32>
    %637 = arith.addf %636, %635 : vector<8x128xf32>
    %638 = arith.divf %636, %637 : vector<8x128xf32>
    %639 = vector.extract_strided_slice %632 {offsets = [0, 128], sizes = [8, 128], strides = [1, 1]} : vector<8x512xf32> to vector<8x128xf32>
    %640 = arith.negf %639 : vector<8x128xf32>
    %641 = math.exp %640 : vector<8x128xf32>
    %cst_106 = arith.constant 1.000000e+00 : f32
    %642 = vector.broadcast %cst_106 : f32 to vector<8x128xf32>
    %643 = arith.addf %642, %641 : vector<8x128xf32>
    %644 = arith.divf %642, %643 : vector<8x128xf32>
    %645 = vector.extract_strided_slice %632 {offsets = [0, 256], sizes = [8, 128], strides = [1, 1]} : vector<8x512xf32> to vector<8x128xf32>
    %646 = math.tanh %645 : vector<8x128xf32>
    %647 = vector.extract_strided_slice %632 {offsets = [0, 384], sizes = [8, 128], strides = [1, 1]} : vector<8x512xf32> to vector<8x128xf32>
    %648 = arith.negf %647 : vector<8x128xf32>
    %649 = math.exp %648 : vector<8x128xf32>
    %cst_107 = arith.constant 1.000000e+00 : f32
    %650 = vector.broadcast %cst_107 : f32 to vector<8x128xf32>
    %651 = arith.addf %650, %649 : vector<8x128xf32>
    %652 = arith.divf %650, %651 : vector<8x128xf32>
    %653 = arith.mulf %644, %562 : vector<8x128xf32>
    %654 = arith.mulf %638, %646 : vector<8x128xf32>
    %655 = arith.addf %653, %654 : vector<8x128xf32>
    %656 = math.tanh %655 : vector<8x128xf32>
    %657 = arith.mulf %652, %656 : vector<8x128xf32>
    %658 = vector.extract_strided_slice %9 {offsets = [5, 0], sizes = [1, 128], strides = [1, 1]} : vector<8x128xf32> to vector<1x128xf32>
    %659 = vector.broadcast %658 : vector<1x128xf32> to vector<8x128xf32>
    %660 = arith.mulf %657, %659 : vector<8x128xf32>
    %cst_108 = arith.constant dense<0.000000e+00> : vector<8xf32>
    %661 = vector.multi_reduction <add>, %660, %cst_108 [1] : vector<8x128xf32> to vector<8xf32>
    %662 = vector.shape_cast %661 : vector<8xf32> to vector<8x1xf32>
    %663 = arith.addf %570, %662 : vector<8x1xf32>
    %664 = tpu.concatenate %599, %628 in 1 : vector<8x128xf32>, vector<8x128xf32> -> vector<8x256xf32>
    %665 = arith.truncf %664 : vector<8x256xf32> to vector<8x256xbf16>
    %cst_109 = arith.constant dense<0.000000e+00> : vector<8x512xf32>
    %666 = tpu.matmul %665, %1, %cst_109 {dimension_numbers = #tpu.dot_dimension_numbers<[1], [0], [0], [1], [0, 0, 1, 1], [], []>} : vector<8x256xbf16>, vector<256x512xbf16>, vector<8x512xf32> -> vector<8x512xf32>
    %667 = arith.addf %666, %5 : vector<8x512xf32>
    %668 = vector.extract_strided_slice %667 {offsets = [0, 0], sizes = [8, 128], strides = [1, 1]} : vector<8x512xf32> to vector<8x128xf32>
    %669 = arith.negf %668 : vector<8x128xf32>
    %670 = math.exp %669 : vector<8x128xf32>
    %cst_110 = arith.constant 1.000000e+00 : f32
    %671 = vector.broadcast %cst_110 : f32 to vector<8x128xf32>
    %672 = arith.addf %671, %670 : vector<8x128xf32>
    %673 = arith.divf %671, %672 : vector<8x128xf32>
    %674 = vector.extract_strided_slice %667 {offsets = [0, 128], sizes = [8, 128], strides = [1, 1]} : vector<8x512xf32> to vector<8x128xf32>
    %675 = arith.negf %674 : vector<8x128xf32>
    %676 = math.exp %675 : vector<8x128xf32>
    %cst_111 = arith.constant 1.000000e+00 : f32
    %677 = vector.broadcast %cst_111 : f32 to vector<8x128xf32>
    %678 = arith.addf %677, %676 : vector<8x128xf32>
    %679 = arith.divf %677, %678 : vector<8x128xf32>
    %680 = vector.extract_strided_slice %667 {offsets = [0, 256], sizes = [8, 128], strides = [1, 1]} : vector<8x512xf32> to vector<8x128xf32>
    %681 = math.tanh %680 : vector<8x128xf32>
    %682 = vector.extract_strided_slice %667 {offsets = [0, 384], sizes = [8, 128], strides = [1, 1]} : vector<8x512xf32> to vector<8x128xf32>
    %683 = arith.negf %682 : vector<8x128xf32>
    %684 = math.exp %683 : vector<8x128xf32>
    %cst_112 = arith.constant 1.000000e+00 : f32
    %685 = vector.broadcast %cst_112 : f32 to vector<8x128xf32>
    %686 = arith.addf %685, %684 : vector<8x128xf32>
    %687 = arith.divf %685, %686 : vector<8x128xf32>
    %688 = arith.mulf %679, %626 : vector<8x128xf32>
    %689 = arith.mulf %673, %681 : vector<8x128xf32>
    %690 = arith.addf %688, %689 : vector<8x128xf32>
    %691 = math.tanh %690 : vector<8x128xf32>
    %692 = arith.mulf %687, %691 : vector<8x128xf32>
    %693 = tpu.concatenate %628, %657 in 1 : vector<8x128xf32>, vector<8x128xf32> -> vector<8x256xf32>
    %694 = arith.truncf %693 : vector<8x256xf32> to vector<8x256xbf16>
    %cst_113 = arith.constant dense<0.000000e+00> : vector<8x512xf32>
    %695 = tpu.matmul %694, %2, %cst_113 {dimension_numbers = #tpu.dot_dimension_numbers<[1], [0], [0], [1], [0, 0, 1, 1], [], []>} : vector<8x256xbf16>, vector<256x512xbf16>, vector<8x512xf32> -> vector<8x512xf32>
    %696 = arith.addf %695, %8 : vector<8x512xf32>
    %697 = vector.extract_strided_slice %696 {offsets = [0, 0], sizes = [8, 128], strides = [1, 1]} : vector<8x512xf32> to vector<8x128xf32>
    %698 = arith.negf %697 : vector<8x128xf32>
    %699 = math.exp %698 : vector<8x128xf32>
    %cst_114 = arith.constant 1.000000e+00 : f32
    %700 = vector.broadcast %cst_114 : f32 to vector<8x128xf32>
    %701 = arith.addf %700, %699 : vector<8x128xf32>
    %702 = arith.divf %700, %701 : vector<8x128xf32>
    %703 = vector.extract_strided_slice %696 {offsets = [0, 128], sizes = [8, 128], strides = [1, 1]} : vector<8x512xf32> to vector<8x128xf32>
    %704 = arith.negf %703 : vector<8x128xf32>
    %705 = math.exp %704 : vector<8x128xf32>
    %cst_115 = arith.constant 1.000000e+00 : f32
    %706 = vector.broadcast %cst_115 : f32 to vector<8x128xf32>
    %707 = arith.addf %706, %705 : vector<8x128xf32>
    %708 = arith.divf %706, %707 : vector<8x128xf32>
    %709 = vector.extract_strided_slice %696 {offsets = [0, 256], sizes = [8, 128], strides = [1, 1]} : vector<8x512xf32> to vector<8x128xf32>
    %710 = math.tanh %709 : vector<8x128xf32>
    %711 = vector.extract_strided_slice %696 {offsets = [0, 384], sizes = [8, 128], strides = [1, 1]} : vector<8x512xf32> to vector<8x128xf32>
    %712 = arith.negf %711 : vector<8x128xf32>
    %713 = math.exp %712 : vector<8x128xf32>
    %cst_116 = arith.constant 1.000000e+00 : f32
    %714 = vector.broadcast %cst_116 : f32 to vector<8x128xf32>
    %715 = arith.addf %714, %713 : vector<8x128xf32>
    %716 = arith.divf %714, %715 : vector<8x128xf32>
    %717 = arith.mulf %708, %655 : vector<8x128xf32>
    %718 = arith.mulf %702, %710 : vector<8x128xf32>
    %719 = arith.addf %717, %718 : vector<8x128xf32>
    %720 = math.tanh %719 : vector<8x128xf32>
    %721 = arith.mulf %716, %720 : vector<8x128xf32>
    %722 = vector.extract_strided_slice %9 {offsets = [6, 0], sizes = [1, 128], strides = [1, 1]} : vector<8x128xf32> to vector<1x128xf32>
    %723 = vector.broadcast %722 : vector<1x128xf32> to vector<8x128xf32>
    %724 = arith.mulf %721, %723 : vector<8x128xf32>
    %cst_117 = arith.constant dense<0.000000e+00> : vector<8xf32>
    %725 = vector.multi_reduction <add>, %724, %cst_117 [1] : vector<8x128xf32> to vector<8xf32>
    %726 = vector.shape_cast %725 : vector<8xf32> to vector<8x1xf32>
    %727 = arith.addf %663, %726 : vector<8x1xf32>
    %728 = tpu.concatenate %692, %721 in 1 : vector<8x128xf32>, vector<8x128xf32> -> vector<8x256xf32>
    %729 = arith.truncf %728 : vector<8x256xf32> to vector<8x256xbf16>
    %cst_118 = arith.constant dense<0.000000e+00> : vector<8x512xf32>
    %730 = tpu.matmul %729, %2, %cst_118 {dimension_numbers = #tpu.dot_dimension_numbers<[1], [0], [0], [1], [0, 0, 1, 1], [], []>} : vector<8x256xbf16>, vector<256x512xbf16>, vector<8x512xf32> -> vector<8x512xf32>
    %731 = arith.addf %730, %8 : vector<8x512xf32>
    %732 = vector.extract_strided_slice %731 {offsets = [0, 0], sizes = [8, 128], strides = [1, 1]} : vector<8x512xf32> to vector<8x128xf32>
    %733 = arith.negf %732 : vector<8x128xf32>
    %734 = math.exp %733 : vector<8x128xf32>
    %cst_119 = arith.constant 1.000000e+00 : f32
    %735 = vector.broadcast %cst_119 : f32 to vector<8x128xf32>
    %736 = arith.addf %735, %734 : vector<8x128xf32>
    %737 = arith.divf %735, %736 : vector<8x128xf32>
    %738 = vector.extract_strided_slice %731 {offsets = [0, 128], sizes = [8, 128], strides = [1, 1]} : vector<8x512xf32> to vector<8x128xf32>
    %739 = arith.negf %738 : vector<8x128xf32>
    %740 = math.exp %739 : vector<8x128xf32>
    %cst_120 = arith.constant 1.000000e+00 : f32
    %741 = vector.broadcast %cst_120 : f32 to vector<8x128xf32>
    %742 = arith.addf %741, %740 : vector<8x128xf32>
    %743 = arith.divf %741, %742 : vector<8x128xf32>
    %744 = vector.extract_strided_slice %731 {offsets = [0, 256], sizes = [8, 128], strides = [1, 1]} : vector<8x512xf32> to vector<8x128xf32>
    %745 = math.tanh %744 : vector<8x128xf32>
    %746 = vector.extract_strided_slice %731 {offsets = [0, 384], sizes = [8, 128], strides = [1, 1]} : vector<8x512xf32> to vector<8x128xf32>
    %747 = arith.negf %746 : vector<8x128xf32>
    %748 = math.exp %747 : vector<8x128xf32>
    %cst_121 = arith.constant 1.000000e+00 : f32
    %749 = vector.broadcast %cst_121 : f32 to vector<8x128xf32>
    %750 = arith.addf %749, %748 : vector<8x128xf32>
    %751 = arith.divf %749, %750 : vector<8x128xf32>
    %752 = arith.mulf %743, %719 : vector<8x128xf32>
    %753 = arith.mulf %737, %745 : vector<8x128xf32>
    %754 = arith.addf %752, %753 : vector<8x128xf32>
    %755 = math.tanh %754 : vector<8x128xf32>
    %756 = arith.mulf %751, %755 : vector<8x128xf32>
    %757 = vector.extract_strided_slice %9 {offsets = [7, 0], sizes = [1, 128], strides = [1, 1]} : vector<8x128xf32> to vector<1x128xf32>
    %758 = vector.broadcast %757 : vector<1x128xf32> to vector<8x128xf32>
    %759 = arith.mulf %756, %758 : vector<8x128xf32>
    %cst_122 = arith.constant dense<0.000000e+00> : vector<8xf32>
    %760 = vector.multi_reduction <add>, %759, %cst_122 [1] : vector<8x128xf32> to vector<8xf32>
    %761 = vector.shape_cast %760 : vector<8xf32> to vector<8x1xf32>
    %762 = arith.addf %727, %761 : vector<8x1xf32>
    %c0_123 = arith.constant 0 : index
    %c0_124 = arith.constant 0 : index
    %763 = vector.load %arg9[%c0_123, %c0_124] : memref<1x1xf32, #tpu.memory_space<vmem>>, vector<1x1xf32>
    %764 = vector.broadcast %763 : vector<1x1xf32> to vector<8x1xf32>
    %765 = arith.addf %762, %764 : vector<8x1xf32>
    %c0_125 = arith.constant 0 : index
    %c0_126 = arith.constant 0 : index
    %766 = vector.load %arg10[%c0_125, %c0_126] : memref<8x1xf32, #tpu.memory_space<vmem>>, vector<8x1xf32>
    tpu.vector_store %arg10[%c0_125, %c0_126], %765 {strides = array<i32>} : memref<8x1xf32, #tpu.memory_space<vmem>>, vector<8x1xf32>,
    return
  }
}

</mosaic_0001>

<bundles_post_ra>
// kernel: tpu_custom_call.1
= control target key start
LH: loop header
LB: loop body
LE: loop exit
PB: predicated region body
PF: predicated region fallthrough
CT: control target
= control target key end

     0   :  { %s8925_s0 = inlined_call_operand.vmem [shape: f32[64,7], index: 0, kind: input, shape index: {}]   ;;  %s8926_s1 = inlined_call_operand.vmem [shape: bf16[7,512], index: 1, kind: input, shape index: {}]   ;;  %s8927_s2 = inlined_call_operand.hbm [shape: bf16[128,512], index: 2, kind: input, shape index: {}]   ;;  %s8928_s3 = inlined_call_operand.vmem [shape: f32[1,512], index: 3, kind: input, shape index: {}]   ;;  %s8929_s4 = inlined_call_operand.hbm [shape: bf16[256,512], index: 4, kind: input, shape index: {}]   ;;  %s8930_s5 = inlined_call_operand.vmem [shape: f32[1,512], index: 5, kind: input, shape index: {}]   ;;  %s8931_s6 = inlined_call_operand.hbm [shape: bf16[256,512], index: 6, kind: input, shape index: {}]   ;;  %s8932_s7 = inlined_call_operand.vmem [shape: f32[1,512], index: 7, kind: input, shape index: {}]   ;;  %s8933_s8 = inlined_call_operand.vmem [shape: f32[8,128], index: 8, kind: input, shape index: {}]   ;;  %s8934_s9 = inlined_call_operand.<no memory space> [shape: f32[1,1], index: 9, kind: input, shape index: {}]   ;;  %s8935_s10 = inlined_call_operand.vmem [shape: f32[8,1], index: 10, kind: output, shape index: {}]  }
   0x1   :  { %v15_v0 = vstv %s8934_s9 }
   0x2   :  { %16 = vst [vmem:[#allocation2] sm:$0x1] %v15_v0 }
   0x3   :  { %17 = vsyncpa [#allocation4], 0 }
   0x4   :  { %18 = vsyncpa [#allocation6], 0  ;;  %s42_s17 = sshll.u32 %s8929_s4, 4  ;;  %s6306_s18 = smov [#allocation5]   ;;  %s43_s17 = int_to_ptr.hbm [resolvable:$true] %s42_s17 }
   0x5   :  { %s44_s19 = sshll.u32 %s6306_s18, 4  ;;  %s27_s22 = sshll.u32 %s8927_s2, 4  ;;  %s45_s19 = int_to_ptr.vmem [resolvable:$true] %s44_s19  ;;  %s28_s22 = int_to_ptr.hbm [resolvable:$true] %s27_s22 }
   0x6   :  { %s6307_s23 = smov 256   ;;  %s6308_s24 = smov 16  }
   0x7   :  { %50 = dma.hbm_to_vmem [thread:$0]  %s43_s17, 8192, %s45_s19, [#allocation6], %s6307_s23, %s6307_s23, %s6308_s24  }
   0x8   :  { %s6309_s9 = smov [#allocation3]   ;;  %s57_s28 = sshll.u32 %s8931_s6, 4  ;;  %s58_s28 = int_to_ptr.hbm [resolvable:$true] %s57_s28 }
   0x9   :  { %s29_s25 = sshll.u32 %s6309_s9, 4  ;;  %s6310_s4 = smov [#allocation7]   ;;  %s30_s25 = int_to_ptr.vmem [resolvable:$true] %s29_s25 }
   0xa   :  { %35 = dma.hbm_to_vmem [thread:$0]  %s28_s22, 4096, %s30_s25, [#allocation4], %s6307_s23, %s6307_s23, %s6308_s24  }
   0xb   :  { %s59_s29 = sshll.u32 %s6310_s4, 4  ;;  %s60_s29 = int_to_ptr.vmem [resolvable:$true] %s59_s29 }
   0xc   :  { %65 = dma.hbm_to_vmem [thread:$0]  %s58_s28, 8192, %s60_s29, [#allocation6], %s6307_s23, %s6307_s23, %s6308_s24  }
   0xd   :  { %6302 = dma.done.wait [#allocation4], 4096  }
   0xe   :  { %6303 = vsyncadd [#allocation4], 4294963200 }
   0xf   :  { %6304 = dma.done.wait [#allocation6], 16384  }
  0x10   :  { %6305 = vsyncadd [#allocation6], 4294950912  ;;  %vm313_vm0 = vcmask 1042432   ;;  %vm314_vm1 = vcmask 1043456   ;;  %v6311_v1 = vmov 65535   ;;  %v278_v3 = vld [vmem:[%s8926_s1] sm:$0xff] }
  0x11   :  { %v315_v2 = vsel %vm313_vm0, 4294967295, %v6311_v1  ;;  %v279_v4 = vld [vmem:[%s8926_s1 + $0x8] sm:$0xff]  ;;  %v292_v5 = vunpack.c.l.b16 %v278_v3  ;;  %v293_v6 = vunpack.c.h.b16 %v278_v3  ;;  %v5076_v9 = vld [vmem:[#allocation3 + $0xe0] sm:$0xf]  ;;  %v5704_v10 = vld [vmem:[#allocation3 + $0xec] sm:$0xf0] }
  0x12   :  { %v294_v7 = vunpack.c.l.b16 %v279_v4  ;;  %v295_v8 = vunpack.c.h.b16 %v279_v4  ;;  %v316_v11 = vsel %vm314_vm1, %v315_v2, 0  ;;  %v5702_v12 = vld [vmem:[#allocation3 + $0xe4] sm:$0xf]  ;;  %v5078_v13 = vld [vmem:[#allocation3 + $0xf0] sm:$0xf0]  ;;  %v6393_v20 = vor.u32 %v5704_v10, %v5076_v9 }
  0x13   :  { %v296_v14 = vpack.c.b16 %v292_v5, %v292_v5  ;;  %v297_v15 = vpack.c.b16 %v293_v6, %v293_v6  ;;  %v266_v18 = vld [vmem:[%s8925_s0] sm:$0xff]  ;;  %v267_v19 = vld [vmem:[%s8925_s0 + $0x8] sm:$0xff]  ;;  %v6395_v21 = vor.u32 %v5702_v12, %v5078_v13  ;;  %v5700_v29 = vld [vmem:[#allocation3 + $0xcc] sm:$0xf0]  ;;  %vm300_vm2 = vcmask 56320  }
  0x14   :  { %v298_v16 = vpack.c.b16 %v294_v7, %v294_v7  ;;  %v299_v17 = vpack.c.b16 %v295_v8, %v295_v8  ;;  %9323 = vst [vmem:[#allocation10_spill] sm:$0xff] %v6393_v20  ;;  %v5703_v22 = vld [vmem:[#allocation3 + $0xec] sm:$0xf]  ;;  %v5086_v23 = vld [vmem:[#allocation3 + $0xf8] sm:$0xf0]  ;;  %v274_v31 = vpack.c.bf16 %v267_v19, %v266_v18 }
  0x15   :  { %9324 = vst [vmem:[#allocation11_spill] sm:$0xff] %v6395_v21  ;;  %v318_v24 = vand.u32 %v316_v11, %v296_v14  ;;  %v321_v25 = vand.u32 %v316_v11, %v297_v15  ;;  %v5060_v28 = vld [vmem:[#allocation3 + $0xc0] sm:$0xf]  ;;  %v5698_v30 = vld [vmem:[#allocation3 + $0xc4] sm:$0xf]  ;;  %v6397_v35 = vor.u32 %v5703_v22, %v5086_v23  ;;  %v268_v7 = vld [vmem:[%s8925_s0 + $0x10] sm:$0xff] }
  0x16   :  { %v324_v26 = vand.u32 %v316_v11, %v298_v16  ;;  %v327_v27 = vand.u32 %v316_v11, %v299_v17  ;;  %v5062_v32 = vld [vmem:[#allocation3 + $0xd0] sm:$0xf0]  ;;  %v5084_v33 = vld [vmem:[#allocation3 + $0xe8] sm:$0xf]  ;;  %v5705_v34 = vld [vmem:[#allocation3 + $0xf4] sm:$0xf0]  ;;  %v6403_v37 = vor.u32 %v5700_v29, %v5060_v28 }
  0x17   :  { %336 = vmatpush.bf16.msra.mxu0 %v318_v24  ;;  %365 = vmatpush.bf16.msra.mxu1 %v321_v25  ;;  %9325 = vst [vmem:[#allocation12_spill] sm:$0xff] %v6397_v35  ;;  %v6399_v36 = vor.u32 %v5705_v34, %v5084_v33  ;;  %v6405_v38 = vor.u32 %v5698_v30, %v5062_v32  ;;  %v5699_v39 = vld [vmem:[#allocation3 + $0xcc] sm:$0xf]  ;;  %v5070_v40 = vld [vmem:[#allocation3 + $0xd8] sm:$0xf0] }
  0x18   :  { %394 = vmatpush.bf16.msra.mxu2 %v324_v26  ;;  %423 = vmatpush.bf16.msra.mxu3 %v327_v27  ;;  %9327 = vst [vmem:[#allocation14_spill] sm:$0xff] %v6403_v37  ;;  %v5044_v41 = vld [vmem:[#allocation3 + $0xa0] sm:$0xf]  ;;  %v5696_v42 = vld [vmem:[#allocation3 + $0xac] sm:$0xf0]  ;;  %v6412_v46 = vor.u32 %v5699_v39, %v5070_v40  ;;  %v269_v8 = vld [vmem:[%s8925_s0 + $0x18] sm:$0xff] }
  0x19   :  { %9326 = vst [vmem:[#allocation13_spill] sm:$0xff] %v6399_v36  ;;  %v5694_v43 = vld [vmem:[#allocation3 + $0xa4] sm:$0xf]  ;;  %v5046_v44 = vld [vmem:[#allocation3 + $0xb0] sm:$0xf0]  ;;  %v6417_v50 = vor.u32 %v5696_v42, %v5044_v41  ;;  %v275_v13 = vpack.c.bf16 %v269_v8, %v268_v7 }
  0x1a   :  { %9328 = vst [vmem:[#allocation15_spill] sm:$0xff] %v6405_v38  ;;  %4946 = vmatmul.msk.bf16.vlgmr.msra.gmra.mxu0 %vm300_vm2, %v274_v31  ;;  %4950 = vmatmul.msk.bf16.vlgmr.msra.gmra.mxu1 %vm300_vm2, %v274_v31  ;;  %v5068_v45 = vld [vmem:[#allocation3 + $0xc8] sm:$0xf]  ;;  %v5695_v47 = vld [vmem:[#allocation3 + $0xac] sm:$0xf]  ;;  %v6419_v51 = vor.u32 %v5694_v43, %v5046_v44 }
  0x1b   :  { %605 = vmatpush.bf16.msrb.mxu0 %v6393_v20  ;;  %618 = vmatpush.bf16.msrb.mxu1 %v6395_v21  ;;  %9329 = vst [vmem:[#allocation16_spill] sm:$0xff] %v6412_v46  ;;  %v5054_v48 = vld [vmem:[#allocation3 + $0xb8] sm:$0xf0]  ;;  %v5701_v49 = vld [vmem:[#allocation3 + $0xd4] sm:$0xf0] }
  0x1c   :  { %4954 = vmatmul.msk.bf16.vlgmr.msra.gmra.mxu2 %vm300_vm2, %v274_v31  ;;  %4958 = vmatmul.msk.bf16.vlgmr.msra.gmra.mxu3 %vm300_vm2, %v274_v31  ;;  %9330 = vst [vmem:[#allocation17_spill] sm:$0xff] %v6417_v50  ;;  %v6421_v52 = vor.u32 %v5701_v49, %v5068_v45  ;;  %v5028_v53 = vld [vmem:[#allocation3 + $0x80] sm:$0xf]  ;;  %v5692_v54 = vld [vmem:[#allocation3 + $0x8c] sm:$0xf0]  ;;  %v6424_v59 = vor.u32 %v5695_v47, %v5054_v48 }
  0x1d   :  { %644 = vmatpush.bf16.msrb.mxu3 %v6397_v35  ;;  %631 = vmatpush.bf16.msrb.mxu2 %v6399_v36  ;;  %9331 = vst [vmem:[#allocation18_spill] sm:$0xff] %v6419_v51  ;;  %v5052_v55 = vld [vmem:[#allocation3 + $0xa8] sm:$0xf]  ;;  %v5690_v56 = vld [vmem:[#allocation3 + $0x84] sm:$0xf]  ;;  %v6431_v63 = vor.u32 %v5692_v54, %v5028_v53 }
  0x1e   :  { %9332 = vst [vmem:[#allocation19_spill] sm:$0xff] %v6421_v52  ;;  %v5030_v57 = vld [vmem:[#allocation3 + $0x90] sm:$0xf0]  ;;  %v5697_v58 = vld [vmem:[#allocation3 + $0xb4] sm:$0xf0] }
  0x1f   :  { %606 = vmatpush.bf16.msrb.mxu0 %v6403_v37  ;;  %619 = vmatpush.bf16.msrb.mxu1 %v6405_v38  ;;  %9333 = vst [vmem:[#allocation20_spill] sm:$0xff] %v6424_v59  ;;  %v6427_v60 = vor.u32 %v5697_v58, %v5052_v55  ;;  %v5691_v61 = vld [vmem:[#allocation3 + $0x8c] sm:$0xf]  ;;  %v5038_v62 = vld [vmem:[#allocation3 + $0x98] sm:$0xf0]  ;;  %v6433_v0 = vor.u32 %v5690_v56, %v5030_v57 }
  0x20   :  { %9335 = vst [vmem:[#allocation22_spill] sm:$0xff] %v6431_v63  ;;  %v5036_v1 = vld [vmem:[#allocation3 + $0x88] sm:$0xf]  ;;  %v5693_v2 = vld [vmem:[#allocation3 + $0x94] sm:$0xf0]  ;;  %v6443_v9 = vor.u32 %v5691_v61, %v5038_v62 }
  0x21   :  { %645 = vmatpush.bf16.msrb.mxu3 %v6412_v46  ;;  %632 = vmatpush.bf16.msrb.mxu2 %v6421_v52  ;;  %9334 = vst [vmem:[#allocation21_spill] sm:$0xff] %v6427_v60  ;;  %v5012_v3 = vld [vmem:[#allocation3 + $0x60] sm:$0xf]  ;;  %v5688_v4 = vld [vmem:[#allocation3 + $0x6c] sm:$0xf0]  ;;  %v6445_v10 = vor.u32 %v5693_v2, %v5036_v1 }
  0x22   :  { %9336 = vst [vmem:[#allocation23_spill] sm:$0xff] %v6433_v0  ;;  %v5686_v5 = vld [vmem:[#allocation3 + $0x64] sm:$0xf]  ;;  %v5014_v6 = vld [vmem:[#allocation3 + $0x70] sm:$0xf0]  ;;  %v6449_v11 = vor.u32 %v5688_v4, %v5012_v3 }
  0x23   :  { %607 = vmatpush.bf16.msrb.mxu0 %v6417_v50  ;;  %620 = vmatpush.bf16.msrb.mxu1 %v6419_v51  ;;  %9337 = vst [vmem:[#allocation24_spill] sm:$0xff] %v6443_v9  ;;  %v6451_v12 = vor.u32 %v5686_v5, %v5014_v6  ;;  %v5020_v14 = vld [vmem:[#allocation3 + $0x68] sm:$0xf]  ;;  %v5689_v15 = vld [vmem:[#allocation3 + $0x74] sm:$0xf0]  ;;  %v270_v3 = vld [vmem:[%s8925_s0 + $0x20] sm:$0xff] }
  0x24   :  { %9338 = vst [vmem:[#allocation25_spill] sm:$0xff] %v6445_v10  ;;  %v5687_v16 = vld [vmem:[#allocation3 + $0x6c] sm:$0xf]  ;;  %v6459_v17 = vor.u32 %v5689_v15, %v5020_v14  ;;  %v5022_v18 = vld [vmem:[#allocation3 + $0x78] sm:$0xf0] }
  0x25   :  { %646 = vmatpush.bf16.msrb.mxu3 %v6424_v59  ;;  %633 = vmatpush.bf16.msrb.mxu2 %v6427_v60  ;;  %9339 = vst [vmem:[#allocation26_spill] sm:$0xff] %v6449_v11  ;;  %v6463_v19 = vor.u32 %v5687_v16, %v5022_v18  ;;  %v4996_v22 = vld [vmem:[#allocation3 + $0x40] sm:$0xf]  ;;  %v5684_v23 = vld [vmem:[#allocation3 + $0x4c] sm:$0xf0]  ;;  %v271_v4 = vld [vmem:[%s8925_s0 + $0x28] sm:$0xff] }
  0x26   :  { %9340 = vst [vmem:[#allocation27_spill] sm:$0xff] %v6451_v12  ;;  %v5682_v24 = vld [vmem:[#allocation3 + $0x44] sm:$0xf]  ;;  %v6466_v25 = vor.u32 %v5684_v23, %v4996_v22  ;;  %v4998_v26 = vld [vmem:[#allocation3 + $0x50] sm:$0xf0]  ;;  %v276_v8 = vpack.c.bf16 %v271_v4, %v270_v3  ;;  %v6312_v16 = vmov 0  }
  0x27   :  { %608 = vmatpush.bf16.msrb.mxu0 %v6431_v63  ;;  %621 = vmatpush.bf16.msrb.mxu1 %v6433_v0  ;;  %9341 = vst [vmem:[#allocation28_spill] sm:$0xff] %v6459_v17  ;;  %v5004_v27 = vld [vmem:[#allocation3 + $0x48] sm:$0xf]  ;;  %v5685_v28 = vld [vmem:[#allocation3 + $0x54] sm:$0xf0]  ;;  %v6469_v29 = vor.u32 %v5682_v24, %v4998_v26 }
  0x28   :  { %9342 = vst [vmem:[#allocation29_spill] sm:$0xff] %v6463_v19  ;;  %v6471_v30 = vor.u32 %v5685_v28, %v5004_v27  ;;  %v5683_v31 = vld [vmem:[#allocation3 + $0x4c] sm:$0xf]  ;;  %v5006_v32 = vld [vmem:[#allocation3 + $0x58] sm:$0xf0] }
  0x29   :  { %647 = vmatpush.bf16.msrb.mxu3 %v6443_v9  ;;  %634 = vmatpush.bf16.msrb.mxu2 %v6445_v10  ;;  %9343 = vst [vmem:[#allocation30_spill] sm:$0xff] %v6466_v25  ;;  %v4980_v33 = vld [vmem:[#allocation3 + $0x20] sm:$0xf]  ;;  %v6474_v34 = vor.u32 %v5683_v31, %v5006_v32  ;;  %v5680_v39 = vld [vmem:[#allocation3 + $0x2c] sm:$0xf0]  ;;  %v273_v14 = vld [vmem:[%s8925_s0 + $0x38] sm:$0xff] }
  0x2a   :  { %4947 = vmatmul.msk.bf16.gmra.mxu0 %vm300_vm2, %v275_v13  ;;  %4951 = vmatmul.msk.bf16.gmra.mxu1 %vm300_vm2, %v275_v13  ;;  %9344 = vst [vmem:[#allocation31_spill] sm:$0xff] %v6469_v29  ;;  %v5678_v40 = vld [vmem:[#allocation3 + $0x24] sm:$0xf]  ;;  %v4982_v41 = vld [vmem:[#allocation3 + $0x30] sm:$0xf0]  ;;  %v6477_v42 = vor.u32 %v5680_v39, %v4980_v33 }
  0x2b   :  { %609 = vmatpush.bf16.msrb.mxu0 %v6449_v11  ;;  %622 = vmatpush.bf16.msrb.mxu1 %v6451_v12  ;;  %9345 = vst [vmem:[#allocation32_spill] sm:$0xff] %v6471_v30  ;;  %v6479_v43 = vor.u32 %v5678_v40, %v4982_v41  ;;  %v4988_v44 = vld [vmem:[#allocation3 + $0x28] sm:$0xf]  ;;  %v5681_v45 = vld [vmem:[#allocation3 + $0x34] sm:$0xf0] }
  0x2c   :  { %4955 = vmatmul.msk.bf16.gmra.mxu2 %vm300_vm2, %v275_v13  ;;  %4959 = vmatmul.msk.bf16.gmra.mxu3 %vm300_vm2, %v275_v13  ;;  %9346 = vst [vmem:[#allocation33_spill] sm:$0xff] %v6474_v34  ;;  %v5679_v47 = vld [vmem:[#allocation3 + $0x2c] sm:$0xf]  ;;  %v6482_v48 = vor.u32 %v5681_v45, %v4988_v44  ;;  %v4990_v49 = vld [vmem:[#allocation3 + $0x38] sm:$0xf0] }
  0x2d   :  { %635 = vmatpush.bf16.msrb.mxu2 %v6459_v17  ;;  %648 = vmatpush.bf16.msrb.mxu3 %v6463_v19  ;;  %9347 = vst [vmem:[#allocation34_spill] sm:$0xff] %v6477_v42  ;;  %v4964_v53 = vld [vmem:[#allocation3] sm:$0xf]  ;;  %v5676_v54 = vld [vmem:[#allocation3 + $0xc] sm:$0xf0]  ;;  %v6485_v55 = vor.u32 %v5679_v47, %v4990_v49 }
  0x2e   :  { %9348 = vst [vmem:[#allocation35_spill] sm:$0xff] %v6479_v43  ;;  %v5674_v56 = vld [vmem:[#allocation3 + $0x4] sm:$0xf]  ;;  %v4966_v57 = vld [vmem:[#allocation3 + $0x10] sm:$0xf0]  ;;  %v6488_v61 = vor.u32 %v5676_v54, %v4964_v53 }
  0x2f   :  { %610 = vmatpush.bf16.msrb.mxu0 %v6466_v25  ;;  %623 = vmatpush.bf16.msrb.mxu1 %v6469_v29  ;;  %9349 = vst [vmem:[#allocation36_spill] sm:$0xff] %v6482_v48  ;;  %v4972_v58 = vld [vmem:[#allocation3 + $0x8] sm:$0xf]  ;;  %v5677_v62 = vld [vmem:[#allocation3 + $0x14] sm:$0xf0]  ;;  %v6497_v5 = vor.u32 %v5674_v56, %v4966_v57  ;;  %v272_v13 = vld [vmem:[%s8925_s0 + $0x30] sm:$0xff] }
  0x30   :  { %9350 = vst [vmem:[#allocation37_spill] sm:$0xff] %v6485_v55  ;;  %v5675_v1 = vld [vmem:[#allocation3 + $0xc] sm:$0xf]  ;;  %v4974_v2 = vld [vmem:[#allocation3 + $0x18] sm:$0xf0]  ;;  %v6500_v6 = vor.u32 %v5677_v62, %v4972_v58  ;;  %v277_v15 = vpack.c.bf16 %v273_v14, %v272_v13 }
  0x31   :  { %636 = vmatpush.bf16.msrb.mxu2 %v6471_v30  ;;  %649 = vmatpush.bf16.msrb.mxu3 %v6474_v34  ;;  %9351 = vst [vmem:[#allocation38_spill] sm:$0xff] %v6488_v61  ;;  %v6503_v7 = vor.u32 %v5675_v1, %v4974_v2  ;;  %v280_v28 = vld [vmem:[%s8928_s3] sm:$0xf] }
  0x32   :  { %9352 = vst [vmem:[#allocation39_spill] sm:$0xff] %v6497_v5  ;;  %v6570_v31 = vperm.slane %v280_v28, 0  ;;  %v6572_v32 = vperm.slane %v280_v28, 1  ;;  %v6584_v47 = vperm.slane %v280_v28, 2  ;;  %v6586_v49 = vperm.slane %v280_v28, 3 }
  0x33   :  { %611 = vmatpush.bf16.msrb.mxu0 %v6477_v42  ;;  %624 = vmatpush.bf16.msrb.mxu1 %v6479_v43  ;;  %9353 = vst [vmem:[#allocation40_spill] sm:$0xff] %v6500_v6 }
  0x34   :  { %9354 = vst [vmem:[#allocation41_spill] sm:$0xff] %v6503_v7 }
  0x35   :  { %637 = vmatpush.bf16.msrb.mxu2 %v6482_v48  ;;  %650 = vmatpush.bf16.msrb.mxu3 %v6485_v55  ;;  %9357 = vst [vmem:[#allocation44_spill] sm:$0xff] %v6570_v31 }
  0x36   :  { %9358 = vst [vmem:[#allocation45_spill] sm:$0xff] %v6572_v32 }
  0x37   :  { %612 = vmatpush.bf16.msrb.mxu0 %v6488_v61  ;;  %625 = vmatpush.bf16.msrb.mxu1 %v6497_v5  ;;  %9363 = vst [vmem:[#allocation50_spill] sm:$0xff] %v6584_v47 }
  0x38   :  { %9364 = vst [vmem:[#allocation51_spill] sm:$0xff] %v6586_v49 }
  0x39   :  { %638 = vmatpush.bf16.msrb.mxu2 %v6500_v6  ;;  %651 = vmatpush.bf16.msrb.mxu3 %v6503_v7 }
  0x3a   :  { %4948 = vmatmul.msk.bf16.gmra.mxu0 %vm300_vm2, %v276_v8  ;;  %4952 = vmatmul.msk.bf16.gmra.mxu1 %vm300_vm2, %v276_v8 }
  0x3b   :  { %725 = vmatpush.bf16.msra.mxu0 %v6393_v20  ;;  %738 = vmatpush.bf16.msra.mxu1 %v6395_v21 }
  0x3c   :  { %4956 = vmatmul.msk.bf16.gmra.mxu2 %vm300_vm2, %v276_v8  ;;  %4960 = vmatmul.msk.bf16.gmra.mxu3 %vm300_vm2, %v276_v8 }
  0x3d   :  { %751 = vmatpush.bf16.msra.mxu2 %v6399_v36  ;;  %764 = vmatpush.bf16.msra.mxu3 %v6397_v35 }
  0x3f   :  { %726 = vmatpush.bf16.msra.mxu0 %v6403_v37  ;;  %739 = vmatpush.bf16.msra.mxu1 %v6405_v38 }
  0x41   :  { %752 = vmatpush.bf16.msra.mxu2 %v6421_v52  ;;  %765 = vmatpush.bf16.msra.mxu3 %v6412_v46 }
  0x43   :  { %727 = vmatpush.bf16.msra.mxu0 %v6417_v50  ;;  %740 = vmatpush.bf16.msra.mxu1 %v6419_v51 }
  0x45   :  { %753 = vmatpush.bf16.msra.mxu2 %v6427_v60  ;;  %766 = vmatpush.bf16.msra.mxu3 %v6424_v59 }
  0x47   :  { %728 = vmatpush.bf16.msra.mxu0 %v6431_v63  ;;  %741 = vmatpush.bf16.msra.mxu1 %v6433_v0 }
  0x49   :  { %754 = vmatpush.bf16.msra.mxu2 %v6445_v10  ;;  %767 = vmatpush.bf16.msra.mxu3 %v6443_v9 }
  0x4a   :  { %4949 = vmatmul.msk.bf16.gmra.mxu0 %vm300_vm2, %v277_v15  ;;  %4953 = vmatmul.msk.bf16.gmra.mxu1 %vm300_vm2, %v277_v15 }
  0x4b   :  { %729 = vmatpush.bf16.msra.mxu0 %v6449_v11  ;;  %742 = vmatpush.bf16.msra.mxu1 %v6451_v12 }
  0x4c   :  { %4957 = vmatmul.msk.bf16.gmra.mxu2 %vm300_vm2, %v277_v15  ;;  %4961 = vmatmul.msk.bf16.gmra.mxu3 %vm300_vm2, %v277_v15 }
  0x4d   :  { %755 = vmatpush.bf16.msra.mxu2 %v6459_v17  ;;  %768 = vmatpush.bf16.msra.mxu3 %v6463_v19 }
  0x4f   :  { %730 = vmatpush.bf16.msra.mxu0 %v6466_v25  ;;  %743 = vmatpush.bf16.msra.mxu1 %v6469_v29 }
  0x51   :  { %756 = vmatpush.bf16.msra.mxu2 %v6471_v30  ;;  %769 = vmatpush.bf16.msra.mxu3 %v6474_v34 }
  0x53   :  { %731 = vmatpush.bf16.msra.mxu0 %v6477_v42  ;;  %744 = vmatpush.bf16.msra.mxu1 %v6479_v43 }
  0x55   :  { %757 = vmatpush.bf16.msra.mxu2 %v6482_v48  ;;  %770 = vmatpush.bf16.msra.mxu3 %v6485_v55 }
  0x57   :  { %732 = vmatpush.bf16.msra.mxu0 %v6488_v61  ;;  %745 = vmatpush.bf16.msra.mxu1 %v6497_v5 }
  0x59   :  { %758 = vmatpush.bf16.msra.mxu2 %v6500_v6  ;;  %771 = vmatpush.bf16.msra.mxu3 %v6503_v7 }
  0x5a   :  { %613 = vmatmul.bf16.vlgmr.msrb.gmra.mxu0 %v6312_v16  ;;  %626 = vmatmul.bf16.vlgmr.msrb.gmra.mxu1 %v6312_v16 }
  0x5c   :  { %639 = vmatmul.bf16.vlgmr.msrb.gmra.mxu2 %v6312_v16  ;;  %652 = vmatmul.bf16.vlgmr.msrb.gmra.mxu3 %v6312_v16 }
  0x97   :  { %v6555_v18 = vpop.f32.mrf.mxu0  ;;  %v6557_v22 = vpop.f32.mrf.mxu1 }
  0x9f   :  { %v6559_v23 = vpop.f32.mrf.mxu2  ;;  %v6561_v24 = vpop.f32.mrf.mxu3 }
  0xa0   :  { %v6563_v26 = vpop.f32.mrf.mxu0  ;;  %v6565_v27 = vpop.f32.mrf.mxu1 }
  0xa1   :  { %9355 = vst [vmem:[#allocation42_spill] sm:$0xff] %v6563_v26 }
  0xa2   :  { %9356 = vst [vmem:[#allocation43_spill] sm:$0xff] %v6565_v27 }
  0xa7   :  { %v6574_v33 = vpop.f32.mrf.mxu2  ;;  %v6576_v39 = vpop.f32.mrf.mxu3 }
  0xa8   :  { %9359 = vst [vmem:[#allocation46_spill] sm:$0xff] %v6574_v33  ;;  %v343_v40 = vpop.f32.mrf.mxu0  ;;  %v372_v41 = vpop.f32.mrf.mxu1  ;;  %v5162_v33 = vld [vmem:[#allocation5 + $0x80] sm:$0xf] }
  0xa9   :  { %9360 = vst [vmem:[#allocation47_spill] sm:$0xff] %v6576_v39  ;;  %v6579_v44 = vadd.f32 %v343_v40, %v6570_v31  ;;  %v6582_v45 = vadd.f32 %v372_v41, %v6572_v32 }
  0xab   :  { %9361 = vst [vmem:[#allocation48_spill] sm:$0xff] %v6579_v44 }
  0xac   :  { %9362 = vst [vmem:[#allocation49_spill] sm:$0xff] %v6582_v45 }
  0xaf   :  { %v401_v53 = vpop.f32.mrf.mxu2  ;;  %v430_v54 = vpop.f32.mrf.mxu3 }
  0xb0   :  { %v6589_v56 = vadd.f32 %v401_v53, %v6584_v47  ;;  %v6592_v57 = vadd.f32 %v430_v54, %v6586_v49  ;;  %v6594_v58 = vpop.f32.mrf.mxu0  ;;  %v6596_v62 = vpop.f32.mrf.mxu1 }
  0xb1   :  { %9367 = vst [vmem:[#allocation54_spill] sm:$0xff] %v6594_v58 }
  0xb2   :  { %9365 = vst [vmem:[#allocation52_spill] sm:$0xff] %v6589_v56  ;;  %v5764_v56 = vld [vmem:[#allocation5 + $0x1cc] sm:$0xf0] }
  0xb3   :  { %9366 = vst [vmem:[#allocation53_spill] sm:$0xff] %v6592_v57 }
  0xb4   :  { %9368 = vst [vmem:[#allocation55_spill] sm:$0xff] %v6596_v62  ;;  %v5768_v62 = vld [vmem:[#allocation5 + $0x1ec] sm:$0xf0] }
  0xb7   :  { %v6598_v1 = vpop.f32.mrf.mxu2  ;;  %v6600_v2 = vpop.f32.mrf.mxu3 }
  0xb8   :  { %9369 = vst [vmem:[#allocation56_spill] sm:$0xff] %v6598_v1  ;;  %v348_v3 = vpop.f32.mrf.mxu0  ;;  %v377_v4 = vpop.f32.mrf.mxu1  ;;  %v5766_v1 = vld [vmem:[#allocation5 + $0x1e4] sm:$0xf] }
  0xb9   :  { %9370 = vst [vmem:[#allocation57_spill] sm:$0xff] %v6600_v2  ;;  %v6603_v8 = vadd.f32 %v348_v3, %v6570_v31  ;;  %v6606_v13 = vadd.f32 %v377_v4, %v6572_v32 }
  0xbb   :  { %9371 = vst [vmem:[#allocation58_spill] sm:$0xff] %v6603_v8 }
  0xbc   :  { %9372 = vst [vmem:[#allocation59_spill] sm:$0xff] %v6606_v13 }
  0xbf   :  { %v406_v14 = vpop.f32.mrf.mxu2  ;;  %v435_v15 = vpop.f32.mrf.mxu3 }
  0xc0   :  { %v6609_v16 = vadd.f32 %v406_v14, %v6584_v47  ;;  %v6612_v28 = vadd.f32 %v435_v15, %v6586_v49  ;;  %v6614_v40 = vpop.f32.mrf.mxu0  ;;  %v6616_v41 = vpop.f32.mrf.mxu1  ;;  %v5210_v14 = vld [vmem:[#allocation5 + $0xe0] sm:$0xf]  ;;  %v5734_v15 = vld [vmem:[#allocation5 + $0xe4] sm:$0xf] }
  0xc1   :  { %9375 = vst [vmem:[#allocation62_spill] sm:$0xff] %v6614_v40  ;;  %v5212_v40 = vld [vmem:[#allocation5 + $0xf0] sm:$0xf0] }
  0xc2   :  { %9373 = vst [vmem:[#allocation60_spill] sm:$0xff] %v6609_v16  ;;  %v5736_v16 = vld [vmem:[#allocation5 + $0xec] sm:$0xf0]  ;;  %v6630_v2 = vor.u32 %v5734_v15, %v5212_v40  ;;  %v5196_v40 = vld [vmem:[#allocation5 + $0xd0] sm:$0xf0] }
  0xc3   :  { %9374 = vst [vmem:[#allocation61_spill] sm:$0xff] %v6612_v28  ;;  %v6628_v28 = vor.u32 %v5736_v16, %v5210_v14  ;;  %v5732_v16 = vld [vmem:[#allocation5 + $0xcc] sm:$0xf0]  ;;  %v5730_v14 = vld [vmem:[#allocation5 + $0xc4] sm:$0xf] }
  0xc4   :  { %9376 = vst [vmem:[#allocation63_spill] sm:$0xff] %v6616_v41  ;;  %v5340_v41 = vld [vmem:[#allocation5 + $0x1f0] sm:$0xf0]  ;;  %1191 = vmatpush.bf16.msrb.mxu2 %v6630_v2  ;;  %v6642_v58 = vor.u32 %v5730_v14, %v5196_v40  ;;  %v5178_v14 = vld [vmem:[#allocation5 + $0xa0] sm:$0xf] }
  0xc5   :  { %9381 = vst [vmem:[#allocation68_spill] sm:$0xff] %v6628_v28  ;;  %1165 = vmatpush.bf16.msrb.mxu0 %v6628_v28  ;;  %v5728_v40 = vld [vmem:[#allocation5 + $0xac] sm:$0xf0] }
  0xc6   :  { %9382 = vst [vmem:[#allocation69_spill] sm:$0xff] %v6630_v2 }
  0xc7   :  { %v6618_v53 = vpop.f32.mrf.mxu2  ;;  %v6620_v54 = vpop.f32.mrf.mxu3  ;;  %9386 = vst [vmem:[#allocation73_spill] sm:$0xff] %v6642_v58 }
  0xc8   :  { %9377 = vst [vmem:[#allocation64_spill] sm:$0xff] %v6618_v53  ;;  %v353_v3 = vpop.f32.mrf.mxu0  ;;  %v382_v8 = vpop.f32.mrf.mxu1  ;;  %v6632_v53 = vor.u32 %v5766_v1, %v5340_v41  ;;  %v5762_v1 = vld [vmem:[#allocation5 + $0x1c4] sm:$0xf]  ;;  %v5324_v41 = vld [vmem:[#allocation5 + $0x1d0] sm:$0xf0]  ;;  %1192 = vmatpush.bf16.msrb.mxu2 %v6642_v58 }
  0xc9   :  { %9378 = vst [vmem:[#allocation65_spill] sm:$0xff] %v6620_v54  ;;  %v6623_v4 = vadd.f32 %v353_v3, %v6570_v31  ;;  %v6626_v13 = vadd.f32 %v382_v8, %v6572_v32  ;;  %v5338_v54 = vld [vmem:[#allocation5 + $0x1e0] sm:$0xf] }
  0xca   :  { %9383 = vst [vmem:[#allocation70_spill] sm:$0xff] %v6632_v53  ;;  %v6635_v3 = vor.u32 %v5768_v62, %v5338_v54  ;;  %1204 = vmatpush.bf16.msrb.mxu3 %v6632_v53  ;;  %v5194_v8 = vld [vmem:[#allocation5 + $0xc0] sm:$0xf]  ;;  %v6644_v62 = vor.u32 %v5762_v1, %v5324_v41  ;;  %v5726_v1 = vld [vmem:[#allocation5 + $0xa4] sm:$0xf]  ;;  %v6662_v41 = vor.u32 %v5728_v40, %v5178_v14 }
  0xcb   :  { %9379 = vst [vmem:[#allocation66_spill] sm:$0xff] %v6623_v4  ;;  %v5322_v54 = vld [vmem:[#allocation5 + $0x1c0] sm:$0xf]  ;;  %v5724_v14 = vld [vmem:[#allocation5 + $0x8c] sm:$0xf0] }
  0xcc   :  { %9380 = vst [vmem:[#allocation67_spill] sm:$0xff] %v6626_v13  ;;  %1178 = vmatpush.bf16.msrb.mxu1 %v6635_v3  ;;  %v6640_v13 = vor.u32 %v5732_v16, %v5194_v8  ;;  %v6657_v16 = vor.u32 %v5764_v56, %v5322_v54  ;;  %v5306_v56 = vld [vmem:[#allocation5 + $0x1a0] sm:$0xf]  ;;  %v5760_v54 = vld [vmem:[#allocation5 + $0x1ac] sm:$0xf0]  ;;  %v6674_v39 = vor.u32 %v5724_v14, %v5162_v33 }
  0xcd   :  { %9384 = vst [vmem:[#allocation71_spill] sm:$0xff] %v6635_v3  ;;  %v5722_v40 = vld [vmem:[#allocation5 + $0x84] sm:$0xf]  ;;  %v5756_v33 = vld [vmem:[#allocation5 + $0x18c] sm:$0xf0] }
  0xce   :  { %9385 = vst [vmem:[#allocation72_spill] sm:$0xff] %v6640_v13  ;;  %1166 = vmatpush.bf16.msrb.mxu0 %v6640_v13  ;;  %1205 = vmatpush.bf16.msrb.mxu3 %v6644_v62 }
  0xcf   :  { %v411_v15 = vpop.f32.mrf.mxu2  ;;  %v440_v4 = vpop.f32.mrf.mxu3  ;;  %9387 = vst [vmem:[#allocation74_spill] sm:$0xff] %v6644_v62 }
  0xd0   :  { %v6647_v57 = vadd.f32 %v411_v15, %v6584_v47  ;;  %v6650_v45 = vadd.f32 %v440_v4, %v6586_v49  ;;  %v6652_v44 = vpop.f32.mrf.mxu0  ;;  %v6654_v8 = vpop.f32.mrf.mxu1  ;;  %9392 = vst [vmem:[#allocation79_spill] sm:$0xff] %v6657_v16  ;;  %1179 = vmatpush.bf16.msrb.mxu1 %v6657_v16  ;;  %v5180_v4 = vld [vmem:[#allocation5 + $0xb0] sm:$0xf0]  ;;  %v5758_v15 = vld [vmem:[#allocation5 + $0x1a4] sm:$0xf] }
  0xd1   :  { %9390 = vst [vmem:[#allocation77_spill] sm:$0xff] %v6652_v44  ;;  %v5308_v44 = vld [vmem:[#allocation5 + $0x1b0] sm:$0xf0] }
  0xd2   :  { %9388 = vst [vmem:[#allocation75_spill] sm:$0xff] %v6647_v57  ;;  %v6664_v57 = vor.u32 %v5726_v1, %v5180_v4  ;;  %1167 = vmatpush.bf16.msrb.mxu0 %v6662_v41  ;;  %v5164_v1 = vld [vmem:[#allocation5 + $0x90] sm:$0xf0] }
  0xd3   :  { %9389 = vst [vmem:[#allocation76_spill] sm:$0xff] %v6650_v45  ;;  %v6669_v45 = vor.u32 %v5760_v54, %v5306_v56  ;;  %v5292_v4 = vld [vmem:[#allocation5 + $0x190] sm:$0xf0]  ;;  %v368_v56 = vadd.f32 %v6557_v22, %v6572_v32  ;;  %v6684_v26 = vor.u32 %v5722_v40, %v5164_v1  ;;  %v5146_v22 = vld [vmem:[#allocation5 + $0x60] sm:$0xf] }
  0xd4   :  { %9391 = vst [vmem:[#allocation78_spill] sm:$0xff] %v6654_v8  ;;  %v6666_v8 = vor.u32 %v5758_v15, %v5308_v44  ;;  %1193 = vmatpush.bf16.msrb.mxu2 %v6664_v57  ;;  %v5754_v44 = vld [vmem:[#allocation5 + $0x184] sm:$0xf]  ;;  %v339_v15 = vadd.f32 %v6555_v18, %v6570_v31 }
  0xd5   :  { %9393 = vst [vmem:[#allocation80_spill] sm:$0xff] %v6662_v41  ;;  %1180 = vmatpush.bf16.msrb.mxu1 %v6669_v45  ;;  %v5718_v40 = vld [vmem:[#allocation5 + $0x64] sm:$0xf] }
  0xd6   :  { %9394 = vst [vmem:[#allocation81_spill] sm:$0xff] %v6664_v57  ;;  %1206 = vmatpush.bf16.msrb.mxu3 %v6666_v8  ;;  %1168 = vmatpush.bf16.msrb.mxu0 %v6674_v39 }
  0xd7   :  { %9395 = vst [vmem:[#allocation82_spill] sm:$0xff] %v6666_v8  ;;  %v6680_v54 = vpop.f32.mrf.mxu2  ;;  %v6682_v27 = vpop.f32.mrf.mxu3  ;;  %v6686_v8 = vor.u32 %v5754_v44, %v5292_v4  ;;  %v5148_v44 = vld [vmem:[#allocation5 + $0x70] sm:$0xf0]  ;;  %v5750_v4 = vld [vmem:[#allocation5 + $0x164] sm:$0xf] }
  0xd8   :  { %9396 = vst [vmem:[#allocation83_spill] sm:$0xff] %v6669_v45  ;;  %v5290_v45 = vld [vmem:[#allocation5 + $0x180] sm:$0xf]  ;;  %v614_v14 = vpop.f32.mrf.mxu0  ;;  %v627_v57 = vpop.f32.mrf.mxu1  ;;  %1194 = vmatpush.bf16.msrb.mxu2 %v6684_v26 }
  0xd9   :  { %9397 = vst [vmem:[#allocation84_spill] sm:$0xff] %v6674_v39  ;;  %v6689_v41 = vor.u32 %v5756_v33, %v5290_v45  ;;  %v657_v18 = vadd.f32 %v614_v14, %v339_v15  ;;  %v658_v31 = vadd.f32 %v627_v57, %v368_v56  ;;  %v6696_v45 = vor.u32 %v5718_v40, %v5148_v44  ;;  %v5274_v57 = vld [vmem:[#allocation5 + $0x160] sm:$0xf]  ;;  %v5752_v56 = vld [vmem:[#allocation5 + $0x16c] sm:$0xf0] }
  0xda   :  { %9398 = vst [vmem:[#allocation85_spill] sm:$0xff] %v6680_v54  ;;  %1207 = vmatpush.bf16.msrb.mxu3 %v6686_v8  ;;  %v5720_v54 = vld [vmem:[#allocation5 + $0x6c] sm:$0xf0]  ;;  %v5130_v33 = vld [vmem:[#allocation5 + $0x40] sm:$0xf] }
  0xdb   :  { %9399 = vst [vmem:[#allocation86_spill] sm:$0xff] %v6682_v27  ;;  %1181 = vmatpush.bf16.msrb.mxu1 %v6689_v41  ;;  %v6694_v1 = vor.u32 %v5720_v54, %v5146_v22  ;;  %v5276_v27 = vld [vmem:[#allocation5 + $0x170] sm:$0xf0]  ;;  %v5090_v32 = vmul.f32 -1.442695, %v657_v18  ;;  %v6703_v54 = vor.u32 %v5752_v56, %v5274_v57 }
  0xdc   :  { %9400 = vst [vmem:[#allocation87_spill] sm:$0xff] %v6684_v26  ;;  %v5091_v39 = vmul.f32 -1.442695, %v658_v31  ;;  %v6698_v15 = vor.u32 %v5750_v4, %v5276_v27  ;;  %1195 = vmatpush.bf16.msrb.mxu2 %v6696_v45  ;;  %v5716_v14 = vld [vmem:[#allocation5 + $0x4c] sm:$0xf0]  ;;  %v426_v31 = vadd.f32 %v6561_v24, %v6586_v49 }
  0xdd   :  { %9401 = vst [vmem:[#allocation88_spill] sm:$0xff] %v6686_v8  ;;  %1169 = vmatpush.bf16.msrb.mxu0 %v6694_v1  ;;  %5843 = vpow2.f32 %v5090_v32  ;;  %v5714_v22 = vld [vmem:[#allocation5 + $0x44] sm:$0xf]  ;;  %v6707_v27 = vor.u32 %v5716_v14, %v5130_v33  ;;  %v5132_v18 = vld [vmem:[#allocation5 + $0x50] sm:$0xf0] }
  0xde   :  { %9402 = vst [vmem:[#allocation89_spill] sm:$0xff] %v6689_v41  ;;  %1208 = vmatpush.bf16.msrb.mxu3 %v6698_v15  ;;  %5845 = vpow2.f32 %v5091_v39  ;;  %v5746_v40 = vld [vmem:[#allocation5 + $0x144] sm:$0xf]  ;;  %v5260_v44 = vld [vmem:[#allocation5 + $0x150] sm:$0xf0] }
  0xdf   :  { %9403 = vst [vmem:[#allocation90_spill] sm:$0xff] %v6694_v1  ;;  %v640_v4 = vpop.f32.mrf.mxu2  ;;  %v653_v32 = vpop.f32.mrf.mxu3  ;;  %1182 = vmatpush.bf16.msrb.mxu1 %v6703_v54  ;;  %v6712_v57 = vor.u32 %v5746_v40, %v5260_v44  ;;  %v5258_v56 = vld [vmem:[#allocation5 + $0x140] sm:$0xf]  ;;  %v5712_v33 = vld [vmem:[#allocation5 + $0x2c] sm:$0xf0] }
  0xe0   :  { %9404 = vst [vmem:[#allocation91_spill] sm:$0xff] %v6696_v45  ;;  %v6710_v45 = vor.u32 %v5714_v22, %v5132_v18  ;;  %v660_v1 = vadd.f32 %v653_v32, %v426_v31  ;;  %v616_v41 = vpop.f32.mrf.mxu0  ;;  %v629_v8 = vpop.f32.mrf.mxu1  ;;  %v5114_v39 = vld [vmem:[#allocation5 + $0x20] sm:$0xf]  ;;  %v5710_v14 = vld [vmem:[#allocation5 + $0x24] sm:$0xf] }
  0xe1   :  { %9405 = vst [vmem:[#allocation92_spill] sm:$0xff] %v6698_v15  ;;  %v5748_v15 = vld [vmem:[#allocation5 + $0x14c] sm:$0xf0]  ;;  %1170 = vmatpush.bf16.msrb.mxu0 %v6707_v27  ;;  %v6719_v18 = vor.u32 %v5712_v33, %v5114_v39  ;;  %v5116_v40 = vld [vmem:[#allocation5 + $0x30] sm:$0xf0] }
  0xe2   :  { %9406 = vst [vmem:[#allocation93_spill] sm:$0xff] %v6703_v54  ;;  %v6715_v24 = vor.u32 %v5748_v15, %v5258_v56  ;;  %1196 = vmatpush.bf16.msrb.mxu2 %v6710_v45  ;;  %1209 = vmatpush.bf16.msrb.mxu3 %v6712_v57  ;;  %v5092_v22 = vmul.f32 -1.442695, %v660_v1  ;;  %v5742_v44 = vld [vmem:[#allocation5 + $0x124] sm:$0xf]  ;;  %v6722_v8 = vor.u32 %v5710_v14, %v5116_v40 }
  0xe3   :  { %9407 = vst [vmem:[#allocation94_spill] sm:$0xff] %v6707_v27  ;;  %v5844_v49 = vpop.eup %5843  ;;  %v5244_v41 = vld [vmem:[#allocation5 + $0x130] sm:$0xf0]  ;;  %v5242_v15 = vld [vmem:[#allocation5 + $0x120] sm:$0xf] }
  0xe4   :  { %9408 = vst [vmem:[#allocation95_spill] sm:$0xff] %v6710_v45  ;;  %1183 = vmatpush.bf16.msrb.mxu1 %v6715_v24  ;;  %v5744_v31 = vld [vmem:[#allocation5 + $0x12c] sm:$0xf0]  ;;  %v5846_v32 = vpop.eup %5845  ;;  %v664_v56 = vadd.f32 1.0, %v5844_v49  ;;  %5847 = vpow2.f32 %v5092_v22  ;;  %v5098_v33 = vld [vmem:[#allocation5] sm:$0xf] }
  0xe5   :  { %9409 = vst [vmem:[#allocation96_spill] sm:$0xff] %v6712_v57  ;;  %1171 = vmatpush.bf16.msrb.mxu0 %v6719_v18  ;;  %v6725_v57 = vor.u32 %v5742_v44, %v5244_v41  ;;  %v6727_v1 = vor.u32 %v5744_v31, %v5242_v15  ;;  %v683_v39 = vadd.f32 1.0, %v5846_v32  ;;  %v5708_v45 = vld [vmem:[#allocation5 + $0xc] sm:$0xf0]  ;;  %v5706_v14 = vld [vmem:[#allocation5 + $0x4] sm:$0xf] }
  0xe6   :  { %9410 = vst [vmem:[#allocation97_spill] sm:$0xff] %v6715_v24  ;;  %1197 = vmatpush.bf16.msrb.mxu2 %v6722_v8  ;;  %5849 = vrcp.f32 %v664_v56  ;;  %v5100_v49 = vld [vmem:[#allocation5 + $0x10] sm:$0xf0]  ;;  %v6732_v22 = vor.u32 %v5708_v45, %v5098_v33  ;;  %v5738_v41 = vld [vmem:[#allocation5 + $0x104] sm:$0xf]  ;;  %vm670_vm5 = vweird.f32 %v664_v56 }
  0xe7   :  { %9411 = vst [vmem:[#allocation98_spill] sm:$0xff] %v6719_v18  ;;  %1210 = vmatpush.bf16.msrb.mxu3 %v6725_v57  ;;  %5851 = vrcp.f32 %v683_v39  ;;  %v655_v40 = vpop.f32.mrf.mxu3  ;;  %v642_v24 = vpop.f32.mrf.mxu2  ;;  %v6734_v44 = vor.u32 %v5706_v14, %v5100_v49  ;;  %v5228_v15 = vld [vmem:[#allocation5 + $0x110] sm:$0xf0]  ;;  %v5226_v33 = vld [vmem:[#allocation5 + $0x100] sm:$0xf]  ;;  %vm689_vm6 = vweird.f32 %v683_v39 }
  0xe8   :  { %9412 = vst [vmem:[#allocation99_spill] sm:$0xff] %v6722_v8  ;;  %1184 = vmatpush.bf16.msrb.mxu1 %v6727_v1  ;;  %v6736_v31 = vor.u32 %v5738_v41, %v5228_v15  ;;  %v397_v8 = vadd.f32 %v6559_v23, %v6584_v47  ;;  %v5740_v14 = vld [vmem:[#allocation5 + $0x10c] sm:$0xf0]  ;;  %v676_v23 = vand.u32 2147483648, %v664_v56  ;;  %v695_v47 = vand.u32 2147483648, %v683_v39 }
  0xe9   :  { %9413 = vst [vmem:[#allocation100_spill] sm:$0xff] %v6725_v57  ;;  %1172 = vmatpush.bf16.msrb.mxu0 %v6732_v22  ;;  %v6743_v57 = vor.u32 %v5740_v14, %v5226_v33 }
  0xea   :  { %9414 = vst [vmem:[#allocation101_spill] sm:$0xff] %v6727_v1  ;;  %v5848_v32 = vpop.eup %5847  ;;  %1198 = vmatpush.bf16.msrb.mxu2 %v6734_v44  ;;  %v659_v45 = vadd.f32 %v640_v4, %v397_v8  ;;  %v693_v4 = vand.u32 2147483647, %v683_v39 }
  0xeb   :  { %9415 = vst [vmem:[#allocation102_spill] sm:$0xff] %v6732_v22  ;;  %v703_v24 = vadd.f32 1.0, %v5848_v32  ;;  %1211 = vmatpush.bf16.msrb.mxu3 %v6736_v31  ;;  %v674_v32 = vand.u32 2147483647, %v664_v56 }
  0xec   :  { %9416 = vst [vmem:[#allocation103_spill] sm:$0xff] %v6734_v44  ;;  %v5850_v40 = vpop.eup %5849  ;;  %1185 = vmatpush.bf16.msrb.mxu1 %v6743_v57  ;;  %vm694_vm10 = vcmp.eq.f32.partialorder %v693_v4, 8.507059e+37  ;;  %v5769_v4 = vld [vmem:[#allocation5 + $0x1f4] sm:$0xf0] }
  0xed   :  { %9417 = vst [vmem:[#allocation104_spill] sm:$0xff] %v6736_v31  ;;  %v5852_v49 = vpop.eup %5851  ;;  %v666_v1 = vmul.f32 %v5850_v40, %v664_v56  ;;  %5853 = vrcp.f32 %v703_v24  ;;  %vm671_vm3 = vweird.f32 %v5850_v40  ;;  %vm675_vm8 = vcmp.eq.f32.partialorder %v674_v32, 8.507059e+37  ;;  %v5220_v32 = vld [vmem:[#allocation5 + $0xf8] sm:$0xf0] }
  0xee   :  { %v685_v41 = vmul.f32 %v5852_v49, %v683_v39  ;;  %9418 = vst [vmem:[#allocation105_spill] sm:$0xff] %v6743_v57  ;;  %5855 = vtanh.f32 %v659_v45  ;;  %vm690_vm4 = vweird.f32 %v5852_v49  ;;  %vm672_vm7 = vmor %vm670_vm5, %vm671_vm3  ;;  %v715_v39 = vand.u32 2147483648, %v703_v24 }
  0xef   :  { %v667_v15 = vsub.f32 1.0, %v666_v1  ;;  %v677_v1 = vor.u32 1.1754944e-38, %v676_v23  ;;  %vm691_vm9 = vmor %vm689_vm6, %vm690_vm4  ;;  %vm709_vm12 = vweird.f32 %v703_v24  ;;  %v5735_v23 = vld [vmem:[#allocation5 + $0xec] sm:$0xf] }
  0xf0   :  { %v686_v18 = vsub.f32 1.0, %v685_v41  ;;  %v696_v41 = vor.u32 1.1754944e-38, %v695_v47  ;;  %v713_v47 = vand.u32 2147483647, %v703_v24 }
  0xf1   :  { %v668_v22 = vmul.f32 %v5850_v40, %v667_v15 }
  0xf2   :  { %v687_v31 = vmul.f32 %v5852_v49, %v686_v18  ;;  %vm714_vm14 = vcmp.eq.f32.partialorder %v713_v47, 8.507059e+37  ;;  %v5330_v47 = vld [vmem:[#allocation5 + $0x1c8] sm:$0xf] }
  0xf3   :  { %v5854_v8 = vpop.eup %5853  ;;  %v669_v44 = vadd.f32 %v5850_v40, %v668_v22 }
  0xf4   :  { %v688_v33 = vadd.f32 %v5852_v49, %v687_v31  ;;  %v705_v14 = vmul.f32 %v5854_v8, %v703_v24  ;;  %v5856_v45 = vpop.eup %5855  ;;  %vm710_vm11 = vweird.f32 %v5854_v8  ;;  %v716_v31 = vor.u32 1.1754944e-38, %v715_v39  ;;  %v5332_v39 = vld [vmem:[#allocation5 + $0x1d8] sm:$0xf0] }
  0xf5   :  { %v673_v27 = vsel %vm672_vm7, %v5850_v40, %v669_v44  ;;  %vm711_vm13 = vmor %vm709_vm12, %vm710_vm11  ;;  %v5737_v40 = vld [vmem:[#allocation5 + $0xf4] sm:$0xf0]  ;;  %v6753_v24 = vor.u32 %v5735_v23, %v5220_v32  ;;  %v5727_v32 = vld [vmem:[#allocation5 + $0xac] sm:$0xf] }
  0xf6   :  { %v678_v15 = vsel %vm675_vm8, %v677_v1, %v673_v27  ;;  %v692_v54 = vsel %vm691_vm9, %v5852_v49, %v688_v33  ;;  %v706_v57 = vsub.f32 1.0, %v705_v14  ;;  %v5218_v27 = vld [vmem:[#allocation5 + $0xe8] sm:$0xf]  ;;  %v5733_v14 = vld [vmem:[#allocation5 + $0xd4] sm:$0xf0] }
  0xf7   :  { %v697_v18 = vsel %vm694_vm10, %v696_v41, %v692_v54  ;;  %v720_v26 = vmul.f32 %v5856_v45, %v678_v15  ;;  %v6751_v33 = vor.u32 %v5737_v40, %v5218_v27  ;;  %v5731_v15 = vld [vmem:[#allocation5 + $0xcc] sm:$0xf]  ;;  %v5186_v40 = vld [vmem:[#allocation5 + $0xa8] sm:$0xf] }
  0xf8   :  { %v719_v16 = vmul.f32 0.0, %v697_v18  ;;  %v707_v62 = vmul.f32 %v5854_v8, %v706_v57  ;;  %v5767_v57 = vld [vmem:[#allocation5 + $0x1ec] sm:$0xf]  ;;  %v5204_v18 = vld [vmem:[#allocation5 + $0xd8] sm:$0xf0] }
  0xf9   :  { %v6767_v27 = vor.u32 %v5731_v15, %v5204_v18  ;;  %v5170_v15 = vld [vmem:[#allocation5 + $0x88] sm:$0xf]  ;;  %v5725_v18 = vld [vmem:[#allocation5 + $0x94] sm:$0xf0] }
  0xfa   :  { %v6746_v22 = vadd.f32 %v720_v26, %v719_v16  ;;  %v708_v56 = vadd.f32 %v5854_v8, %v707_v62  ;;  %v5348_v16 = vld [vmem:[#allocation5 + $0x1f8] sm:$0xf0]  ;;  %v5346_v62 = vld [vmem:[#allocation5 + $0x1e8] sm:$0xf] }
  0xfb   :  { %v6755_v41 = vor.u32 %v5767_v57, %v5348_v16  ;;  %v6757_v45 = vor.u32 %v5769_v4, %v5346_v62  ;;  %9422 = vst [vmem:[#allocation109_spill] sm:$0xff] %v6767_v27  ;;  %v5188_v57 = vld [vmem:[#allocation5 + $0xb8] sm:$0xf0]  ;;  %v5314_v62 = vld [vmem:[#allocation5 + $0x1a8] sm:$0xf] }
  0xfc   :  { %5857 = vtanh.f32 %v6746_v22  ;;  %v712_v44 = vsel %vm711_vm13, %v5854_v8, %v708_v56  ;;  %v5202_v8 = vld [vmem:[#allocation5 + $0xc8] sm:$0xf]  ;;  %v5763_v56 = vld [vmem:[#allocation5 + $0x1cc] sm:$0xf]  ;;  %v5316_v16 = vld [vmem:[#allocation5 + $0x1b8] sm:$0xf0] }
  0xfd   :  { %v717_v54 = vsel %vm714_vm14, %v716_v31, %v712_v44  ;;  %9419 = vst [vmem:[#allocation106_spill] sm:$0xff] %v6755_v41  ;;  %v5765_v44 = vld [vmem:[#allocation5 + $0x1d4] sm:$0xf0]  ;;  %v6765_v31 = vor.u32 %v5733_v14, %v5202_v8  ;;  %v6779_v14 = vor.u32 %v5727_v32, %v5188_v57  ;;  %v5154_v32 = vld [vmem:[#allocation5 + $0x68] sm:$0xf] }
  0xfe   :  { %9420 = vst [vmem:[#allocation107_spill] sm:$0xff] %v6757_v45  ;;  %v6773_v23 = vor.u32 %v5765_v44, %v5330_v47  ;;  %v5761_v4 = vld [vmem:[#allocation5 + $0x1b4] sm:$0xf0]  ;;  %v5723_v47 = vld [vmem:[#allocation5 + $0x8c] sm:$0xf] }
  0xff   :  { %9421 = vst [vmem:[#allocation108_spill] sm:$0xff] %v6765_v31  ;;  %v5172_v44 = vld [vmem:[#allocation5 + $0x98] sm:$0xf0]  ;;  %v5721_v57 = vld [vmem:[#allocation5 + $0x74] sm:$0xf0] }
 0x100   :  { %9424 = vst [vmem:[#allocation111_spill] sm:$0xff] %v6773_v23 }
 0x101   :  { %9426 = vst [vmem:[#allocation113_spill] sm:$0xff] %v6779_v14 }
 0x102   :  { %v5858_v49 = vpop.eup %5857 }
 0x103   :  { %v723_v26 = vmul.f32 %v5858_v49, %v717_v54  ;;  %v5729_v49 = vld [vmem:[#allocation5 + $0xb4] sm:$0xf0]  ;;  %v6771_v54 = vor.u32 %v5763_v56, %v5332_v39  ;;  %v6785_v39 = vor.u32 %v5761_v4, %v5314_v62  ;;  %v5719_v62 = vld [vmem:[#allocation5 + $0x6c] sm:$0xf]  ;;  %v5156_v4 = vld [vmem:[#allocation5 + $0x78] sm:$0xf0] }
 0x104   :  { %v6777_v8 = vor.u32 %v5729_v49, %v5186_v40  ;;  %v6789_v40 = vor.u32 %v5725_v18, %v5170_v15  ;;  %v6791_v49 = vor.u32 %v5723_v47, %v5172_v44  ;;  %v6801_v15 = vor.u32 %v5721_v57, %v5154_v32  ;;  %v5138_v47 = vld [vmem:[#allocation5 + $0x48] sm:$0xf]  ;;  %v5717_v44 = vld [vmem:[#allocation5 + $0x54] sm:$0xf0]  ;;  %v5268_v32 = vld [vmem:[#allocation5 + $0x158] sm:$0xf0] }
 0x105   :  { %v6749_v1 = vpack.c.bf16 %v723_v26, %v723_v26  ;;  %9423 = vst [vmem:[#allocation110_spill] sm:$0xff] %v6771_v54  ;;  %v5759_v26 = vld [vmem:[#allocation5 + $0x1ac] sm:$0xf]  ;;  %v6803_v18 = vor.u32 %v5719_v62, %v5156_v4  ;;  %v5266_v57 = vld [vmem:[#allocation5 + $0x148] sm:$0xf] }
 0x106   :  { %9425 = vst [vmem:[#allocation112_spill] sm:$0xff] %v6777_v8  ;;  %v6783_v56 = vor.u32 %v5759_v26, %v5316_v16  ;;  %v5749_v62 = vld [vmem:[#allocation5 + $0x154] sm:$0xf0] }
 0x107   :  { %733 = vmatmul.bf16.vlgmr.msra.gmra.mxu0 %v6749_v1  ;;  %746 = vmatmul.bf16.vlgmr.msra.gmra.mxu1 %v6749_v1  ;;  %9428 = vst [vmem:[#allocation115_spill] sm:$0xff] %v6785_v39 }
 0x108   :  { %759 = vmatmul.bf16.vlgmr.msra.gmra.mxu2 %v6749_v1  ;;  %772 = vmatmul.bf16.vlgmr.msra.gmra.mxu3 %v6749_v1  ;;  %9427 = vst [vmem:[#allocation114_spill] sm:$0xff] %v6783_v56 }
 0x109   :  { %1217 = vmatpush.bf16.msra.mxu0 %v6751_v33  ;;  %1243 = vmatpush.bf16.msra.mxu2 %v6753_v24  ;;  %9429 = vst [vmem:[#allocation116_spill] sm:$0xff] %v6789_v40 }
 0x10a   :  { %1256 = vmatpush.bf16.msra.mxu3 %v6755_v41  ;;  %1230 = vmatpush.bf16.msra.mxu1 %v6757_v45  ;;  %v5755_v45 = vld [vmem:[#allocation5 + $0x18c] sm:$0xf]  ;;  %v5298_v41 = vld [vmem:[#allocation5 + $0x188] sm:$0xf]  ;;  %9430 = vst [vmem:[#allocation117_spill] sm:$0xff] %v6791_v49 }
 0x10b   :  { %9433 = vst [vmem:[#allocation120_spill] sm:$0xff] %v6801_v15 }
 0x10c   :  { %9434 = vst [vmem:[#allocation121_spill] sm:$0xff] %v6803_v18 }
 0x10d   :  { %1218 = vmatpush.bf16.msra.mxu0 %v6765_v31  ;;  %1244 = vmatpush.bf16.msra.mxu2 %v6767_v27  ;;  %v5300_v31 = vld [vmem:[#allocation5 + $0x198] sm:$0xf0]  ;;  %v5757_v27 = vld [vmem:[#allocation5 + $0x194] sm:$0xf0] }
 0x10e   :  { %1257 = vmatpush.bf16.msra.mxu3 %v6771_v54  ;;  %1231 = vmatpush.bf16.msra.mxu1 %v6773_v23  ;;  %v6795_v26 = vor.u32 %v5755_v45, %v5300_v31  ;;  %v6797_v16 = vor.u32 %v5757_v27, %v5298_v41  ;;  %v5751_v23 = vld [vmem:[#allocation5 + $0x16c] sm:$0xf]  ;;  %v5282_v54 = vld [vmem:[#allocation5 + $0x168] sm:$0xf]  ;;  %v5140_v27 = vld [vmem:[#allocation5 + $0x58] sm:$0xf0] }
 0x10f   :  { %v5715_v31 = vld [vmem:[#allocation5 + $0x4c] sm:$0xf] }
 0x110   :  { %9431 = vst [vmem:[#allocation118_spill] sm:$0xff] %v6795_v26 }
 0x111   :  { %1219 = vmatpush.bf16.msra.mxu0 %v6777_v8  ;;  %1245 = vmatpush.bf16.msra.mxu2 %v6779_v14  ;;  %9432 = vst [vmem:[#allocation119_spill] sm:$0xff] %v6797_v16  ;;  %v5284_v8 = vld [vmem:[#allocation5 + $0x178] sm:$0xf0]  ;;  %v5753_v14 = vld [vmem:[#allocation5 + $0x174] sm:$0xf0] }
 0x112   :  { %1258 = vmatpush.bf16.msra.mxu3 %v6783_v56  ;;  %1232 = vmatpush.bf16.msra.mxu1 %v6785_v39  ;;  %v6807_v41 = vor.u32 %v5751_v23, %v5284_v8  ;;  %v6809_v45 = vor.u32 %v5753_v14, %v5282_v54  ;;  %v5747_v39 = vld [vmem:[#allocation5 + $0x14c] sm:$0xf]  ;;  %v6817_v54 = vor.u32 %v5717_v44, %v5138_v47  ;;  %v5122_v8 = vld [vmem:[#allocation5 + $0x28] sm:$0xf]  ;;  %v5713_v14 = vld [vmem:[#allocation5 + $0x34] sm:$0xf0] }
 0x113   :  { %v6819_v23 = vor.u32 %v5715_v31, %v5140_v27  ;;  %v6823_v4 = vor.u32 %v5747_v39, %v5268_v32  ;;  %v5250_v56 = vld [vmem:[#allocation5 + $0x128] sm:$0xf]  ;;  %v6829_v47 = vor.u32 %v5713_v14, %v5122_v8  ;;  %v5709_v27 = vld [vmem:[#allocation5 + $0x14] sm:$0xf0]  ;;  %v9456_v8 = vld [vmem:[#allocation84_spill] sm:$0xff] }
 0x114   :  { %9435 = vst [vmem:[#allocation122_spill] sm:$0xff] %v6807_v41  ;;  %v5106_v31 = vld [vmem:[#allocation5 + $0x8] sm:$0xf] }
 0x115   :  { %1220 = vmatpush.bf16.msra.mxu0 %v6789_v40  ;;  %1246 = vmatpush.bf16.msra.mxu2 %v6791_v49  ;;  %9436 = vst [vmem:[#allocation123_spill] sm:$0xff] %v6809_v45  ;;  %v9020_v49 = vmov 0.0|0.0   ;;  %v5743_v40 = vld [vmem:[#allocation5 + $0x12c] sm:$0xf] }
 0x116   :  { %1259 = vmatpush.bf16.msra.mxu3 %v6795_v26  ;;  %1233 = vmatpush.bf16.msra.mxu1 %v6797_v16  ;;  %9437 = vst [vmem:[#allocation124_spill] sm:$0xff] %v6817_v54  ;;  %v6825_v16 = vor.u32 %v5749_v62, %v5266_v57  ;;  %v5711_v26 = vld [vmem:[#allocation5 + $0x2c] sm:$0xf]  ;;  %v5108_v62 = vld [vmem:[#allocation5 + $0x18] sm:$0xf0] }
 0x117   :  { %1173 = vmatmul.bf16.vlgmr.msrb.gmra.mxu0 %v6749_v1  ;;  %1186 = vmatmul.bf16.vlgmr.msrb.gmra.mxu1 %v9020_v49  ;;  %9438 = vst [vmem:[#allocation125_spill] sm:$0xff] %v6819_v23  ;;  %v5707_v57 = vld [vmem:[#allocation5 + $0xc] sm:$0xf] }
 0x118   :  { %1199 = vmatmul.bf16.vlgmr.msrb.gmra.mxu2 %v6749_v1  ;;  %1212 = vmatmul.bf16.vlgmr.msrb.gmra.mxu3 %v9020_v49  ;;  %9439 = vst [vmem:[#allocation126_spill] sm:$0xff] %v6823_v4  ;;  %v5124_v49 = vld [vmem:[#allocation5 + $0x38] sm:$0xf0]  ;;  %v9457_v14 = vld [vmem:[#allocation87_spill] sm:$0xff] }
 0x119   :  { %1221 = vmatpush.bf16.msra.mxu0 %v6801_v15  ;;  %1247 = vmatpush.bf16.msra.mxu2 %v6803_v18  ;;  %9440 = vst [vmem:[#allocation127_spill] sm:$0xff] %v6825_v16  ;;  %v5252_v15 = vld [vmem:[#allocation5 + $0x138] sm:$0xf0]  ;;  %v5745_v18 = vld [vmem:[#allocation5 + $0x134] sm:$0xf0]  ;;  %v6831_v44 = vor.u32 %v5711_v26, %v5124_v49  ;;  %v6841_v49 = vor.u32 %v5709_v27, %v5106_v31  ;;  %v9458_v31 = vld [vmem:[#allocation88_spill] sm:$0xff] }
 0x11a   :  { %1260 = vmatpush.bf16.msra.mxu3 %v6807_v41  ;;  %1234 = vmatpush.bf16.msra.mxu1 %v6809_v45  ;;  %9441 = vst [vmem:[#allocation128_spill] sm:$0xff] %v6829_v47  ;;  %v6835_v39 = vor.u32 %v5743_v40, %v5252_v15  ;;  %v6837_v32 = vor.u32 %v5745_v18, %v5250_v56  ;;  %v5739_v45 = vld [vmem:[#allocation5 + $0x10c] sm:$0xf]  ;;  %v5234_v41 = vld [vmem:[#allocation5 + $0x108] sm:$0xf]  ;;  %v9449_v15 = vmov 0.0|0.0  }
 0x11b   :  { %9442 = vst [vmem:[#allocation129_spill] sm:$0xff] %v6831_v44  ;;  %v6843_v26 = vor.u32 %v5707_v57, %v5108_v62  ;;  %v9451_v18 = vld [vmem:[#allocation79_spill] sm:$0xff]  ;;  %v9459_v27 = vld [vmem:[#allocation89_spill] sm:$0xff]  ;;  %v9460_v57 = vld [vmem:[#allocation90_spill] sm:$0xff] }
 0x11c   :  { %9443 = vst [vmem:[#allocation130_spill] sm:$0xff] %v6835_v39  ;;  %v9461_v62 = vld [vmem:[#allocation91_spill] sm:$0xff] }
 0x11d   :  { %1222 = vmatpush.bf16.msra.mxu0 %v6817_v54  ;;  %1248 = vmatpush.bf16.msra.mxu2 %v6819_v23  ;;  %9444 = vst [vmem:[#allocation131_spill] sm:$0xff] %v6837_v32  ;;  %v5236_v54 = vld [vmem:[#allocation5 + $0x118] sm:$0xf0]  ;;  %v5741_v23 = vld [vmem:[#allocation5 + $0x114] sm:$0xf0] }
 0x11e   :  { %1261 = vmatpush.bf16.msra.mxu3 %v6823_v4  ;;  %1235 = vmatpush.bf16.msra.mxu1 %v6825_v16  ;;  %9445 = vst [vmem:[#allocation132_spill] sm:$0xff] %v6841_v49  ;;  %v6847_v56 = vor.u32 %v5739_v45, %v5236_v54  ;;  %v6849_v40 = vor.u32 %v5741_v23, %v5234_v41  ;;  %v9452_v41 = vld [vmem:[#allocation80_spill] sm:$0xff]  ;;  %v9453_v45 = vld [vmem:[#allocation81_spill] sm:$0xff]  ;;  %v9454_v54 = vld [vmem:[#allocation82_spill] sm:$0xff] }
 0x11f   :  { %9446 = vst [vmem:[#allocation133_spill] sm:$0xff] %v6843_v26  ;;  %v9455_v23 = vld [vmem:[#allocation83_spill] sm:$0xff] }
 0x120   :  { %9447 = vst [vmem:[#allocation134_spill] sm:$0xff] %v6847_v56 }
 0x121   :  { %1223 = vmatpush.bf16.msra.mxu0 %v6829_v47  ;;  %1249 = vmatpush.bf16.msra.mxu2 %v6831_v44  ;;  %9448 = vst [vmem:[#allocation135_spill] sm:$0xff] %v6849_v40 }
 0x122   :  { %1262 = vmatpush.bf16.msra.mxu3 %v6835_v39  ;;  %1236 = vmatpush.bf16.msra.mxu1 %v6837_v32 }
 0x125   :  { %1224 = vmatpush.bf16.msra.mxu0 %v6841_v49  ;;  %1250 = vmatpush.bf16.msra.mxu2 %v6843_v26 }
 0x126   :  { %1263 = vmatpush.bf16.msra.mxu3 %v6847_v56  ;;  %1237 = vmatpush.bf16.msra.mxu1 %v6849_v40 }
 0x128   :  { %1225 = vmatmul.bf16.vlgmr.msra.gmra.mxu0 %v6749_v1  ;;  %1251 = vmatmul.bf16.vlgmr.msra.gmra.mxu2 %v6749_v1  ;;  %v9450_v1 = vld [vmem:[#allocation74_spill] sm:$0xff] }
 0x129   :  { %1333 = vmatpush.bf16.msrb.mxu0 %v6393_v20  ;;  %1359 = vmatpush.bf16.msrb.mxu2 %v6399_v36 }
 0x12a   :  { %1264 = vmatmul.bf16.vlgmr.msra.gmra.mxu3 %v9449_v15  ;;  %1238 = vmatmul.bf16.vlgmr.msra.gmra.mxu1 %v9449_v15 }
 0x12b   :  { %1372 = vmatpush.bf16.msrb.mxu3 %v6397_v35  ;;  %1346 = vmatpush.bf16.msrb.mxu1 %v6395_v21 }
 0x12d   :  { %1334 = vmatpush.bf16.msrb.mxu0 %v6403_v37  ;;  %1360 = vmatpush.bf16.msrb.mxu2 %v6421_v52 }
 0x12f   :  { %1373 = vmatpush.bf16.msrb.mxu3 %v6412_v46  ;;  %1347 = vmatpush.bf16.msrb.mxu1 %v6405_v38 }
 0x131   :  { %1335 = vmatpush.bf16.msrb.mxu0 %v6417_v50  ;;  %1361 = vmatpush.bf16.msrb.mxu2 %v6427_v60 }
 0x133   :  { %1374 = vmatpush.bf16.msrb.mxu3 %v6424_v59  ;;  %1348 = vmatpush.bf16.msrb.mxu1 %v6419_v51 }
 0x135   :  { %1336 = vmatpush.bf16.msrb.mxu0 %v6431_v63  ;;  %1362 = vmatpush.bf16.msrb.mxu2 %v6445_v10 }
 0x137   :  { %1375 = vmatpush.bf16.msrb.mxu3 %v6443_v9  ;;  %1349 = vmatpush.bf16.msrb.mxu1 %v6433_v0 }
 0x139   :  { %1337 = vmatpush.bf16.msrb.mxu0 %v6449_v11  ;;  %1363 = vmatpush.bf16.msrb.mxu2 %v6459_v17 }
 0x13b   :  { %1376 = vmatpush.bf16.msrb.mxu3 %v6463_v19  ;;  %1350 = vmatpush.bf16.msrb.mxu1 %v6451_v12 }
 0x13d   :  { %1338 = vmatpush.bf16.msrb.mxu0 %v6466_v25  ;;  %1364 = vmatpush.bf16.msrb.mxu2 %v6471_v30 }
 0x13f   :  { %1377 = vmatpush.bf16.msrb.mxu3 %v6474_v34  ;;  %1351 = vmatpush.bf16.msrb.mxu1 %v6469_v29 }
 0x141   :  { %1339 = vmatpush.bf16.msrb.mxu0 %v6477_v42  ;;  %1365 = vmatpush.bf16.msrb.mxu2 %v6482_v48 }
 0x143   :  { %1378 = vmatpush.bf16.msrb.mxu3 %v6485_v55  ;;  %1352 = vmatpush.bf16.msrb.mxu1 %v6479_v43 }
 0x145   :  { %1340 = vmatpush.bf16.msrb.mxu0 %v6488_v61  ;;  %1366 = vmatpush.bf16.msrb.mxu2 %v6500_v6 }
 0x147   :  { %1379 = vmatpush.bf16.msrb.mxu3 %v6503_v7  ;;  %1353 = vmatpush.bf16.msrb.mxu1 %v6497_v5  ;;  %v9481_v7 = vld [vmem:[#allocation47_spill] sm:$0xff] }
 0x149   :  { %1453 = vmatpush.bf16.msra.mxu0 %v6628_v28  ;;  %1479 = vmatpush.bf16.msra.mxu2 %v6630_v2 }
 0x14b   :  { %1492 = vmatpush.bf16.msra.mxu3 %v6632_v53  ;;  %1466 = vmatpush.bf16.msra.mxu1 %v6635_v3 }
 0x14d   :  { %1454 = vmatpush.bf16.msra.mxu0 %v6640_v13  ;;  %1480 = vmatpush.bf16.msra.mxu2 %v6642_v58  ;;  %v9479_v58 = vld [vmem:[#allocation43_spill] sm:$0xff] }
 0x14f   :  { %1493 = vmatpush.bf16.msra.mxu3 %v9450_v1  ;;  %1467 = vmatpush.bf16.msra.mxu1 %v9451_v18  ;;  %v9462_v1 = vld [vmem:[#allocation92_spill] sm:$0xff] }
 0x151   :  { %1455 = vmatpush.bf16.msra.mxu0 %v9452_v41  ;;  %1481 = vmatpush.bf16.msra.mxu2 %v9453_v45  ;;  %v9463_v41 = vld [vmem:[#allocation93_spill] sm:$0xff]  ;;  %v9464_v45 = vld [vmem:[#allocation94_spill] sm:$0xff] }
 0x153   :  { %1494 = vmatpush.bf16.msra.mxu3 %v9454_v54  ;;  %1468 = vmatpush.bf16.msra.mxu1 %v9455_v23  ;;  %v9465_v54 = vld [vmem:[#allocation95_spill] sm:$0xff]  ;;  %v9466_v23 = vld [vmem:[#allocation96_spill] sm:$0xff] }
 0x155   :  { %1456 = vmatpush.bf16.msra.mxu0 %v9456_v8  ;;  %1482 = vmatpush.bf16.msra.mxu2 %v9457_v14  ;;  %v9467_v8 = vld [vmem:[#allocation97_spill] sm:$0xff]  ;;  %v9468_v14 = vld [vmem:[#allocation98_spill] sm:$0xff] }
 0x157   :  { %1495 = vmatpush.bf16.msra.mxu3 %v9458_v31  ;;  %1469 = vmatpush.bf16.msra.mxu1 %v9459_v27  ;;  %v9469_v31 = vld [vmem:[#allocation99_spill] sm:$0xff]  ;;  %v9470_v27 = vld [vmem:[#allocation100_spill] sm:$0xff] }
 0x159   :  { %1457 = vmatpush.bf16.msra.mxu0 %v9460_v57  ;;  %1483 = vmatpush.bf16.msra.mxu2 %v9461_v62  ;;  %v9471_v57 = vld [vmem:[#allocation101_spill] sm:$0xff]  ;;  %v9472_v62 = vld [vmem:[#allocation102_spill] sm:$0xff] }
 0x15b   :  { %1496 = vmatpush.bf16.msra.mxu3 %v9462_v1  ;;  %1470 = vmatpush.bf16.msra.mxu1 %v9463_v41  ;;  %v9473_v1 = vld [vmem:[#allocation103_spill] sm:$0xff]  ;;  %v9474_v41 = vld [vmem:[#allocation104_spill] sm:$0xff] }
 0x15d   :  { %1458 = vmatpush.bf16.msra.mxu0 %v9464_v45  ;;  %1484 = vmatpush.bf16.msra.mxu2 %v9465_v54  ;;  %v9475_v45 = vld [vmem:[#allocation105_spill] sm:$0xff]  ;;  %v9476_v54 = vld [vmem:[#allocation44_spill] sm:$0xff] }
 0x15f   :  { %1497 = vmatpush.bf16.msra.mxu3 %v9466_v23  ;;  %1471 = vmatpush.bf16.msra.mxu1 %v9467_v8  ;;  %v9477_v23 = vld [vmem:[#allocation42_spill] sm:$0xff]  ;;  %v9478_v8 = vld [vmem:[#allocation45_spill] sm:$0xff] }
 0x160   :  { %v341_v18 = vadd.f32 %v9477_v23, %v9476_v54 }
 0x161   :  { %1459 = vmatpush.bf16.msra.mxu0 %v9468_v14  ;;  %1485 = vmatpush.bf16.msra.mxu2 %v9469_v31  ;;  %v370_v14 = vadd.f32 %v9479_v58, %v9478_v8  ;;  %v6932_v58 = vld [vmem:[%s8930_s5] sm:$0xf] }
 0x163   :  { %1498 = vmatpush.bf16.msra.mxu3 %v9470_v27  ;;  %1472 = vmatpush.bf16.msra.mxu1 %v9471_v57 }
 0x165   :  { %1460 = vmatpush.bf16.msra.mxu0 %v9472_v62  ;;  %1486 = vmatpush.bf16.msra.mxu2 %v9473_v1  ;;  %v9480_v62 = vld [vmem:[#allocation51_spill] sm:$0xff] }
 0x166   :  { %v428_v1 = vadd.f32 %v9481_v7, %v9480_v62 }
 0x167   :  { %1499 = vmatpush.bf16.msra.mxu3 %v9474_v41  ;;  %1473 = vmatpush.bf16.msra.mxu1 %v9475_v45 }
 0x184   :  { %v734_v13 = vpop.f32.mrf.mxu0  ;;  %v747_v31 = vpop.f32.mrf.mxu1 }
 0x185   :  { %v777_v53 = vadd.f32 %v734_v13, %v341_v18  ;;  %v778_v27 = vadd.f32 %v747_v31, %v370_v14  ;;  %v6935_v14 = vperm.slane %v6932_v58, 0 }
 0x187   :  { %v5093_v3 = vmul.f32 -1.442695, %v777_v53  ;;  %v5094_v57 = vmul.f32 -1.442695, %v778_v27  ;;  %9482 = vst [vmem:[#allocation42_spill] sm:$0xff] %v6935_v14 }
 0x189   :  { %5859 = vpow2.f32 %v5093_v3 }
 0x18a   :  { %5861 = vpow2.f32 %v5094_v57 }
 0x18b   :  { %v760_v41 = vpop.f32.mrf.mxu2  ;;  %v773_v5 = vpop.f32.mrf.mxu3 }
 0x18c   :  { %v780_v45 = vadd.f32 %v773_v5, %v428_v1  ;;  %v736_v2 = vpop.f32.mrf.mxu0  ;;  %v749_v28 = vpop.f32.mrf.mxu1  ;;  %v9483_v1 = vld [vmem:[#allocation50_spill] sm:$0xff] }
 0x18e   :  { %v5095_v23 = vmul.f32 -1.442695, %v780_v45  ;;  %v9484_v45 = vld [vmem:[#allocation46_spill] sm:$0xff] }
 0x18f   :  { %v5860_v13 = vpop.eup %5859  ;;  %v399_v31 = vadd.f32 %v9484_v45, %v9483_v1 }
 0x190   :  { %v5862_v18 = vpop.eup %5861  ;;  %v784_v53 = vadd.f32 1.0, %v5860_v13  ;;  %5863 = vpow2.f32 %v5095_v23 }
 0x191   :  { %v803_v3 = vadd.f32 1.0, %v5862_v18  ;;  %v779_v62 = vadd.f32 %v760_v41, %v399_v31  ;;  %v6943_v18 = vperm.slane %v6932_v58, 1 }
 0x192   :  { %5865 = vrcp.f32 %v784_v53  ;;  %v794_v61 = vand.u32 2147483647, %v784_v53  ;;  %v796_v31 = vand.u32 2147483648, %v784_v53  ;;  %vm790_vm2 = vweird.f32 %v784_v53 }
 0x193   :  { %5867 = vrcp.f32 %v803_v3  ;;  %v762_v7 = vpop.f32.mrf.mxu2  ;;  %v775_v5 = vpop.f32.mrf.mxu3  ;;  %9485 = vst [vmem:[#allocation43_spill] sm:$0xff] %v6943_v18  ;;  %v815_v41 = vand.u32 2147483648, %v803_v3  ;;  %v813_v43 = vand.u32 2147483647, %v803_v3  ;;  %vm809_vm1 = vweird.f32 %v803_v3 }
 0x194   :  { %v1174_v2 = vpop.f32.mrf.mxu0  ;;  %v1187_v28 = vpop.f32.mrf.mxu1  ;;  %vm795_vm5 = vcmp.eq.f32.partialorder %v794_v61, 8.507059e+37 }
 0x195   :  { %v1175_v27 = vadd.f32 %v1174_v2, %v6935_v14  ;;  %vm814_vm6 = vcmp.eq.f32.partialorder %v813_v43, 8.507059e+37 }
 0x196   :  { %v5864_v57 = vpop.eup %5863 }
 0x197   :  { %v6940_v8 = vadd.f32 1.0, %v5864_v57  ;;  %v1188_v23 = vadd.f32 %v1187_v28, %v1175_v27 }
 0x198   :  { %v5866_v13 = vpop.eup %5865 }
 0x199   :  { %v5868_v54 = vpop.eup %5867  ;;  %v786_v6 = vmul.f32 %v5866_v13, %v784_v53  ;;  %5869 = vrcp.f32 %v6940_v8  ;;  %v5352_v45 = vmul.f32 -1.442695, %v1188_v23  ;;  %vm791_vm15 = vweird.f32 %v5866_v13 }
 0x19a   :  { %v805_v7 = vmul.f32 %v5868_v54, %v803_v3  ;;  %5871 = vtanh.f32 %v779_v62  ;;  %vm810_vm0 = vweird.f32 %v5868_v54  ;;  %vm792_vm3 = vmor %vm790_vm2, %vm791_vm15  ;;  %v797_v23 = vor.u32 1.1754944e-38, %v796_v31 }
 0x19b   :  { %v787_v5 = vsub.f32 1.0, %v786_v6  ;;  %v1200_v1 = vpop.f32.mrf.mxu2  ;;  %v1213_v2 = vpop.f32.mrf.mxu3  ;;  %5873 = vpow2.f32 %v5352_v45  ;;  %vm811_vm4 = vmor %vm809_vm1, %vm810_vm0  ;;  %vm829_vm8 = vweird.f32 %v6940_v8 }
 0x19c   :  { %v806_v14 = vsub.f32 1.0, %v805_v7  ;;  %v1201_v28 = vadd.f32 %v1200_v1, %v6943_v18  ;;  %v1176_v27 = vpop.f32.mrf.mxu0  ;;  %v1189_v57 = vpop.f32.mrf.mxu1 }
 0x19d   :  { %v788_v55 = vmul.f32 %v5866_v13, %v787_v5  ;;  %v816_v27 = vor.u32 1.1754944e-38, %v815_v41 }
 0x19e   :  { %v807_v48 = vmul.f32 %v5868_v54, %v806_v14  ;;  %v1214_v42 = vadd.f32 %v1213_v2, %v1201_v28 }
 0x19f   :  { %v5870_v6 = vpop.eup %5869  ;;  %v789_v62 = vadd.f32 %v5866_v13, %v788_v55 }
 0x1a0   :  { %v808_v7 = vadd.f32 %v5868_v54, %v807_v48  ;;  %v825_v34 = vmul.f32 %v5870_v6, %v6940_v8  ;;  %v5353_v29 = vmul.f32 -1.442695, %v1214_v42  ;;  %v5872_v1 = vpop.eup %5871  ;;  %vm830_vm7 = vweird.f32 %v5870_v6 }
 0x1a1   :  { %v793_v5 = vsel %vm792_vm3, %v5866_v13, %v789_v62  ;;  %v5874_v2 = vpop.eup %5873  ;;  %vm831_vm9 = vmor %vm829_vm8, %vm830_vm7 }
 0x1a2   :  { %v798_v45 = vsel %vm795_vm5, %v797_v23, %v793_v5  ;;  %v812_v14 = vsel %vm811_vm4, %v5868_v54, %v808_v7  ;;  %v826_v57 = vsub.f32 1.0, %v825_v34  ;;  %5875 = vpow2.f32 %v5353_v29 }
 0x1a3   :  { %v817_v3 = vsel %vm814_vm6, %v816_v27, %v812_v14  ;;  %v840_v55 = vmul.f32 %v5872_v1, %v798_v45  ;;  %v1202_v53 = vpop.f32.mrf.mxu2  ;;  %v1215_v28 = vpop.f32.mrf.mxu3  ;;  %v6949_v18 = vadd.f32 1.0, %v5874_v2  ;;  %v835_v29 = vand.u32 2147483648, %v6940_v8 }
 0x1a4   :  { %v839_v48 = vmul.f32 %v817_v3, %v6746_v22  ;;  %v827_v31 = vmul.f32 %v5870_v6, %v826_v57  ;;  %v6957_v54 = vperm.slane %v6932_v58, 3  ;;  %v833_v22 = vand.u32 2147483647, %v6940_v8 }
 0x1a5   :  { %v1226_v42 = vpop.f32.mrf.mxu0  ;;  %5877 = vrcp.f32 %v6949_v18  ;;  %v836_v7 = vor.u32 1.1754944e-38, %v835_v29  ;;  %v6964_v1 = vperm.slane %v6932_v58, 2  ;;  %vm1278_vm13 = vweird.f32 %v6949_v18 }
 0x1a6   :  { %v6951_v30 = vadd.f32 %v840_v55, %v839_v48  ;;  %v828_v61 = vadd.f32 %v5870_v6, %v827_v31  ;;  %9486 = vst [vmem:[#allocation47_spill] sm:$0xff] %v6957_v54  ;;  %vm834_vm10 = vcmp.eq.f32.partialorder %v833_v22, 8.507059e+37 }
 0x1a7   :  { %v1239_v43 = vpop.f32.mrf.mxu1  ;;  %9487 = vst [vmem:[#allocation46_spill] sm:$0xff] %v6964_v1  ;;  %v1227_v53 = vadd.f32 %v1226_v42, %v6964_v1 }
 0x1a8   :  { %v5876_v34 = vpop.eup %5875  ;;  %5879 = vtanh.f32 %v6951_v30  ;;  %v832_v41 = vsel %vm831_vm9, %v5870_v6, %v828_v61 }
 0x1a9   :  { %v1291_v13 = vadd.f32 1.0, %v5876_v34  ;;  %v837_v57 = vsel %vm834_vm10, %v836_v7, %v832_v41  ;;  %v1240_v22 = vadd.f32 %v1239_v43, %v1227_v53  ;;  %v9488_v43 = vld [vmem:[#allocation106_spill] sm:$0xff]  ;;  %v9492_v53 = vld [vmem:[#allocation108_spill] sm:$0xff] }
 0x1ab   :  { %5881 = vrcp.f32 %v1291_v13  ;;  %v1252_v62 = vpop.f32.mrf.mxu2  ;;  %v6961_v23 = vpop.eup %5877  ;;  %v1303_v42 = vand.u32 2147483648, %v1291_v13  ;;  %vm1297_vm14 = vweird.f32 %v1291_v13 }
 0x1ac   :  { %v1253_v27 = vadd.f32 %v1252_v62, %v6957_v54  ;;  %v1274_v45 = vmul.f32 %v6961_v23, %v6949_v18  ;;  %vm1279_vm11 = vweird.f32 %v6961_v23 }
 0x1ad   :  { %v1265_v5 = vpop.f32.mrf.mxu3  ;;  %v1228_v14 = vpop.f32.mrf.mxu0  ;;  %vm6986_vm15 = vmor %vm1278_vm13, %vm1279_vm11 }
 0x1ae   :  { %v5880_v8 = vpop.eup %5879  ;;  %v1266_v2 = vadd.f32 %v1265_v5, %v1253_v27  ;;  %v1275_v55 = vsub.f32 1.0, %v1274_v45  ;;  %v1284_v27 = vand.u32 2147483648, %v6949_v18  ;;  %v1301_v5 = vand.u32 2147483647, %v1291_v13  ;;  %v9489_v45 = vld [vmem:[#allocation107_spill] sm:$0xff] }
 0x1af   :  { %v1241_v6 = vpop.f32.mrf.mxu1  ;;  %v843_v3 = vmul.f32 %v5880_v8, %v837_v57  ;;  %v1282_v14 = vand.u32 2147483647, %v6949_v18 }
 0x1b0   :  { %v5354_v28 = vmul.f32 -1.442695, %v1266_v2  ;;  %v1276_v31 = vmul.f32 %v6961_v23, %v1275_v55  ;;  %v1304_v6 = vor.u32 1.1754944e-38, %v1303_v42  ;;  %v1285_v18 = vor.u32 1.1754944e-38, %v1284_v27 }
 0x1b1   :  { %v5882_v48 = vpop.eup %5881  ;;  %v6970_v58 = vpack.c.bf16 %v843_v3, %v843_v3  ;;  %vm1302_vm1 = vcmp.eq.f32.partialorder %v1301_v5, 8.507059e+37  ;;  %vm1283_vm2 = vcmp.eq.f32.partialorder %v1282_v14, 8.507059e+37  ;;  %v9502_v14 = vld [vmem:[#allocation117_spill] sm:$0xff] }
 0x1b2   :  { %v1293_v61 = vmul.f32 %v5882_v48, %v1291_v13  ;;  %5883 = vpow2.f32 %v5354_v28  ;;  %v1277_v62 = vadd.f32 %v6961_v23, %v1276_v31  ;;  %vm1298_vm12 = vweird.f32 %v5882_v48  ;;  %v9493_v28 = vld [vmem:[#allocation109_spill] sm:$0xff]  ;;  %v9494_v13 = vld [vmem:[#allocation110_spill] sm:$0xff] }
 0x1b3   :  { %v1254_v34 = vpop.f32.mrf.mxu2  ;;  %1341 = vmatmul.bf16.vlgmr.msrb.gmra.mxu0 %v6970_v58  ;;  %1354 = vmatmul.bf16.vlgmr.msrb.gmra.mxu1 %v6970_v58  ;;  %5885 = vtanh.f32 %v1240_v22  ;;  %vm1299_vm0 = vmor %vm1297_vm14, %vm1298_vm12 }
 0x1b4   :  { %v1294_v29 = vsub.f32 1.0, %v1293_v61  ;;  %1367 = vmatmul.bf16.vlgmr.msrb.gmra.mxu2 %v6970_v58  ;;  %1380 = vmatmul.bf16.vlgmr.msrb.gmra.mxu3 %v6970_v58  ;;  %v1281_v3 = vsel %vm6986_vm15, %v6961_v23, %v1277_v62  ;;  %v9495_v61 = vld [vmem:[#allocation111_spill] sm:$0xff]  ;;  %v9497_v23 = vld [vmem:[#allocation113_spill] sm:$0xff]  ;;  %v9498_v62 = vld [vmem:[#allocation114_spill] sm:$0xff] }
 0x1b5   :  { %v1267_v41 = vpop.f32.mrf.mxu3  ;;  %1505 = vmatpush.bf16.msrb.mxu0 %v6751_v33  ;;  %1531 = vmatpush.bf16.msrb.mxu2 %v6753_v24 }
 0x1b6   :  { %v1295_v7 = vmul.f32 %v5882_v48, %v1294_v29  ;;  %1544 = vmatpush.bf16.msrb.mxu3 %v9488_v43  ;;  %1518 = vmatpush.bf16.msrb.mxu1 %v9489_v45  ;;  %v1286_v29 = vsel %vm1283_vm2, %v1285_v18, %v1281_v3  ;;  %v9496_v41 = vld [vmem:[#allocation112_spill] sm:$0xff] }
 0x1b8   :  { %v5884_v8 = vpop.eup %5883  ;;  %v1296_v2 = vadd.f32 %v5882_v48, %v1295_v7  ;;  %v9499_v7 = vld [vmem:[#allocation115_spill] sm:$0xff] }
 0x1b9   :  { %v1311_v55 = vadd.f32 1.0, %v5884_v8  ;;  %1506 = vmatpush.bf16.msrb.mxu0 %v9492_v53  ;;  %1532 = vmatpush.bf16.msrb.mxu2 %v9493_v28  ;;  %v5886_v42 = vpop.eup %5885  ;;  %v9501_v8 = vld [vmem:[#allocation116_spill] sm:$0xff] }
 0x1ba   :  { %v1300_v31 = vsel %vm1299_vm0, %v5882_v48, %v1296_v2  ;;  %1545 = vmatpush.bf16.msrb.mxu3 %v9494_v13  ;;  %1519 = vmatpush.bf16.msrb.mxu1 %v9495_v61  ;;  %v1328_v48 = vmul.f32 %v5886_v42, %v1286_v29  ;;  %v9503_v2 = vld [vmem:[#allocation118_spill] sm:$0xff] }
 0x1bb   :  { %v1305_v34 = vsel %vm1302_vm1, %v1304_v6, %v1300_v31  ;;  %5887 = vrcp.f32 %v1311_v55  ;;  %v9504_v6 = vld [vmem:[#allocation119_spill] sm:$0xff]  ;;  %v1323_v18 = vand.u32 2147483648, %v1311_v55  ;;  %v9505_v31 = vld [vmem:[#allocation120_spill] sm:$0xff]  ;;  %v9507_v42 = vld [vmem:[#allocation122_spill] sm:$0xff]  ;;  %vm1317_vm4 = vweird.f32 %v1311_v55 }
 0x1bc   :  { %v1327_v22 = vmul.f32 0.0, %v1305_v34  ;;  %v9506_v34 = vld [vmem:[#allocation121_spill] sm:$0xff] }
 0x1bd   :  { %1507 = vmatpush.bf16.msrb.mxu0 %v9496_v41  ;;  %1533 = vmatpush.bf16.msrb.mxu2 %v9497_v23 }
 0x1be   :  { %1546 = vmatpush.bf16.msrb.mxu3 %v9498_v62  ;;  %1520 = vmatpush.bf16.msrb.mxu1 %v9499_v7  ;;  %v7001_v5 = vadd.f32 %v1328_v48, %v1327_v22  ;;  %v1321_v22 = vand.u32 2147483647, %v1311_v55  ;;  %v9508_v48 = vld [vmem:[#allocation123_spill] sm:$0xff]  ;;  %v5605_v62 = vld [vmem:[#allocation7 + $0x1f0] sm:$0xf0] }
 0x1c0   :  { %9500 = vst [vmem:[#allocation106_spill] sm:$0xff] %v7001_v5  ;;  %5889 = vtanh.f32 %v7001_v5  ;;  %vm1322_vm6 = vcmp.eq.f32.partialorder %v1321_v22, 8.507059e+37 }
 0x1c1   :  { %v5888_v27 = vpop.eup %5887  ;;  %1508 = vmatpush.bf16.msrb.mxu0 %v9501_v8  ;;  %1534 = vmatpush.bf16.msrb.mxu2 %v9502_v14  ;;  %v9510_v14 = vld [vmem:[#allocation125_spill] sm:$0xff]  ;;  %v5798_v8 = vld [vmem:[#allocation7 + $0xe4] sm:$0xf] }
 0x1c2   :  { %v1313_v57 = vmul.f32 %v5888_v27, %v1311_v55  ;;  %1547 = vmatpush.bf16.msrb.mxu3 %v9503_v2  ;;  %1521 = vmatpush.bf16.msrb.mxu1 %v9504_v6  ;;  %vm1318_vm3 = vweird.f32 %v5888_v27  ;;  %v9509_v6 = vld [vmem:[#allocation124_spill] sm:$0xff]  ;;  %v5830_v55 = vld [vmem:[#allocation7 + $0x1e4] sm:$0xf] }
 0x1c3   :  { %1461 = vmatmul.bf16.vlgmr.msra.gmra.mxu0 %v6970_v58  ;;  %vm1319_vm5 = vmor %vm1317_vm4, %vm1318_vm3 }
 0x1c4   :  { %v1314_v3 = vsub.f32 1.0, %v1313_v57  ;;  %1487 = vmatmul.bf16.vlgmr.msra.gmra.mxu2 %v6970_v58  ;;  %v1324_v57 = vor.u32 1.1754944e-38, %v1323_v18 }
 0x1c5   :  { %1509 = vmatpush.bf16.msrb.mxu0 %v9505_v31  ;;  %1535 = vmatpush.bf16.msrb.mxu2 %v9506_v34  ;;  %v5475_v31 = vld [vmem:[#allocation7 + $0xe0] sm:$0xf] }
 0x1c6   :  { %v1315_v29 = vmul.f32 %v5888_v27, %v1314_v3  ;;  %1548 = vmatpush.bf16.msrb.mxu3 %v9507_v42  ;;  %1522 = vmatpush.bf16.msrb.mxu1 %v9508_v48  ;;  %v5890_v3 = vpop.eup %5889  ;;  %v5800_v42 = vld [vmem:[#allocation7 + $0xec] sm:$0xf0] }
 0x1c8   :  { %v1316_v2 = vadd.f32 %v5888_v27, %v1315_v29  ;;  %v5477_v29 = vld [vmem:[#allocation7 + $0xf0] sm:$0xf0] }
 0x1c9   :  { %1510 = vmatpush.bf16.msrb.mxu0 %v9509_v6  ;;  %1536 = vmatpush.bf16.msrb.mxu2 %v9510_v14  ;;  %v7026_v22 = vor.u32 %v5798_v8, %v5477_v29  ;;  %v5587_v8 = vld [vmem:[#allocation7 + $0x1c0] sm:$0xf]  ;;  %v5795_v14 = vld [vmem:[#allocation7 + $0xcc] sm:$0xf] }
 0x1ca   :  { %v1320_v5 = vsel %vm1319_vm5, %v5888_v27, %v1316_v2  ;;  %1549 = vmatpush.bf16.msrb.mxu3 %v6823_v4  ;;  %1523 = vmatpush.bf16.msrb.mxu1 %v6825_v16  ;;  %v7024_v27 = vor.u32 %v5800_v42, %v5475_v31  ;;  %v5832_v2 = vld [vmem:[#allocation7 + $0x1ec] sm:$0xf0]  ;;  %v5794_v4 = vld [vmem:[#allocation7 + $0xc4] sm:$0xf]  ;;  %v5833_v16 = vld [vmem:[#allocation7 + $0x1f4] sm:$0xf0] }
 0x1cb   :  { %v1325_v34 = vsel %vm1322_vm6, %v1324_v57, %v1320_v5  ;;  %v5603_v5 = vld [vmem:[#allocation7 + $0x1e0] sm:$0xf]  ;;  %9512 = vst [vmem:[#allocation108_spill] sm:$0xff] %v7026_v22  ;;  %v5828_v42 = vld [vmem:[#allocation7 + $0x1cc] sm:$0xf0] }
 0x1cc   :  { %v1331_v48 = vmul.f32 %v5890_v3, %v1325_v34  ;;  %9511 = vst [vmem:[#allocation107_spill] sm:$0xff] %v7024_v27  ;;  %v7028_v34 = vor.u32 %v5830_v55, %v5605_v62  ;;  %v5459_v57 = vld [vmem:[#allocation7 + $0xc0] sm:$0xf]  ;;  %v5796_v3 = vld [vmem:[#allocation7 + $0xcc] sm:$0xf0]  ;;  %v7034_v31 = vor.u32 %v5832_v2, %v5603_v5 }
 0x1cd   :  { %1511 = vmatpush.bf16.msrb.mxu0 %v6829_v47  ;;  %1537 = vmatpush.bf16.msrb.mxu2 %v6831_v44  ;;  %v5826_v44 = vld [vmem:[#allocation7 + $0x1c4] sm:$0xf]  ;;  %v7038_v62 = vor.u32 %v5796_v3, %v5459_v57  ;;  %v5445_v2 = vld [vmem:[#allocation7 + $0xb0] sm:$0xf0]  ;;  %v5831_v47 = vld [vmem:[#allocation7 + $0x1ec] sm:$0xf] }
 0x1ce   :  { %v7020_v18 = vpack.c.bf16 %v1331_v48, %v1331_v48  ;;  %1550 = vmatpush.bf16.msrb.mxu3 %v6835_v39  ;;  %1524 = vmatpush.bf16.msrb.mxu1 %v6837_v32  ;;  %9513 = vst [vmem:[#allocation109_spill] sm:$0xff] %v7028_v34  ;;  %v5461_v48 = vld [vmem:[#allocation7 + $0xd0] sm:$0xf0]  ;;  %v5790_v5 = vld [vmem:[#allocation7 + $0xa4] sm:$0xf] }
 0x1cf   :  { %v5589_v39 = vld [vmem:[#allocation7 + $0x1d0] sm:$0xf0]  ;;  %9514 = vst [vmem:[#allocation110_spill] sm:$0xff] %v7034_v31  ;;  %v7042_v29 = vor.u32 %v5794_v4, %v5461_v48  ;;  %v5822_v57 = vld [vmem:[#allocation7 + $0x1a4] sm:$0xf]  ;;  %v7057_v48 = vor.u32 %v5790_v5, %v5445_v2 }
 0x1d0   :  { %1474 = vmatmul.bf16.vlgmr.msra.gmra.mxu1 %v7020_v18  ;;  %1500 = vmatmul.bf16.vlgmr.msra.gmra.mxu3 %v7020_v18  ;;  %9515 = vst [vmem:[#allocation112_spill] sm:$0xff] %v7038_v62  ;;  %v7044_v55 = vor.u32 %v5826_v44, %v5589_v39  ;;  %v5573_v3 = vld [vmem:[#allocation7 + $0x1b0] sm:$0xf0]  ;;  %v5571_v44 = vld [vmem:[#allocation7 + $0x1a0] sm:$0xf] }
 0x1d1   :  { %1512 = vmatpush.bf16.msrb.mxu0 %v6841_v49  ;;  %1538 = vmatpush.bf16.msrb.mxu2 %v6843_v26  ;;  %9516 = vst [vmem:[#allocation113_spill] sm:$0xff] %v7042_v29  ;;  %v5443_v49 = vld [vmem:[#allocation7 + $0xa0] sm:$0xf]  ;;  %v5792_v26 = vld [vmem:[#allocation7 + $0xac] sm:$0xf0] }
 0x1d2   :  { %1551 = vmatpush.bf16.msrb.mxu3 %v6847_v56  ;;  %9517 = vst [vmem:[#allocation136_spill] sm:$0xff] %v7044_v55  ;;  %1525 = vmatpush.bf16.msrb.mxu1 %v6849_v40  ;;  %v7050_v56 = vor.u32 %v5828_v42, %v5587_v8  ;;  %v7053_v4 = vor.u32 %v5792_v26, %v5443_v49  ;;  %v5824_v39 = vld [vmem:[#allocation7 + $0x1ac] sm:$0xf0]  ;;  %v5427_v40 = vld [vmem:[#allocation7 + $0x80] sm:$0xf] }
 0x1d3   :  { %9520 = vst [vmem:[#allocation139_spill] sm:$0xff] %v7057_v48  ;;  %v5818_v8 = vld [vmem:[#allocation7 + $0x184] sm:$0xf]  ;;  %v5557_v42 = vld [vmem:[#allocation7 + $0x190] sm:$0xf0]  ;;  %v7062_v49 = vor.u32 %v5824_v39, %v5571_v44 }
 0x1d4   :  { %1513 = vmatmul.bf16.vlgmr.msrb.gmra.mxu0 %v6970_v58  ;;  %1539 = vmatmul.bf16.vlgmr.msrb.gmra.mxu2 %v6970_v58  ;;  %9518 = vst [vmem:[#allocation137_spill] sm:$0xff] %v7050_v56  ;;  %v5429_v58 = vld [vmem:[#allocation7 + $0x90] sm:$0xf0]  ;;  %v7071_v2 = vor.u32 %v5818_v8, %v5557_v42  ;;  %v5814_v44 = vld [vmem:[#allocation7 + $0x164] sm:$0xf] }
 0x1d5   :  { %1940 = vmatpush.bf16.msra.mxu0 %v7024_v27  ;;  %1966 = vmatpush.bf16.msra.mxu2 %v7026_v22  ;;  %9519 = vst [vmem:[#allocation138_spill] sm:$0xff] %v7053_v4  ;;  %v5786_v22 = vld [vmem:[#allocation7 + $0x84] sm:$0xf]  ;;  %v5541_v39 = vld [vmem:[#allocation7 + $0x170] sm:$0xf0] }
 0x1d6   :  { %1979 = vmatpush.bf16.msra.mxu3 %v7028_v34  ;;  %1953 = vmatpush.bf16.msra.mxu1 %v7034_v31  ;;  %v7059_v34 = vor.u32 %v5822_v57, %v5573_v3  ;;  %v5788_v31 = vld [vmem:[#allocation7 + $0x8c] sm:$0xf0]  ;;  %9522 = vst [vmem:[#allocation141_spill] sm:$0xff] %v7062_v49  ;;  %v7069_v5 = vor.u32 %v5786_v22, %v5429_v58  ;;  %v5411_v57 = vld [vmem:[#allocation7 + $0x60] sm:$0xf] }
 0x1d7   :  { %v7065_v26 = vor.u32 %v5788_v31, %v5427_v40  ;;  %9525 = vst [vmem:[#allocation144_spill] sm:$0xff] %v7071_v2  ;;  %v5784_v3 = vld [vmem:[#allocation7 + $0x6c] sm:$0xf0]  ;;  %v7083_v58 = vor.u32 %v5814_v44, %v5541_v39  ;;  %v5395_v8 = vld [vmem:[#allocation7 + $0x40] sm:$0xf] }
 0x1d8   :  { %9521 = vst [vmem:[#allocation140_spill] sm:$0xff] %v7059_v34  ;;  %v7077_v31 = vor.u32 %v5784_v3, %v5411_v57  ;;  %v5780_v42 = vld [vmem:[#allocation7 + $0x4c] sm:$0xf0]  ;;  %v5525_v57 = vld [vmem:[#allocation7 + $0x150] sm:$0xf0] }
 0x1d9   :  { %1941 = vmatpush.bf16.msra.mxu0 %v7038_v62  ;;  %1967 = vmatpush.bf16.msra.mxu2 %v7042_v29  ;;  %9523 = vst [vmem:[#allocation142_spill] sm:$0xff] %v7065_v26  ;;  %v5555_v29 = vld [vmem:[#allocation7 + $0x180] sm:$0xf]  ;;  %v5782_v62 = vld [vmem:[#allocation7 + $0x64] sm:$0xf] }
 0x1da   :  { %1980 = vmatpush.bf16.msra.mxu3 %v7044_v55  ;;  %1954 = vmatpush.bf16.msra.mxu1 %v7050_v56  ;;  %v5820_v55 = vld [vmem:[#allocation7 + $0x18c] sm:$0xf0]  ;;  %9524 = vst [vmem:[#allocation143_spill] sm:$0xff] %v7069_v5  ;;  %v5413_v56 = vld [vmem:[#allocation7 + $0x70] sm:$0xf0] }
 0x1db   :  { %v7074_v40 = vor.u32 %v5820_v55, %v5555_v29  ;;  %9527 = vst [vmem:[#allocation146_spill] sm:$0xff] %v7077_v31  ;;  %v7081_v22 = vor.u32 %v5782_v62, %v5413_v56  ;;  %v5397_v29 = vld [vmem:[#allocation7 + $0x50] sm:$0xf0]  ;;  %v5810_v55 = vld [vmem:[#allocation7 + $0x144] sm:$0xf]  ;;  %v7091_v56 = vor.u32 %v5780_v42, %v5395_v8 }
 0x1dc   :  { %9529 = vst [vmem:[#allocation148_spill] sm:$0xff] %v7083_v58  ;;  %v5523_v62 = vld [vmem:[#allocation7 + $0x140] sm:$0xf]  ;;  %v5812_v44 = vld [vmem:[#allocation7 + $0x14c] sm:$0xf0] }
 0x1dd   :  { %1942 = vmatpush.bf16.msra.mxu0 %v7053_v4  ;;  %1968 = vmatpush.bf16.msra.mxu2 %v7057_v48  ;;  %9526 = vst [vmem:[#allocation145_spill] sm:$0xff] %v7074_v40  ;;  %v5539_v48 = vld [vmem:[#allocation7 + $0x160] sm:$0xf]  ;;  %v5778_v4 = vld [vmem:[#allocation7 + $0x44] sm:$0xf]  ;;  %v7100_v8 = vor.u32 %v5812_v44, %v5523_v62 }
 0x1de   :  { %1981 = vmatpush.bf16.msra.mxu3 %v7059_v34  ;;  %1955 = vmatpush.bf16.msra.mxu1 %v7062_v49  ;;  %v5816_v34 = vld [vmem:[#allocation7 + $0x16c] sm:$0xf0]  ;;  %9528 = vst [vmem:[#allocation147_spill] sm:$0xff] %v7081_v22  ;;  %v7095_v39 = vor.u32 %v5778_v4, %v5397_v29  ;;  %v5379_v49 = vld [vmem:[#allocation7 + $0x20] sm:$0xf] }
 0x1df   :  { %v7088_v3 = vor.u32 %v5816_v34, %v5539_v48  ;;  %9531 = vst [vmem:[#allocation150_spill] sm:$0xff] %v7091_v56  ;;  %v5806_v34 = vld [vmem:[#allocation7 + $0x124] sm:$0xf]  ;;  %v5509_v48 = vld [vmem:[#allocation7 + $0x130] sm:$0xf0] }
 0x1e0   :  { %1526 = vmatmul.bf16.vlgmr.msrb.gmra.mxu1 %v7020_v18  ;;  %1552 = vmatmul.bf16.vlgmr.msrb.gmra.mxu3 %v7020_v18  ;;  %9532 = vst [vmem:[#allocation151_spill] sm:$0xff] %v7095_v39  ;;  %v5507_v42 = vld [vmem:[#allocation7 + $0x120] sm:$0xf]  ;;  %v5772_v29 = vld [vmem:[#allocation7 + $0xc] sm:$0xf0] }
 0x1e1   :  { %1943 = vmatpush.bf16.msra.mxu0 %v7065_v26  ;;  %1969 = vmatpush.bf16.msra.mxu2 %v7069_v5  ;;  %9530 = vst [vmem:[#allocation149_spill] sm:$0xff] %v7088_v3  ;;  %v5776_v5 = vld [vmem:[#allocation7 + $0x2c] sm:$0xf0]  ;;  %v5774_v26 = vld [vmem:[#allocation7 + $0x24] sm:$0xf] }
 0x1e2   :  { %1982 = vmatpush.bf16.msra.mxu3 %v7071_v2  ;;  %1956 = vmatpush.bf16.msra.mxu1 %v7074_v40  ;;  %v7097_v2 = vor.u32 %v5810_v55, %v5525_v57  ;;  %v5381_v40 = vld [vmem:[#allocation7 + $0x30] sm:$0xf0]  ;;  %9534 = vst [vmem:[#allocation153_spill] sm:$0xff] %v7100_v8  ;;  %v5363_v4 = vld [vmem:[#allocation7] sm:$0xf]  ;;  %v7109_v57 = vor.u32 %v5806_v34, %v5509_v48 }
 0x1e3   :  { %v7107_v55 = vor.u32 %v5774_v26, %v5381_v40  ;;  %v5802_v62 = vld [vmem:[#allocation7 + $0x104] sm:$0xf]  ;;  %v5493_v44 = vld [vmem:[#allocation7 + $0x110] sm:$0xf0]  ;;  %v5483_v27 = vld [vmem:[#allocation7 + $0xe8] sm:$0xf] }
 0x1e4   :  { %9533 = vst [vmem:[#allocation152_spill] sm:$0xff] %v7097_v2  ;;  %v5801_v32 = vld [vmem:[#allocation7 + $0xf4] sm:$0xf0]  ;;  %v5613_v26 = vld [vmem:[#allocation7 + $0x1f8] sm:$0xf0] }
 0x1e5   :  { %1944 = vmatpush.bf16.msra.mxu0 %v7077_v31  ;;  %1970 = vmatpush.bf16.msra.mxu2 %v7081_v22  ;;  %v7103_v22 = vor.u32 %v5776_v5, %v5379_v49  ;;  %9536 = vst [vmem:[#allocation155_spill] sm:$0xff] %v7107_v55  ;;  %v5770_v31 = vld [vmem:[#allocation7 + $0x4] sm:$0xf]  ;;  %v5799_v5 = vld [vmem:[#allocation7 + $0xec] sm:$0xf] }
 0x1e6   :  { %1983 = vmatpush.bf16.msra.mxu3 %v7083_v58  ;;  %1957 = vmatpush.bf16.msra.mxu1 %v7088_v3  ;;  %v5808_v58 = vld [vmem:[#allocation7 + $0x12c] sm:$0xf0]  ;;  %9537 = vst [vmem:[#allocation156_spill] sm:$0xff] %v7109_v57  ;;  %v5365_v3 = vld [vmem:[#allocation7 + $0x10] sm:$0xf0] }
 0x1e7   :  { %9535 = vst [vmem:[#allocation154_spill] sm:$0xff] %v7103_v22  ;;  %v7112_v49 = vor.u32 %v5808_v58, %v5507_v42  ;;  %v5491_v40 = vld [vmem:[#allocation7 + $0x100] sm:$0xf]  ;;  %v5804_v34 = vld [vmem:[#allocation7 + $0x10c] sm:$0xf0]  ;;  %v7119_v48 = vor.u32 %v5770_v31, %v5365_v3  ;;  %v7123_v58 = vor.u32 %v5801_v32, %v5483_v27 }
 0x1e8   :  { %v5469_v31 = vld [vmem:[#allocation7 + $0xd8] sm:$0xf0]  ;;  %v5827_v3 = vld [vmem:[#allocation7 + $0x1cc] sm:$0xf]  ;;  %v5595_v27 = vld [vmem:[#allocation7 + $0x1c8] sm:$0xf] }
 0x1e9   :  { %1945 = vmatpush.bf16.msra.mxu0 %v7091_v56  ;;  %1971 = vmatpush.bf16.msra.mxu2 %v7095_v39  ;;  %9538 = vst [vmem:[#allocation157_spill] sm:$0xff] %v7112_v49  ;;  %v5485_v56 = vld [vmem:[#allocation7 + $0xf8] sm:$0xf0]  ;;  %v7121_v39 = vor.u32 %v5802_v62, %v5493_v44  ;;  %v7143_v44 = vor.u32 %v5795_v14, %v5469_v31  ;;  %v5579_v31 = vld [vmem:[#allocation7 + $0x1a8] sm:$0xf] }
 0x1ea   :  { %1984 = vmatpush.bf16.msra.mxu3 %v7097_v2  ;;  %1958 = vmatpush.bf16.msra.mxu1 %v7100_v8  ;;  %v7115_v2 = vor.u32 %v5772_v29, %v5363_v4  ;;  %9540 = vst [vmem:[#allocation159_spill] sm:$0xff] %v7119_v48  ;;  %v7125_v42 = vor.u32 %v5799_v5, %v5485_v56  ;;  %v5611_v8 = vld [vmem:[#allocation7 + $0x1e8] sm:$0xf]  ;;  %v5597_v62 = vld [vmem:[#allocation7 + $0x1d8] sm:$0xf0] }
 0x1eb   :  { %9541 = vst [vmem:[#allocation160_spill] sm:$0xff] %v7121_v39  ;;  %v7128_v4 = vor.u32 %v5831_v47, %v5613_v26  ;;  %v7130_v29 = vor.u32 %v5804_v34, %v5491_v40  ;;  %v7135_v32 = vor.u32 %v5833_v16, %v5611_v8  ;;  %v5829_v56 = vld [vmem:[#allocation7 + $0x1d4] sm:$0xf0]  ;;  %v7145_v5 = vor.u32 %v5827_v3, %v5597_v62  ;;  %v5451_v26 = vld [vmem:[#allocation7 + $0xa8] sm:$0xf] }
 0x1ec   :  { %9539 = vst [vmem:[#allocation158_spill] sm:$0xff] %v7115_v2  ;;  %v5793_v40 = vld [vmem:[#allocation7 + $0xb4] sm:$0xf0]  ;;  %v5791_v16 = vld [vmem:[#allocation7 + $0xac] sm:$0xf]  ;;  %v7151_v34 = vor.u32 %v5829_v56, %v5595_v27 }
 0x1ed   :  { %1946 = vmatpush.bf16.msra.mxu0 %v7103_v22  ;;  %1972 = vmatpush.bf16.msra.mxu2 %v7107_v55  ;;  %9542 = vst [vmem:[#allocation161_spill] sm:$0xff] %v7123_v58  ;;  %v5467_v22 = vld [vmem:[#allocation7 + $0xc8] sm:$0xf]  ;;  %v5797_v55 = vld [vmem:[#allocation7 + $0xd4] sm:$0xf0]  ;;  %v7155_v14 = vor.u32 %v5793_v40, %v5451_v26 }
 0x1ee   :  { %1985 = vmatpush.bf16.msra.mxu3 %v7109_v57  ;;  %9543 = vst [vmem:[#allocation162_spill] sm:$0xff] %v7125_v42  ;;  %1959 = vmatpush.bf16.msra.mxu1 %v7112_v49  ;;  %v7139_v47 = vor.u32 %v5797_v55, %v5467_v22  ;;  %v5453_v8 = vld [vmem:[#allocation7 + $0xb8] sm:$0xf0]  ;;  %v5823_v22 = vld [vmem:[#allocation7 + $0x1ac] sm:$0xf] }
 0x1ef   :  { %9544 = vst [vmem:[#allocation163_spill] sm:$0xff] %v7128_v4  ;;  %v5581_v55 = vld [vmem:[#allocation7 + $0x1b8] sm:$0xf0]  ;;  %v5825_v3 = vld [vmem:[#allocation7 + $0x1b4] sm:$0xf0]  ;;  %v7159_v62 = vor.u32 %v5791_v16, %v5453_v8 }
 0x1f0   :  { %9545 = vst [vmem:[#allocation164_spill] sm:$0xff] %v7130_v29  ;;  %v5787_v27 = vld [vmem:[#allocation7 + $0x8c] sm:$0xf]  ;;  %v5437_v56 = vld [vmem:[#allocation7 + $0x98] sm:$0xf0]  ;;  %v7164_v26 = vor.u32 %v5825_v3, %v5579_v31 }
 0x1f1   :  { %1947 = vmatpush.bf16.msra.mxu0 %v7115_v2  ;;  %1973 = vmatpush.bf16.msra.mxu2 %v7119_v48  ;;  %9546 = vst [vmem:[#allocation165_spill] sm:$0xff] %v7135_v32  ;;  %v5565_v57 = vld [vmem:[#allocation7 + $0x198] sm:$0xf0]  ;;  %v5563_v49 = vld [vmem:[#allocation7 + $0x188] sm:$0xf]  ;;  %v7171_v16 = vor.u32 %v5787_v27, %v5437_v56 }
 0x1f2   :  { %1986 = vmatpush.bf16.msra.mxu3 %v7121_v39  ;;  %9547 = vst [vmem:[#allocation166_spill] sm:$0xff] %v7139_v47  ;;  %1960 = vmatpush.bf16.msra.mxu1 %v7130_v29  ;;  %v5789_v39 = vld [vmem:[#allocation7 + $0x94] sm:$0xf0]  ;;  %v5819_v29 = vld [vmem:[#allocation7 + $0x18c] sm:$0xf] }
 0x1f3   :  { %9548 = vst [vmem:[#allocation167_spill] sm:$0xff] %v7143_v44  ;;  %v7173_v8 = vor.u32 %v5819_v29, %v5565_v57  ;;  %v5815_v31 = vld [vmem:[#allocation7 + $0x16c] sm:$0xf]  ;;  %v5549_v3 = vld [vmem:[#allocation7 + $0x178] sm:$0xf0] }
 0x1f4   :  { %9549 = vst [vmem:[#allocation168_spill] sm:$0xff] %v7145_v5  ;;  %1948 = vmatmul.bf16.vlgmr.msra.gmra.mxu0 %v7020_v18  ;;  %1974 = vmatmul.bf16.vlgmr.msra.gmra.mxu2 %v7020_v18  ;;  %v7185_v29 = vor.u32 %v5815_v31, %v5549_v3  ;;  %v5403_v27 = vld [vmem:[#allocation7 + $0x48] sm:$0xf]  ;;  %v5781_v56 = vld [vmem:[#allocation7 + $0x54] sm:$0xf0] }
 0x1f5   :  { %1992 = vmatpush.bf16.msrb.mxu0 %v7123_v58  ;;  %2018 = vmatpush.bf16.msrb.mxu2 %v7125_v42  ;;  %9550 = vst [vmem:[#allocation169_spill] sm:$0xff] %v7151_v34  ;;  %v5387_v31 = vld [vmem:[#allocation7 + $0x28] sm:$0xf]  ;;  %v5777_v3 = vld [vmem:[#allocation7 + $0x34] sm:$0xf0] }
 0x1f6   :  { %2031 = vmatpush.bf16.msrb.mxu3 %v7128_v4  ;;  %2005 = vmatpush.bf16.msrb.mxu1 %v7135_v32  ;;  %9551 = vst [vmem:[#allocation170_spill] sm:$0xff] %v7155_v14  ;;  %v7161_v4 = vor.u32 %v5823_v22, %v5581_v55  ;;  %v5435_v32 = vld [vmem:[#allocation7 + $0x88] sm:$0xf]  ;;  %v5785_v55 = vld [vmem:[#allocation7 + $0x74] sm:$0xf0] }
 0x1f7   :  { %1987 = vmatmul.bf16.vlgmr.msra.gmra.mxu3 %v9449_v15  ;;  %1961 = vmatmul.bf16.vlgmr.msra.gmra.mxu1 %v9449_v15  ;;  %9552 = vst [vmem:[#allocation171_spill] sm:$0xff] %v7159_v62  ;;  %v7167_v40 = vor.u32 %v5789_v39, %v5435_v32  ;;  %v5419_v22 = vld [vmem:[#allocation7 + $0x68] sm:$0xf] }
 0x1f8   :  { %9553 = vst [vmem:[#allocation172_spill] sm:$0xff] %v7161_v4  ;;  %v7179_v32 = vor.u32 %v5785_v55, %v5419_v22  ;;  %v7191_v55 = vor.u32 %v5781_v56, %v5403_v27  ;;  %v7203_v56 = vor.u32 %v5777_v3, %v5387_v31 }
 0x1f9   :  { %1993 = vmatpush.bf16.msrb.mxu0 %v7139_v47  ;;  %2019 = vmatpush.bf16.msrb.mxu2 %v7143_v44  ;;  %9554 = vst [vmem:[#allocation173_spill] sm:$0xff] %v7164_v26  ;;  %v5783_v44 = vld [vmem:[#allocation7 + $0x6c] sm:$0xf] }
 0x1fa   :  { %2032 = vmatpush.bf16.msrb.mxu3 %v7145_v5  ;;  %2006 = vmatpush.bf16.msrb.mxu1 %v7151_v34  ;;  %9555 = vst [vmem:[#allocation174_spill] sm:$0xff] %v7167_v40  ;;  %v5821_v5 = vld [vmem:[#allocation7 + $0x194] sm:$0xf0]  ;;  %v5421_v34 = vld [vmem:[#allocation7 + $0x78] sm:$0xf0] }
 0x1fb   :  { %9556 = vst [vmem:[#allocation175_spill] sm:$0xff] %v7171_v16  ;;  %v7176_v39 = vor.u32 %v5821_v5, %v5563_v49  ;;  %v7183_v57 = vor.u32 %v5783_v44, %v5421_v34  ;;  %v5811_v49 = vld [vmem:[#allocation7 + $0x14c] sm:$0xf]  ;;  %v5533_v5 = vld [vmem:[#allocation7 + $0x158] sm:$0xf0] }
 0x1fc   :  { %9557 = vst [vmem:[#allocation176_spill] sm:$0xff] %v7173_v8  ;;  %v7197_v34 = vor.u32 %v5811_v49, %v5533_v5  ;;  %v5371_v49 = vld [vmem:[#allocation7 + $0x8] sm:$0xf]  ;;  %v5773_v5 = vld [vmem:[#allocation7 + $0x14] sm:$0xf0] }
 0x1fd   :  { %1994 = vmatpush.bf16.msrb.mxu0 %v7155_v14  ;;  %2020 = vmatpush.bf16.msrb.mxu2 %v7159_v62  ;;  %9558 = vst [vmem:[#allocation177_spill] sm:$0xff] %v7176_v39  ;;  %v5547_v62 = vld [vmem:[#allocation7 + $0x168] sm:$0xf]  ;;  %v5779_v14 = vld [vmem:[#allocation7 + $0x4c] sm:$0xf]  ;;  %v7215_v3 = vor.u32 %v5773_v5, %v5371_v49  ;;  %v9584_v49 = vld [vmem:[#allocation68_spill] sm:$0xff] }
 0x1fe   :  { %2033 = vmatpush.bf16.msrb.mxu3 %v7161_v4  ;;  %2007 = vmatpush.bf16.msrb.mxu1 %v7164_v26  ;;  %9559 = vst [vmem:[#allocation178_spill] sm:$0xff] %v7179_v32  ;;  %v5817_v4 = vld [vmem:[#allocation7 + $0x174] sm:$0xf0]  ;;  %v5405_v26 = vld [vmem:[#allocation7 + $0x58] sm:$0xf0] }
 0x1ff   :  { %9560 = vst [vmem:[#allocation179_spill] sm:$0xff] %v7183_v57  ;;  %v7188_v22 = vor.u32 %v5817_v4, %v5547_v62  ;;  %v7195_v44 = vor.u32 %v5779_v14, %v5405_v26  ;;  %v5807_v4 = vld [vmem:[#allocation7 + $0x12c] sm:$0xf]  ;;  %v5517_v62 = vld [vmem:[#allocation7 + $0x138] sm:$0xf0] }
 0x200   :  { %9561 = vst [vmem:[#allocation180_spill] sm:$0xff] %v7185_v29  ;;  %v7209_v26 = vor.u32 %v5807_v4, %v5517_v62  ;;  %v9583_v62 = vld [vmem:[#allocation40_spill] sm:$0xff]  ;;  %v9585_v5 = vld [vmem:[#allocation69_spill] sm:$0xff] }
 0x201   :  { %1995 = vmatpush.bf16.msrb.mxu0 %v7167_v40  ;;  %2021 = vmatpush.bf16.msrb.mxu2 %v7171_v16  ;;  %9562 = vst [vmem:[#allocation181_spill] sm:$0xff] %v7188_v22  ;;  %v5531_v16 = vld [vmem:[#allocation7 + $0x148] sm:$0xf]  ;;  %v5775_v40 = vld [vmem:[#allocation7 + $0x2c] sm:$0xf] }
 0x202   :  { %2034 = vmatpush.bf16.msrb.mxu3 %v7173_v8  ;;  %2008 = vmatpush.bf16.msrb.mxu1 %v7176_v39  ;;  %9563 = vst [vmem:[#allocation182_spill] sm:$0xff] %v7191_v55  ;;  %v5813_v8 = vld [vmem:[#allocation7 + $0x154] sm:$0xf0]  ;;  %v5389_v39 = vld [vmem:[#allocation7 + $0x38] sm:$0xf0] }
 0x203   :  { %9564 = vst [vmem:[#allocation183_spill] sm:$0xff] %v7195_v44  ;;  %v7200_v27 = vor.u32 %v5813_v8, %v5531_v16  ;;  %v7207_v14 = vor.u32 %v5775_v40, %v5389_v39  ;;  %v5803_v16 = vld [vmem:[#allocation7 + $0x10c] sm:$0xf]  ;;  %v5501_v8 = vld [vmem:[#allocation7 + $0x118] sm:$0xf0] }
 0x204   :  { %9565 = vst [vmem:[#allocation184_spill] sm:$0xff] %v7197_v34  ;;  %v7221_v39 = vor.u32 %v5803_v16, %v5501_v8  ;;  %v9586_v16 = vld [vmem:[#allocation39_spill] sm:$0xff]  ;;  %v9587_v8 = vld [vmem:[#allocation41_spill] sm:$0xff] }
 0x205   :  { %1996 = vmatpush.bf16.msrb.mxu0 %v7179_v32  ;;  %2022 = vmatpush.bf16.msrb.mxu2 %v7183_v57  ;;  %9566 = vst [vmem:[#allocation185_spill] sm:$0xff] %v7200_v27  ;;  %v5515_v57 = vld [vmem:[#allocation7 + $0x128] sm:$0xf]  ;;  %v5771_v32 = vld [vmem:[#allocation7 + $0xc] sm:$0xf] }
 0x206   :  { %2035 = vmatpush.bf16.msrb.mxu3 %v7185_v29  ;;  %2009 = vmatpush.bf16.msrb.mxu1 %v7188_v22  ;;  %9567 = vst [vmem:[#allocation186_spill] sm:$0xff] %v7203_v56  ;;  %v5809_v29 = vld [vmem:[#allocation7 + $0x134] sm:$0xf0]  ;;  %v5373_v22 = vld [vmem:[#allocation7 + $0x18] sm:$0xf0] }
 0x207   :  { %9568 = vst [vmem:[#allocation187_spill] sm:$0xff] %v7207_v14  ;;  %v7212_v31 = vor.u32 %v5809_v29, %v5515_v57  ;;  %v7219_v40 = vor.u32 %v5771_v32, %v5373_v22  ;;  %v9577_v32 = vld [vmem:[#allocation33_spill] sm:$0xff]  ;;  %v9578_v57 = vld [vmem:[#allocation34_spill] sm:$0xff]  ;;  %v9579_v29 = vld [vmem:[#allocation36_spill] sm:$0xff] }
 0x208   :  { %9569 = vst [vmem:[#allocation188_spill] sm:$0xff] %v7209_v26  ;;  %v9580_v22 = vld [vmem:[#allocation35_spill] sm:$0xff] }
 0x209   :  { %1997 = vmatpush.bf16.msrb.mxu0 %v7191_v55  ;;  %2023 = vmatpush.bf16.msrb.mxu2 %v7195_v44  ;;  %9570 = vst [vmem:[#allocation189_spill] sm:$0xff] %v7212_v31  ;;  %v5499_v44 = vld [vmem:[#allocation7 + $0x108] sm:$0xf] }
 0x20a   :  { %2036 = vmatpush.bf16.msrb.mxu3 %v7197_v34  ;;  %2010 = vmatpush.bf16.msrb.mxu1 %v7200_v27  ;;  %9571 = vst [vmem:[#allocation190_spill] sm:$0xff] %v7215_v3  ;;  %v5805_v34 = vld [vmem:[#allocation7 + $0x114] sm:$0xf0] }
 0x20b   :  { %9572 = vst [vmem:[#allocation191_spill] sm:$0xff] %v7219_v40  ;;  %v7224_v4 = vor.u32 %v5805_v34, %v5499_v44  ;;  %v9581_v44 = vld [vmem:[#allocation37_spill] sm:$0xff]  ;;  %v9582_v34 = vld [vmem:[#allocation38_spill] sm:$0xff] }
 0x20c   :  { %9573 = vst [vmem:[#allocation192_spill] sm:$0xff] %v7221_v39 }
 0x20d   :  { %1998 = vmatpush.bf16.msrb.mxu0 %v7203_v56  ;;  %2024 = vmatpush.bf16.msrb.mxu2 %v7207_v14  ;;  %9574 = vst [vmem:[#allocation193_spill] sm:$0xff] %v7224_v4 }
 0x20e   :  { %2037 = vmatpush.bf16.msrb.mxu3 %v7209_v26  ;;  %2011 = vmatpush.bf16.msrb.mxu1 %v7212_v31 }
 0x211   :  { %1999 = vmatpush.bf16.msrb.mxu0 %v7215_v3  ;;  %2025 = vmatpush.bf16.msrb.mxu2 %v7219_v40 }
 0x212   :  { %2038 = vmatpush.bf16.msrb.mxu3 %v7221_v39  ;;  %2012 = vmatpush.bf16.msrb.mxu1 %v7224_v4 }
 0x214   :  { %2000 = vmatmul.bf16.vlgmr.msrb.gmra.mxu0 %v7020_v18  ;;  %2026 = vmatmul.bf16.vlgmr.msrb.gmra.mxu2 %v7020_v18  ;;  %v9576_v18 = vld [vmem:[#allocation31_spill] sm:$0xff] }
 0x215   :  { %2113 = vmatpush.bf16.msra.mxu0 %v6393_v20  ;;  %2139 = vmatpush.bf16.msra.mxu2 %v6399_v36 }
 0x216   :  { %2039 = vmatmul.bf16.vlgmr.msrb.gmra.mxu3 %v9449_v15  ;;  %2126 = vmatpush.bf16.msra.mxu1 %v6395_v21 }
 0x217   :  { %2152 = vmatpush.bf16.msra.mxu3 %v6397_v35  ;;  %2013 = vmatmul.bf16.vlgmr.msrb.gmra.mxu1 %v9449_v15  ;;  %v9575_v15 = vld [vmem:[#allocation32_spill] sm:$0xff] }
 0x219   :  { %2114 = vmatpush.bf16.msra.mxu0 %v6403_v37  ;;  %2140 = vmatpush.bf16.msra.mxu2 %v6421_v52 }
 0x21a   :  { %2127 = vmatpush.bf16.msra.mxu1 %v6405_v38 }
 0x21b   :  { %2153 = vmatpush.bf16.msra.mxu3 %v6412_v46 }
 0x21d   :  { %2115 = vmatpush.bf16.msra.mxu0 %v6417_v50  ;;  %2141 = vmatpush.bf16.msra.mxu2 %v6427_v60 }
 0x21e   :  { %2128 = vmatpush.bf16.msra.mxu1 %v6419_v51 }
 0x21f   :  { %2154 = vmatpush.bf16.msra.mxu3 %v6424_v59 }
 0x221   :  { %2116 = vmatpush.bf16.msra.mxu0 %v6431_v63  ;;  %2142 = vmatpush.bf16.msra.mxu2 %v6445_v10 }
 0x222   :  { %2129 = vmatpush.bf16.msra.mxu1 %v6433_v0  ;;  %v9617_v0 = vld [vmem:[#allocation100_spill] sm:$0xff] }
 0x223   :  { %2155 = vmatpush.bf16.msra.mxu3 %v6443_v9  ;;  %v9596_v9 = vld [vmem:[#allocation80_spill] sm:$0xff] }
 0x225   :  { %2117 = vmatpush.bf16.msra.mxu0 %v6449_v11  ;;  %2143 = vmatpush.bf16.msra.mxu2 %v6459_v17 }
 0x226   :  { %2130 = vmatpush.bf16.msra.mxu1 %v6451_v12  ;;  %v9594_v12 = vld [vmem:[#allocation79_spill] sm:$0xff] }
 0x227   :  { %2156 = vmatpush.bf16.msra.mxu3 %v6463_v19  ;;  %v9590_v19 = vld [vmem:[#allocation72_spill] sm:$0xff] }
 0x229   :  { %2118 = vmatpush.bf16.msra.mxu0 %v6466_v25  ;;  %2144 = vmatpush.bf16.msra.mxu2 %v9575_v15  ;;  %v9606_v15 = vld [vmem:[#allocation91_spill] sm:$0xff] }
 0x22a   :  { %2131 = vmatpush.bf16.msra.mxu1 %v9576_v18  ;;  %v9589_v18 = vld [vmem:[#allocation70_spill] sm:$0xff]  ;;  %v9615_v25 = vld [vmem:[#allocation99_spill] sm:$0xff] }
 0x22b   :  { %2157 = vmatpush.bf16.msra.mxu3 %v9577_v32  ;;  %v9588_v32 = vld [vmem:[#allocation71_spill] sm:$0xff] }
 0x22d   :  { %2119 = vmatpush.bf16.msra.mxu0 %v9578_v57  ;;  %2145 = vmatpush.bf16.msra.mxu2 %v9579_v29  ;;  %v9591_v29 = vld [vmem:[#allocation73_spill] sm:$0xff] }
 0x22e   :  { %2132 = vmatpush.bf16.msra.mxu1 %v9580_v22  ;;  %v9593_v57 = vld [vmem:[#allocation49_spill] sm:$0xff] }
 0x22f   :  { %2158 = vmatpush.bf16.msra.mxu3 %v9581_v44 }
 0x230   :  { %v1342_v22 = vpop.f32.mrf.mxu0  ;;  %v1355_v44 = vpop.f32.mrf.mxu1 }
 0x231   :  { %2120 = vmatpush.bf16.msra.mxu0 %v9582_v34  ;;  %2146 = vmatpush.bf16.msra.mxu2 %v9583_v62  ;;  %v9592_v34 = vld [vmem:[#allocation48_spill] sm:$0xff] }
 0x232   :  { %2133 = vmatpush.bf16.msra.mxu1 %v9586_v16  ;;  %v1385_v62 = vadd.f32 %v1342_v22, %v9592_v34  ;;  %v9600_v34 = vld [vmem:[#allocation84_spill] sm:$0xff] }
 0x233   :  { %2159 = vmatpush.bf16.msra.mxu3 %v9587_v8 }
 0x234   :  { %v5355_v16 = vmul.f32 -1.442695, %v1385_v62  ;;  %v9602_v62 = vld [vmem:[#allocation87_spill] sm:$0xff] }
 0x235   :  { %2233 = vmatpush.bf16.msrb.mxu0 %v9584_v49  ;;  %2259 = vmatpush.bf16.msrb.mxu2 %v9585_v5  ;;  %v1386_v49 = vadd.f32 %v1355_v44, %v9593_v57  ;;  %v9595_v5 = vld [vmem:[#allocation74_spill] sm:$0xff]  ;;  %v9601_v57 = vld [vmem:[#allocation53_spill] sm:$0xff] }
 0x236   :  { %2246 = vmatpush.bf16.msrb.mxu1 %v9588_v32  ;;  %v9597_v32 = vld [vmem:[#allocation81_spill] sm:$0xff]  ;;  %5891 = vpow2.f32 %v5355_v16 }
 0x237   :  { %2272 = vmatpush.bf16.msrb.mxu3 %v9589_v18  ;;  %v5356_v8 = vmul.f32 -1.442695, %v1386_v49  ;;  %v9598_v18 = vld [vmem:[#allocation83_spill] sm:$0xff]  ;;  %v1381_v22 = vpop.f32.mrf.mxu3 }
 0x238   :  { %v1388_v44 = vadd.f32 %v1381_v22, %v9601_v57  ;;  %v9607_v22 = vld [vmem:[#allocation93_spill] sm:$0xff] }
 0x239   :  { %2234 = vmatpush.bf16.msrb.mxu0 %v9590_v19  ;;  %2260 = vmatpush.bf16.msrb.mxu2 %v9591_v29  ;;  %5893 = vpow2.f32 %v5356_v8  ;;  %v9599_v19 = vld [vmem:[#allocation82_spill] sm:$0xff]  ;;  %v1368_v29 = vpop.f32.mrf.mxu2 }
 0x23a   :  { %2247 = vmatpush.bf16.msrb.mxu1 %v9594_v12  ;;  %v1344_v12 = vpop.f32.mrf.mxu0  ;;  %v5357_v49 = vmul.f32 -1.442695, %v1388_v44  ;;  %v9605_v8 = vld [vmem:[#allocation90_spill] sm:$0xff] }
 0x23b   :  { %2273 = vmatpush.bf16.msrb.mxu3 %v9595_v5  ;;  %v1357_v5 = vpop.f32.mrf.mxu1  ;;  %v9608_v12 = vld [vmem:[#allocation92_spill] sm:$0xff]  ;;  %v9609_v44 = vld [vmem:[#allocation94_spill] sm:$0xff] }
 0x23c   :  { %v5892_v16 = vpop.eup %5891  ;;  %5895 = vpow2.f32 %v5357_v49  ;;  %v9612_v49 = vld [vmem:[#allocation96_spill] sm:$0xff] }
 0x23d   :  { %2235 = vmatpush.bf16.msrb.mxu0 %v9596_v9  ;;  %2261 = vmatpush.bf16.msrb.mxu2 %v9597_v32  ;;  %v9603_v9 = vld [vmem:[#allocation89_spill] sm:$0xff]  ;;  %v9604_v32 = vld [vmem:[#allocation88_spill] sm:$0xff] }
 0x23e   :  { %2248 = vmatpush.bf16.msrb.mxu1 %v9598_v18 }
 0x23f   :  { %2274 = vmatpush.bf16.msrb.mxu3 %v9599_v19  ;;  %v5894_v18 = vpop.eup %5893  ;;  %v1392_v19 = vadd.f32 1.0, %v5892_v16  ;;  %v1383_v57 = vpop.f32.mrf.mxu3 }
 0x241   :  { %2236 = vmatpush.bf16.msrb.mxu0 %v9600_v34  ;;  %2262 = vmatpush.bf16.msrb.mxu2 %v9602_v62  ;;  %v1411_v34 = vadd.f32 1.0, %v5894_v18  ;;  %5897 = vrcp.f32 %v1392_v19  ;;  %v1370_v5 = vpop.f32.mrf.mxu2  ;;  %v9611_v62 = vld [vmem:[#allocation97_spill] sm:$0xff]  ;;  %v9613_v18 = vld [vmem:[#allocation98_spill] sm:$0xff]  ;;  %v1404_v17 = vand.u32 2147483648, %v1392_v19  ;;  %vm1398_vm10 = vweird.f32 %v1392_v19 }
 0x242   :  { %2249 = vmatpush.bf16.msrb.mxu1 %v9603_v9  ;;  %v9610_v9 = vld [vmem:[#allocation95_spill] sm:$0xff] }
 0x243   :  { %2275 = vmatpush.bf16.msrb.mxu3 %v9604_v32  ;;  %5899 = vrcp.f32 %v1411_v34  ;;  %v1462_v32 = vpop.f32.mrf.mxu0  ;;  %v1421_v51 = vand.u32 2147483647, %v1411_v34  ;;  %vm1417_vm9 = vweird.f32 %v1411_v34 }
 0x245   :  { %2237 = vmatpush.bf16.msrb.mxu0 %v9605_v8  ;;  %2263 = vmatpush.bf16.msrb.mxu2 %v9606_v15  ;;  %v5896_v8 = vpop.eup %5895  ;;  %v9614_v15 = vld [vmem:[#allocation52_spill] sm:$0xff]  ;;  %vm1422_vm14 = vcmp.eq.f32.partialorder %v1421_v51, 8.507059e+37 }
 0x246   :  { %2250 = vmatpush.bf16.msrb.mxu1 %v9607_v22  ;;  %v7293_v16 = vadd.f32 1.0, %v5896_v8  ;;  %v9618_v8 = vld [vmem:[#allocation102_spill] sm:$0xff] }
 0x247   :  { %2276 = vmatpush.bf16.msrb.mxu3 %v9608_v12  ;;  %v5898_v22 = vpop.eup %5897  ;;  %v1387_v12 = vadd.f32 %v1368_v29, %v9614_v15  ;;  %v9619_v29 = vld [vmem:[#allocation103_spill] sm:$0xff] }
 0x248   :  { %v1394_v57 = vmul.f32 %v5898_v22, %v1392_v19  ;;  %5901 = vrcp.f32 %v7293_v16  ;;  %vm1399_vm7 = vweird.f32 %v5898_v22  ;;  %vm1437_vm0 = vweird.f32 %v7293_v16 }
 0x249   :  { %2238 = vmatpush.bf16.msrb.mxu0 %v9609_v44  ;;  %2264 = vmatpush.bf16.msrb.mxu2 %v9610_v9  ;;  %v5900_v5 = vpop.eup %5899  ;;  %v9616_v9 = vld [vmem:[#allocation101_spill] sm:$0xff]  ;;  %5903 = vtanh.f32 %v1387_v12  ;;  %vm1400_vm11 = vmor %vm1398_vm10, %vm1399_vm7 }
 0x24a   :  { %2251 = vmatpush.bf16.msrb.mxu1 %v9611_v62  ;;  %v1413_v44 = vmul.f32 %v5900_v5, %v1411_v34  ;;  %v1395_v62 = vsub.f32 1.0, %v1394_v57  ;;  %vm1418_vm8 = vweird.f32 %v5900_v5 }
 0x24b   :  { %2277 = vmatpush.bf16.msrb.mxu3 %v9612_v49  ;;  %v1488_v49 = vpop.f32.mrf.mxu2  ;;  %v1464_v15 = vpop.f32.mrf.mxu0  ;;  %vm1419_vm12 = vmor %vm1417_vm9, %vm1418_vm8 }
 0x24c   :  { %v1414_v59 = vsub.f32 1.0, %v1413_v44  ;;  %v1396_v11 = vmul.f32 %v5898_v22, %v1395_v62  ;;  %v1405_v44 = vor.u32 1.1754944e-38, %v1404_v17 }
 0x24d   :  { %2239 = vmatpush.bf16.msrb.mxu0 %v9613_v18  ;;  %2265 = vmatpush.bf16.msrb.mxu2 %v9615_v25  ;;  %v1402_v18 = vand.u32 2147483647, %v1392_v19  ;;  %v1423_v25 = vand.u32 2147483648, %v1411_v34 }
 0x24e   :  { %2252 = vmatpush.bf16.msrb.mxu1 %v9616_v9  ;;  %v1415_v46 = vmul.f32 %v5900_v5, %v1414_v59  ;;  %v9620_v9 = vld [vmem:[#allocation105_spill] sm:$0xff]  ;;  %v5902_v57 = vpop.eup %5901  ;;  %v1475_v59 = vpop.f32.mrf.mxu1 }
 0x24f   :  { %2278 = vmatpush.bf16.msrb.mxu3 %v9617_v0  ;;  %v9621_v0 = vld [vmem:[#allocation104_spill] sm:$0xff]  ;;  %v1433_v15 = vmul.f32 %v5902_v57, %v7293_v16  ;;  %v1424_v62 = vor.u32 1.1754944e-38, %v1423_v25  ;;  %vm1403_vm13 = vcmp.eq.f32.partialorder %v1402_v18, 8.507059e+37  ;;  %v9623_v25 = vld [vmem:[#allocation43_spill] sm:$0xff]  ;;  %vm1438_vm15 = vweird.f32 %v5902_v57 }
 0x250   :  { %v1416_v12 = vadd.f32 %v5900_v5, %v1415_v46  ;;  %vm1439_vm1 = vmor %vm1437_vm0, %vm1438_vm15 }
 0x251   :  { %2240 = vmatpush.bf16.msrb.mxu0 %v9618_v8  ;;  %2266 = vmatpush.bf16.msrb.mxu2 %v9619_v29  ;;  %v1397_v8 = vadd.f32 %v5898_v22, %v1396_v11  ;;  %v9622_v29 = vld [vmem:[#allocation42_spill] sm:$0xff]  ;;  %v1434_v35 = vsub.f32 1.0, %v1433_v15 }
 0x252   :  { %2253 = vmatpush.bf16.msrb.mxu1 %v9620_v9  ;;  %v1463_v10 = vadd.f32 %v1462_v32, %v9622_v29  ;;  %v5904_v9 = vpop.eup %5903 }
 0x253   :  { %2279 = vmatpush.bf16.msrb.mxu3 %v9621_v0  ;;  %v1401_v63 = vsel %vm1400_vm11, %v5898_v22, %v1397_v8  ;;  %v1420_v0 = vsel %vm1419_vm12, %v5900_v5, %v1416_v12  ;;  %v1490_v60 = vpop.f32.mrf.mxu2  ;;  %v1435_v17 = vmul.f32 %v5902_v57, %v1434_v35  ;;  %v1514_v39 = vpop.f32.mrf.mxu0  ;;  %v1489_v22 = vadd.f32 %v1488_v49, %v9623_v25 }
 0x254   :  { %v1406_v38 = vsel %vm1403_vm13, %v1405_v44, %v1401_v63  ;;  %v1476_v34 = vadd.f32 %v1475_v59, %v1463_v10  ;;  %v1425_v11 = vsel %vm1422_vm14, %v1424_v62, %v1420_v0  ;;  %v1501_v18 = vpop.f32.mrf.mxu3  ;;  %v1443_v63 = vand.u32 2147483648, %v7293_v16 }
 0x255   :  { %v1448_v19 = vmul.f32 %v5904_v9, %v1406_v38  ;;  %v1447_v46 = vmul.f32 %v1425_v11, %v6951_v30  ;;  %v1436_v51 = vadd.f32 %v5902_v57, %v1435_v17  ;;  %v1502_v0 = vadd.f32 %v1501_v18, %v1489_v22 }
 0x256   :  { %v5358_v50 = vmul.f32 -1.442695, %v1476_v34  ;;  %v1441_v38 = vand.u32 2147483647, %v7293_v16  ;;  %v1477_v35 = vpop.f32.mrf.mxu1  ;;  %v1444_v30 = vor.u32 1.1754944e-38, %v1443_v63 }
 0x257   :  { %v7308_v32 = vadd.f32 %v1448_v19, %v1447_v46  ;;  %v5359_v60 = vmul.f32 -1.442695, %v1502_v0  ;;  %v1440_v9 = vsel %vm1439_vm1, %v5902_v57, %v1436_v51  ;;  %v1515_v35 = vadd.f32 %v1514_v39, %v6964_v1 }
 0x258   :  { %5905 = vpow2.f32 %v5358_v50  ;;  %vm1442_vm2 = vcmp.eq.f32.partialorder %v1441_v38, 8.507059e+37 }
 0x259   :  { %5907 = vtanh.f32 %v7308_v32  ;;  %v1445_v44 = vsel %vm1442_vm2, %v1444_v30, %v1440_v9  ;;  %v7346_v9 = vld [vmem:[%s8932_s7] sm:$0xf] }
 0x25a   :  { %5909 = vpow2.f32 %v5359_v60 }
 0x25b   :  { %v1540_v50 = vpop.f32.mrf.mxu2  ;;  %v1516_v5 = vpop.f32.mrf.mxu0 }
 0x25c   :  { %v1503_v15 = vpop.f32.mrf.mxu3  ;;  %v1541_v46 = vadd.f32 %v1540_v50, %v6957_v54  ;;  %v9624_v50 = vld [vmem:[#allocation114_spill] sm:$0xff] }
 0x25e   :  { %v5906_v10 = vpop.eup %5905  ;;  %v1527_v16 = vpop.f32.mrf.mxu1 }
 0x25f   :  { %v7315_v49 = vadd.f32 1.0, %v5906_v10  ;;  %v5908_v8 = vpop.eup %5907  ;;  %v1528_v30 = vadd.f32 %v1527_v16, %v1515_v35 }
 0x260   :  { %v1451_v12 = vmul.f32 %v5908_v8, %v1445_v44  ;;  %v5910_v59 = vpop.eup %5909  ;;  %v7356_v44 = vperm.slane %v7346_v9, 0 }
 0x261   :  { %5911 = vrcp.f32 %v7315_v49  ;;  %v7320_v34 = vadd.f32 1.0, %v5910_v59  ;;  %v1572_v15 = vand.u32 2147483648, %v7315_v49  ;;  %vm1566_vm5 = vweird.f32 %v7315_v49 }
 0x262   :  { %v7318_v62 = vpack.c.bf16 %v1451_v12, %v1451_v12  ;;  %9625 = vst [vmem:[#allocation48_spill] sm:$0xff] %v7356_v44  ;;  %v1570_v59 = vand.u32 2147483647, %v7315_v49 }
 0x263   :  { %v1542_v57 = vpop.f32.mrf.mxu2  ;;  %5913 = vrcp.f32 %v7320_v34  ;;  %v1591_v39 = vand.u32 2147483648, %v7320_v34  ;;  %v1589_v16 = vand.u32 2147483647, %v7320_v34  ;;  %vm1585_vm6 = vweird.f32 %v7320_v34 }
 0x264   :  { %2121 = vmatmul.bf16.vlgmr.msra.gmra.mxu0 %v7318_v62  ;;  %2134 = vmatmul.bf16.vlgmr.msra.gmra.mxu1 %v7318_v62  ;;  %v1553_v17 = vpop.f32.mrf.mxu3  ;;  %v9626_v57 = vld [vmem:[#allocation116_spill] sm:$0xff]  ;;  %vm1571_vm10 = vcmp.eq.f32.partialorder %v1570_v59, 8.507059e+37 }
 0x265   :  { %2147 = vmatmul.bf16.vlgmr.msra.gmra.mxu2 %v7318_v62  ;;  %2160 = vmatmul.bf16.vlgmr.msra.gmra.mxu3 %v7318_v62  ;;  %v1554_v51 = vadd.f32 %v1553_v17, %v1541_v46  ;;  %vm1590_vm9 = vcmp.eq.f32.partialorder %v1589_v16, 8.507059e+37  ;;  %v9637_v16 = vld [vmem:[#allocation106_spill] sm:$0xff] }
 0x266   :  { %2285 = vmatpush.bf16.msra.mxu0 %v6751_v33  ;;  %2311 = vmatpush.bf16.msra.mxu2 %v6753_v24  ;;  %v1529_v18 = vpop.f32.mrf.mxu1 }
 0x267   :  { %v7326_v11 = vpop.eup %5911  ;;  %2298 = vmatpush.bf16.msra.mxu1 %v9489_v45  ;;  %2324 = vmatpush.bf16.msra.mxu3 %v9488_v43  ;;  %v5360_v63 = vmul.f32 -1.442695, %v1554_v51  ;;  %v9630_v51 = vld [vmem:[#allocation119_spill] sm:$0xff]  ;;  %v9631_v18 = vld [vmem:[#allocation118_spill] sm:$0xff] }
 0x268   :  { %v1562_v19 = vmul.f32 %v7326_v11, %v7315_v49  ;;  %vm1567_vm3 = vweird.f32 %v7326_v11 }
 0x269   :  { %v5914_v0 = vpop.eup %5913  ;;  %5915 = vpow2.f32 %v5360_v63  ;;  %vm7365_vm7 = vmor %vm1566_vm5, %vm1567_vm3  ;;  %v1592_v63 = vor.u32 1.1754944e-38, %v1591_v39 }
 0x26a   :  { %v1563_v22 = vsub.f32 1.0, %v1562_v19  ;;  %2286 = vmatpush.bf16.msra.mxu0 %v9492_v53  ;;  %2312 = vmatpush.bf16.msra.mxu2 %v9493_v28  ;;  %v1581_v60 = vmul.f32 %v5914_v0, %v7320_v34  ;;  %vm1586_vm4 = vweird.f32 %v5914_v0  ;;  %v9627_v19 = vld [vmem:[#allocation117_spill] sm:$0xff]  ;;  %5917 = vtanh.f32 %v1528_v30 }
 0x26b   :  { %2299 = vmatpush.bf16.msra.mxu1 %v9495_v61  ;;  %2325 = vmatpush.bf16.msra.mxu3 %v9494_v13  ;;  %vm1587_vm8 = vmor %vm1585_vm6, %vm1586_vm4  ;;  %v1573_v34 = vor.u32 1.1754944e-38, %v1572_v15  ;;  %v9636_v15 = vld [vmem:[#allocation122_spill] sm:$0xff] }
 0x26c   :  { %v1564_v38 = vmul.f32 %v7326_v11, %v1563_v22  ;;  %v1582_v10 = vsub.f32 1.0, %v1581_v60  ;;  %v1555_v8 = vpop.f32.mrf.mxu3 }
 0x26d   :  { %v9632_v8 = vld [vmem:[#allocation120_spill] sm:$0xff] }
 0x26e   :  { %2287 = vmatpush.bf16.msra.mxu0 %v9496_v41  ;;  %2313 = vmatpush.bf16.msra.mxu2 %v9497_v23  ;;  %v1565_v5 = vadd.f32 %v7326_v11, %v1564_v38  ;;  %v1583_v12 = vmul.f32 %v5914_v0, %v1582_v10 }
 0x26f   :  { %2300 = vmatpush.bf16.msra.mxu1 %v9499_v7  ;;  %2326 = vmatpush.bf16.msra.mxu3 %v9624_v50  ;;  %v5916_v46 = vpop.eup %5915 }
 0x270   :  { %v1584_v22 = vadd.f32 %v5914_v0, %v1583_v12  ;;  %v1569_v49 = vsel %vm7365_vm7, %v7326_v11, %v1565_v5  ;;  %v7374_v38 = vadd.f32 1.0, %v5916_v46  ;;  %v9633_v11 = vld [vmem:[#allocation121_spill] sm:$0xff]  ;;  %v7383_v46 = vperm.slane %v7346_v9, 1  ;;  %v5918_v59 = vpop.eup %5917 }
 0x271   :  { %v1949_v35 = vpop.f32.mrf.mxu0  ;;  %v1574_v5 = vsel %vm1571_vm10, %v1573_v34, %v1569_v49 }
 0x272   :  { %2288 = vmatpush.bf16.msra.mxu0 %v9626_v57  ;;  %2314 = vmatpush.bf16.msra.mxu2 %v9627_v19  ;;  %v1588_v60 = vsel %vm1587_vm8, %v5914_v0, %v1584_v22  ;;  %v1950_v10 = vadd.f32 %v1949_v35, %v7356_v44  ;;  %5919 = vrcp.f32 %v7374_v38  ;;  %9634 = vst [vmem:[#allocation49_spill] sm:$0xff] %v7383_v46  ;;  %v9635_v0 = vld [vmem:[#allocation123_spill] sm:$0xff]  ;;  %v9638_v35 = vld [vmem:[#allocation125_spill] sm:$0xff]  ;;  %vm1605_vm12 = vweird.f32 %v7374_v38 }
 0x273   :  { %2301 = vmatpush.bf16.msra.mxu1 %v9630_v51  ;;  %2327 = vmatpush.bf16.msra.mxu3 %v9631_v18  ;;  %v1593_v30 = vsel %vm1590_vm9, %v1592_v63, %v1588_v60  ;;  %v1616_v22 = vmul.f32 %v5918_v59, %v1574_v5  ;;  %v9643_v59 = vld [vmem:[#allocation129_spill] sm:$0xff] }
 0x274   :  { %2241 = vmatmul.bf16.vlgmr.msrb.gmra.mxu0 %v7318_v62  ;;  %v1962_v39 = vpop.f32.mrf.mxu1  ;;  %v1615_v17 = vmul.f32 %v1593_v30, %v9637_v16  ;;  %v9642_v16 = vld [vmem:[#allocation128_spill] sm:$0xff] }
 0x275   :  { %2267 = vmatmul.bf16.vlgmr.msrb.gmra.mxu2 %v7318_v62  ;;  %v1963_v12 = vadd.f32 %v1962_v39, %v1950_v10  ;;  %v9639_v10 = vld [vmem:[#allocation127_spill] sm:$0xff]  ;;  %v9640_v39 = vld [vmem:[#allocation126_spill] sm:$0xff] }
 0x276   :  { %2289 = vmatpush.bf16.msra.mxu0 %v9632_v8  ;;  %2315 = vmatpush.bf16.msra.mxu2 %v9633_v11  ;;  %v7393_v1 = vadd.f32 %v1616_v22, %v1615_v17  ;;  %v1611_v17 = vand.u32 2147483648, %v7374_v38  ;;  %v1609_v22 = vand.u32 2147483647, %v7374_v38  ;;  %v9672_v11 = vld [vmem:[#allocation154_spill] sm:$0xff]  ;;  %v9673_v8 = vld [vmem:[#allocation155_spill] sm:$0xff] }
 0x277   :  { %2302 = vmatpush.bf16.msra.mxu1 %v9635_v0  ;;  %2328 = vmatpush.bf16.msra.mxu3 %v9636_v15  ;;  %v1975_v63 = vpop.f32.mrf.mxu2  ;;  %v5617_v60 = vmul.f32 -1.442695, %v1963_v12 }
 0x278   :  { %v1976_v49 = vadd.f32 %v1975_v63, %v7383_v46  ;;  %v5920_v44 = vpop.eup %5919  ;;  %9641 = vst [vmem:[#allocation53_spill] sm:$0xff] %v7393_v1  ;;  %v9644_v46 = vld [vmem:[#allocation131_spill] sm:$0xff]  ;;  %vm1610_vm14 = vcmp.eq.f32.partialorder %v1609_v22, 8.507059e+37 }
 0x279   :  { %v1951_v15 = vpop.f32.mrf.mxu0  ;;  %v1601_v30 = vmul.f32 %v5920_v44, %v7374_v38  ;;  %5921 = vpow2.f32 %v5617_v60  ;;  %vm1606_vm11 = vweird.f32 %v5920_v44  ;;  %v9655_v22 = vld [vmem:[#allocation139_spill] sm:$0xff] }
 0x27a   :  { %2290 = vmatpush.bf16.msra.mxu0 %v9509_v6  ;;  %2316 = vmatpush.bf16.msra.mxu2 %v9638_v35  ;;  %v1988_v34 = vpop.f32.mrf.mxu3  ;;  %5923 = vtanh.f32 %v7393_v1  ;;  %vm1607_vm13 = vmor %vm1605_vm12, %vm1606_vm11 }
 0x27b   :  { %2303 = vmatpush.bf16.msra.mxu1 %v9639_v10  ;;  %2329 = vmatpush.bf16.msra.mxu3 %v9640_v39  ;;  %v1989_v5 = vadd.f32 %v1988_v34, %v1976_v49  ;;  %v1602_v12 = vsub.f32 1.0, %v1601_v30  ;;  %v9645_v10 = vld [vmem:[#allocation130_spill] sm:$0xff]  ;;  %v9646_v34 = vld [vmem:[#allocation132_spill] sm:$0xff]  ;;  %v9648_v30 = vld [vmem:[#allocation107_spill] sm:$0xff] }
 0x27c   :  { %v1964_v35 = vpop.f32.mrf.mxu1 }
 0x27d   :  { %v5618_v63 = vmul.f32 -1.442695, %v1989_v5  ;;  %v1603_v15 = vmul.f32 %v5920_v44, %v1602_v12  ;;  %v9647_v35 = vld [vmem:[#allocation133_spill] sm:$0xff]  ;;  %v9649_v5 = vld [vmem:[#allocation108_spill] sm:$0xff]  ;;  %v9650_v12 = vld [vmem:[#allocation135_spill] sm:$0xff] }
 0x27e   :  { %2291 = vmatpush.bf16.msra.mxu0 %v9642_v16  ;;  %2317 = vmatpush.bf16.msra.mxu2 %v9643_v59 }
 0x27f   :  { %2304 = vmatpush.bf16.msra.mxu1 %v9644_v46  ;;  %2330 = vmatpush.bf16.msra.mxu3 %v9645_v10  ;;  %5925 = vpow2.f32 %v5618_v63  ;;  %v1977_v49 = vpop.f32.mrf.mxu2  ;;  %v1604_v60 = vadd.f32 %v5920_v44, %v1603_v15  ;;  %v1612_v10 = vor.u32 1.1754944e-38, %v1611_v17  ;;  %v9651_v46 = vld [vmem:[#allocation134_spill] sm:$0xff]  ;;  %v5922_v63 = vpop.eup %5921 }
 0x280   :  { %v5924_v15 = vpop.eup %5923  ;;  %v7414_v17 = vadd.f32 1.0, %v5922_v63  ;;  %v9660_v63 = vld [vmem:[#allocation137_spill] sm:$0xff] }
 0x281   :  { %v1608_v49 = vsel %vm1607_vm13, %v5920_v44, %v1604_v60  ;;  %v9654_v44 = vld [vmem:[#allocation138_spill] sm:$0xff] }
 0x282   :  { %2292 = vmatpush.bf16.msra.mxu0 %v9646_v34  ;;  %2318 = vmatpush.bf16.msra.mxu2 %v9647_v35  ;;  %v1990_v1 = vpop.f32.mrf.mxu3  ;;  %v1613_v38 = vsel %vm1610_vm14, %v1612_v10, %v1608_v49  ;;  %v9652_v34 = vld [vmem:[#allocation112_spill] sm:$0xff]  ;;  %5927 = vrcp.f32 %v7414_v17  ;;  %v9657_v10 = vld [vmem:[#allocation109_spill] sm:$0xff]  ;;  %v9658_v60 = vld [vmem:[#allocation142_spill] sm:$0xff]  ;;  %vm2053_vm1 = vweird.f32 %v7414_v17 }
 0x283   :  { %2305 = vmatpush.bf16.msra.mxu1 %v9650_v12  ;;  %2331 = vmatpush.bf16.msra.mxu3 %v9651_v46  ;;  %v9653_v1 = vld [vmem:[#allocation113_spill] sm:$0xff]  ;;  %v9661_v49 = vld [vmem:[#allocation136_spill] sm:$0xff] }
 0x285   :  { %2293 = vmatmul.bf16.vlgmr.msra.gmra.mxu0 %v7318_v62  ;;  %2319 = vmatmul.bf16.vlgmr.msra.gmra.mxu2 %v7318_v62  ;;  %v5926_v35 = vpop.eup %5925  ;;  %v9656_v62 = vld [vmem:[#allocation110_spill] sm:$0xff] }
 0x286   :  { %2401 = vmatpush.bf16.msrb.mxu0 %v9648_v30  ;;  %2427 = vmatpush.bf16.msrb.mxu2 %v9649_v5  ;;  %v1619_v30 = vmul.f32 %v5924_v15, %v1613_v38  ;;  %v7418_v46 = vadd.f32 1.0, %v5926_v35  ;;  %v9659_v35 = vld [vmem:[#allocation143_spill] sm:$0xff] }
 0x288   :  { %v7416_v12 = vpack.c.bf16 %v1619_v30, %v1619_v30  ;;  %5929 = vrcp.f32 %v7418_v46  ;;  %v7432_v15 = vpop.eup %5927  ;;  %vm2072_vm2 = vweird.f32 %v7418_v46 }
 0x289   :  { %vm2054_vm15 = vweird.f32 %v7432_v15 }
 0x28a   :  { %2402 = vmatpush.bf16.msrb.mxu0 %v9652_v34  ;;  %2428 = vmatpush.bf16.msrb.mxu2 %v9653_v1  ;;  %vm7480_vm3 = vmor %vm2053_vm1, %vm2054_vm15 }
 0x28b   :  { %2254 = vmatmul.bf16.vlgmr.msrb.gmra.mxu1 %v7416_v12  ;;  %2280 = vmatmul.bf16.vlgmr.msrb.gmra.mxu3 %v7416_v12 }
 0x28c   :  { %2414 = vmatpush.bf16.msrb.mxu1 %v9656_v62  ;;  %2440 = vmatpush.bf16.msrb.mxu3 %v9657_v10  ;;  %v7439_v10 = vperm.slane %v7346_v9, 2 }
 0x28e   :  { %2403 = vmatpush.bf16.msrb.mxu0 %v9654_v44  ;;  %2429 = vmatpush.bf16.msrb.mxu2 %v9655_v22  ;;  %v7434_v38 = vpop.eup %5929  ;;  %v9662_v22 = vld [vmem:[#allocation146_spill] sm:$0xff]  ;;  %v9663_v44 = vld [vmem:[#allocation147_spill] sm:$0xff]  ;;  %9664 = vst [vmem:[#allocation52_spill] sm:$0xff] %v7439_v10 }
 0x28f   :  { %v2068_v1 = vmul.f32 %v7434_v38, %v7418_v46  ;;  %vm2073_vm0 = vweird.f32 %v7434_v38 }
 0x290   :  { %2415 = vmatpush.bf16.msrb.mxu1 %v9660_v63  ;;  %2441 = vmatpush.bf16.msrb.mxu3 %v9661_v49  ;;  %v9667_v63 = vld [vmem:[#allocation140_spill] sm:$0xff]  ;;  %v2049_v49 = vmul.f32 %v7432_v15, %v7414_v17  ;;  %vm7488_vm4 = vmor %vm2072_vm2, %vm2073_vm0 }
 0x291   :  { %v2001_v30 = vpop.f32.mrf.mxu0  ;;  %v2069_v6 = vsub.f32 1.0, %v2068_v1 }
 0x292   :  { %2404 = vmatpush.bf16.msrb.mxu0 %v9658_v60  ;;  %2430 = vmatpush.bf16.msrb.mxu2 %v9659_v35  ;;  %v7442_v60 = vperm.slane %v7346_v9, 3  ;;  %v9666_v35 = vld [vmem:[#allocation141_spill] sm:$0xff]  ;;  %v2002_v59 = vadd.f32 %v2001_v30, %v7439_v10  ;;  %v2050_v39 = vsub.f32 1.0, %v2049_v49 }
 0x294   :  { %v2014_v62 = vpop.f32.mrf.mxu1  ;;  %9665 = vst [vmem:[#allocation116_spill] sm:$0xff] %v7442_v60  ;;  %2416 = vmatpush.bf16.msrb.mxu1 %v9666_v35  ;;  %2442 = vmatpush.bf16.msrb.mxu3 %v9667_v63  ;;  %v9670_v35 = vld [vmem:[#allocation145_spill] sm:$0xff]  ;;  %v9671_v63 = vld [vmem:[#allocation144_spill] sm:$0xff]  ;;  %v2051_v1 = vmul.f32 %v7432_v15, %v2050_v39 }
 0x295   :  { %v2015_v30 = vadd.f32 %v2014_v62, %v2002_v59  ;;  %v9677_v59 = vld [vmem:[#allocation152_spill] sm:$0xff]  ;;  %v2059_v62 = vand.u32 2147483648, %v7414_v17 }
 0x296   :  { %2405 = vmatpush.bf16.msrb.mxu0 %v9662_v22  ;;  %2431 = vmatpush.bf16.msrb.mxu2 %v9663_v44  ;;  %v9668_v22 = vld [vmem:[#allocation150_spill] sm:$0xff]  ;;  %v9669_v44 = vld [vmem:[#allocation151_spill] sm:$0xff] }
 0x297   :  { %v2027_v34 = vpop.f32.mrf.mxu2 }
 0x298   :  { %v2028_v9 = vadd.f32 %v2027_v34, %v7442_v60  ;;  %2417 = vmatpush.bf16.msrb.mxu1 %v9670_v35  ;;  %2443 = vmatpush.bf16.msrb.mxu3 %v9671_v63  ;;  %v9674_v34 = vld [vmem:[#allocation149_spill] sm:$0xff]  ;;  %v2070_v63 = vmul.f32 %v7434_v38, %v2069_v6  ;;  %v2052_v6 = vadd.f32 %v7432_v15, %v2051_v1  ;;  %v2060_v35 = vor.u32 1.1754944e-38, %v2059_v62  ;;  %v9687_v60 = vld [vmem:[#allocation164_spill] sm:$0xff]  ;;  %v9692_v62 = vld [vmem:[#allocation175_spill] sm:$0xff] }
 0x299   :  { %v2040_v5 = vpop.f32.mrf.mxu3  ;;  %v2003_v16 = vpop.f32.mrf.mxu0 }
 0x29a   :  { %2406 = vmatpush.bf16.msrb.mxu0 %v9668_v22  ;;  %2432 = vmatpush.bf16.msrb.mxu2 %v9669_v44  ;;  %v2041_v0 = vadd.f32 %v2040_v5, %v2028_v9  ;;  %v9675_v16 = vld [vmem:[#allocation148_spill] sm:$0xff]  ;;  %v2071_v39 = vadd.f32 %v7434_v38, %v2070_v63  ;;  %v2057_v63 = vand.u32 2147483647, %v7414_v17  ;;  %v2076_v9 = vand.u32 2147483647, %v7418_v46 }
 0x29b   :  { %2306 = vmatmul.bf16.vlgmr.msra.gmra.mxu1 %v7416_v12  ;;  %2332 = vmatmul.bf16.vlgmr.msra.gmra.mxu3 %v7416_v12 }
 0x29c   :  { %v2016_v44 = vpop.f32.mrf.mxu1  ;;  %v5619_v10 = vmul.f32 -1.442695, %v2041_v0  ;;  %2418 = vmatpush.bf16.msrb.mxu1 %v9674_v34  ;;  %2444 = vmatpush.bf16.msrb.mxu3 %v9675_v16  ;;  %v9676_v0 = vld [vmem:[#allocation153_spill] sm:$0xff]  ;;  %vm2058_vm5 = vcmp.eq.f32.partialorder %v2057_v63, 8.507059e+37  ;;  %vm2077_vm6 = vcmp.eq.f32.partialorder %v2076_v9, 8.507059e+37 }
 0x29d   :  { %v2078_v44 = vand.u32 2147483648, %v7418_v46  ;;  %v2075_v46 = vsel %vm7488_vm4, %v7434_v38, %v2071_v39  ;;  %v9690_v38 = vld [vmem:[#allocation163_spill] sm:$0xff] }
 0x29e   :  { %2407 = vmatpush.bf16.msrb.mxu0 %v9672_v11  ;;  %2433 = vmatpush.bf16.msrb.mxu2 %v9673_v8  ;;  %5931 = vpow2.f32 %v5619_v10  ;;  %v9689_v10 = vld [vmem:[#allocation165_spill] sm:$0xff] }
 0x29f   :  { %v2029_v5 = vpop.f32.mrf.mxu2  ;;  %5933 = vtanh.f32 %v2015_v30  ;;  %v9680_v30 = vld [vmem:[#allocation167_spill] sm:$0xff]  ;;  %v2079_v34 = vor.u32 1.1754944e-38, %v2078_v44  ;;  %v9691_v44 = vld [vmem:[#allocation174_spill] sm:$0xff] }
 0x2a0   :  { %2419 = vmatpush.bf16.msrb.mxu1 %v9676_v0  ;;  %2445 = vmatpush.bf16.msrb.mxu3 %v9677_v59  ;;  %v9684_v59 = vld [vmem:[#allocation156_spill] sm:$0xff]  ;;  %v2056_v0 = vsel %vm7480_vm3, %v7432_v15, %v2052_v6  ;;  %v9698_v5 = vld [vmem:[#allocation173_spill] sm:$0xff] }
 0x2a1   :  { %v2042_v49 = vpop.f32.mrf.mxu3  ;;  %v9688_v15 = vld [vmem:[#allocation160_spill] sm:$0xff] }
 0x2a2   :  { %2408 = vmatpush.bf16.msrb.mxu0 %v7115_v2  ;;  %2434 = vmatpush.bf16.msrb.mxu2 %v7119_v48  ;;  %v9683_v49 = vld [vmem:[#allocation157_spill] sm:$0xff] }
 0x2a4   :  { %v5932_v1 = vpop.eup %5931  ;;  %2420 = vmatpush.bf16.msrb.mxu1 %v9683_v49  ;;  %2446 = vmatpush.bf16.msrb.mxu3 %v9684_v59  ;;  %v9686_v49 = vld [vmem:[#allocation171_spill] sm:$0xff]  ;;  %v2061_v59 = vsel %vm2058_vm5, %v2060_v35, %v2056_v0  ;;  %v9695_v35 = vld [vmem:[#allocation168_spill] sm:$0xff]  ;;  %v9696_v0 = vld [vmem:[#allocation178_spill] sm:$0xff] }
 0x2a5   :  { %2409 = vmatmul.bf16.vlgmr.msrb.gmra.mxu0 %v7416_v12  ;;  %2435 = vmatmul.bf16.vlgmr.msrb.gmra.mxu2 %v7416_v12  ;;  %v2086_v17 = vadd.f32 1.0, %v5932_v1  ;;  %v5934_v16 = vpop.eup %5933  ;;  %v9694_v1 = vld [vmem:[#allocation169_spill] sm:$0xff] }
 0x2a6   :  { %2453 = vmatpush.bf16.msra.mxu0 %v7123_v58  ;;  %2479 = vmatpush.bf16.msra.mxu2 %v7125_v42  ;;  %v2103_v6 = vmul.f32 %v5934_v16, %v2061_v59  ;;  %v9697_v16 = vld [vmem:[#allocation179_spill] sm:$0xff] }
 0x2a7   :  { %5935 = vrcp.f32 %v2086_v17  ;;  %vm2092_vm8 = vweird.f32 %v2086_v17 }
 0x2a8   :  { %2421 = vmatpush.bf16.msrb.mxu1 %v9687_v60  ;;  %2447 = vmatpush.bf16.msrb.mxu3 %v9688_v15 }
 0x2aa   :  { %2454 = vmatpush.bf16.msra.mxu0 %v7139_v47  ;;  %2480 = vmatpush.bf16.msra.mxu2 %v9680_v30  ;;  %v9685_v30 = vld [vmem:[#allocation170_spill] sm:$0xff]  ;;  %v2080_v47 = vsel %vm2077_vm6, %v2079_v34, %v2075_v46  ;;  %v2098_v46 = vand.u32 2147483648, %v2086_v17 }
 0x2ab   :  { %v2102_v39 = vmul.f32 0.0, %v2080_v47  ;;  %v9699_v47 = vld [vmem:[#allocation172_spill] sm:$0xff] }
 0x2ac   :  { %2466 = vmatpush.bf16.msra.mxu1 %v9689_v10  ;;  %2492 = vmatpush.bf16.msra.mxu3 %v9690_v38 }
 0x2ad   :  { %v5936_v63 = vpop.eup %5935  ;;  %v7508_v9 = vadd.f32 %v2103_v6, %v2102_v39  ;;  %v2096_v6 = vand.u32 2147483647, %v2086_v17  ;;  %v9700_v39 = vld [vmem:[#allocation183_spill] sm:$0xff] }
 0x2ae   :  { %2455 = vmatpush.bf16.msra.mxu0 %v9685_v30  ;;  %2481 = vmatpush.bf16.msra.mxu2 %v9686_v49  ;;  %v2088_v34 = vmul.f32 %v5936_v63, %v2086_v17  ;;  %vm2093_vm7 = vweird.f32 %v5936_v63  ;;  %v9705_v17 = vld [vmem:[#allocation180_spill] sm:$0xff] }
 0x2af   :  { %9693 = vst [vmem:[#allocation117_spill] sm:$0xff] %v7508_v9  ;;  %5937 = vtanh.f32 %v7508_v9  ;;  %vm2094_vm9 = vmor %vm2092_vm8, %vm2093_vm7  ;;  %vm2097_vm10 = vcmp.eq.f32.partialorder %v2096_v6, 8.507059e+37  ;;  %v9714_v6 = vld [vmem:[#allocation16_spill] sm:$0xff] }
 0x2b0   :  { %2467 = vmatpush.bf16.msra.mxu1 %v9694_v1  ;;  %2493 = vmatpush.bf16.msra.mxu3 %v9695_v35  ;;  %v2089_v59 = vsub.f32 1.0, %v2088_v34  ;;  %v7522_v35 = vld [vmem:[%s8933_s8] sm:$0xff]  ;;  %v2099_v1 = vor.u32 1.1754944e-38, %v2098_v46 }
 0x2b1   :  { %9701 = vst [vmem:[#allocation106_spill] sm:$0xff] %v7522_v35  ;;  %v2107_v10 = vperm.slane %v7522_v35, 0  ;;  %v9713_v46 = vld [vmem:[#allocation25_spill] sm:$0xff] }
 0x2b2   :  { %2456 = vmatpush.bf16.msra.mxu0 %v9691_v44  ;;  %2482 = vmatpush.bf16.msra.mxu2 %v9692_v62  ;;  %v2090_v38 = vmul.f32 %v5936_v63, %v2089_v59 }
 0x2b4   :  { %2468 = vmatpush.bf16.msra.mxu1 %v9698_v5  ;;  %2494 = vmatpush.bf16.msra.mxu3 %v9699_v47  ;;  %v2091_v34 = vadd.f32 %v5936_v63, %v2090_v38  ;;  %v9702_v5 = vld [vmem:[#allocation177_spill] sm:$0xff]  ;;  %v9703_v47 = vld [vmem:[#allocation176_spill] sm:$0xff] }
 0x2b5   :  { %v5938_v15 = vpop.eup %5937 }
 0x2b6   :  { %2457 = vmatpush.bf16.msra.mxu0 %v9696_v0  ;;  %2483 = vmatpush.bf16.msra.mxu2 %v9697_v16  ;;  %v2095_v59 = vsel %vm2094_vm9, %v5936_v63, %v2091_v34  ;;  %v9710_v63 = vld [vmem:[#allocation12_spill] sm:$0xff]  ;;  %v9715_v34 = vld [vmem:[#allocation18_spill] sm:$0xff] }
 0x2b7   :  { %v2100_v60 = vsel %vm2097_vm10, %v2099_v1, %v2095_v59  ;;  %v9712_v1 = vld [vmem:[#allocation22_spill] sm:$0xff] }
 0x2b8   :  { %2469 = vmatpush.bf16.msra.mxu1 %v9702_v5  ;;  %2495 = vmatpush.bf16.msra.mxu3 %v9703_v47  ;;  %v2106_v9 = vmul.f32 %v5938_v15, %v2100_v60  ;;  %v9706_v60 = vld [vmem:[#allocation184_spill] sm:$0xff]  ;;  %v9716_v59 = vld [vmem:[#allocation26_spill] sm:$0xff]  ;;  %v9769_v47 = vld [vmem:[#allocation103_spill] sm:$0xff] }
 0x2b9   :  { %v9707_v15 = vld [vmem:[#allocation192_spill] sm:$0xff] }
 0x2ba   :  { %2458 = vmatpush.bf16.msra.mxu0 %v7191_v55  ;;  %2484 = vmatpush.bf16.msra.mxu2 %v9700_v39  ;;  %v9704_v39 = vld [vmem:[#allocation181_spill] sm:$0xff]  ;;  %v2108_v38 = vmul.f32 %v2107_v10, %v2106_v9  ;;  %v2400_v5 = vpack.c.bf16 %v2106_v9, %v2106_v9  ;;  %v9711_v9 = vld [vmem:[#allocation15_spill] sm:$0xff] }
 0x2bb   :  { %v9709_v10 = vld [vmem:[#allocation21_spill] sm:$0xff] }
 0x2bc   :  { %2470 = vmatpush.bf16.msra.mxu1 %v9704_v39  ;;  %2496 = vmatpush.bf16.msra.mxu3 %v9705_v17  ;;  %v9742_v17 = vld [vmem:[#allocation71_spill] sm:$0xff] }
 0x2bd   :  { %2109 = vadd.xlane.f32.xlu0 %v2108_v38  ;;  %2422 = vmatmul.bf16.vlgmr.msrb.gmra.mxu1 %v2400_v5  ;;  %v9717_v38 = vld [vmem:[#allocation28_spill] sm:$0xff] }
 0x2be   :  { %2459 = vmatpush.bf16.msra.mxu0 %v7203_v56  ;;  %2485 = vmatpush.bf16.msra.mxu2 %v7207_v14 }
 0x2bf   :  { %2448 = vmatmul.bf16.vlgmr.msrb.gmra.mxu3 %v2400_v5 }
 0x2c0   :  { %2471 = vmatpush.bf16.msra.mxu1 %v7200_v27  ;;  %2497 = vmatpush.bf16.msra.mxu3 %v9706_v60  ;;  %v9738_v27 = vld [vmem:[#allocation72_spill] sm:$0xff] }
 0x2c2   :  { %2460 = vmatpush.bf16.msra.mxu0 %v7215_v3  ;;  %2486 = vmatpush.bf16.msra.mxu2 %v7219_v40  ;;  %v9772_v40 = vld [vmem:[#allocation100_spill] sm:$0xff] }
 0x2c4   :  { %2472 = vmatpush.bf16.msra.mxu1 %v7212_v31  ;;  %2498 = vmatpush.bf16.msra.mxu3 %v7209_v26  ;;  %v9723_v26 = vld [vmem:[#allocation27_spill] sm:$0xff] }
 0x2c5   :  { %2461 = vmatmul.bf16.vlgmr.msra.gmra.mxu0 %v7416_v12  ;;  %2487 = vmatmul.bf16.vlgmr.msra.gmra.mxu2 %v7416_v12  ;;  %v9708_v12 = vld [vmem:[#allocation17_spill] sm:$0xff]  ;;  %v9727_v31 = vld [vmem:[#allocation31_spill] sm:$0xff] }
 0x2c6   :  { %2574 = vmatpush.bf16.msrb.mxu0 %v6393_v20  ;;  %2600 = vmatpush.bf16.msrb.mxu2 %v6399_v36 }
 0x2c8   :  { %2473 = vmatpush.bf16.msra.mxu1 %v7224_v4  ;;  %2499 = vmatpush.bf16.msra.mxu3 %v9707_v15  ;;  %v9719_v15 = vld [vmem:[#allocation23_spill] sm:$0xff]  ;;  %v9722_v4 = vld [vmem:[#allocation24_spill] sm:$0xff] }
 0x2ca   :  { %2575 = vmatpush.bf16.msrb.mxu0 %v6403_v37  ;;  %2601 = vmatpush.bf16.msrb.mxu2 %v6421_v52 }
 0x2cc   :  { %2587 = vmatpush.bf16.msrb.mxu1 %v6395_v21  ;;  %2613 = vmatpush.bf16.msrb.mxu3 %v9710_v63  ;;  %v9718_v21 = vld [vmem:[#allocation20_spill] sm:$0xff]  ;;  %v9720_v63 = vld [vmem:[#allocation30_spill] sm:$0xff] }
 0x2cd   :  { %2474 = vmatmul.bf16.vlgmr.msra.gmra.mxu1 %v2400_v5 }
 0x2ce   :  { %2576 = vmatpush.bf16.msrb.mxu0 %v9708_v12  ;;  %2602 = vmatpush.bf16.msrb.mxu2 %v9709_v10 }
 0x2cf   :  { %2500 = vmatmul.bf16.vlgmr.msra.gmra.mxu3 %v2400_v5  ;;  %v9724_v5 = vld [vmem:[#allocation34_spill] sm:$0xff] }
 0x2d0   :  { %2588 = vmatpush.bf16.msrb.mxu1 %v9711_v9  ;;  %2614 = vmatpush.bf16.msrb.mxu3 %v9714_v6  ;;  %v9721_v9 = vld [vmem:[#allocation32_spill] sm:$0xff] }
 0x2d1   :  { %v9725_v6 = vld [vmem:[#allocation36_spill] sm:$0xff] }
 0x2d2   :  { %2577 = vmatpush.bf16.msrb.mxu0 %v9712_v1  ;;  %2603 = vmatpush.bf16.msrb.mxu2 %v9713_v46  ;;  %v9737_v46 = vld [vmem:[#allocation55_spill] sm:$0xff]  ;;  %v9739_v1 = vld [vmem:[#allocation73_spill] sm:$0xff] }
 0x2d4   :  { %2589 = vmatpush.bf16.msrb.mxu1 %v9715_v34  ;;  %2615 = vmatpush.bf16.msrb.mxu3 %v9718_v21  ;;  %v9726_v34 = vld [vmem:[#allocation29_spill] sm:$0xff]  ;;  %v9729_v21 = vld [vmem:[#allocation40_spill] sm:$0xff] }
 0x2d6   :  { %2578 = vmatpush.bf16.msrb.mxu0 %v9716_v59  ;;  %2604 = vmatpush.bf16.msrb.mxu2 %v9717_v38  ;;  %v9728_v38 = vld [vmem:[#allocation38_spill] sm:$0xff] }
 0x2d8   :  { %2590 = vmatpush.bf16.msrb.mxu1 %v9719_v15  ;;  %2616 = vmatpush.bf16.msrb.mxu3 %v9722_v4  ;;  %v9730_v15 = vld [vmem:[#allocation68_spill] sm:$0xff]  ;;  %v9733_v4 = vld [vmem:[#allocation35_spill] sm:$0xff] }
 0x2da   :  { %2579 = vmatpush.bf16.msrb.mxu0 %v9720_v63  ;;  %2605 = vmatpush.bf16.msrb.mxu2 %v9721_v9  ;;  %v9731_v63 = vld [vmem:[#allocation69_spill] sm:$0xff] }
 0x2db   :  { %v9732_v9 = vld [vmem:[#allocation33_spill] sm:$0xff] }
 0x2dc   :  { %2591 = vmatpush.bf16.msrb.mxu1 %v9723_v26  ;;  %2617 = vmatpush.bf16.msrb.mxu3 %v9726_v34  ;;  %v9734_v26 = vld [vmem:[#allocation44_spill] sm:$0xff] }
 0x2de   :  { %2580 = vmatpush.bf16.msrb.mxu0 %v9724_v5  ;;  %2606 = vmatpush.bf16.msrb.mxu2 %v9725_v6  ;;  %v9735_v5 = vld [vmem:[#allocation54_spill] sm:$0xff]  ;;  %v9736_v6 = vld [vmem:[#allocation45_spill] sm:$0xff] }
 0x2df   :  { %v346_v59 = vadd.f32 %v9735_v5, %v9734_v26  ;;  %v375_v34 = vadd.f32 %v9737_v46, %v9736_v6  ;;  %v9743_v5 = vld [vmem:[#allocation80_spill] sm:$0xff]  ;;  %v9744_v46 = vld [vmem:[#allocation81_spill] sm:$0xff]  ;;  %v9745_v6 = vld [vmem:[#allocation51_spill] sm:$0xff] }
 0x2e0   :  { %2592 = vmatpush.bf16.msrb.mxu1 %v9727_v31  ;;  %2618 = vmatpush.bf16.msrb.mxu3 %v9732_v9  ;;  %v9746_v26 = vld [vmem:[#allocation57_spill] sm:$0xff] }
 0x2e1   :  { %v2122_v60 = vpop.f32.mrf.mxu0  ;;  %v2135_v31 = vpop.f32.mrf.mxu1 }
 0x2e2   :  { %2581 = vmatpush.bf16.msrb.mxu0 %v9728_v38  ;;  %2607 = vmatpush.bf16.msrb.mxu2 %v9729_v21  ;;  %v2165_v38 = vadd.f32 %v2122_v60, %v346_v59  ;;  %v2166_v21 = vadd.f32 %v2135_v31, %v375_v34  ;;  %v9747_v31 = vld [vmem:[#allocation41_spill] sm:$0xff]  ;;  %v9748_v59 = vld [vmem:[#allocation70_spill] sm:$0xff] }
 0x2e4   :  { %2593 = vmatpush.bf16.msrb.mxu1 %v9733_v4  ;;  %v5620_v9 = vmul.f32 -1.442695, %v2165_v38  ;;  %v5621_v4 = vmul.f32 -1.442695, %v2166_v21 }
 0x2e6   :  { %2694 = vmatpush.bf16.msra.mxu0 %v9730_v15  ;;  %2720 = vmatpush.bf16.msra.mxu2 %v9731_v63  ;;  %v9740_v15 = vld [vmem:[#allocation37_spill] sm:$0xff]  ;;  %v9741_v63 = vld [vmem:[#allocation39_spill] sm:$0xff]  ;;  %5939 = vpow2.f32 %v5620_v9 }
 0x2e7   :  { %2619 = vmatpush.bf16.msrb.mxu3 %v9740_v15  ;;  %5941 = vpow2.f32 %v5621_v4  ;;  %v9750_v15 = vld [vmem:[#allocation84_spill] sm:$0xff]  ;;  %v9751_v9 = vld [vmem:[#allocation87_spill] sm:$0xff] }
 0x2e8   :  { %2594 = vmatpush.bf16.msrb.mxu1 %v9741_v63  ;;  %v2148_v60 = vpop.f32.mrf.mxu2  ;;  %v2161_v34 = vpop.f32.mrf.mxu3  ;;  %v9749_v63 = vld [vmem:[#allocation79_spill] sm:$0xff] }
 0x2e9   :  { %v2124_v38 = vpop.f32.mrf.mxu0 }
 0x2ea   :  { %2695 = vmatpush.bf16.msra.mxu0 %v9738_v27  ;;  %2721 = vmatpush.bf16.msra.mxu2 %v9739_v1  ;;  %v433_v27 = vadd.f32 %v9746_v26, %v9745_v6  ;;  %v9752_v1 = vld [vmem:[#allocation74_spill] sm:$0xff]  ;;  %v9753_v26 = vld [vmem:[#allocation83_spill] sm:$0xff] }
 0x2eb   :  { %2620 = vmatpush.bf16.msrb.mxu3 %v9747_v31  ;;  %v9754_v31 = vld [vmem:[#allocation90_spill] sm:$0xff] }
 0x2ec   :  { %2707 = vmatpush.bf16.msra.mxu1 %v9742_v17  ;;  %v2168_v21 = vadd.f32 %v2161_v34, %v433_v27  ;;  %v2137_v17 = vpop.f32.mrf.mxu1  ;;  %v9756_v34 = vld [vmem:[#allocation82_spill] sm:$0xff] }
 0x2ee   :  { %2696 = vmatpush.bf16.msra.mxu0 %v9743_v5  ;;  %2722 = vmatpush.bf16.msra.mxu2 %v9744_v46  ;;  %v5622_v46 = vmul.f32 -1.442695, %v2168_v21  ;;  %v5940_v5 = vpop.eup %5939  ;;  %v9757_v21 = vld [vmem:[#allocation89_spill] sm:$0xff] }
 0x2ef   :  { %2733 = vmatpush.bf16.msra.mxu3 %v9748_v59  ;;  %v5942_v4 = vpop.eup %5941  ;;  %v2172_v6 = vadd.f32 1.0, %v5940_v5 }
 0x2f0   :  { %2708 = vmatpush.bf16.msra.mxu1 %v9749_v63  ;;  %5943 = vpow2.f32 %v5622_v46  ;;  %v2191_v59 = vadd.f32 1.0, %v5942_v4  ;;  %v9755_v63 = vld [vmem:[#allocation91_spill] sm:$0xff]  ;;  %v2150_v27 = vpop.f32.mrf.mxu2  ;;  %v2163_v17 = vpop.f32.mrf.mxu3  ;;  %v9760_v46 = vld [vmem:[#allocation50_spill] sm:$0xff] }
 0x2f1   :  { %5945 = vrcp.f32 %v2172_v6  ;;  %v7596_v38 = vpop.f32.mrf.mxu0  ;;  %v9763_v27 = vld [vmem:[#allocation93_spill] sm:$0xff]  ;;  %v2182_v35 = vand.u32 2147483647, %v2172_v6  ;;  %vm2178_vm13 = vweird.f32 %v2172_v6 }
 0x2f2   :  { %2697 = vmatpush.bf16.msra.mxu0 %v9750_v15  ;;  %2723 = vmatpush.bf16.msra.mxu2 %v9751_v9  ;;  %5947 = vrcp.f32 %v2191_v59  ;;  %v9764_v15 = vld [vmem:[#allocation98_spill] sm:$0xff]  ;;  %vm2197_vm14 = vweird.f32 %v2191_v59 }
 0x2f3   :  { %2734 = vmatpush.bf16.msra.mxu3 %v9752_v1  ;;  %v9758_v1 = vld [vmem:[#allocation94_spill] sm:$0xff]  ;;  %vm2183_vm1 = vcmp.eq.f32.partialorder %v2182_v35, 8.507059e+37  ;;  %v9774_v35 = vld [vmem:[#allocation104_spill] sm:$0xff] }
 0x2f4   :  { %2709 = vmatpush.bf16.msra.mxu1 %v9753_v26  ;;  %v9759_v26 = vld [vmem:[#allocation95_spill] sm:$0xff] }
 0x2f6   :  { %2698 = vmatpush.bf16.msra.mxu0 %v9754_v31  ;;  %2724 = vmatpush.bf16.msra.mxu2 %v9755_v63  ;;  %v5944_v5 = vpop.eup %5943  ;;  %v9761_v31 = vld [vmem:[#allocation56_spill] sm:$0xff] }
 0x2f7   :  { %2735 = vmatpush.bf16.msra.mxu3 %v9756_v34  ;;  %v404_v4 = vadd.f32 %v9761_v31, %v9760_v46  ;;  %v7602_v9 = vadd.f32 1.0, %v5944_v5  ;;  %v9762_v63 = vld [vmem:[#allocation88_spill] sm:$0xff]  ;;  %v5946_v17 = vpop.eup %5945  ;;  %v9767_v5 = vld [vmem:[#allocation97_spill] sm:$0xff] }
 0x2f8   :  { %2710 = vmatpush.bf16.msra.mxu1 %v9757_v21  ;;  %v5948_v21 = vpop.eup %5947  ;;  %v2174_v39 = vmul.f32 %v5946_v17, %v2172_v6  ;;  %v7609_v12 = vpop.f32.mrf.mxu2  ;;  %v9766_v31 = vld [vmem:[#allocation92_spill] sm:$0xff]  ;;  %vm2179_vm11 = vweird.f32 %v5946_v17 }
 0x2f9   :  { %v2167_v34 = vadd.f32 %v2148_v60, %v404_v4  ;;  %5949 = vrcp.f32 %v7602_v9  ;;  %v2244_v60 = vpop.f32.mrf.mxu0  ;;  %v9768_v4 = vld [vmem:[#allocation102_spill] sm:$0xff]  ;;  %vm2198_vm12 = vweird.f32 %v5948_v21  ;;  %vm2180_vm15 = vmor %vm2178_vm13, %vm2179_vm11  ;;  %vm2217_vm4 = vweird.f32 %v7602_v9 }
 0x2fa   :  { %2699 = vmatpush.bf16.msra.mxu0 %v9758_v1  ;;  %2725 = vmatpush.bf16.msra.mxu2 %v9759_v26  ;;  %v9765_v1 = vld [vmem:[#allocation99_spill] sm:$0xff]  ;;  %v2193_v26 = vmul.f32 %v5948_v21, %v2191_v59  ;;  %v2175_v10 = vsub.f32 1.0, %v2174_v39  ;;  %v2201_v39 = vand.u32 2147483647, %v2191_v59  ;;  %vm2199_vm0 = vmor %vm2197_vm14, %vm2198_vm12 }
 0x2fb   :  { %2736 = vmatpush.bf16.msra.mxu3 %v9762_v63  ;;  %5951 = vtanh.f32 %v2167_v34  ;;  %v2203_v63 = vand.u32 2147483648, %v2191_v59  ;;  %v9773_v59 = vld [vmem:[#allocation105_spill] sm:$0xff] }
 0x2fc   :  { %2711 = vmatpush.bf16.msra.mxu1 %v9763_v27  ;;  %v2194_v46 = vsub.f32 1.0, %v2193_v26  ;;  %v2184_v27 = vand.u32 2147483648, %v2172_v6  ;;  %v9771_v26 = vld [vmem:[#allocation101_spill] sm:$0xff]  ;;  %vm2202_vm2 = vcmp.eq.f32.partialorder %v2201_v39, 8.507059e+37 }
 0x2fe   :  { %2700 = vmatpush.bf16.msra.mxu0 %v9764_v15  ;;  %2726 = vmatpush.bf16.msra.mxu2 %v9765_v1  ;;  %v2176_v15 = vmul.f32 %v5946_v17, %v2175_v10  ;;  %v2195_v1 = vmul.f32 %v5948_v21, %v2194_v46  ;;  %v2185_v34 = vor.u32 1.1754944e-38, %v2184_v27 }
 0x2ff   :  { %2737 = vmatpush.bf16.msra.mxu3 %v9766_v31  ;;  %v5950_v52 = vpop.eup %5949  ;;  %v9770_v31 = vld [vmem:[#allocation96_spill] sm:$0xff] }
 0x300   :  { %2712 = vmatpush.bf16.msra.mxu1 %v9767_v5  ;;  %v2177_v37 = vadd.f32 %v5946_v17, %v2176_v15  ;;  %v2196_v60 = vadd.f32 %v5948_v21, %v2195_v1  ;;  %v2213_v10 = vmul.f32 %v5950_v52, %v7602_v9  ;;  %v2204_v5 = vor.u32 1.1754944e-38, %v2203_v63 }
 0x301   :  { %v5952_v46 = vpop.eup %5951  ;;  %vm2218_vm3 = vweird.f32 %v5950_v52 }
 0x302   :  { %2701 = vmatpush.bf16.msra.mxu0 %v9768_v4  ;;  %2727 = vmatpush.bf16.msra.mxu2 %v9769_v47  ;;  %v2181_v4 = vsel %vm2180_vm15, %v5946_v17, %v2177_v37  ;;  %v2200_v36 = vsel %vm2199_vm0, %v5948_v21, %v2196_v60  ;;  %v2214_v15 = vsub.f32 1.0, %v2213_v10  ;;  %vm2219_vm5 = vmor %vm2217_vm4, %vm2218_vm3 }
 0x303   :  { %2738 = vmatpush.bf16.msra.mxu3 %v9770_v31  ;;  %v2186_v47 = vsel %vm2183_vm1, %v2185_v34, %v2181_v4  ;;  %v2205_v6 = vsel %vm2202_vm2, %v2204_v5, %v2200_v36  ;;  %v2270_v31 = vpop.f32.mrf.mxu2  ;;  %v2223_v36 = vand.u32 2147483648, %v7602_v9 }
 0x304   :  { %2713 = vmatpush.bf16.msra.mxu1 %v9771_v26  ;;  %v2228_v20 = vmul.f32 %v5952_v46, %v2186_v47  ;;  %v2227_v1 = vmul.f32 %v2205_v6, %v7308_v32  ;;  %v2215_v27 = vmul.f32 %v5950_v52, %v2214_v15  ;;  %v7621_v26 = vpop.f32.mrf.mxu0  ;;  %v2221_v47 = vand.u32 2147483647, %v7602_v9 }
 0x305   :  { %v2243_v32 = vadd.f32 %v7596_v38, %v9622_v29  ;;  %v2269_v9 = vadd.f32 %v7609_v12, %v9623_v25 }
 0x306   :  { %v7623_v63 = vadd.f32 %v2228_v20, %v2227_v1  ;;  %v2216_v37 = vadd.f32 %v5950_v52, %v2215_v27  ;;  %v2224_v20 = vor.u32 1.1754944e-38, %v2223_v36  ;;  %vm2222_vm6 = vcmp.eq.f32.partialorder %v2221_v47, 8.507059e+37 }
 0x307   :  { %2739 = vmatpush.bf16.msra.mxu3 %v9772_v40 }
 0x308   :  { %2714 = vmatpush.bf16.msra.mxu1 %v9773_v59  ;;  %5953 = vtanh.f32 %v7623_v63  ;;  %v2220_v21 = vsel %vm2219_vm5, %v5950_v52, %v2216_v37  ;;  %v2255_v31 = vpop.f32.mrf.mxu1 }
 0x309   :  { %v2256_v5 = vadd.f32 %v2255_v31, %v2243_v32  ;;  %v2225_v34 = vsel %vm2222_vm6, %v2224_v20, %v2220_v21 }
 0x30b   :  { %2740 = vmatpush.bf16.msra.mxu3 %v9774_v35  ;;  %v2320_v17 = vpop.f32.mrf.mxu2  ;;  %v5623_v10 = vmul.f32 -1.442695, %v2256_v5 }
 0x30c   :  { %v2296_v4 = vpop.f32.mrf.mxu0  ;;  %v2321_v20 = vadd.f32 %v2320_v17, %v6957_v54 }
 0x30d   :  { %5955 = vpow2.f32 %v5623_v10  ;;  %v9775_v10 = vld [vmem:[#allocation120_spill] sm:$0xff] }
 0x30e   :  { %v5954_v39 = vpop.eup %5953  ;;  %v2281_v52 = vpop.f32.mrf.mxu3 }
 0x30f   :  { %v2231_v60 = vmul.f32 %v5954_v39, %v2225_v34  ;;  %v2282_v15 = vadd.f32 %v2281_v52, %v2269_v9  ;;  %v9776_v9 = vld [vmem:[#allocation121_spill] sm:$0xff] }
 0x310   :  { %v2257_v38 = vpop.f32.mrf.mxu1 }
 0x311   :  { %v7632_v46 = vpack.c.bf16 %v2231_v60, %v2231_v60  ;;  %v5624_v1 = vmul.f32 -1.442695, %v2282_v15  ;;  %v9778_v38 = vld [vmem:[#allocation122_spill] sm:$0xff] }
 0x313   :  { %v2322_v6 = vpop.f32.mrf.mxu2  ;;  %2582 = vmatmul.bf16.vlgmr.msrb.gmra.mxu0 %v7632_v46  ;;  %2595 = vmatmul.bf16.vlgmr.msrb.gmra.mxu1 %v7632_v46  ;;  %v5956_v12 = vpop.eup %5955  ;;  %5957 = vpow2.f32 %v5624_v1  ;;  %v9779_v1 = vld [vmem:[#allocation46_spill] sm:$0xff] }
 0x314   :  { %2608 = vmatmul.bf16.vlgmr.msrb.gmra.mxu2 %v7632_v46  ;;  %2621 = vmatmul.bf16.vlgmr.msrb.gmra.mxu3 %v7632_v46  ;;  %v7644_v27 = vadd.f32 1.0, %v5956_v12  ;;  %v9777_v6 = vld [vmem:[#allocation123_spill] sm:$0xff]  ;;  %v2295_v12 = vadd.f32 %v7621_v26, %v9779_v1  ;;  %v9783_v26 = vld [vmem:[#allocation126_spill] sm:$0xff] }
 0x315   :  { %2746 = vmatpush.bf16.msrb.mxu0 %v6751_v33  ;;  %2772 = vmatpush.bf16.msrb.mxu2 %v6753_v24 }
 0x316   :  { %2759 = vmatpush.bf16.msrb.mxu1 %v9489_v45  ;;  %2785 = vmatpush.bf16.msrb.mxu3 %v9488_v43  ;;  %5959 = vrcp.f32 %v7644_v27  ;;  %v2283_v37 = vpop.f32.mrf.mxu3  ;;  %vm2346_vm9 = vweird.f32 %v7644_v27 }
 0x318   :  { %v2307_v36 = vpop.f32.mrf.mxu1 }
 0x319   :  { %2747 = vmatpush.bf16.msrb.mxu0 %v9492_v53  ;;  %2773 = vmatpush.bf16.msrb.mxu2 %v9493_v28  ;;  %v5958_v47 = vpop.eup %5957 }
 0x31a   :  { %2760 = vmatpush.bf16.msrb.mxu1 %v9495_v61  ;;  %2786 = vmatpush.bf16.msrb.mxu3 %v9494_v13  ;;  %v2359_v21 = vadd.f32 1.0, %v5958_v47 }
 0x31c   :  { %v7655_v32 = vpop.eup %5959  ;;  %5961 = vrcp.f32 %v2359_v21  ;;  %vm2365_vm10 = vweird.f32 %v2359_v21 }
 0x31d   :  { %2748 = vmatpush.bf16.msrb.mxu0 %v9496_v41  ;;  %2774 = vmatpush.bf16.msrb.mxu2 %v9497_v23  ;;  %v2342_v31 = vmul.f32 %v7655_v32, %v7644_v27  ;;  %vm2347_vm7 = vweird.f32 %v7655_v32 }
 0x31e   :  { %2761 = vmatpush.bf16.msrb.mxu1 %v9499_v7  ;;  %2787 = vmatpush.bf16.msrb.mxu3 %v9624_v50  ;;  %v2333_v4 = vpop.f32.mrf.mxu3  ;;  %vm7686_vm11 = vmor %vm2346_vm9, %vm2347_vm7 }
 0x31f   :  { %v2343_v39 = vsub.f32 1.0, %v2342_v31  ;;  %v2334_v34 = vadd.f32 %v2333_v4, %v2321_v20  ;;  %v2308_v31 = vadd.f32 %v2307_v36, %v2295_v12  ;;  %v9780_v4 = vld [vmem:[#allocation124_spill] sm:$0xff]  ;;  %v2369_v36 = vand.u32 2147483647, %v2359_v21 }
 0x320   :  { %v2309_v17 = vpop.f32.mrf.mxu1  ;;  %v2350_v12 = vand.u32 2147483647, %v7644_v27 }
 0x321   :  { %2749 = vmatpush.bf16.msrb.mxu0 %v9626_v57  ;;  %2775 = vmatpush.bf16.msrb.mxu2 %v9627_v19  ;;  %v5625_v60 = vmul.f32 -1.442695, %v2334_v34  ;;  %v2344_v15 = vmul.f32 %v7655_v32, %v2343_v39  ;;  %v9781_v34 = vld [vmem:[#allocation125_spill] sm:$0xff]  ;;  %v2371_v17 = vand.u32 2147483648, %v2359_v21  ;;  %vm2370_vm13 = vcmp.eq.f32.partialorder %v2369_v36, 8.507059e+37 }
 0x322   :  { %v7662_v5 = vpop.f32.mrf.mxu0  ;;  %2762 = vmatpush.bf16.msrb.mxu1 %v9630_v51  ;;  %2788 = vmatpush.bf16.msrb.mxu3 %v9631_v18  ;;  %v5962_v52 = vpop.eup %5961  ;;  %vm2351_vm14 = vcmp.eq.f32.partialorder %v2350_v12, 8.507059e+37 }
 0x323   :  { %2702 = vmatmul.bf16.vlgmr.msra.gmra.mxu0 %v7632_v46  ;;  %v2361_v37 = vmul.f32 %v5962_v52, %v2359_v21  ;;  %5963 = vpow2.f32 %v5625_v60  ;;  %v2345_v39 = vadd.f32 %v7655_v32, %v2344_v15  ;;  %vm2366_vm8 = vweird.f32 %v5962_v52  ;;  %v9789_v21 = vld [vmem:[#allocation130_spill] sm:$0xff] }
 0x324   :  { %2728 = vmatmul.bf16.vlgmr.msra.gmra.mxu2 %v7632_v46  ;;  %5965 = vtanh.f32 %v2308_v31  ;;  %vm2367_vm12 = vmor %vm2365_vm10, %vm2366_vm8 }
 0x325   :  { %2750 = vmatpush.bf16.msrb.mxu0 %v9775_v10  ;;  %2776 = vmatpush.bf16.msrb.mxu2 %v9776_v9  ;;  %v2362_v20 = vsub.f32 1.0, %v2361_v37  ;;  %v2352_v37 = vand.u32 2147483648, %v7644_v27  ;;  %v9788_v27 = vld [vmem:[#allocation131_spill] sm:$0xff]  ;;  %v9792_v10 = vld [vmem:[#allocation53_spill] sm:$0xff] }
 0x326   :  { %2763 = vmatpush.bf16.msrb.mxu1 %v9777_v6  ;;  %2789 = vmatpush.bf16.msrb.mxu3 %v9778_v38  ;;  %v2335_v38 = vpop.f32.mrf.mxu3  ;;  %v9782_v6 = vld [vmem:[#allocation127_spill] sm:$0xff] }
 0x327   :  { %v2363_v60 = vmul.f32 %v5962_v52, %v2362_v20  ;;  %v9786_v38 = vld [vmem:[#allocation128_spill] sm:$0xff]  ;;  %v2372_v20 = vor.u32 1.1754944e-38, %v2371_v17  ;;  %v9791_v17 = vld [vmem:[#allocation133_spill] sm:$0xff] }
 0x328   :  { %v7675_v47 = vpop.f32.mrf.mxu2 }
 0x329   :  { %2751 = vmatpush.bf16.msrb.mxu0 %v9780_v4  ;;  %2777 = vmatpush.bf16.msrb.mxu2 %v9781_v34  ;;  %v5964_v1 = vpop.eup %5963  ;;  %v2353_v4 = vor.u32 1.1754944e-38, %v2352_v37 }
 0x32a   :  { %v2412_v54 = vpop.f32.mrf.mxu0  ;;  %2764 = vmatpush.bf16.msrb.mxu1 %v9782_v6  ;;  %2790 = vmatpush.bf16.msrb.mxu3 %v9783_v26  ;;  %v9787_v26 = vld [vmem:[#allocation129_spill] sm:$0xff]  ;;  %v2349_v6 = vsel %vm7686_vm11, %v7655_v32, %v2345_v39  ;;  %v2379_v34 = vadd.f32 1.0, %v5964_v1  ;;  %v9793_v32 = vld [vmem:[#allocation107_spill] sm:$0xff]  ;;  %v9794_v1 = vld [vmem:[#allocation108_spill] sm:$0xff]  ;;  %v5966_v39 = vpop.eup %5965 }
 0x32b   :  { %v2364_v54 = vadd.f32 %v5962_v52, %v2363_v60 }
 0x32c   :  { %5967 = vrcp.f32 %v2379_v34  ;;  %vm2385_vm0 = vweird.f32 %v2379_v34 }
 0x32d   :  { %2752 = vmatpush.bf16.msrb.mxu0 %v9786_v38  ;;  %2778 = vmatpush.bf16.msrb.mxu2 %v9787_v26  ;;  %v2368_v9 = vsel %vm2367_vm12, %v5962_v52, %v2364_v54  ;;  %v2354_v38 = vsel %vm2351_vm14, %v2353_v4, %v2349_v6  ;;  %v9790_v26 = vld [vmem:[#allocation132_spill] sm:$0xff]  ;;  %v9796_v52 = vld [vmem:[#allocation134_spill] sm:$0xff]  ;;  %v2391_v54 = vand.u32 2147483648, %v2379_v34 }
 0x32e   :  { %2765 = vmatpush.bf16.msrb.mxu1 %v9788_v27  ;;  %2791 = vmatpush.bf16.msrb.mxu3 %v9789_v21  ;;  %v2373_v31 = vsel %vm2370_vm13, %v2372_v20, %v2368_v9  ;;  %v9795_v21 = vld [vmem:[#allocation135_spill] sm:$0xff]  ;;  %v2396_v37 = vmul.f32 %v5966_v39, %v2354_v38  ;;  %v9798_v4 = vld [vmem:[#allocation112_spill] sm:$0xff]  ;;  %v9800_v20 = vld [vmem:[#allocation138_spill] sm:$0xff] }
 0x32f   :  { %v2395_v15 = vmul.f32 %v2373_v31, %v9792_v10  ;;  %v9799_v10 = vld [vmem:[#allocation113_spill] sm:$0xff]  ;;  %v9801_v31 = vld [vmem:[#allocation139_spill] sm:$0xff] }
 0x330   :  { %v2438_v60 = vpop.f32.mrf.mxu2 }
 0x331   :  { %2753 = vmatpush.bf16.msrb.mxu0 %v9790_v26  ;;  %2779 = vmatpush.bf16.msrb.mxu2 %v9791_v17  ;;  %v7706_v6 = vadd.f32 %v2396_v37, %v2395_v15  ;;  %v2389_v60 = vand.u32 2147483647, %v2379_v34 }
 0x332   :  { %2766 = vmatpush.bf16.msrb.mxu1 %v9795_v21  ;;  %2792 = vmatpush.bf16.msrb.mxu3 %v9796_v52  ;;  %v5968_v9 = vpop.eup %5967 }
 0x333   :  { %9797 = vst [vmem:[#allocation54_spill] sm:$0xff] %v7706_v6  ;;  %v2381_v36 = vmul.f32 %v5968_v9, %v2379_v34  ;;  %5969 = vtanh.f32 %v7706_v6  ;;  %vm2386_vm15 = vweird.f32 %v5968_v9  ;;  %v9804_v6 = vld [vmem:[#allocation143_spill] sm:$0xff]  ;;  %vm2390_vm2 = vcmp.eq.f32.partialorder %v2389_v60, 8.507059e+37 }
 0x334   :  { %2754 = vmatmul.bf16.vlgmr.msrb.gmra.mxu0 %v7632_v46  ;;  %2780 = vmatmul.bf16.vlgmr.msrb.gmra.mxu2 %v7632_v46  ;;  %v9802_v46 = vld [vmem:[#allocation48_spill] sm:$0xff]  ;;  %vm2387_vm1 = vmor %vm2385_vm0, %vm2386_vm15  ;;  %v9806_v34 = vld [vmem:[#allocation147_spill] sm:$0xff] }
 0x335   :  { %2862 = vmatpush.bf16.msra.mxu0 %v9793_v32  ;;  %2888 = vmatpush.bf16.msra.mxu2 %v9794_v1  ;;  %v2382_v12 = vsub.f32 1.0, %v2381_v36  ;;  %v2411_v15 = vadd.f32 %v7662_v5, %v9802_v46  ;;  %v9803_v36 = vld [vmem:[#allocation142_spill] sm:$0xff] }
 0x336   :  { %v9805_v5 = vld [vmem:[#allocation146_spill] sm:$0xff] }
 0x337   :  { %v2383_v38 = vmul.f32 %v5968_v9, %v2382_v12 }
 0x339   :  { %2863 = vmatpush.bf16.msra.mxu0 %v9798_v4  ;;  %2889 = vmatpush.bf16.msra.mxu2 %v9799_v10  ;;  %v2384_v39 = vadd.f32 %v5968_v9, %v2383_v38  ;;  %v2392_v10 = vor.u32 1.1754944e-38, %v2391_v54  ;;  %v5970_v12 = vpop.eup %5969  ;;  %v9807_v54 = vld [vmem:[#allocation49_spill] sm:$0xff] }
 0x33a   :  { %v2423_v37 = vpop.f32.mrf.mxu1 }
 0x33b   :  { %v2424_v4 = vadd.f32 %v2423_v37, %v2411_v15  ;;  %v2388_v52 = vsel %vm2387_vm1, %v5968_v9, %v2384_v39  ;;  %v2437_v15 = vadd.f32 %v7675_v47, %v9807_v54  ;;  %v9811_v39 = vld [vmem:[#allocation137_spill] sm:$0xff] }
 0x33d   :  { %2864 = vmatpush.bf16.msra.mxu0 %v9800_v20  ;;  %2890 = vmatpush.bf16.msra.mxu2 %v9801_v31  ;;  %v2393_v31 = vsel %vm2390_vm2, %v2392_v10, %v2388_v52  ;;  %v5626_v21 = vmul.f32 -1.442695, %v2424_v4  ;;  %v9809_v10 = vld [vmem:[#allocation110_spill] sm:$0xff] }
 0x33e   :  { %v2399_v1 = vmul.f32 %v5970_v12, %v2393_v31  ;;  %v9812_v12 = vld [vmem:[#allocation136_spill] sm:$0xff] }
 0x33f   :  { %5971 = vpow2.f32 %v5626_v21  ;;  %v9808_v21 = vld [vmem:[#allocation151_spill] sm:$0xff] }
 0x340   :  { %v7721_v38 = vpack.c.bf16 %v2399_v1, %v2399_v1  ;;  %v9810_v1 = vld [vmem:[#allocation109_spill] sm:$0xff] }
 0x341   :  { %2865 = vmatpush.bf16.msra.mxu0 %v9803_v36  ;;  %2891 = vmatpush.bf16.msra.mxu2 %v9804_v6 }
 0x342   :  { %v7717_v20 = vpop.f32.mrf.mxu0  ;;  %v2449_v37 = vpop.f32.mrf.mxu3  ;;  %2715 = vmatmul.bf16.vlgmr.msra.gmra.mxu1 %v7721_v38  ;;  %2741 = vmatmul.bf16.vlgmr.msra.gmra.mxu3 %v7721_v38 }
 0x343   :  { %v2450_v46 = vadd.f32 %v2449_v37, %v2437_v15  ;;  %v2425_v9 = vpop.f32.mrf.mxu1  ;;  %2875 = vmatpush.bf16.msra.mxu1 %v9809_v10  ;;  %2901 = vmatpush.bf16.msra.mxu3 %v9810_v1  ;;  %v9816_v1 = vld [vmem:[#allocation166_spill] sm:$0xff]  ;;  %v9817_v10 = vld [vmem:[#allocation167_spill] sm:$0xff] }
 0x345   :  { %2866 = vmatpush.bf16.msra.mxu0 %v9805_v5  ;;  %2892 = vmatpush.bf16.msra.mxu2 %v9806_v34  ;;  %v5627_v52 = vmul.f32 -1.442695, %v2450_v46  ;;  %v5972_v31 = vpop.eup %5971 }
 0x346   :  { %v7731_v47 = vadd.f32 1.0, %v5972_v31  ;;  %v9814_v31 = vld [vmem:[#allocation140_spill] sm:$0xff] }
 0x347   :  { %5973 = vpow2.f32 %v5627_v52  ;;  %2876 = vmatpush.bf16.msra.mxu1 %v9811_v39  ;;  %2902 = vmatpush.bf16.msra.mxu3 %v9812_v12 }
 0x348   :  { %v2488_v60 = vpop.f32.mrf.mxu2  ;;  %5975 = vrcp.f32 %v7731_v47  ;;  %vm2514_vm5 = vweird.f32 %v7731_v47 }
 0x349   :  { %2867 = vmatpush.bf16.msra.mxu0 %v9668_v22  ;;  %2893 = vmatpush.bf16.msra.mxu2 %v9808_v21 }
 0x34a   :  { %v2464_v4 = vpop.f32.mrf.mxu0  ;;  %v2451_v46 = vpop.f32.mrf.mxu3 }
 0x34b   :  { %v2475_v15 = vpop.f32.mrf.mxu1  ;;  %v9813_v4 = vld [vmem:[#allocation141_spill] sm:$0xff]  ;;  %2903 = vmatpush.bf16.msra.mxu3 %v9814_v31  ;;  %v9819_v31 = vld [vmem:[#allocation144_spill] sm:$0xff] }
 0x34c   :  { %2877 = vmatpush.bf16.msra.mxu1 %v9813_v4 }
 0x34d   :  { %2868 = vmatpush.bf16.msra.mxu0 %v9672_v11  ;;  %2894 = vmatpush.bf16.msra.mxu2 %v9673_v8  ;;  %v5974_v9 = vpop.eup %5973 }
 0x34e   :  { %v2527_v52 = vadd.f32 1.0, %v5974_v9  ;;  %v7744_v39 = vpop.eup %5975 }
 0x34f   :  { %v2510_v46 = vmul.f32 %v7744_v39, %v7731_v47  ;;  %2904 = vmatpush.bf16.msra.mxu3 %v9819_v31  ;;  %vm2515_vm3 = vweird.f32 %v7744_v39 }
 0x350   :  { %v2490_v37 = vpop.f32.mrf.mxu2  ;;  %5977 = vrcp.f32 %v2527_v52  ;;  %vm2533_vm6 = vweird.f32 %v2527_v52  ;;  %vm7773_vm7 = vmor %vm2514_vm5, %vm2515_vm3 }
 0x351   :  { %2869 = vmatpush.bf16.msra.mxu0 %v7115_v2  ;;  %2895 = vmatpush.bf16.msra.mxu2 %v7119_v48  ;;  %v9815_v37 = vld [vmem:[#allocation116_spill] sm:$0xff]  ;;  %v2511_v9 = vsub.f32 1.0, %v2510_v46  ;;  %v9820_v46 = vld [vmem:[#allocation149_spill] sm:$0xff] }
 0x352   :  { %v2489_v12 = vadd.f32 %v2488_v60, %v9815_v37  ;;  %v2501_v4 = vpop.f32.mrf.mxu3  ;;  %2767 = vmatmul.bf16.vlgmr.msrb.gmra.mxu1 %v7721_v38  ;;  %2793 = vmatmul.bf16.vlgmr.msrb.gmra.mxu3 %v7721_v38 }
 0x353   :  { %v2477_v48 = vpop.f32.mrf.mxu1  ;;  %v2512_v37 = vmul.f32 %v7744_v39, %v2511_v9 }
 0x354   :  { %2870 = vmatmul.bf16.vlgmr.msra.gmra.mxu0 %v7721_v38  ;;  %2896 = vmatmul.bf16.vlgmr.msra.gmra.mxu2 %v7721_v38 }
 0x355   :  { %2914 = vmatpush.bf16.msrb.mxu0 %v7123_v58  ;;  %2940 = vmatpush.bf16.msrb.mxu2 %v7125_v42  ;;  %v9818_v42 = vld [vmem:[#allocation145_spill] sm:$0xff]  ;;  %v2502_v58 = vadd.f32 %v2501_v4, %v2489_v12 }
 0x356   :  { %2878 = vmatpush.bf16.msra.mxu1 %v9818_v42  ;;  %v5978_v60 = vpop.eup %5977  ;;  %v9822_v42 = vld [vmem:[#allocation52_spill] sm:$0xff] }
 0x357   :  { %v5628_v2 = vmul.f32 -1.442695, %v2502_v58  ;;  %v2463_v12 = vadd.f32 %v7717_v20, %v9822_v42  ;;  %v2529_v48 = vmul.f32 %v5978_v60, %v2527_v52  ;;  %v2539_v58 = vand.u32 2147483648, %v2527_v52 }
 0x358   :  { %vm2534_vm4 = vweird.f32 %v5978_v60  ;;  %v2537_v20 = vand.u32 2147483647, %v2527_v52  ;;  %v9828_v52 = vld [vmem:[#allocation156_spill] sm:$0xff] }
 0x359   :  { %2915 = vmatpush.bf16.msrb.mxu0 %v9816_v1  ;;  %2941 = vmatpush.bf16.msrb.mxu2 %v9817_v10  ;;  %v9821_v10 = vld [vmem:[#allocation148_spill] sm:$0xff]  ;;  %5979 = vpow2.f32 %v5628_v2  ;;  %v2530_v4 = vsub.f32 1.0, %v2529_v48  ;;  %v2476_v31 = vadd.f32 %v2475_v15, %v2463_v12  ;;  %v2520_v2 = vand.u32 2147483648, %v7731_v47  ;;  %vm2535_vm8 = vmor %vm2533_vm6, %vm2534_vm4 }
 0x35a   :  { %2879 = vmatpush.bf16.msra.mxu1 %v9820_v46  ;;  %2905 = vmatpush.bf16.msra.mxu3 %v9821_v10  ;;  %v2503_v9 = vpop.f32.mrf.mxu3  ;;  %v9823_v46 = vld [vmem:[#allocation153_spill] sm:$0xff]  ;;  %v9824_v10 = vld [vmem:[#allocation152_spill] sm:$0xff]  ;;  %v2518_v15 = vand.u32 2147483647, %v7731_v47  ;;  %vm2538_vm9 = vcmp.eq.f32.partialorder %v2537_v20, 8.507059e+37 }
 0x35b   :  { %5981 = vtanh.f32 %v2476_v31  ;;  %v9827_v47 = vld [vmem:[#allocation157_spill] sm:$0xff] }
 0x35c   :  { %vm2519_vm10 = vcmp.eq.f32.partialorder %v2518_v15, 8.507059e+37  ;;  %v9836_v20 = vld [vmem:[#allocation169_spill] sm:$0xff]  ;;  %v9837_v15 = vld [vmem:[#allocation168_spill] sm:$0xff] }
 0x35d   :  { %2916 = vmatpush.bf16.msrb.mxu0 %v9685_v30  ;;  %2942 = vmatpush.bf16.msrb.mxu2 %v9686_v49  ;;  %v2513_v49 = vadd.f32 %v7744_v39, %v2512_v37  ;;  %v2531_v30 = vmul.f32 %v5978_v60, %v2530_v4  ;;  %v2540_v4 = vor.u32 1.1754944e-38, %v2539_v58  ;;  %v9830_v58 = vld [vmem:[#allocation117_spill] sm:$0xff]  ;;  %v9831_v37 = vld [vmem:[#allocation164_spill] sm:$0xff] }
 0x35e   :  { %2880 = vmatpush.bf16.msra.mxu1 %v9823_v46  ;;  %2906 = vmatpush.bf16.msra.mxu3 %v9824_v10  ;;  %v2521_v46 = vor.u32 1.1754944e-38, %v2520_v2  ;;  %v9834_v2 = vld [vmem:[#allocation163_spill] sm:$0xff] }
 0x35f   :  { %v5980_v12 = vpop.eup %5979  ;;  %v2532_v48 = vadd.f32 %v5978_v60, %v2531_v30  ;;  %v2517_v9 = vsel %vm7773_vm7, %v7744_v39, %v2513_v49  ;;  %v9832_v49 = vld [vmem:[#allocation160_spill] sm:$0xff] }
 0x360   :  { %v2547_v10 = vadd.f32 1.0, %v5980_v12  ;;  %v2522_v31 = vsel %vm2519_vm10, %v2521_v46, %v2517_v9  ;;  %v9833_v12 = vld [vmem:[#allocation165_spill] sm:$0xff] }
 0x361   :  { %2917 = vmatpush.bf16.msrb.mxu0 %v9691_v44  ;;  %2943 = vmatpush.bf16.msrb.mxu2 %v9692_v62  ;;  %v2536_v42 = vsel %vm2535_vm8, %v5978_v60, %v2532_v48  ;;  %v5982_v39 = vpop.eup %5981  ;;  %v9912_v62 = vld [vmem:[#allocation93_spill] sm:$0xff] }
 0x362   :  { %2881 = vmatpush.bf16.msra.mxu1 %v9827_v47  ;;  %2907 = vmatpush.bf16.msra.mxu3 %v9828_v52  ;;  %v2541_v30 = vsel %vm2538_vm9, %v2540_v4, %v2536_v42  ;;  %5983 = vrcp.f32 %v2547_v10  ;;  %v2564_v60 = vmul.f32 %v5982_v39, %v2522_v31  ;;  %v9838_v4 = vld [vmem:[#allocation191_spill] sm:$0xff]  ;;  %v9839_v31 = vld [vmem:[#allocation10_spill] sm:$0xff]  ;;  %v9841_v39 = vld [vmem:[#allocation173_spill] sm:$0xff]  ;;  %vm2553_vm12 = vweird.f32 %v2547_v10 }
 0x365   :  { %2918 = vmatpush.bf16.msrb.mxu0 %v9696_v0  ;;  %2944 = vmatpush.bf16.msrb.mxu2 %v9697_v16  ;;  %v9829_v16 = vld [vmem:[#allocation183_spill] sm:$0xff]  ;;  %v2563_v0 = vmul.f32 %v2541_v30, %v9830_v58  ;;  %v2559_v30 = vand.u32 2147483648, %v2547_v10  ;;  %v9840_v58 = vld [vmem:[#allocation13_spill] sm:$0xff] }
 0x366   :  { %2882 = vmatpush.bf16.msra.mxu1 %v9831_v37  ;;  %2908 = vmatpush.bf16.msra.mxu3 %v9832_v49  ;;  %v9845_v49 = vld [vmem:[#allocation177_spill] sm:$0xff] }
 0x367   :  { %v7793_v46 = vadd.f32 %v2564_v60, %v2563_v0  ;;  %v9842_v0 = vld [vmem:[#allocation172_spill] sm:$0xff] }
 0x368   :  { %v5984_v42 = vpop.eup %5983 }
 0x369   :  { %2919 = vmatpush.bf16.msrb.mxu0 %v7191_v55  ;;  %2945 = vmatpush.bf16.msrb.mxu2 %v9829_v16  ;;  %9835 = vst [vmem:[#allocation55_spill] sm:$0xff] %v7793_v46  ;;  %v2549_v48 = vmul.f32 %v5984_v42, %v2547_v10  ;;  %5985 = vtanh.f32 %v7793_v46  ;;  %vm2554_vm11 = vweird.f32 %v5984_v42 }
 0x36a   :  { %2927 = vmatpush.bf16.msrb.mxu1 %v9833_v12  ;;  %2953 = vmatpush.bf16.msrb.mxu3 %v9834_v2  ;;  %vm2555_vm13 = vmor %vm2553_vm12, %vm2554_vm11  ;;  %v9843_v2 = vld [vmem:[#allocation14_spill] sm:$0xff]  ;;  %v9844_v12 = vld [vmem:[#allocation19_spill] sm:$0xff] }
 0x36b   :  { %v2550_v9 = vsub.f32 1.0, %v2549_v48  ;;  %v2560_v48 = vor.u32 1.1754944e-38, %v2559_v30 }
 0x36d   :  { %2920 = vmatpush.bf16.msrb.mxu0 %v7203_v56  ;;  %2946 = vmatpush.bf16.msrb.mxu2 %v7207_v14  ;;  %v2551_v60 = vmul.f32 %v5984_v42, %v2550_v9  ;;  %v9847_v9 = vld [vmem:[#allocation106_spill] sm:$0xff] }
 0x36e   :  { %2928 = vmatpush.bf16.msrb.mxu1 %v9836_v20  ;;  %2954 = vmatpush.bf16.msrb.mxu3 %v9837_v15  ;;  %v2557_v15 = vand.u32 2147483647, %v2547_v10  ;;  %v2568_v37 = vperm.slane %v9847_v9, 1  ;;  %v9849_v10 = vld [vmem:[#allocation21_spill] sm:$0xff] }
 0x36f   :  { %v2552_v20 = vadd.f32 %v5984_v42, %v2551_v60  ;;  %v5986_v46 = vpop.eup %5985  ;;  %v9861_v9 = vld [vmem:[#allocation193_spill] sm:$0xff] }
 0x370   :  { %vm2558_vm14 = vcmp.eq.f32.partialorder %v2557_v15, 8.507059e+37  ;;  %v9854_v15 = vld [vmem:[#allocation184_spill] sm:$0xff] }
 0x371   :  { %2921 = vmatpush.bf16.msrb.mxu0 %v7215_v3  ;;  %2947 = vmatpush.bf16.msrb.mxu2 %v9838_v4 }
 0x372   :  { %2929 = vmatpush.bf16.msrb.mxu1 %v9841_v39  ;;  %2955 = vmatpush.bf16.msrb.mxu3 %v9842_v0  ;;  %v9846_v39 = vld [vmem:[#allocation176_spill] sm:$0xff]  ;;  %v2556_v0 = vsel %vm2555_vm13, %v5984_v42, %v2552_v20  ;;  %v9852_v42 = vld [vmem:[#allocation22_spill] sm:$0xff]  ;;  %v9853_v20 = vld [vmem:[#allocation185_spill] sm:$0xff] }
 0x374   :  { %2922 = vmatmul.bf16.vlgmr.msrb.gmra.mxu0 %v7721_v38  ;;  %2948 = vmatmul.bf16.vlgmr.msrb.gmra.mxu2 %v7721_v38  ;;  %v9848_v38 = vld [vmem:[#allocation17_spill] sm:$0xff] }
 0x375   :  { %3035 = vmatpush.bf16.msra.mxu0 %v9839_v31  ;;  %3061 = vmatpush.bf16.msra.mxu2 %v9840_v58  ;;  %v2561_v58 = vsel %vm2558_vm14, %v2560_v48, %v2556_v0  ;;  %v9857_v0 = vld [vmem:[#allocation189_spill] sm:$0xff]  ;;  %v9860_v48 = vld [vmem:[#allocation30_spill] sm:$0xff] }
 0x376   :  { %2930 = vmatpush.bf16.msrb.mxu1 %v9845_v49  ;;  %2956 = vmatpush.bf16.msrb.mxu3 %v9846_v39  ;;  %v2567_v31 = vmul.f32 %v5986_v46, %v2561_v58  ;;  %v9855_v46 = vld [vmem:[#allocation25_spill] sm:$0xff]  ;;  %v9856_v58 = vld [vmem:[#allocation26_spill] sm:$0xff]  ;;  %v9881_v39 = vld [vmem:[#allocation59_spill] sm:$0xff] }
 0x377   :  { %v9882_v49 = vld [vmem:[#allocation80_spill] sm:$0xff] }
 0x378   :  { %v2569_v30 = vmul.f32 %v2568_v37, %v2567_v31  ;;  %v2861_v60 = vpack.c.bf16 %v2567_v31, %v2567_v31  ;;  %v9858_v37 = vld [vmem:[#allocation188_spill] sm:$0xff] }
 0x379   :  { %3036 = vmatpush.bf16.msra.mxu0 %v9843_v2  ;;  %3062 = vmatpush.bf16.msra.mxu2 %v9844_v12  ;;  %v9850_v2 = vld [vmem:[#allocation181_spill] sm:$0xff]  ;;  %v9851_v12 = vld [vmem:[#allocation180_spill] sm:$0xff] }
 0x37a   :  { %2931 = vmatpush.bf16.msrb.mxu1 %v9850_v2  ;;  %2957 = vmatpush.bf16.msrb.mxu3 %v9851_v12  ;;  %v9859_v31 = vld [vmem:[#allocation28_spill] sm:$0xff]  ;;  %v9866_v2 = vld [vmem:[#allocation34_spill] sm:$0xff] }
 0x37b   :  { %2570 = vadd.xlane.f32.xlu0 %v2569_v30  ;;  %2883 = vmatmul.bf16.vlgmr.msra.gmra.mxu1 %v2861_v60  ;;  %v9862_v30 = vld [vmem:[#allocation192_spill] sm:$0xff] }
 0x37c   :  { %2909 = vmatmul.bf16.vlgmr.msra.gmra.mxu3 %v2861_v60  ;;  %v9863_v12 = vld [vmem:[#allocation32_spill] sm:$0xff] }
 0x37d   :  { %3037 = vmatpush.bf16.msra.mxu0 %v9848_v38  ;;  %3063 = vmatpush.bf16.msra.mxu2 %v9849_v10  ;;  %v9895_v10 = vld [vmem:[#allocation94_spill] sm:$0xff] }
 0x37e   :  { %2932 = vmatpush.bf16.msrb.mxu1 %v9853_v20  ;;  %2958 = vmatpush.bf16.msrb.mxu3 %v9854_v15  ;;  %v9864_v20 = vld [vmem:[#allocation11_spill] sm:$0xff]  ;;  %v9865_v15 = vld [vmem:[#allocation12_spill] sm:$0xff] }
 0x381   :  { %3038 = vmatpush.bf16.msra.mxu0 %v9852_v42  ;;  %3064 = vmatpush.bf16.msra.mxu2 %v9855_v46  ;;  %v9884_v46 = vld [vmem:[#allocation81_spill] sm:$0xff] }
 0x382   :  { %2933 = vmatpush.bf16.msrb.mxu1 %v9857_v0  ;;  %2959 = vmatpush.bf16.msrb.mxu3 %v9858_v37  ;;  %v9868_v0 = vld [vmem:[#allocation15_spill] sm:$0xff]  ;;  %v9869_v37 = vld [vmem:[#allocation16_spill] sm:$0xff] }
 0x385   :  { %3039 = vmatpush.bf16.msra.mxu0 %v9856_v58  ;;  %3065 = vmatpush.bf16.msra.mxu2 %v9859_v31  ;;  %v9867_v58 = vld [vmem:[#allocation36_spill] sm:$0xff]  ;;  %v9880_v31 = vld [vmem:[#allocation58_spill] sm:$0xff] }
 0x386   :  { %2934 = vmatpush.bf16.msrb.mxu1 %v9861_v9  ;;  %2960 = vmatpush.bf16.msrb.mxu3 %v9862_v30  ;;  %v9871_v9 = vld [vmem:[#allocation68_spill] sm:$0xff] }
 0x387   :  { %v9872_v30 = vld [vmem:[#allocation40_spill] sm:$0xff] }
 0x389   :  { %3040 = vmatpush.bf16.msra.mxu0 %v9860_v48  ;;  %3066 = vmatpush.bf16.msra.mxu2 %v9863_v12  ;;  %v9870_v48 = vld [vmem:[#allocation38_spill] sm:$0xff] }
 0x38a   :  { %3048 = vmatpush.bf16.msra.mxu1 %v9864_v20  ;;  %3074 = vmatpush.bf16.msra.mxu3 %v9865_v15  ;;  %v9873_v12 = vld [vmem:[#allocation18_spill] sm:$0xff]  ;;  %v9874_v20 = vld [vmem:[#allocation69_spill] sm:$0xff]  ;;  %v9875_v15 = vld [vmem:[#allocation20_spill] sm:$0xff] }
 0x38b   :  { %2935 = vmatmul.bf16.vlgmr.msrb.gmra.mxu1 %v2861_v60 }
 0x38c   :  { %2961 = vmatmul.bf16.vlgmr.msrb.gmra.mxu3 %v2861_v60 }
 0x38d   :  { %3041 = vmatpush.bf16.msra.mxu0 %v9866_v2  ;;  %3067 = vmatpush.bf16.msra.mxu2 %v9867_v58  ;;  %v9876_v2 = vld [vmem:[#allocation72_spill] sm:$0xff]  ;;  %v9877_v58 = vld [vmem:[#allocation23_spill] sm:$0xff] }
 0x38e   :  { %3049 = vmatpush.bf16.msra.mxu1 %v9868_v0  ;;  %3075 = vmatpush.bf16.msra.mxu3 %v9869_v37  ;;  %v9878_v0 = vld [vmem:[#allocation73_spill] sm:$0xff]  ;;  %v9879_v37 = vld [vmem:[#allocation24_spill] sm:$0xff] }
 0x390   :  { %v2583_v60 = vpop.f32.mrf.mxu0 }
 0x391   :  { %3042 = vmatpush.bf16.msra.mxu0 %v9870_v48  ;;  %3068 = vmatpush.bf16.msra.mxu2 %v9872_v30  ;;  %v2596_v48 = vpop.f32.mrf.mxu1 }
 0x392   :  { %3050 = vmatpush.bf16.msra.mxu1 %v9873_v12  ;;  %3076 = vmatpush.bf16.msra.mxu3 %v9875_v15  ;;  %v2627_v30 = vadd.f32 %v2596_v48, %v9881_v39  ;;  %v9883_v12 = vld [vmem:[#allocation27_spill] sm:$0xff]  ;;  %v9889_v39 = vld [vmem:[#allocation33_spill] sm:$0xff] }
 0x393   :  { %v9890_v48 = vld [vmem:[#allocation61_spill] sm:$0xff] }
 0x394   :  { %v5630_v15 = vmul.f32 -1.442695, %v2627_v30 }
 0x395   :  { %3155 = vmatpush.bf16.msrb.mxu0 %v9871_v9  ;;  %3181 = vmatpush.bf16.msrb.mxu2 %v9874_v20  ;;  %v2626_v9 = vadd.f32 %v2583_v60, %v9880_v31  ;;  %v9888_v60 = vld [vmem:[#allocation87_spill] sm:$0xff] }
 0x396   :  { %3051 = vmatpush.bf16.msra.mxu1 %v9877_v58  ;;  %3077 = vmatpush.bf16.msra.mxu3 %v9879_v37  ;;  %v9886_v58 = vld [vmem:[#allocation84_spill] sm:$0xff]  ;;  %v9887_v37 = vld [vmem:[#allocation31_spill] sm:$0xff] }
 0x397   :  { %v5629_v20 = vmul.f32 -1.442695, %v2626_v9  ;;  %v2622_v31 = vpop.f32.mrf.mxu3 }
 0x398   :  { %v2585_v9 = vpop.f32.mrf.mxu0 }
 0x399   :  { %3156 = vmatpush.bf16.msrb.mxu0 %v9876_v2  ;;  %3182 = vmatpush.bf16.msrb.mxu2 %v9878_v0  ;;  %v9885_v2 = vld [vmem:[#allocation29_spill] sm:$0xff]  ;;  %5987 = vpow2.f32 %v5629_v20  ;;  %v2609_v0 = vpop.f32.mrf.mxu2  ;;  %v2598_v30 = vpop.f32.mrf.mxu1 }
 0x39a   :  { %3052 = vmatpush.bf16.msra.mxu1 %v9883_v12  ;;  %3078 = vmatpush.bf16.msra.mxu3 %v9885_v2  ;;  %5989 = vpow2.f32 %v5630_v15  ;;  %v2629_v12 = vadd.f32 %v2622_v31, %v9890_v48  ;;  %v9892_v2 = vld [vmem:[#allocation35_spill] sm:$0xff]  ;;  %v9894_v15 = vld [vmem:[#allocation37_spill] sm:$0xff] }
 0x39b   :  { %v9896_v31 = vld [vmem:[#allocation39_spill] sm:$0xff]  ;;  %v9898_v30 = vld [vmem:[#allocation41_spill] sm:$0xff] }
 0x39d   :  { %3157 = vmatpush.bf16.msrb.mxu0 %v9882_v49  ;;  %3183 = vmatpush.bf16.msrb.mxu2 %v9884_v46  ;;  %v9891_v49 = vld [vmem:[#allocation90_spill] sm:$0xff]  ;;  %v5631_v46 = vmul.f32 -1.442695, %v2629_v12  ;;  %v9897_v12 = vld [vmem:[#allocation95_spill] sm:$0xff] }
 0x39e   :  { %3053 = vmatpush.bf16.msra.mxu1 %v9887_v37  ;;  %3079 = vmatpush.bf16.msra.mxu3 %v9889_v39  ;;  %v9899_v39 = vld [vmem:[#allocation71_spill] sm:$0xff] }
 0x39f   :  { %v5988_v20 = vpop.eup %5987  ;;  %5991 = vpow2.f32 %v5631_v46  ;;  %v2624_v9 = vpop.f32.mrf.mxu3  ;;  %v9901_v46 = vld [vmem:[#allocation98_spill] sm:$0xff] }
 0x3a0   :  { %v5990_v37 = vpop.eup %5989  ;;  %v2633_v42 = vadd.f32 1.0, %v5988_v20 }
 0x3a1   :  { %3158 = vmatpush.bf16.msrb.mxu0 %v9886_v58  ;;  %3184 = vmatpush.bf16.msrb.mxu2 %v9888_v60  ;;  %v9893_v58 = vld [vmem:[#allocation91_spill] sm:$0xff]  ;;  %v2652_v60 = vadd.f32 1.0, %v5990_v37  ;;  %v2611_v48 = vpop.f32.mrf.mxu2 }
 0x3a2   :  { %3054 = vmatpush.bf16.msra.mxu1 %v9892_v2  ;;  %3080 = vmatpush.bf16.msra.mxu3 %v9894_v15  ;;  %5993 = vrcp.f32 %v2633_v42  ;;  %v7862_v2 = vpop.f32.mrf.mxu0  ;;  %v9900_v15 = vld [vmem:[#allocation70_spill] sm:$0xff]  ;;  %v9903_v48 = vld [vmem:[#allocation60_spill] sm:$0xff]  ;;  %v2645_v4 = vand.u32 2147483648, %v2633_v42  ;;  %v2643_v52 = vand.u32 2147483647, %v2633_v42  ;;  %vm2639_vm1 = vweird.f32 %v2633_v42 }
 0x3a3   :  { %5995 = vrcp.f32 %v2652_v60  ;;  %v2628_v9 = vadd.f32 %v2609_v0, %v9903_v48  ;;  %v9908_v48 = vld [vmem:[#allocation83_spill] sm:$0xff]  ;;  %vm2658_vm2 = vweird.f32 %v2652_v60 }
 0x3a4   :  { %vm2644_vm5 = vcmp.eq.f32.partialorder %v2643_v52, 8.507059e+37 }
 0x3a5   :  { %3159 = vmatpush.bf16.msrb.mxu0 %v9891_v49  ;;  %3185 = vmatpush.bf16.msrb.mxu2 %v9893_v58  ;;  %v5992_v37 = vpop.eup %5991  ;;  %v9904_v58 = vld [vmem:[#allocation79_spill] sm:$0xff] }
 0x3a6   :  { %3055 = vmatpush.bf16.msra.mxu1 %v9896_v31  ;;  %3081 = vmatpush.bf16.msra.mxu3 %v9898_v30  ;;  %v7867_v20 = vadd.f32 1.0, %v5992_v37  ;;  %v9907_v37 = vld [vmem:[#allocation103_spill] sm:$0xff] }
 0x3a8   :  { %v5994_v31 = vpop.eup %5993  ;;  %5997 = vrcp.f32 %v7867_v20  ;;  %v2684_v52 = vand.u32 2147483648, %v7867_v20  ;;  %vm2678_vm8 = vweird.f32 %v7867_v20 }
 0x3a9   :  { %3160 = vmatpush.bf16.msrb.mxu0 %v9895_v10  ;;  %3186 = vmatpush.bf16.msrb.mxu2 %v9897_v12  ;;  %v9902_v10 = vld [vmem:[#allocation99_spill] sm:$0xff]  ;;  %v9905_v12 = vld [vmem:[#allocation74_spill] sm:$0xff]  ;;  %v5996_v30 = vpop.eup %5995  ;;  %v2635_v49 = vmul.f32 %v5994_v31, %v2633_v42  ;;  %v7875_v38 = vpop.f32.mrf.mxu2  ;;  %5999 = vtanh.f32 %v2628_v9  ;;  %vm2640_vm15 = vweird.f32 %v5994_v31 }
 0x3aa   :  { %3168 = vmatpush.bf16.msrb.mxu1 %v9899_v39  ;;  %3194 = vmatpush.bf16.msrb.mxu3 %v9900_v15  ;;  %v9906_v39 = vld [vmem:[#allocation102_spill] sm:$0xff]  ;;  %v2654_v15 = vmul.f32 %v5996_v30, %v2652_v60  ;;  %v2705_v0 = vpop.f32.mrf.mxu0  ;;  %vm2659_vm0 = vweird.f32 %v5996_v30  ;;  %vm2641_vm3 = vmor %vm2639_vm1, %vm2640_vm15 }
 0x3ab   :  { %v9910_v0 = vld [vmem:[#allocation89_spill] sm:$0xff]  ;;  %vm2660_vm4 = vmor %vm2658_vm2, %vm2659_vm0 }
 0x3ad   :  { %3161 = vmatpush.bf16.msrb.mxu0 %v9901_v46  ;;  %3187 = vmatpush.bf16.msrb.mxu2 %v9902_v10  ;;  %v2636_v46 = vsub.f32 1.0, %v2635_v49  ;;  %v2655_v10 = vsub.f32 1.0, %v2654_v15  ;;  %v2646_v15 = vor.u32 1.1754944e-38, %v2645_v4 }
 0x3ae   :  { %3169 = vmatpush.bf16.msrb.mxu1 %v9904_v58  ;;  %3195 = vmatpush.bf16.msrb.mxu3 %v9905_v12  ;;  %v9909_v58 = vld [vmem:[#allocation82_spill] sm:$0xff]  ;;  %v2664_v12 = vand.u32 2147483648, %v2652_v60  ;;  %v5998_v49 = vpop.eup %5997 }
 0x3af   :  { %v2637_v3 = vmul.f32 %v5994_v31, %v2636_v46  ;;  %v2656_v47 = vmul.f32 %v5996_v30, %v2655_v10  ;;  %v2674_v9 = vmul.f32 %v5998_v49, %v7867_v20  ;;  %v6000_v10 = vpop.eup %5999  ;;  %vm2679_vm7 = vweird.f32 %v5998_v49 }
 0x3b0   :  { %v2665_v46 = vor.u32 1.1754944e-38, %v2664_v12  ;;  %vm2680_vm9 = vmor %vm2678_vm8, %vm2679_vm7 }
 0x3b1   :  { %3162 = vmatpush.bf16.msrb.mxu0 %v9906_v39  ;;  %3188 = vmatpush.bf16.msrb.mxu2 %v9907_v37  ;;  %v2662_v39 = vand.u32 2147483647, %v2652_v60  ;;  %v2638_v14 = vadd.f32 %v5994_v31, %v2637_v3  ;;  %v2657_v37 = vadd.f32 %v5996_v30, %v2656_v47  ;;  %v2675_v3 = vsub.f32 1.0, %v2674_v9  ;;  %v2731_v55 = vpop.f32.mrf.mxu2 }
 0x3b2   :  { %3170 = vmatpush.bf16.msrb.mxu1 %v9908_v48  ;;  %3196 = vmatpush.bf16.msrb.mxu3 %v9909_v58  ;;  %v9911_v48 = vld [vmem:[#allocation88_spill] sm:$0xff] }
 0x3b3   :  { %v2642_v58 = vsel %vm2641_vm3, %v5994_v31, %v2638_v14  ;;  %v2661_v16 = vsel %vm2660_vm4, %v5996_v30, %v2657_v37  ;;  %vm2663_vm6 = vcmp.eq.f32.partialorder %v2662_v39, 8.507059e+37  ;;  %v2676_v4 = vmul.f32 %v5998_v49, %v2675_v3  ;;  %v9915_v55 = vld [vmem:[#allocation96_spill] sm:$0xff]  ;;  %v9916_v31 = vld [vmem:[#allocation101_spill] sm:$0xff] }
 0x3b4   :  { %v2647_v56 = vsel %vm2644_vm5, %v2646_v15, %v2642_v58  ;;  %v2666_v42 = vsel %vm2663_vm6, %v2665_v46, %v2661_v16  ;;  %v9914_v16 = vld [vmem:[#allocation97_spill] sm:$0xff]  ;;  %v2685_v39 = vor.u32 1.1754944e-38, %v2684_v52 }
 0x3b5   :  { %v2689_v60 = vmul.f32 %v6000_v10, %v2647_v56  ;;  %v2688_v47 = vmul.f32 %v2666_v42, %v7623_v63  ;;  %v2677_v14 = vadd.f32 %v5998_v49, %v2676_v4  ;;  %v2682_v56 = vand.u32 2147483647, %v7867_v20 }
 0x3b6   :  { %3171 = vmatpush.bf16.msrb.mxu1 %v9910_v0  ;;  %3197 = vmatpush.bf16.msrb.mxu3 %v9911_v48  ;;  %v9913_v0 = vld [vmem:[#allocation92_spill] sm:$0xff]  ;;  %v7886_v48 = vpop.f32.mrf.mxu0 }
 0x3b7   :  { %v7888_v12 = vadd.f32 %v2689_v60, %v2688_v47  ;;  %v2681_v63 = vsel %vm2680_vm9, %v5998_v49, %v2677_v14  ;;  %vm2683_vm10 = vcmp.eq.f32.partialorder %v2682_v56, 8.507059e+37  ;;  %v2704_v49 = vadd.f32 %v7862_v2, %v9622_v29 }
 0x3b8   :  { %v2686_v15 = vsel %vm2683_vm10, %v2685_v39, %v2681_v63  ;;  %v2730_v2 = vadd.f32 %v7875_v38, %v9623_v25  ;;  %v9917_v39 = vld [vmem:[#allocation120_spill] sm:$0xff] }
 0x3b9   :  { %6001 = vtanh.f32 %v7888_v12  ;;  %v7896_v58 = vpop.f32.mrf.mxu2 }
 0x3ba   :  { %3172 = vmatpush.bf16.msrb.mxu1 %v9912_v62  ;;  %3198 = vmatpush.bf16.msrb.mxu3 %v9913_v0 }
 0x3be   :  { %3173 = vmatpush.bf16.msrb.mxu1 %v9914_v16  ;;  %3199 = vmatpush.bf16.msrb.mxu3 %v9915_v55  ;;  %v2757_v30 = vpop.f32.mrf.mxu0 }
 0x3bf   :  { %v6002_v37 = vpop.eup %6001  ;;  %v2716_v10 = vpop.f32.mrf.mxu1  ;;  %v9918_v30 = vld [vmem:[#allocation121_spill] sm:$0xff] }
 0x3c0   :  { %v2692_v9 = vmul.f32 %v6002_v37, %v2686_v15  ;;  %v2717_v3 = vadd.f32 %v2716_v10, %v2704_v49  ;;  %v9919_v15 = vld [vmem:[#allocation123_spill] sm:$0xff] }
 0x3c1   :  { %v2783_v20 = vpop.f32.mrf.mxu2 }
 0x3c2   :  { %3174 = vmatpush.bf16.msrb.mxu1 %v9916_v31  ;;  %3200 = vmatpush.bf16.msrb.mxu3 %v9772_v40  ;;  %v7902_v46 = vpack.c.bf16 %v2692_v9, %v2692_v9  ;;  %v5632_v42 = vmul.f32 -1.442695, %v2717_v3  ;;  %v9920_v9 = vld [vmem:[#allocation122_spill] sm:$0xff]  ;;  %v9921_v3 = vld [vmem:[#allocation124_spill] sm:$0xff] }
 0x3c4   :  { %3043 = vmatmul.bf16.vlgmr.msra.gmra.mxu0 %v7902_v46  ;;  %3056 = vmatmul.bf16.vlgmr.msra.gmra.mxu1 %v7902_v46  ;;  %6003 = vpow2.f32 %v5632_v42  ;;  %v9922_v42 = vld [vmem:[#allocation125_spill] sm:$0xff] }
 0x3c5   :  { %3069 = vmatmul.bf16.vlgmr.msra.gmra.mxu2 %v7902_v46  ;;  %3082 = vmatmul.bf16.vlgmr.msra.gmra.mxu3 %v7902_v46  ;;  %v2742_v60 = vpop.f32.mrf.mxu3 }
 0x3c6   :  { %3175 = vmatpush.bf16.msrb.mxu1 %v9773_v59  ;;  %3201 = vmatpush.bf16.msrb.mxu3 %v9774_v35  ;;  %v2743_v47 = vadd.f32 %v2742_v60, %v2730_v2 }
 0x3c7   :  { %3207 = vmatpush.bf16.msra.mxu0 %v6751_v33  ;;  %3233 = vmatpush.bf16.msra.mxu2 %v6753_v24  ;;  %v2718_v4 = vpop.f32.mrf.mxu1 }
 0x3c8   :  { %v5633_v14 = vmul.f32 -1.442695, %v2743_v47  ;;  %v9923_v47 = vld [vmem:[#allocation127_spill] sm:$0xff]  ;;  %v9924_v4 = vld [vmem:[#allocation126_spill] sm:$0xff] }
 0x3ca   :  { %3220 = vmatpush.bf16.msra.mxu1 %v9489_v45  ;;  %3246 = vmatpush.bf16.msra.mxu3 %v9488_v43  ;;  %v6004_v52 = vpop.eup %6003  ;;  %6005 = vpow2.f32 %v5633_v14  ;;  %v9925_v14 = vld [vmem:[#allocation47_spill] sm:$0xff] }
 0x3cb   :  { %3208 = vmatpush.bf16.msra.mxu0 %v9492_v53  ;;  %3234 = vmatpush.bf16.msra.mxu2 %v9493_v28  ;;  %v7926_v38 = vadd.f32 1.0, %v6004_v52  ;;  %v2782_v52 = vadd.f32 %v7896_v58, %v9925_v14  ;;  %v9929_v14 = vld [vmem:[#allocation46_spill] sm:$0xff] }
 0x3cc   :  { %v2756_v25 = vadd.f32 %v7886_v48, %v9929_v14 }
 0x3cd   :  { %6007 = vrcp.f32 %v7926_v38  ;;  %v2744_v63 = vpop.f32.mrf.mxu3  ;;  %v2813_v14 = vand.u32 2147483648, %v7926_v38  ;;  %vm2807_vm13 = vweird.f32 %v7926_v38 }
 0x3ce   :  { %3221 = vmatpush.bf16.msra.mxu1 %v9495_v61  ;;  %3247 = vmatpush.bf16.msra.mxu3 %v9494_v13 }
 0x3cf   :  { %3209 = vmatpush.bf16.msra.mxu0 %v9496_v41  ;;  %3235 = vmatpush.bf16.msra.mxu2 %v9497_v23  ;;  %v2768_v37 = vpop.f32.mrf.mxu1 }
 0x3d0   :  { %v6006_v20 = vpop.eup %6005 }
 0x3d1   :  { %v7928_v56 = vpop.f32.mrf.mxu0  ;;  %v2820_v49 = vadd.f32 1.0, %v6006_v20 }
 0x3d2   :  { %3222 = vmatpush.bf16.msra.mxu1 %v9499_v7  ;;  %3248 = vmatpush.bf16.msra.mxu3 %v9624_v50 }
 0x3d3   :  { %3210 = vmatpush.bf16.msra.mxu0 %v9626_v57  ;;  %3236 = vmatpush.bf16.msra.mxu2 %v9627_v19  ;;  %v7943_v2 = vpop.eup %6007  ;;  %6009 = vrcp.f32 %v2820_v49  ;;  %vm2826_vm14 = vweird.f32 %v2820_v49 }
 0x3d4   :  { %3163 = vmatmul.bf16.vlgmr.msrb.gmra.mxu0 %v7902_v46  ;;  %v2803_v63 = vmul.f32 %v7943_v2, %v7926_v38  ;;  %vm2808_vm11 = vweird.f32 %v7943_v2 }
 0x3d5   :  { %3189 = vmatmul.bf16.vlgmr.msrb.gmra.mxu2 %v7902_v46  ;;  %v2794_v20 = vpop.f32.mrf.mxu3  ;;  %vm7973_vm15 = vmor %vm2807_vm13, %vm2808_vm11 }
 0x3d6   :  { %3223 = vmatpush.bf16.msra.mxu1 %v9630_v51  ;;  %3249 = vmatpush.bf16.msra.mxu3 %v9631_v18 }
 0x3d7   :  { %3211 = vmatpush.bf16.msra.mxu0 %v9917_v39  ;;  %3237 = vmatpush.bf16.msra.mxu2 %v9918_v30  ;;  %v7939_v10 = vpop.f32.mrf.mxu2  ;;  %v2770_v18 = vpop.f32.mrf.mxu1 }
 0x3d8   :  { %v9930_v18 = vld [vmem:[#allocation108_spill] sm:$0xff] }
 0x3d9   :  { %v2873_v60 = vpop.f32.mrf.mxu0 }
 0x3da   :  { %3224 = vmatpush.bf16.msra.mxu1 %v9919_v15  ;;  %3250 = vmatpush.bf16.msra.mxu3 %v9920_v9  ;;  %v2804_v9 = vsub.f32 1.0, %v2803_v63  ;;  %v9926_v15 = vld [vmem:[#allocation128_spill] sm:$0xff]  ;;  %v9928_v60 = vld [vmem:[#allocation130_spill] sm:$0xff]  ;;  %v2769_v63 = vadd.f32 %v2768_v37, %v2756_v25  ;;  %v2811_v25 = vand.u32 2147483647, %v7926_v38  ;;  %v2814_v38 = vor.u32 1.1754944e-38, %v2813_v14 }
 0x3db   :  { %3212 = vmatpush.bf16.msra.mxu0 %v9921_v3  ;;  %3238 = vmatpush.bf16.msra.mxu2 %v9922_v42  ;;  %v9927_v3 = vld [vmem:[#allocation129_spill] sm:$0xff]  ;;  %v2795_v42 = vadd.f32 %v2794_v20, %v2782_v52  ;;  %v9932_v20 = vld [vmem:[#allocation134_spill] sm:$0xff]  ;;  %v9933_v37 = vld [vmem:[#allocation112_spill] sm:$0xff] }
 0x3dc   :  { %v2805_v51 = vmul.f32 %v7943_v2, %v2804_v9  ;;  %v2832_v9 = vand.u32 2147483648, %v2820_v49  ;;  %vm2812_vm2 = vcmp.eq.f32.partialorder %v2811_v25, 8.507059e+37 }
 0x3dd   :  { %v2796_v48 = vpop.f32.mrf.mxu3 }
 0x3de   :  { %3225 = vmatpush.bf16.msra.mxu1 %v9923_v47  ;;  %3251 = vmatpush.bf16.msra.mxu3 %v9924_v4  ;;  %v5634_v47 = vmul.f32 -1.442695, %v2795_v42  ;;  %v6010_v4 = vpop.eup %6009  ;;  %v9931_v42 = vld [vmem:[#allocation135_spill] sm:$0xff] }
 0x3df   :  { %3213 = vmatpush.bf16.msra.mxu0 %v9926_v15  ;;  %3239 = vmatpush.bf16.msra.mxu2 %v9927_v3  ;;  %v2899_v58 = vpop.f32.mrf.mxu2  ;;  %v2822_v30 = vmul.f32 %v6010_v4, %v2820_v49  ;;  %vm2827_vm12 = vweird.f32 %v6010_v4 }
 0x3e0   :  { %6011 = vpow2.f32 %v5634_v47  ;;  %v2806_v58 = vadd.f32 %v7943_v2, %v2805_v51  ;;  %vm2828_vm0 = vmor %vm2826_vm14, %vm2827_vm12 }
 0x3e1   :  { %v2823_v52 = vsub.f32 1.0, %v2822_v30  ;;  %v2830_v30 = vand.u32 2147483647, %v2820_v49  ;;  %6013 = vtanh.f32 %v2769_v63  ;;  %v9937_v49 = vld [vmem:[#allocation138_spill] sm:$0xff] }
 0x3e2   :  { %3226 = vmatpush.bf16.msra.mxu1 %v9788_v27  ;;  %3252 = vmatpush.bf16.msra.mxu3 %v9928_v60  ;;  %v2810_v48 = vsel %vm7973_vm15, %v7943_v2, %v2806_v58 }
 0x3e3   :  { %3214 = vmatpush.bf16.msra.mxu0 %v9790_v26  ;;  %3240 = vmatpush.bf16.msra.mxu2 %v9791_v17  ;;  %v2824_v47 = vmul.f32 %v6010_v4, %v2823_v52  ;;  %v2833_v52 = vor.u32 1.1754944e-38, %v2832_v9  ;;  %vm2831_vm1 = vcmp.eq.f32.partialorder %v2830_v30, 8.507059e+37  ;;  %v9941_v30 = vld [vmem:[#allocation48_spill] sm:$0xff] }
 0x3e4   :  { %v2872_v25 = vadd.f32 %v7928_v56, %v9941_v30  ;;  %v9966_v30 = vld [vmem:[#allocation153_spill] sm:$0xff] }
 0x3e6   :  { %3227 = vmatpush.bf16.msra.mxu1 %v9931_v42  ;;  %3253 = vmatpush.bf16.msra.mxu3 %v9932_v20  ;;  %v9934_v20 = vld [vmem:[#allocation113_spill] sm:$0xff]  ;;  %v6012_v51 = vpop.eup %6011 }
 0x3e7   :  { %3323 = vmatpush.bf16.msrb.mxu0 %v9793_v32  ;;  %3349 = vmatpush.bf16.msrb.mxu2 %v9930_v18  ;;  %v2840_v60 = vadd.f32 1.0, %v6012_v51  ;;  %v2815_v18 = vsel %vm2812_vm2, %v2814_v38, %v2810_v48  ;;  %v6014_v32 = vpop.eup %6013 }
 0x3e8   :  { %3215 = vmatmul.bf16.vlgmr.msra.gmra.mxu0 %v7902_v46  ;;  %3241 = vmatmul.bf16.vlgmr.msra.gmra.mxu2 %v7902_v46  ;;  %v2825_v46 = vadd.f32 %v6010_v4, %v2824_v47  ;;  %v9939_v47 = vld [vmem:[#allocation54_spill] sm:$0xff]  ;;  %v2857_v9 = vmul.f32 %v6014_v32, %v2815_v18 }
 0x3e9   :  { %6015 = vrcp.f32 %v2840_v60  ;;  %v2850_v32 = vand.u32 2147483647, %v2840_v60  ;;  %vm2846_vm4 = vweird.f32 %v2840_v60 }
 0x3ea   :  { %v2829_v27 = vsel %vm2828_vm0, %v6010_v4, %v2825_v46 }
 0x3eb   :  { %3324 = vmatpush.bf16.msrb.mxu0 %v9933_v37  ;;  %3350 = vmatpush.bf16.msrb.mxu2 %v9934_v20  ;;  %v2834_v20 = vsel %vm2831_vm1, %v2833_v52, %v2829_v27  ;;  %v9938_v37 = vld [vmem:[#allocation139_spill] sm:$0xff]  ;;  %vm2851_vm6 = vcmp.eq.f32.partialorder %v2850_v32, 8.507059e+37  ;;  %v9944_v32 = vld [vmem:[#allocation161_spill] sm:$0xff] }
 0x3ec   :  { %v2856_v63 = vmul.f32 %v2834_v20, %v9939_v47  ;;  %v2852_v20 = vand.u32 2147483648, %v2840_v60 }
 0x3ee   :  { %v7987_v14 = vadd.f32 %v2857_v9, %v2856_v63  ;;  %v2853_v52 = vor.u32 1.1754944e-38, %v2852_v20  ;;  %v9942_v20 = vld [vmem:[#allocation158_spill] sm:$0xff] }
 0x3ef   :  { %3325 = vmatpush.bf16.msrb.mxu0 %v9937_v49  ;;  %3351 = vmatpush.bf16.msrb.mxu2 %v9938_v37  ;;  %v6016_v4 = vpop.eup %6015 }
 0x3f0   :  { %9940 = vst [vmem:[#allocation57_spill] sm:$0xff] %v7987_v14  ;;  %v2842_v27 = vmul.f32 %v6016_v4, %v2840_v60  ;;  %6017 = vtanh.f32 %v7987_v14  ;;  %vm2847_vm3 = vweird.f32 %v6016_v4  ;;  %v2898_v60 = vadd.f32 %v7939_v10, %v9807_v54  ;;  %v9957_v54 = vld [vmem:[#allocation145_spill] sm:$0xff] }
 0x3f1   :  { %v7985_v2 = vpop.f32.mrf.mxu0  ;;  %vm2848_vm5 = vmor %vm2846_vm4, %vm2847_vm3 }
 0x3f2   :  { %v2843_v42 = vsub.f32 1.0, %v2842_v27 }
 0x3f3   :  { %3326 = vmatpush.bf16.msrb.mxu0 %v9803_v36  ;;  %3352 = vmatpush.bf16.msrb.mxu2 %v9804_v6 }
 0x3f4   :  { %v2844_v58 = vmul.f32 %v6016_v4, %v2843_v42 }
 0x3f6   :  { %v2845_v51 = vadd.f32 %v6016_v4, %v2844_v58  ;;  %v6018_v63 = vpop.eup %6017 }
 0x3f7   :  { %3327 = vmatpush.bf16.msrb.mxu0 %v9805_v5  ;;  %3353 = vmatpush.bf16.msrb.mxu2 %v9806_v34  ;;  %v2949_v18 = vpop.f32.mrf.mxu2 }
 0x3f8   :  { %v2884_v48 = vpop.f32.mrf.mxu1  ;;  %v2849_v38 = vsel %vm2848_vm5, %v6016_v4, %v2845_v51  ;;  %v9943_v4 = vld [vmem:[#allocation159_spill] sm:$0xff] }
 0x3f9   :  { %v2925_v46 = vpop.f32.mrf.mxu0  ;;  %v2885_v47 = vadd.f32 %v2884_v48, %v2872_v25  ;;  %v2854_v9 = vsel %vm2851_vm6, %v2853_v52, %v2849_v38  ;;  %v9945_v25 = vld [vmem:[#allocation162_spill] sm:$0xff]  ;;  %v9947_v48 = vld [vmem:[#allocation109_spill] sm:$0xff] }
 0x3fa   :  { %v2860_v27 = vmul.f32 %v6018_v63, %v2854_v9  ;;  %v9946_v52 = vld [vmem:[#allocation110_spill] sm:$0xff]  ;;  %v9949_v9 = vld [vmem:[#allocation137_spill] sm:$0xff] }
 0x3fb   :  { %3328 = vmatpush.bf16.msrb.mxu0 %v9668_v22  ;;  %3354 = vmatpush.bf16.msrb.mxu2 %v9808_v21  ;;  %v5635_v42 = vmul.f32 -1.442695, %v2885_v47  ;;  %v9948_v47 = vld [vmem:[#allocation167_spill] sm:$0xff] }
 0x3fc   :  { %v7998_v14 = vpack.c.bf16 %v2860_v27, %v2860_v27  ;;  %v9950_v27 = vld [vmem:[#allocation136_spill] sm:$0xff] }
 0x3fd   :  { %6019 = vpow2.f32 %v5635_v42 }
 0x3fe   :  { %3176 = vmatmul.bf16.vlgmr.msrb.gmra.mxu1 %v7998_v14  ;;  %3202 = vmatmul.bf16.vlgmr.msrb.gmra.mxu3 %v7998_v14 }
 0x3ff   :  { %3329 = vmatpush.bf16.msrb.mxu0 %v9672_v11  ;;  %3355 = vmatpush.bf16.msrb.mxu2 %v9673_v8  ;;  %v2951_v56 = vpop.f32.mrf.mxu2  ;;  %v2910_v58 = vpop.f32.mrf.mxu3  ;;  %v10055_v8 = vld [vmem:[#allocation79_spill] sm:$0xff] }
 0x400   :  { %v2911_v51 = vadd.f32 %v2910_v58, %v2898_v60  ;;  %v2886_v46 = vpop.f32.mrf.mxu1  ;;  %3336 = vmatpush.bf16.msrb.mxu1 %v9946_v52  ;;  %3362 = vmatpush.bf16.msrb.mxu3 %v9947_v48  ;;  %v9951_v56 = vld [vmem:[#allocation170_spill] sm:$0xff]  ;;  %v9952_v60 = vld [vmem:[#allocation171_spill] sm:$0xff]  ;;  %v9954_v48 = vld [vmem:[#allocation140_spill] sm:$0xff] }
 0x401   :  { %v9953_v46 = vld [vmem:[#allocation141_spill] sm:$0xff] }
 0x402   :  { %v5636_v10 = vmul.f32 -1.442695, %v2911_v51 }
 0x403   :  { %3330 = vmatpush.bf16.msrb.mxu0 %v9942_v20  ;;  %3356 = vmatpush.bf16.msrb.mxu2 %v9943_v4  ;;  %v6020_v38 = vpop.eup %6019 }
 0x404   :  { %v8014_v63 = vadd.f32 1.0, %v6020_v38  ;;  %6021 = vpow2.f32 %v5636_v10  ;;  %3337 = vmatpush.bf16.msrb.mxu1 %v9949_v9  ;;  %3363 = vmatpush.bf16.msrb.mxu3 %v9950_v27  ;;  %v9955_v10 = vld [vmem:[#allocation175_spill] sm:$0xff]  ;;  %v9956_v27 = vld [vmem:[#allocation116_spill] sm:$0xff] }
 0x405   :  { %v2950_v9 = vadd.f32 %v2949_v18, %v9956_v27  ;;  %v9962_v18 = vld [vmem:[#allocation148_spill] sm:$0xff]  ;;  %v9964_v27 = vld [vmem:[#allocation183_spill] sm:$0xff] }
 0x406   :  { %3331 = vmatmul.bf16.vlgmr.msrb.gmra.mxu0 %v7998_v14  ;;  %3357 = vmatmul.bf16.vlgmr.msrb.gmra.mxu2 %v7998_v14  ;;  %6023 = vrcp.f32 %v8014_v63  ;;  %vm2975_vm9 = vweird.f32 %v8014_v63 }
 0x407   :  { %3375 = vmatpush.bf16.msra.mxu0 %v9944_v32  ;;  %3401 = vmatpush.bf16.msra.mxu2 %v9945_v25  ;;  %v2912_v42 = vpop.f32.mrf.mxu3  ;;  %v10054_v32 = vld [vmem:[#allocation70_spill] sm:$0xff] }
 0x408   :  { %v2936_v58 = vpop.f32.mrf.mxu1  ;;  %3338 = vmatpush.bf16.msrb.mxu1 %v9953_v46  ;;  %3364 = vmatpush.bf16.msrb.mxu3 %v9954_v48  ;;  %v9959_v48 = vld [vmem:[#allocation178_spill] sm:$0xff] }
 0x40a   :  { %v6022_v51 = vpop.eup %6021 }
 0x40b   :  { %3376 = vmatpush.bf16.msra.mxu0 %v9816_v1  ;;  %3402 = vmatpush.bf16.msra.mxu2 %v9948_v47  ;;  %v2988_v38 = vadd.f32 1.0, %v6022_v51  ;;  %v9960_v51 = vld [vmem:[#allocation179_spill] sm:$0xff]  ;;  %v9961_v1 = vld [vmem:[#allocation149_spill] sm:$0xff] }
 0x40c   :  { %v8025_v52 = vpop.eup %6023  ;;  %3339 = vmatpush.bf16.msrb.mxu1 %v9957_v54 }
 0x40d   :  { %v2971_v42 = vmul.f32 %v8025_v52, %v8014_v63  ;;  %6025 = vrcp.f32 %v2988_v38  ;;  %vm2976_vm7 = vweird.f32 %v8025_v52  ;;  %vm2994_vm10 = vweird.f32 %v2988_v38 }
 0x40e   :  { %3228 = vmatmul.bf16.vlgmr.msra.gmra.mxu1 %v7998_v14  ;;  %3254 = vmatmul.bf16.vlgmr.msra.gmra.mxu3 %v7998_v14  ;;  %vm8052_vm11 = vmor %vm2975_vm9, %vm2976_vm7 }
 0x40f   :  { %3377 = vmatpush.bf16.msra.mxu0 %v9951_v56  ;;  %3403 = vmatpush.bf16.msra.mxu2 %v9952_v60  ;;  %v9958_v60 = vld [vmem:[#allocation144_spill] sm:$0xff]  ;;  %v2972_v46 = vsub.f32 1.0, %v2971_v42  ;;  %v2962_v56 = vpop.f32.mrf.mxu3  ;;  %v9963_v42 = vld [vmem:[#allocation182_spill] sm:$0xff] }
 0x410   :  { %3365 = vmatpush.bf16.msrb.mxu3 %v9958_v60  ;;  %3340 = vmatpush.bf16.msrb.mxu1 %v9961_v1  ;;  %v3000_v1 = vand.u32 2147483648, %v2988_v38 }
 0x411   :  { %v2973_v60 = vmul.f32 %v8025_v52, %v2972_v46 }
 0x413   :  { %3378 = vmatpush.bf16.msra.mxu0 %v9691_v44  ;;  %3404 = vmatpush.bf16.msra.mxu2 %v9955_v10  ;;  %v2963_v44 = vadd.f32 %v2962_v56, %v2950_v9  ;;  %v2938_v10 = vpop.f32.mrf.mxu1  ;;  %v6026_v54 = vpop.eup %6025 }
 0x414   :  { %3366 = vmatpush.bf16.msrb.mxu3 %v9962_v18  ;;  %v2990_v56 = vmul.f32 %v6026_v54, %v2988_v38  ;;  %3341 = vmatpush.bf16.msrb.mxu1 %v9966_v30  ;;  %v2974_v18 = vadd.f32 %v8025_v52, %v2973_v60  ;;  %vm2995_vm8 = vweird.f32 %v6026_v54  ;;  %v9980_v60 = vld [vmem:[#allocation160_spill] sm:$0xff] }
 0x415   :  { %v5637_v47 = vmul.f32 -1.442695, %v2963_v44  ;;  %v9967_v44 = vld [vmem:[#allocation152_spill] sm:$0xff]  ;;  %vm2996_vm12 = vmor %vm2994_vm10, %vm2995_vm8 }
 0x416   :  { %v2991_v10 = vsub.f32 1.0, %v2990_v56  ;;  %v2978_v30 = vsel %vm8052_vm11, %v8025_v52, %v2974_v18  ;;  %v9978_v52 = vld [vmem:[#allocation55_spill] sm:$0xff] }
 0x417   :  { %3379 = vmatpush.bf16.msra.mxu0 %v9959_v48  ;;  %3405 = vmatpush.bf16.msra.mxu2 %v9960_v51  ;;  %v9965_v48 = vld [vmem:[#allocation52_spill] sm:$0xff]  ;;  %6027 = vpow2.f32 %v5637_v47  ;;  %v2964_v46 = vpop.f32.mrf.mxu3  ;;  %v2998_v47 = vand.u32 2147483647, %v2988_v38  ;;  %v9975_v38 = vld [vmem:[#allocation191_spill] sm:$0xff] }
 0x418   :  { %v2924_v9 = vadd.f32 %v7985_v2, %v9965_v48  ;;  %3367 = vmatpush.bf16.msrb.mxu3 %v9967_v44  ;;  %v2992_v25 = vmul.f32 %v6026_v54, %v2991_v10  ;;  %v2981_v2 = vand.u32 2147483648, %v8014_v63  ;;  %v9972_v46 = vld [vmem:[#allocation157_spill] sm:$0xff]  ;;  %v9973_v44 = vld [vmem:[#allocation156_spill] sm:$0xff]  ;;  %v3001_v10 = vor.u32 1.1754944e-38, %v3000_v1 }
 0x419   :  { %3342 = vmatpush.bf16.msrb.mxu1 %v9972_v46  ;;  %vm2999_vm13 = vcmp.eq.f32.partialorder %v2998_v47, 8.507059e+37  ;;  %v9982_v47 = vld [vmem:[#allocation163_spill] sm:$0xff] }
 0x41a   :  { %v2937_v51 = vadd.f32 %v2936_v58, %v2924_v9  ;;  %v2979_v58 = vand.u32 2147483647, %v8014_v63  ;;  %v2993_v56 = vadd.f32 %v6026_v54, %v2992_v25  ;;  %v9974_v63 = vld [vmem:[#allocation190_spill] sm:$0xff] }
 0x41b   :  { %3380 = vmatpush.bf16.msra.mxu0 %v9963_v42  ;;  %3406 = vmatpush.bf16.msra.mxu2 %v9964_v27  ;;  %v9968_v42 = vld [vmem:[#allocation186_spill] sm:$0xff]  ;;  %v9969_v27 = vld [vmem:[#allocation187_spill] sm:$0xff] }
 0x41c   :  { %6029 = vtanh.f32 %v2937_v51  ;;  %3368 = vmatpush.bf16.msrb.mxu3 %v9973_v44  ;;  %v9976_v25 = vld [vmem:[#allocation10_spill] sm:$0xff]  ;;  %v9977_v51 = vld [vmem:[#allocation13_spill] sm:$0xff]  ;;  %vm2980_vm14 = vcmp.eq.f32.partialorder %v2979_v58, 8.507059e+37 }
 0x41d   :  { %v6028_v9 = vpop.eup %6027  ;;  %v9983_v58 = vld [vmem:[#allocation14_spill] sm:$0xff] }
 0x41e   :  { %v3008_v48 = vadd.f32 1.0, %v6028_v9  ;;  %v9979_v9 = vld [vmem:[#allocation164_spill] sm:$0xff] }
 0x41f   :  { %3381 = vmatpush.bf16.msra.mxu0 %v9968_v42  ;;  %3407 = vmatpush.bf16.msra.mxu2 %v9969_v27  ;;  %v2982_v27 = vor.u32 1.1754944e-38, %v2981_v2  ;;  %v2997_v42 = vsel %vm2996_vm12, %v6026_v54, %v2993_v56  ;;  %v9981_v2 = vld [vmem:[#allocation165_spill] sm:$0xff] }
 0x420   :  { %v3002_v44 = vsel %vm2999_vm13, %v3001_v10, %v2997_v42  ;;  %6031 = vrcp.f32 %v3008_v48  ;;  %3343 = vmatpush.bf16.msrb.mxu1 %v9979_v9  ;;  %3369 = vmatpush.bf16.msrb.mxu3 %v9980_v60  ;;  %v9984_v42 = vld [vmem:[#allocation19_spill] sm:$0xff]  ;;  %v9989_v60 = vld [vmem:[#allocation21_spill] sm:$0xff]  ;;  %v3020_v9 = vand.u32 2147483648, %v3008_v48  ;;  %vm3014_vm0 = vweird.f32 %v3008_v48 }
 0x421   :  { %v2983_v1 = vsel %vm2980_vm14, %v2982_v27, %v2978_v30  ;;  %v3024_v18 = vmul.f32 %v3002_v44, %v9978_v52  ;;  %v9987_v44 = vld [vmem:[#allocation168_spill] sm:$0xff]  ;;  %v9988_v52 = vld [vmem:[#allocation17_spill] sm:$0xff] }
 0x422   :  { %v6030_v54 = vpop.eup %6029  ;;  %v3021_v46 = vor.u32 1.1754944e-38, %v3020_v9 }
 0x423   :  { %3382 = vmatpush.bf16.msra.mxu0 %v9974_v63  ;;  %3408 = vmatpush.bf16.msra.mxu2 %v9975_v38  ;;  %v3025_v56 = vmul.f32 %v6030_v54, %v2983_v1  ;;  %v9990_v1 = vld [vmem:[#allocation173_spill] sm:$0xff]  ;;  %v9991_v54 = vld [vmem:[#allocation172_spill] sm:$0xff]  ;;  %v10051_v63 = vld [vmem:[#allocation39_spill] sm:$0xff] }
 0x424   :  { %3388 = vmatpush.bf16.msra.mxu1 %v9981_v2  ;;  %3414 = vmatpush.bf16.msra.mxu3 %v9982_v47 }
 0x425   :  { %v8074_v27 = vadd.f32 %v3025_v56, %v3024_v18  ;;  %v3018_v18 = vand.u32 2147483647, %v3008_v48  ;;  %v9992_v56 = vld [vmem:[#allocation22_spill] sm:$0xff] }
 0x426   :  { %3383 = vmatmul.bf16.vlgmr.msra.gmra.mxu0 %v7998_v14  ;;  %3409 = vmatmul.bf16.vlgmr.msra.gmra.mxu2 %v7998_v14  ;;  %v6032_v30 = vpop.eup %6031  ;;  %v9986_v14 = vld [vmem:[#allocation169_spill] sm:$0xff] }
 0x427   :  { %3496 = vmatpush.bf16.msrb.mxu0 %v9976_v25  ;;  %3522 = vmatpush.bf16.msrb.mxu2 %v9977_v51  ;;  %9985 = vst [vmem:[#allocation56_spill] sm:$0xff] %v8074_v27  ;;  %v3010_v10 = vmul.f32 %v6032_v30, %v3008_v48  ;;  %6033 = vtanh.f32 %v8074_v27  ;;  %vm3015_vm15 = vweird.f32 %v6032_v30  ;;  %vm3019_vm2 = vcmp.eq.f32.partialorder %v3018_v18, 8.507059e+37  ;;  %v9998_v48 = vld [vmem:[#allocation28_spill] sm:$0xff]  ;;  %v10049_v51 = vld [vmem:[#allocation102_spill] sm:$0xff] }
 0x428   :  { %3389 = vmatpush.bf16.msra.mxu1 %v9986_v14  ;;  %3415 = vmatpush.bf16.msra.mxu3 %v9987_v44  ;;  %v9993_v14 = vld [vmem:[#allocation25_spill] sm:$0xff]  ;;  %vm3016_vm1 = vmor %vm3014_vm0, %vm3015_vm15  ;;  %v10002_v18 = vld [vmem:[#allocation32_spill] sm:$0xff] }
 0x429   :  { %v3011_v2 = vsub.f32 1.0, %v3010_v10  ;;  %v9995_v10 = vld [vmem:[#allocation176_spill] sm:$0xff] }
 0x42b   :  { %3497 = vmatpush.bf16.msrb.mxu0 %v9983_v58  ;;  %3523 = vmatpush.bf16.msrb.mxu2 %v9984_v42  ;;  %v3012_v47 = vmul.f32 %v6032_v30, %v3011_v2  ;;  %v8090_v2 = vld [vmem:[%s8933_s8] sm:$0xff]  ;;  %v10023_v42 = vld [vmem:[#allocation15_spill] sm:$0xff] }
 0x42c   :  { %3390 = vmatpush.bf16.msra.mxu1 %v9990_v1  ;;  %3416 = vmatpush.bf16.msra.mxu3 %v9991_v54  ;;  %9996 = vst [vmem:[#allocation100_spill] sm:$0xff] %v8090_v2  ;;  %v3029_v54 = vperm.slane %v8090_v2, 2  ;;  %v10003_v2 = vld [vmem:[#allocation185_spill] sm:$0xff]  ;;  %v10047_v58 = vld [vmem:[#allocation35_spill] sm:$0xff] }
 0x42d   :  { %v3013_v44 = vadd.f32 %v6032_v30, %v3012_v47  ;;  %v6034_v1 = vpop.eup %6033 }
 0x42f   :  { %3498 = vmatpush.bf16.msrb.mxu0 %v9988_v52  ;;  %3524 = vmatpush.bf16.msrb.mxu2 %v9989_v60  ;;  %v9994_v60 = vld [vmem:[#allocation177_spill] sm:$0xff]  ;;  %v3017_v27 = vsel %vm3016_vm1, %v6032_v30, %v3013_v44  ;;  %v10000_v30 = vld [vmem:[#allocation180_spill] sm:$0xff]  ;;  %v10001_v44 = vld [vmem:[#allocation30_spill] sm:$0xff] }
 0x430   :  { %3391 = vmatpush.bf16.msra.mxu1 %v9994_v60  ;;  %3417 = vmatpush.bf16.msra.mxu3 %v9995_v10  ;;  %v9999_v52 = vld [vmem:[#allocation181_spill] sm:$0xff] }
 0x431   :  { %v10013_v10 = vld [vmem:[#allocation193_spill] sm:$0xff] }
 0x433   :  { %3499 = vmatpush.bf16.msrb.mxu0 %v9992_v56  ;;  %3525 = vmatpush.bf16.msrb.mxu2 %v9993_v14  ;;  %v3022_v56 = vsel %vm3019_vm2, %v3021_v46, %v3017_v27  ;;  %v9997_v14 = vld [vmem:[#allocation26_spill] sm:$0xff]  ;;  %v10004_v46 = vld [vmem:[#allocation184_spill] sm:$0xff] }
 0x434   :  { %v3028_v9 = vmul.f32 %v6034_v1, %v3022_v56  ;;  %3392 = vmatpush.bf16.msra.mxu1 %v9999_v52  ;;  %3418 = vmatpush.bf16.msra.mxu3 %v10000_v30  ;;  %v10005_v27 = vld [vmem:[#allocation34_spill] sm:$0xff]  ;;  %v10006_v1 = vld [vmem:[#allocation36_spill] sm:$0xff] }
 0x435   :  { %v10008_v56 = vld [vmem:[#allocation188_spill] sm:$0xff] }
 0x436   :  { %v3030_v47 = vmul.f32 %v3029_v54, %v3028_v9  ;;  %v3322_v60 = vpack.c.bf16 %v3028_v9, %v3028_v9  ;;  %v10007_v54 = vld [vmem:[#allocation189_spill] sm:$0xff]  ;;  %v10009_v9 = vld [vmem:[#allocation38_spill] sm:$0xff]  ;;  %v10010_v30 = vld [vmem:[#allocation40_spill] sm:$0xff] }
 0x437   :  { %3500 = vmatpush.bf16.msrb.mxu0 %v9997_v14  ;;  %3526 = vmatpush.bf16.msrb.mxu2 %v9998_v48  ;;  %v10011_v52 = vld [vmem:[#allocation68_spill] sm:$0xff] }
 0x438   :  { %3031 = vadd.xlane.f32.xlu1 %v3030_v47  ;;  %3344 = vmatmul.bf16.vlgmr.msrb.gmra.mxu1 %v3322_v60  ;;  %v10012_v47 = vld [vmem:[#allocation69_spill] sm:$0xff] }
 0x439   :  { %3370 = vmatmul.bf16.vlgmr.msrb.gmra.mxu3 %v3322_v60  ;;  %3393 = vmatpush.bf16.msra.mxu1 %v10003_v2  ;;  %v10014_v2 = vld [vmem:[#allocation192_spill] sm:$0xff] }
 0x43a   :  { %3419 = vmatpush.bf16.msra.mxu3 %v10004_v46  ;;  %v10015_v46 = vld [vmem:[#allocation11_spill] sm:$0xff] }
 0x43b   :  { %3501 = vmatpush.bf16.msrb.mxu0 %v10001_v44  ;;  %3527 = vmatpush.bf16.msrb.mxu2 %v10002_v18  ;;  %v10022_v44 = vld [vmem:[#allocation63_spill] sm:$0xff] }
 0x43d   :  { %3394 = vmatpush.bf16.msra.mxu1 %v10007_v54  ;;  %v10018_v54 = vld [vmem:[#allocation73_spill] sm:$0xff] }
 0x43e   :  { %3420 = vmatpush.bf16.msra.mxu3 %v10008_v56  ;;  %v10019_v56 = vld [vmem:[#allocation44_spill] sm:$0xff] }
 0x43f   :  { %3502 = vmatpush.bf16.msrb.mxu0 %v10005_v27  ;;  %3528 = vmatpush.bf16.msrb.mxu2 %v10006_v1  ;;  %v10016_v27 = vld [vmem:[#allocation12_spill] sm:$0xff] }
 0x440   :  { %v10017_v1 = vld [vmem:[#allocation72_spill] sm:$0xff] }
 0x441   :  { %3395 = vmatpush.bf16.msra.mxu1 %v10013_v10  ;;  %v3044_v48 = vpop.f32.mrf.mxu0 }
 0x442   :  { %3421 = vmatpush.bf16.msra.mxu3 %v10014_v2  ;;  %v10024_v2 = vld [vmem:[#allocation16_spill] sm:$0xff] }
 0x443   :  { %3503 = vmatpush.bf16.msrb.mxu0 %v10009_v9  ;;  %3529 = vmatpush.bf16.msrb.mxu2 %v10010_v30  ;;  %v10020_v9 = vld [vmem:[#allocation62_spill] sm:$0xff]  ;;  %v10021_v30 = vld [vmem:[#allocation45_spill] sm:$0xff] }
 0x444   :  { %v351_v18 = vadd.f32 %v10020_v9, %v10019_v56  ;;  %v10027_v9 = vld [vmem:[#allocation18_spill] sm:$0xff] }
 0x445   :  { %3509 = vmatpush.bf16.msrb.mxu1 %v10015_v46 }
 0x446   :  { %3535 = vmatpush.bf16.msrb.mxu3 %v10016_v27  ;;  %v3087_v14 = vadd.f32 %v3044_v48, %v351_v18  ;;  %v10025_v27 = vld [vmem:[#allocation80_spill] sm:$0xff]  ;;  %v10030_v48 = vld [vmem:[#allocation65_spill] sm:$0xff] }
 0x447   :  { %3616 = vmatpush.bf16.msra.mxu0 %v10011_v52  ;;  %3642 = vmatpush.bf16.msra.mxu2 %v10012_v47  ;;  %v380_v52 = vadd.f32 %v10022_v44, %v10021_v30  ;;  %v3057_v47 = vpop.f32.mrf.mxu1  ;;  %v10028_v44 = vld [vmem:[#allocation20_spill] sm:$0xff]  ;;  %v10029_v30 = vld [vmem:[#allocation51_spill] sm:$0xff] }
 0x448   :  { %3396 = vmatmul.bf16.vlgmr.msra.gmra.mxu1 %v3322_v60  ;;  %v5638_v46 = vmul.f32 -1.442695, %v3087_v14  ;;  %v10031_v18 = vld [vmem:[#allocation84_spill] sm:$0xff]  ;;  %v3083_v56 = vpop.f32.mrf.mxu3 }
 0x449   :  { %v3088_v10 = vadd.f32 %v3057_v47, %v380_v52  ;;  %3510 = vmatpush.bf16.msrb.mxu1 %v10023_v42  ;;  %3422 = vmatmul.bf16.vlgmr.msra.gmra.mxu3 %v3322_v60  ;;  %v438_v52 = vadd.f32 %v10030_v48, %v10029_v30  ;;  %v3070_v47 = vpop.f32.mrf.mxu2  ;;  %v3046_v14 = vpop.f32.mrf.mxu0  ;;  %v10033_v42 = vld [vmem:[#allocation23_spill] sm:$0xff] }
 0x44a   :  { %3536 = vmatpush.bf16.msrb.mxu3 %v10024_v2  ;;  %6035 = vpow2.f32 %v5638_v46  ;;  %v10032_v2 = vld [vmem:[#allocation87_spill] sm:$0xff]  ;;  %v10034_v46 = vld [vmem:[#allocation24_spill] sm:$0xff] }
 0x44b   :  { %3617 = vmatpush.bf16.msra.mxu0 %v10017_v1  ;;  %3643 = vmatpush.bf16.msra.mxu2 %v10018_v54  ;;  %v5639_v54 = vmul.f32 -1.442695, %v3088_v10  ;;  %v10026_v1 = vld [vmem:[#allocation81_spill] sm:$0xff]  ;;  %v3090_v60 = vadd.f32 %v3083_v56, %v438_v52  ;;  %v10039_v56 = vld [vmem:[#allocation94_spill] sm:$0xff] }
 0x44d   :  { %3511 = vmatpush.bf16.msrb.mxu1 %v10027_v9  ;;  %6037 = vpow2.f32 %v5639_v54  ;;  %v5640_v9 = vmul.f32 -1.442695, %v3090_v60  ;;  %v10040_v60 = vld [vmem:[#allocation95_spill] sm:$0xff] }
 0x44e   :  { %3537 = vmatpush.bf16.msrb.mxu3 %v10028_v44 }
 0x44f   :  { %3618 = vmatpush.bf16.msra.mxu0 %v10025_v27  ;;  %3644 = vmatpush.bf16.msra.mxu2 %v10026_v1  ;;  %v3059_v10 = vpop.f32.mrf.mxu1  ;;  %v10035_v1 = vld [vmem:[#allocation90_spill] sm:$0xff]  ;;  %v10036_v27 = vld [vmem:[#allocation91_spill] sm:$0xff]  ;;  %6039 = vpow2.f32 %v5640_v9 }
 0x450   :  { %v6036_v44 = vpop.eup %6035  ;;  %v3085_v14 = vpop.f32.mrf.mxu3 }
 0x451   :  { %3512 = vmatpush.bf16.msrb.mxu1 %v10033_v42  ;;  %v3094_v48 = vadd.f32 1.0, %v6036_v44  ;;  %v3072_v52 = vpop.f32.mrf.mxu2  ;;  %v8137_v10 = vpop.f32.mrf.mxu0  ;;  %v10042_v42 = vld [vmem:[#allocation33_spill] sm:$0xff]  ;;  %v10043_v44 = vld [vmem:[#allocation50_spill] sm:$0xff] }
 0x452   :  { %3538 = vmatpush.bf16.msrb.mxu3 %v10034_v46  ;;  %v10041_v46 = vld [vmem:[#allocation31_spill] sm:$0xff] }
 0x453   :  { %3619 = vmatpush.bf16.msra.mxu0 %v10031_v18  ;;  %3645 = vmatpush.bf16.msra.mxu2 %v10032_v2  ;;  %v6038_v54 = vpop.eup %6037  ;;  %v10037_v18 = vld [vmem:[#allocation27_spill] sm:$0xff]  ;;  %v10038_v2 = vld [vmem:[#allocation29_spill] sm:$0xff]  ;;  %6041 = vrcp.f32 %v3094_v48  ;;  %v3104_v38 = vand.u32 2147483647, %v3094_v48  ;;  %vm3100_vm5 = vweird.f32 %v3094_v48 }
 0x454   :  { %v3113_v30 = vadd.f32 1.0, %v6038_v54  ;;  %v10044_v54 = vld [vmem:[#allocation64_spill] sm:$0xff] }
 0x455   :  { %3513 = vmatpush.bf16.msrb.mxu1 %v10037_v18  ;;  %v6040_v9 = vpop.eup %6039  ;;  %v409_v18 = vadd.f32 %v10044_v54, %v10043_v44  ;;  %vm3105_vm9 = vcmp.eq.f32.partialorder %v3104_v38, 8.507059e+37  ;;  %v10057_v38 = vld [vmem:[#allocation83_spill] sm:$0xff] }
 0x456   :  { %3539 = vmatpush.bf16.msrb.mxu3 %v10038_v2  ;;  %6043 = vrcp.f32 %v3113_v30  ;;  %v8144_v2 = vadd.f32 1.0, %v6040_v9  ;;  %v10050_v9 = vld [vmem:[#allocation103_spill] sm:$0xff]  ;;  %vm3119_vm6 = vweird.f32 %v3113_v30 }
 0x457   :  { %3620 = vmatpush.bf16.msra.mxu0 %v10035_v1  ;;  %3646 = vmatpush.bf16.msra.mxu2 %v10036_v27  ;;  %v10045_v27 = vld [vmem:[#allocation98_spill] sm:$0xff]  ;;  %v3089_v14 = vadd.f32 %v3070_v47, %v409_v18  ;;  %v3125_v47 = vand.u32 2147483648, %v3113_v30 }
 0x458   :  { %6045 = vrcp.f32 %v8144_v2  ;;  %vm3139_vm12 = vweird.f32 %v8144_v2 }
 0x459   :  { %3514 = vmatpush.bf16.msrb.mxu1 %v10041_v46  ;;  %v6042_v52 = vpop.eup %6041  ;;  %v10048_v46 = vld [vmem:[#allocation37_spill] sm:$0xff]  ;;  %v8151_v44 = vpop.f32.mrf.mxu2  ;;  %6047 = vtanh.f32 %v3089_v14 }
 0x45a   :  { %3540 = vmatpush.bf16.msrb.mxu3 %v10042_v42  ;;  %v3166_v18 = vpop.f32.mrf.mxu0  ;;  %vm3101_vm3 = vweird.f32 %v6042_v52 }
 0x45b   :  { %3621 = vmatpush.bf16.msra.mxu0 %v10039_v56  ;;  %3647 = vmatpush.bf16.msra.mxu2 %v10040_v60  ;;  %v10046_v56 = vld [vmem:[#allocation99_spill] sm:$0xff]  ;;  %v3096_v60 = vmul.f32 %v6042_v52, %v3094_v48  ;;  %vm3102_vm7 = vmor %vm3100_vm5, %vm3101_vm3 }
 0x45c   :  { %v6044_v1 = vpop.eup %6043 }
 0x45d   :  { %3515 = vmatpush.bf16.msrb.mxu1 %v10047_v58  ;;  %v3115_v42 = vmul.f32 %v6044_v1, %v3113_v30  ;;  %v3097_v54 = vsub.f32 1.0, %v3096_v60  ;;  %v10052_v58 = vld [vmem:[#allocation41_spill] sm:$0xff]  ;;  %vm3120_vm4 = vweird.f32 %v6044_v1  ;;  %v10053_v60 = vld [vmem:[#allocation71_spill] sm:$0xff] }
 0x45e   :  { %3541 = vmatpush.bf16.msrb.mxu3 %v10048_v46  ;;  %vm3121_vm8 = vmor %vm3119_vm6, %vm3120_vm4 }
 0x45f   :  { %3622 = vmatpush.bf16.msra.mxu0 %v10045_v27  ;;  %3648 = vmatpush.bf16.msra.mxu2 %v10046_v56  ;;  %v3116_v27 = vsub.f32 1.0, %v3115_v42  ;;  %v3106_v56 = vand.u32 2147483648, %v3094_v48  ;;  %v3098_v25 = vmul.f32 %v6042_v52, %v3097_v54 }
 0x461   :  { %3516 = vmatpush.bf16.msrb.mxu1 %v10051_v63  ;;  %v3117_v46 = vmul.f32 %v6044_v1, %v3116_v27  ;;  %v3099_v42 = vadd.f32 %v6042_v52, %v3098_v25  ;;  %v3107_v14 = vor.u32 1.1754944e-38, %v3106_v56  ;;  %v3126_v63 = vor.u32 1.1754944e-38, %v3125_v47  ;;  %v3192_v48 = vpop.f32.mrf.mxu2 }
 0x462   :  { %3542 = vmatpush.bf16.msrb.mxu3 %v10052_v58 }
 0x463   :  { %3623 = vmatpush.bf16.msra.mxu0 %v10049_v51  ;;  %3649 = vmatpush.bf16.msra.mxu2 %v10050_v9  ;;  %v3123_v51 = vand.u32 2147483647, %v3113_v30  ;;  %v6046_v9 = vpop.eup %6045  ;;  %v3118_v54 = vadd.f32 %v6044_v1, %v3117_v46  ;;  %v3103_v4 = vsel %vm3102_vm7, %v6042_v52, %v3099_v42 }
 0x464   :  { %v3135_v18 = vmul.f32 %v6046_v9, %v8144_v2  ;;  %v6048_v27 = vpop.eup %6047  ;;  %v3108_v58 = vsel %vm3105_vm9, %v3107_v14, %v3103_v4  ;;  %v10058_v4 = vld [vmem:[#allocation82_spill] sm:$0xff]  ;;  %vm3140_vm11 = vweird.f32 %v6046_v9 }
 0x465   :  { %3629 = vmatpush.bf16.msra.mxu1 %v10053_v60  ;;  %v3122_v20 = vsel %vm3121_vm8, %v6044_v1, %v3118_v54  ;;  %vm3124_vm10 = vcmp.eq.f32.partialorder %v3123_v51, 8.507059e+37  ;;  %v3150_v30 = vmul.f32 %v6048_v27, %v3108_v58  ;;  %v8162_v11 = vpop.f32.mrf.mxu0  ;;  %v3145_v1 = vand.u32 2147483648, %v8144_v2  ;;  %vm3141_vm13 = vmor %vm3139_vm12, %vm3140_vm11 }
 0x466   :  { %3655 = vmatpush.bf16.msra.mxu3 %v10054_v32  ;;  %v3136_v60 = vsub.f32 1.0, %v3135_v18  ;;  %v10056_v32 = vld [vmem:[#allocation74_spill] sm:$0xff]  ;;  %v3127_v25 = vsel %vm3124_vm10, %v3126_v63, %v3122_v20  ;;  %v3143_v20 = vand.u32 2147483647, %v8144_v2  ;;  %v10060_v63 = vld [vmem:[#allocation88_spill] sm:$0xff] }
 0x467   :  { %v3149_v46 = vmul.f32 %v3127_v25, %v7888_v12  ;;  %v10059_v12 = vld [vmem:[#allocation89_spill] sm:$0xff] }
 0x468   :  { %v3137_v56 = vmul.f32 %v6046_v9, %v3136_v60  ;;  %v3146_v60 = vor.u32 1.1754944e-38, %v3145_v1  ;;  %vm3144_vm14 = vcmp.eq.f32.partialorder %v3143_v20, 8.507059e+37  ;;  %v10063_v20 = vld [vmem:[#allocation119_spill] sm:$0xff] }
 0x469   :  { %3630 = vmatpush.bf16.msra.mxu1 %v10055_v8  ;;  %v8164_v47 = vadd.f32 %v3150_v30, %v3149_v46 }
 0x46a   :  { %3656 = vmatpush.bf16.msra.mxu3 %v10056_v32  ;;  %v3138_v51 = vadd.f32 %v6046_v9, %v3137_v56  ;;  %v10062_v56 = vld [vmem:[#allocation43_spill] sm:$0xff] }
 0x46b   :  { %6049 = vtanh.f32 %v8164_v47  ;;  %v8174_v52 = vpop.f32.mrf.mxu2 }
 0x46c   :  { %v3142_v58 = vsel %vm3141_vm13, %v6046_v9, %v3138_v51  ;;  %v3165_v9 = vadd.f32 %v8137_v10, %v9622_v29  ;;  %v10061_v10 = vld [vmem:[#allocation121_spill] sm:$0xff]  ;;  %v3191_v51 = vadd.f32 %v8151_v44, %v10062_v56  ;;  %v10068_v44 = vld [vmem:[#allocation122_spill] sm:$0xff] }
 0x46d   :  { %3631 = vmatpush.bf16.msra.mxu1 %v10057_v38  ;;  %v3218_v42 = vpop.f32.mrf.mxu0  ;;  %v3147_v54 = vsel %vm3144_vm14, %v3146_v60, %v3142_v58 }
 0x46e   :  { %3657 = vmatpush.bf16.msra.mxu3 %v10058_v4  ;;  %v10064_v42 = vld [vmem:[#allocation118_spill] sm:$0xff] }
 0x471   :  { %3632 = vmatpush.bf16.msra.mxu1 %v10059_v12  ;;  %v6050_v14 = vpop.eup %6049 }
 0x472   :  { %3658 = vmatpush.bf16.msra.mxu3 %v10060_v63  ;;  %v3153_v18 = vmul.f32 %v6050_v14, %v3147_v54  ;;  %v10065_v14 = vld [vmem:[#allocation124_spill] sm:$0xff]  ;;  %v10066_v54 = vld [vmem:[#allocation125_spill] sm:$0xff] }
 0x473   :  { %v3244_v2 = vpop.f32.mrf.mxu2 }
 0x474   :  { %v8178_v27 = vpack.c.bf16 %v3153_v18, %v3153_v18 }
 0x475   :  { %3633 = vmatpush.bf16.msra.mxu1 %v9912_v62 }
 0x476   :  { %3659 = vmatpush.bf16.msra.mxu3 %v9913_v0  ;;  %3504 = vmatmul.bf16.vlgmr.msrb.gmra.mxu0 %v8178_v27 }
 0x477   :  { %3517 = vmatmul.bf16.vlgmr.msrb.gmra.mxu1 %v8178_v27  ;;  %3530 = vmatmul.bf16.vlgmr.msrb.gmra.mxu2 %v8178_v27 }
 0x478   :  { %3543 = vmatmul.bf16.vlgmr.msrb.gmra.mxu3 %v8178_v27  ;;  %3668 = vmatpush.bf16.msrb.mxu0 %v6751_v33 }
 0x479   :  { %3634 = vmatpush.bf16.msra.mxu1 %v9914_v16  ;;  %3694 = vmatpush.bf16.msrb.mxu2 %v6753_v24 }
 0x47a   :  { %3660 = vmatpush.bf16.msra.mxu3 %v9915_v55 }
 0x47b   :  { %v3177_v25 = vpop.f32.mrf.mxu1 }
 0x47c   :  { %3669 = vmatpush.bf16.msrb.mxu0 %v9492_v53  ;;  %v3178_v30 = vadd.f32 %v3177_v25, %v3165_v9  ;;  %v10067_v25 = vld [vmem:[#allocation123_spill] sm:$0xff] }
 0x47d   :  { %3635 = vmatpush.bf16.msra.mxu1 %v9916_v31  ;;  %3695 = vmatpush.bf16.msrb.mxu2 %v9493_v28 }
 0x47e   :  { %3661 = vmatpush.bf16.msra.mxu3 %v9772_v40  ;;  %v5641_v46 = vmul.f32 -1.442695, %v3178_v30 }
 0x480   :  { %3670 = vmatpush.bf16.msrb.mxu0 %v9496_v41  ;;  %6051 = vpow2.f32 %v5641_v46 }
 0x481   :  { %3636 = vmatpush.bf16.msra.mxu1 %v9773_v59  ;;  %3696 = vmatpush.bf16.msrb.mxu2 %v9497_v23  ;;  %v3203_v1 = vpop.f32.mrf.mxu3 }
 0x482   :  { %3662 = vmatpush.bf16.msra.mxu3 %v9774_v35  ;;  %v3204_v58 = vadd.f32 %v3203_v1, %v3191_v51  ;;  %v10069_v1 = vld [vmem:[#allocation127_spill] sm:$0xff] }
 0x483   :  { %v8204_v48 = vpop.f32.mrf.mxu0  ;;  %v3179_v18 = vpop.f32.mrf.mxu1 }
 0x484   :  { %3671 = vmatpush.bf16.msrb.mxu0 %v9626_v57  ;;  %v5642_v2 = vmul.f32 -1.442695, %v3204_v58  ;;  %v10070_v58 = vld [vmem:[#allocation126_spill] sm:$0xff] }
 0x485   :  { %3681 = vmatpush.bf16.msrb.mxu1 %v9489_v45  ;;  %3697 = vmatpush.bf16.msrb.mxu2 %v9627_v19 }
 0x486   :  { %3707 = vmatpush.bf16.msrb.mxu3 %v9488_v43  ;;  %3624 = vmatmul.bf16.vlgmr.msra.gmra.mxu0 %v8178_v27  ;;  %v6052_v30 = vpop.eup %6051  ;;  %6053 = vpow2.f32 %v5642_v2 }
 0x487   :  { %3650 = vmatmul.bf16.vlgmr.msra.gmra.mxu2 %v8178_v27  ;;  %v8222_v46 = vadd.f32 1.0, %v6052_v30  ;;  %v10071_v30 = vld [vmem:[#allocation107_spill] sm:$0xff] }
 0x488   :  { %3672 = vmatpush.bf16.msrb.mxu0 %v9917_v39 }
 0x489   :  { %3682 = vmatpush.bf16.msrb.mxu1 %v9495_v61  ;;  %3698 = vmatpush.bf16.msrb.mxu2 %v10061_v10  ;;  %v8215_v60 = vpop.f32.mrf.mxu2  ;;  %6055 = vrcp.f32 %v8222_v46  ;;  %v3205_v51 = vpop.f32.mrf.mxu3  ;;  %vm3268_vm1 = vweird.f32 %v8222_v46 }
 0x48a   :  { %3708 = vmatpush.bf16.msrb.mxu3 %v9494_v13 }
 0x48b   :  { %v3334_v9 = vpop.f32.mrf.mxu0  ;;  %v3229_v2 = vpop.f32.mrf.mxu1 }
 0x48c   :  { %3673 = vmatpush.bf16.msrb.mxu0 %v10065_v14  ;;  %v6054_v9 = vpop.eup %6053 }
 0x48d   :  { %3683 = vmatpush.bf16.msrb.mxu1 %v9499_v7  ;;  %3699 = vmatpush.bf16.msrb.mxu2 %v10066_v54 }
 0x48e   :  { %3709 = vmatpush.bf16.msrb.mxu3 %v9624_v50  ;;  %v10080_v50 = vld [vmem:[#allocation46_spill] sm:$0xff] }
 0x48f   :  { %v6056_v51 = vpop.eup %6055 }
 0x490   :  { %3674 = vmatpush.bf16.msrb.mxu0 %v9926_v15  ;;  %vm3269_vm15 = vweird.f32 %v6056_v51 }
 0x491   :  { %3684 = vmatpush.bf16.msrb.mxu1 %v10063_v20  ;;  %3700 = vmatpush.bf16.msrb.mxu2 %v9927_v3  ;;  %v3360_v18 = vpop.f32.mrf.mxu2  ;;  %v3264_v20 = vmul.f32 %v6056_v51, %v8222_v46  ;;  %vm8255_vm3 = vmor %vm3268_vm1, %vm3269_vm15 }
 0x492   :  { %3710 = vmatpush.bf16.msrb.mxu3 %v10064_v42  ;;  %v10073_v42 = vld [vmem:[#allocation131_spill] sm:$0xff]  ;;  %v10074_v18 = vld [vmem:[#allocation130_spill] sm:$0xff] }
 0x493   :  { %v3231_v56 = vpop.f32.mrf.mxu1 }
 0x494   :  { %3675 = vmatpush.bf16.msrb.mxu0 %v9790_v26 }
 0x495   :  { %3685 = vmatpush.bf16.msrb.mxu1 %v10067_v25  ;;  %3701 = vmatpush.bf16.msrb.mxu2 %v9791_v17  ;;  %v3281_v25 = vadd.f32 1.0, %v6054_v9  ;;  %v10076_v17 = vld [vmem:[#allocation112_spill] sm:$0xff]  ;;  %v3255_v9 = vpop.f32.mrf.mxu3 }
 0x496   :  { %3711 = vmatpush.bf16.msrb.mxu3 %v10068_v44  ;;  %v10072_v44 = vld [vmem:[#allocation108_spill] sm:$0xff] }
 0x497   :  { %3676 = vmatmul.bf16.vlgmr.msrb.gmra.mxu0 %v8178_v27  ;;  %6057 = vrcp.f32 %v3281_v25  ;;  %v3293_v56 = vand.u32 2147483648, %v3281_v25  ;;  %vm3287_vm2 = vweird.f32 %v3281_v25 }
 0x498   :  { %3784 = vmatpush.bf16.msra.mxu0 %v10071_v30  ;;  %3702 = vmatmul.bf16.vlgmr.msrb.gmra.mxu2 %v8178_v27  ;;  %v10077_v30 = vld [vmem:[#allocation113_spill] sm:$0xff]  ;;  %v10079_v27 = vld [vmem:[#allocation134_spill] sm:$0xff] }
 0x499   :  { %3686 = vmatpush.bf16.msrb.mxu1 %v10069_v1  ;;  %3810 = vmatpush.bf16.msra.mxu2 %v10072_v44  ;;  %v10078_v44 = vld [vmem:[#allocation135_spill] sm:$0xff] }
 0x49a   :  { %3712 = vmatpush.bf16.msrb.mxu3 %v10070_v58  ;;  %v10075_v58 = vld [vmem:[#allocation47_spill] sm:$0xff] }
 0x49b   :  { %v3243_v1 = vadd.f32 %v8174_v52, %v10075_v58 }
 0x49c   :  { %3785 = vmatpush.bf16.msra.mxu0 %v10076_v17  ;;  %v3217_v17 = vadd.f32 %v8162_v11, %v10080_v50 }
 0x49d   :  { %3687 = vmatpush.bf16.msrb.mxu1 %v10073_v42  ;;  %3811 = vmatpush.bf16.msra.mxu2 %v10077_v30  ;;  %v3265_v42 = vsub.f32 1.0, %v3264_v20  ;;  %v3256_v26 = vadd.f32 %v3255_v9, %v3243_v1  ;;  %v6058_v52 = vpop.eup %6057  ;;  %v3257_v9 = vpop.f32.mrf.mxu3 }
 0x49e   :  { %3713 = vmatpush.bf16.msrb.mxu3 %v10074_v18  ;;  %v3283_v7 = vmul.f32 %v6058_v52, %v3281_v25  ;;  %v3230_v3 = vadd.f32 %v3229_v2, %v3217_v17  ;;  %vm3288_vm0 = vweird.f32 %v6058_v52  ;;  %v3294_v2 = vor.u32 1.1754944e-38, %v3293_v56 }
 0x49f   :  { %v5643_v18 = vmul.f32 -1.442695, %v3256_v26  ;;  %v3266_v58 = vmul.f32 %v6056_v51, %v3265_v42  ;;  %v3274_v42 = vand.u32 2147483648, %v8222_v46  ;;  %vm3289_vm4 = vmor %vm3287_vm2, %vm3288_vm0 }
 0x4a0   :  { %3786 = vmatpush.bf16.msra.mxu0 %v9937_v49  ;;  %v3284_v30 = vsub.f32 1.0, %v3283_v7  ;;  %v3272_v7 = vand.u32 2147483647, %v8222_v46 }
 0x4a1   :  { %3688 = vmatpush.bf16.msrb.mxu1 %v10078_v44  ;;  %3812 = vmatpush.bf16.msra.mxu2 %v9938_v37  ;;  %6059 = vpow2.f32 %v5643_v18  ;;  %v3267_v20 = vadd.f32 %v6056_v51, %v3266_v58  ;;  %v3275_v9 = vor.u32 1.1754944e-38, %v3274_v42 }
 0x4a2   :  { %3714 = vmatpush.bf16.msrb.mxu3 %v10079_v27  ;;  %v3285_v26 = vmul.f32 %v6058_v52, %v3284_v30  ;;  %v3291_v27 = vand.u32 2147483647, %v3281_v25  ;;  %6061 = vtanh.f32 %v3230_v3  ;;  %vm3273_vm6 = vcmp.eq.f32.partialorder %v3272_v7, 8.507059e+37  ;;  %v10083_v3 = vld [vmem:[#allocation57_spill] sm:$0xff] }
 0x4a3   :  { %v8250_v1 = vpop.f32.mrf.mxu0  ;;  %v3271_v30 = vsel %vm8255_vm3, %v6056_v51, %v3267_v20  ;;  %v10084_v51 = vld [vmem:[#allocation154_spill] sm:$0xff]  ;;  %v10085_v20 = vld [vmem:[#allocation155_spill] sm:$0xff] }
 0x4a4   :  { %3787 = vmatpush.bf16.msra.mxu0 %v9803_v36  ;;  %v3286_v58 = vadd.f32 %v6058_v52, %v3285_v26  ;;  %vm3292_vm5 = vcmp.eq.f32.partialorder %v3291_v27, 8.507059e+37  ;;  %v3276_v26 = vsel %vm3273_vm6, %v3275_v9, %v3271_v30  ;;  %v10089_v9 = vld [vmem:[#allocation161_spill] sm:$0xff] }
 0x4a5   :  { %3813 = vmatpush.bf16.msra.mxu2 %v9804_v6  ;;  %v10195_v6 = vld [vmem:[#allocation37_spill] sm:$0xff] }
 0x4a6   :  { %v3290_v46 = vsel %vm3289_vm4, %v6058_v52, %v3286_v58  ;;  %v10087_v58 = vld [vmem:[#allocation158_spill] sm:$0xff] }
 0x4a7   :  { %v6060_v11 = vpop.eup %6059  ;;  %v3295_v25 = vsel %vm3292_vm5, %v3294_v2, %v3290_v46  ;;  %v10088_v2 = vld [vmem:[#allocation159_spill] sm:$0xff] }
 0x4a8   :  { %3788 = vmatpush.bf16.msra.mxu0 %v9805_v5  ;;  %v3301_v18 = vadd.f32 1.0, %v6060_v11  ;;  %v6062_v5 = vpop.eup %6061 }
 0x4a9   :  { %3814 = vmatpush.bf16.msra.mxu2 %v9806_v34  ;;  %v8263_v44 = vpop.f32.mrf.mxu2  ;;  %v3317_v34 = vmul.f32 %v3295_v25, %v10083_v3  ;;  %v3318_v17 = vmul.f32 %v6062_v5, %v3276_v26  ;;  %v10090_v5 = vld [vmem:[#allocation162_spill] sm:$0xff]  ;;  %v10091_v26 = vld [vmem:[#allocation48_spill] sm:$0xff] }
 0x4aa   :  { %6063 = vrcp.f32 %v3301_v18  ;;  %v3313_v30 = vand.u32 2147483648, %v3301_v18  ;;  %v3311_v25 = vand.u32 2147483647, %v3301_v18  ;;  %vm3307_vm8 = vweird.f32 %v3301_v18 }
 0x4ab   :  { %v3386_v56 = vpop.f32.mrf.mxu0  ;;  %v8270_v52 = vadd.f32 %v3318_v17, %v3317_v34  ;;  %v3333_v34 = vadd.f32 %v8204_v48, %v10091_v26 }
 0x4ac   :  { %3789 = vmatpush.bf16.msra.mxu0 %v9668_v22  ;;  %v3314_v56 = vor.u32 1.1754944e-38, %v3313_v30  ;;  %vm3312_vm10 = vcmp.eq.f32.partialorder %v3311_v25, 8.507059e+37  ;;  %v10097_v25 = vld [vmem:[#allocation174_spill] sm:$0xff] }
 0x4ad   :  { %3815 = vmatpush.bf16.msra.mxu2 %v9808_v21  ;;  %10086 = vst [vmem:[#allocation105_spill] sm:$0xff] %v8270_v52  ;;  %6065 = vtanh.f32 %v8270_v52 }
 0x4b0   :  { %3790 = vmatpush.bf16.msra.mxu0 %v10084_v51  ;;  %v6064_v27 = vpop.eup %6063  ;;  %v10095_v51 = vld [vmem:[#allocation171_spill] sm:$0xff] }
 0x4b1   :  { %3816 = vmatpush.bf16.msra.mxu2 %v10085_v20  ;;  %v3303_v42 = vmul.f32 %v6064_v27, %v3301_v18  ;;  %v3412_v7 = vpop.f32.mrf.mxu2  ;;  %vm3308_vm7 = vweird.f32 %v6064_v27  ;;  %v10094_v20 = vld [vmem:[#allocation170_spill] sm:$0xff]  ;;  %v10096_v18 = vld [vmem:[#allocation49_spill] sm:$0xff] }
 0x4b2   :  { %vm3309_vm9 = vmor %vm3307_vm8, %vm3308_vm7  ;;  %v10093_v7 = vld [vmem:[#allocation167_spill] sm:$0xff]  ;;  %v3359_v30 = vadd.f32 %v8215_v60, %v10096_v18  ;;  %v10101_v60 = vld [vmem:[#allocation178_spill] sm:$0xff] }
 0x4b3   :  { %v3304_v11 = vsub.f32 1.0, %v3303_v42  ;;  %v10092_v42 = vld [vmem:[#allocation166_spill] sm:$0xff] }
 0x4b4   :  { %3791 = vmatpush.bf16.msra.mxu0 %v10087_v58  ;;  %v10109_v18 = vld [vmem:[#allocation186_spill] sm:$0xff] }
 0x4b5   :  { %3817 = vmatpush.bf16.msra.mxu2 %v10088_v2  ;;  %v3305_v46 = vmul.f32 %v6064_v27, %v3304_v11  ;;  %v3345_v17 = vpop.f32.mrf.mxu1  ;;  %v6066_v2 = vpop.eup %6065 }
 0x4b7   :  { %v3306_v3 = vadd.f32 %v6064_v27, %v3305_v46 }
 0x4b8   :  { %3836 = vmatpush.bf16.msrb.mxu0 %v10089_v9  ;;  %v3346_v9 = vadd.f32 %v3345_v17, %v3333_v34  ;;  %v10098_v34 = vld [vmem:[#allocation175_spill] sm:$0xff]  ;;  %v10104_v17 = vld [vmem:[#allocation136_spill] sm:$0xff] }
 0x4b9   :  { %3862 = vmatpush.bf16.msrb.mxu2 %v10090_v5  ;;  %v3310_v52 = vsel %vm3309_vm9, %v6064_v27, %v3306_v3  ;;  %v10102_v3 = vld [vmem:[#allocation179_spill] sm:$0xff] }
 0x4ba   :  { %v3315_v5 = vsel %vm3312_vm10, %v3314_v56, %v3310_v52  ;;  %v5644_v58 = vmul.f32 -1.442695, %v3346_v9  ;;  %v10100_v9 = vld [vmem:[#allocation109_spill] sm:$0xff] }
 0x4bb   :  { %v3321_v11 = vmul.f32 %v6066_v2, %v3315_v5  ;;  %v10099_v2 = vld [vmem:[#allocation110_spill] sm:$0xff]  ;;  %v10103_v56 = vld [vmem:[#allocation137_spill] sm:$0xff] }
 0x4bc   :  { %3837 = vmatpush.bf16.msrb.mxu0 %v10092_v42  ;;  %6067 = vpow2.f32 %v5644_v58  ;;  %v3371_v46 = vpop.f32.mrf.mxu3 }
 0x4bd   :  { %3863 = vmatpush.bf16.msrb.mxu2 %v10093_v7  ;;  %v3615_v48 = vpack.c.bf16 %v3321_v11, %v3321_v11  ;;  %v3372_v26 = vadd.f32 %v3371_v46, %v3359_v30  ;;  %v3347_v27 = vpop.f32.mrf.mxu1  ;;  %v10105_v30 = vld [vmem:[#allocation182_spill] sm:$0xff]  ;;  %v10106_v46 = vld [vmem:[#allocation183_spill] sm:$0xff] }
 0x4bf   :  { %3637 = vmatmul.bf16.vlgmr.msra.gmra.mxu1 %v3615_v48  ;;  %3663 = vmatmul.bf16.vlgmr.msra.gmra.mxu3 %v3615_v48  ;;  %v5645_v52 = vmul.f32 -1.442695, %v3372_v26 }
 0x4c0   :  { %3838 = vmatpush.bf16.msrb.mxu0 %v10094_v20  ;;  %3818 = vmatmul.bf16.vlgmr.msra.gmra.mxu2 %v3615_v48 }
 0x4c1   :  { %3864 = vmatpush.bf16.msrb.mxu2 %v10095_v51  ;;  %3792 = vmatmul.bf16.vlgmr.msra.gmra.mxu0 %v3615_v48  ;;  %6069 = vpow2.f32 %v5645_v52  ;;  %v10108_v52 = vld [vmem:[#allocation140_spill] sm:$0xff] }
 0x4c2   :  { %3797 = vmatpush.bf16.msra.mxu1 %v10099_v2  ;;  %3823 = vmatpush.bf16.msra.mxu3 %v10100_v9  ;;  %v6068_v58 = vpop.eup %6067 }
 0x4c3   :  { %v8289_v5 = vadd.f32 1.0, %v6068_v58  ;;  %v10107_v58 = vld [vmem:[#allocation141_spill] sm:$0xff] }
 0x4c4   :  { %3839 = vmatpush.bf16.msrb.mxu0 %v10097_v25  ;;  %v3373_v11 = vpop.f32.mrf.mxu3  ;;  %v10117_v25 = vld [vmem:[#allocation13_spill] sm:$0xff] }
 0x4c5   :  { %3865 = vmatpush.bf16.msrb.mxu2 %v10098_v34  ;;  %6071 = vrcp.f32 %v8289_v5  ;;  %v3397_v26 = vpop.f32.mrf.mxu1  ;;  %v10116_v34 = vld [vmem:[#allocation10_spill] sm:$0xff]  ;;  %vm3436_vm13 = vweird.f32 %v8289_v5 }
 0x4c6   :  { %3798 = vmatpush.bf16.msra.mxu1 %v10103_v56  ;;  %3824 = vmatpush.bf16.msra.mxu3 %v10104_v17  ;;  %v10111_v17 = vld [vmem:[#allocation116_spill] sm:$0xff] }
 0x4c7   :  { %v6070_v27 = vpop.eup %6069  ;;  %v3411_v56 = vadd.f32 %v8263_v44, %v10111_v17  ;;  %v10118_v44 = vld [vmem:[#allocation149_spill] sm:$0xff]  ;;  %v10119_v17 = vld [vmem:[#allocation148_spill] sm:$0xff] }
 0x4c8   :  { %3840 = vmatpush.bf16.msrb.mxu0 %v10101_v60  ;;  %v3449_v9 = vadd.f32 1.0, %v6070_v27 }
 0x4c9   :  { %3866 = vmatpush.bf16.msrb.mxu2 %v10102_v3  ;;  %v10110_v3 = vld [vmem:[#allocation187_spill] sm:$0xff] }
 0x4ca   :  { %3799 = vmatpush.bf16.msra.mxu1 %v10107_v58  ;;  %3825 = vmatpush.bf16.msra.mxu3 %v10108_v52  ;;  %6073 = vrcp.f32 %v3449_v9  ;;  %vm3455_vm14 = vweird.f32 %v3449_v9 }
 0x4cb   :  { %v8300_v2 = vpop.eup %6071 }
 0x4cc   :  { %3841 = vmatpush.bf16.msrb.mxu0 %v10105_v30  ;;  %v3432_v11 = vmul.f32 %v8300_v2, %v8289_v5  ;;  %v10113_v30 = vld [vmem:[#allocation144_spill] sm:$0xff]  ;;  %v3423_v52 = vpop.f32.mrf.mxu3  ;;  %vm3437_vm11 = vweird.f32 %v8300_v2 }
 0x4cd   :  { %3867 = vmatpush.bf16.msrb.mxu2 %v10106_v46  ;;  %v10112_v46 = vld [vmem:[#allocation145_spill] sm:$0xff]  ;;  %v3424_v27 = vadd.f32 %v3423_v52, %v3411_v56  ;;  %v3399_v60 = vpop.f32.mrf.mxu1  ;;  %v10120_v56 = vld [vmem:[#allocation52_spill] sm:$0xff]  ;;  %vm8330_vm15 = vmor %vm3436_vm13, %vm3437_vm11 }
 0x4ce   :  { %3800 = vmatpush.bf16.msra.mxu1 %v10112_v46  ;;  %3826 = vmatpush.bf16.msra.mxu3 %v10113_v30  ;;  %v3433_v58 = vsub.f32 1.0, %v3432_v11  ;;  %v3385_v60 = vadd.f32 %v8250_v1, %v10120_v56  ;;  %v10121_v46 = vld [vmem:[#allocation14_spill] sm:$0xff]  ;;  %v3442_v1 = vand.u32 2147483648, %v8289_v5 }
 0x4cf   :  { %3689 = vmatmul.bf16.vlgmr.msrb.gmra.mxu1 %v3615_v48  ;;  %3715 = vmatmul.bf16.vlgmr.msrb.gmra.mxu3 %v3615_v48  ;;  %v5646_v51 = vmul.f32 -1.442695, %v3424_v27  ;;  %v10131_v56 = vld [vmem:[#allocation22_spill] sm:$0xff] }
 0x4d0   :  { %3842 = vmatpush.bf16.msrb.mxu0 %v10109_v18  ;;  %v10114_v18 = vld [vmem:[#allocation190_spill] sm:$0xff]  ;;  %v6074_v30 = vpop.eup %6073  ;;  %v3434_v11 = vmul.f32 %v8300_v2, %v3433_v58  ;;  %v3398_v27 = vadd.f32 %v3397_v26, %v3385_v60  ;;  %v10125_v26 = vld [vmem:[#allocation17_spill] sm:$0xff] }
 0x4d1   :  { %3868 = vmatpush.bf16.msrb.mxu2 %v10110_v3  ;;  %v10115_v3 = vld [vmem:[#allocation191_spill] sm:$0xff]  ;;  %v3451_v52 = vmul.f32 %v6074_v30, %v3449_v9  ;;  %6075 = vpow2.f32 %v5646_v51  ;;  %vm3456_vm12 = vweird.f32 %v6074_v30  ;;  %v3459_v51 = vand.u32 2147483647, %v3449_v9  ;;  %v10126_v60 = vld [vmem:[#allocation21_spill] sm:$0xff] }
 0x4d2   :  { %3801 = vmatpush.bf16.msra.mxu1 %v10118_v44  ;;  %3827 = vmatpush.bf16.msra.mxu3 %v10119_v17  ;;  %v10124_v44 = vld [vmem:[#allocation152_spill] sm:$0xff]  ;;  %v3461_v17 = vand.u32 2147483648, %v3449_v9  ;;  %v3435_v58 = vadd.f32 %v8300_v2, %v3434_v11  ;;  %6077 = vtanh.f32 %v3398_v27  ;;  %vm3457_vm0 = vmor %vm3455_vm14, %vm3456_vm12  ;;  %v10136_v11 = vld [vmem:[#allocation165_spill] sm:$0xff] }
 0x4d3   :  { %vm3460_vm1 = vcmp.eq.f32.partialorder %v3459_v51, 8.507059e+37  ;;  %v10141_v51 = vld [vmem:[#allocation169_spill] sm:$0xff] }
 0x4d4   :  { %3843 = vmatpush.bf16.msrb.mxu0 %v10114_v18 }
 0x4d5   :  { %3869 = vmatpush.bf16.msrb.mxu2 %v10115_v3  ;;  %v10123_v3 = vld [vmem:[#allocation153_spill] sm:$0xff] }
 0x4d6   :  { %3802 = vmatpush.bf16.msra.mxu1 %v10123_v3  ;;  %3828 = vmatpush.bf16.msra.mxu3 %v10124_v44  ;;  %v3462_v44 = vor.u32 1.1754944e-38, %v3461_v17  ;;  %v10135_v17 = vld [vmem:[#allocation56_spill] sm:$0xff] }
 0x4d7   :  { %3844 = vmatmul.bf16.vlgmr.msrb.gmra.mxu0 %v3615_v48 }
 0x4d8   :  { %3957 = vmatpush.bf16.msra.mxu0 %v10116_v34  ;;  %3870 = vmatmul.bf16.vlgmr.msrb.gmra.mxu2 %v3615_v48  ;;  %v10122_v34 = vld [vmem:[#allocation19_spill] sm:$0xff]  ;;  %v3425_v48 = vpop.f32.mrf.mxu3 }
 0x4d9   :  { %3983 = vmatpush.bf16.msra.mxu2 %v10117_v25  ;;  %v3452_v25 = vsub.f32 1.0, %v3451_v52  ;;  %v6076_v52 = vpop.eup %6075  ;;  %v10130_v48 = vld [vmem:[#allocation156_spill] sm:$0xff] }
 0x4da   :  { %3829 = vmatpush.bf16.msra.mxu3 %v10130_v48  ;;  %v10134_v48 = vld [vmem:[#allocation160_spill] sm:$0xff] }
 0x4db   :  { %v3453_v18 = vmul.f32 %v6074_v30, %v3452_v25  ;;  %v10129_v25 = vld [vmem:[#allocation157_spill] sm:$0xff] }
 0x4dc   :  { %3958 = vmatpush.bf16.msra.mxu0 %v10121_v46  ;;  %v3440_v46 = vand.u32 2147483647, %v8289_v5  ;;  %3803 = vmatpush.bf16.msra.mxu1 %v10129_v25  ;;  %v3439_v5 = vsel %vm8330_vm15, %v8300_v2, %v3435_v58  ;;  %v10133_v25 = vld [vmem:[#allocation164_spill] sm:$0xff]  ;;  %v10137_v2 = vld [vmem:[#allocation163_spill] sm:$0xff] }
 0x4dd   :  { %3984 = vmatpush.bf16.msra.mxu2 %v10122_v34  ;;  %v3454_v34 = vadd.f32 %v6074_v30, %v3453_v18  ;;  %v10132_v18 = vld [vmem:[#allocation25_spill] sm:$0xff] }
 0x4de   :  { %vm3441_vm2 = vcmp.eq.f32.partialorder %v3440_v46, 8.507059e+37  ;;  %3830 = vmatpush.bf16.msra.mxu3 %v10134_v48  ;;  %v10142_v46 = vld [vmem:[#allocation168_spill] sm:$0xff] }
 0x4df   :  { %v3458_v3 = vsel %vm3457_vm0, %v6074_v30, %v3454_v34  ;;  %v6078_v30 = vpop.eup %6077  ;;  %v10143_v34 = vld [vmem:[#allocation30_spill] sm:$0xff]  ;;  %v10169_v48 = vld [vmem:[#allocation192_spill] sm:$0xff] }
 0x4e0   :  { %3959 = vmatpush.bf16.msra.mxu0 %v10125_v26  ;;  %v3469_v26 = vadd.f32 1.0, %v6076_v52  ;;  %v3463_v9 = vsel %vm3460_vm1, %v3462_v44, %v3458_v3  ;;  %3804 = vmatpush.bf16.msra.mxu1 %v10133_v25  ;;  %v10139_v3 = vld [vmem:[#allocation28_spill] sm:$0xff]  ;;  %v10175_v25 = vld [vmem:[#allocation15_spill] sm:$0xff] }
 0x4e1   :  { %3985 = vmatpush.bf16.msra.mxu2 %v10126_v60  ;;  %v3443_v60 = vor.u32 1.1754944e-38, %v3442_v1  ;;  %v3485_v20 = vmul.f32 %v3463_v9, %v10135_v17  ;;  %v10138_v1 = vld [vmem:[#allocation26_spill] sm:$0xff]  ;;  %v10145_v9 = vld [vmem:[#allocation173_spill] sm:$0xff] }
 0x4e2   :  { %6079 = vrcp.f32 %v3469_v26  ;;  %3875 = vmatpush.bf16.msrb.mxu3 %v10137_v2  ;;  %vm3475_vm4 = vweird.f32 %v3469_v26 }
 0x4e3   :  { %v3444_v27 = vsel %vm3441_vm2, %v3443_v60, %v3439_v5  ;;  %v10144_v5 = vld [vmem:[#allocation32_spill] sm:$0xff] }
 0x4e4   :  { %3960 = vmatpush.bf16.msra.mxu0 %v10131_v56  ;;  %3849 = vmatpush.bf16.msrb.mxu1 %v10136_v11  ;;  %v3486_v58 = vmul.f32 %v6078_v30, %v3444_v27  ;;  %v3481_v27 = vand.u32 2147483648, %v3469_v26  ;;  %v10147_v30 = vld [vmem:[#allocation34_spill] sm:$0xff] }
 0x4e5   :  { %3986 = vmatpush.bf16.msra.mxu2 %v10132_v18  ;;  %v10146_v18 = vld [vmem:[#allocation172_spill] sm:$0xff] }
 0x4e6   :  { %v8348_v56 = vadd.f32 %v3486_v58, %v3485_v20  ;;  %3876 = vmatpush.bf16.msrb.mxu3 %v10142_v46  ;;  %v3479_v20 = vand.u32 2147483647, %v3469_v26  ;;  %v10148_v58 = vld [vmem:[#allocation36_spill] sm:$0xff] }
 0x4e8   :  { %3961 = vmatpush.bf16.msra.mxu0 %v10138_v1  ;;  %v6080_v44 = vpop.eup %6079  ;;  %10140 = vst [vmem:[#allocation104_spill] sm:$0xff] %v8348_v56  ;;  %3850 = vmatpush.bf16.msrb.mxu1 %v10141_v51  ;;  %6081 = vtanh.f32 %v8348_v56  ;;  %vm3480_vm6 = vcmp.eq.f32.partialorder %v3479_v20, 8.507059e+37  ;;  %v10152_v51 = vld [vmem:[#allocation38_spill] sm:$0xff]  ;;  %v10153_v56 = vld [vmem:[#allocation40_spill] sm:$0xff] }
 0x4e9   :  { %3987 = vmatpush.bf16.msra.mxu2 %v10139_v3  ;;  %v3471_v52 = vmul.f32 %v6080_v44, %v3469_v26  ;;  %vm3476_vm3 = vweird.f32 %v6080_v44  ;;  %v10149_v3 = vld [vmem:[#allocation177_spill] sm:$0xff]  ;;  %v10159_v20 = vld [vmem:[#allocation184_spill] sm:$0xff] }
 0x4ea   :  { %3877 = vmatpush.bf16.msrb.mxu3 %v10146_v18  ;;  %vm3477_vm5 = vmor %vm3475_vm4, %vm3476_vm3  ;;  %v10151_v18 = vld [vmem:[#allocation100_spill] sm:$0xff]  ;;  %v10155_v26 = vld [vmem:[#allocation69_spill] sm:$0xff] }
 0x4eb   :  { %v3472_v60 = vsub.f32 1.0, %v3471_v52  ;;  %v3482_v52 = vor.u32 1.1754944e-38, %v3481_v27 }
 0x4ec   :  { %3962 = vmatpush.bf16.msra.mxu0 %v10143_v34  ;;  %3851 = vmatpush.bf16.msrb.mxu1 %v10145_v9  ;;  %v10150_v34 = vld [vmem:[#allocation176_spill] sm:$0xff]  ;;  %v3490_v9 = vperm.slane %v10151_v18, 3  ;;  %v10158_v18 = vld [vmem:[#allocation185_spill] sm:$0xff] }
 0x4ed   :  { %3988 = vmatpush.bf16.msra.mxu2 %v10144_v5  ;;  %v3473_v17 = vmul.f32 %v6080_v44, %v3472_v60 }
 0x4ee   :  { %3878 = vmatpush.bf16.msrb.mxu3 %v10150_v34  ;;  %v6082_v46 = vpop.eup %6081  ;;  %v10157_v34 = vld [vmem:[#allocation180_spill] sm:$0xff] }
 0x4ef   :  { %v3474_v1 = vadd.f32 %v6080_v44, %v3473_v17  ;;  %v10156_v17 = vld [vmem:[#allocation181_spill] sm:$0xff] }
 0x4f0   :  { %3963 = vmatpush.bf16.msra.mxu0 %v10147_v30  ;;  %3852 = vmatpush.bf16.msrb.mxu1 %v10149_v3  ;;  %v10166_v3 = vld [vmem:[#allocation80_spill] sm:$0xff] }
 0x4f1   :  { %3989 = vmatpush.bf16.msra.mxu2 %v10148_v58  ;;  %v3478_v5 = vsel %vm3477_vm5, %v6080_v44, %v3474_v1  ;;  %v10154_v58 = vld [vmem:[#allocation68_spill] sm:$0xff]  ;;  %v10161_v1 = vld [vmem:[#allocation73_spill] sm:$0xff] }
 0x4f2   :  { %v3483_v60 = vsel %vm3480_vm6, %v3482_v52, %v3478_v5  ;;  %3879 = vmatpush.bf16.msrb.mxu3 %v10157_v34  ;;  %v10162_v52 = vld [vmem:[#allocation66_spill] sm:$0xff]  ;;  %v10164_v34 = vld [vmem:[#allocation189_spill] sm:$0xff] }
 0x4f3   :  { %v3489_v30 = vmul.f32 %v6082_v46, %v3483_v60  ;;  %v10163_v60 = vld [vmem:[#allocation67_spill] sm:$0xff] }
 0x4f4   :  { %3964 = vmatpush.bf16.msra.mxu0 %v10152_v51  ;;  %3853 = vmatpush.bf16.msrb.mxu1 %v10156_v17  ;;  %v10160_v51 = vld [vmem:[#allocation72_spill] sm:$0xff]  ;;  %v3518_v46 = vpop.f32.mrf.mxu1 }
 0x4f5   :  { %3990 = vmatpush.bf16.msra.mxu2 %v10153_v56  ;;  %v3491_v27 = vmul.f32 %v3490_v9, %v3489_v30  ;;  %v3783_v44 = vpack.c.bf16 %v3489_v30, %v3489_v30  ;;  %v3505_v56 = vpop.f32.mrf.mxu0  ;;  %v3549_v17 = vadd.f32 %v3518_v46, %v10163_v60  ;;  %v10171_v46 = vld [vmem:[#allocation76_spill] sm:$0xff] }
 0x4f6   :  { %3880 = vmatpush.bf16.msrb.mxu3 %v10159_v20  ;;  %v3548_v5 = vadd.f32 %v3505_v56, %v10162_v52  ;;  %v10168_v20 = vld [vmem:[#allocation193_spill] sm:$0xff]  ;;  %v10170_v56 = vld [vmem:[#allocation11_spill] sm:$0xff]  ;;  %v10172_v60 = vld [vmem:[#allocation12_spill] sm:$0xff] }
 0x4f7   :  { %3492 = vadd.xlane.f32.xlu1 %v3491_v27  ;;  %3805 = vmatmul.bf16.vlgmr.msra.gmra.mxu1 %v3783_v44  ;;  %v5648_v30 = vmul.f32 -1.442695, %v3549_v17  ;;  %v10165_v27 = vld [vmem:[#allocation188_spill] sm:$0xff] }
 0x4f8   :  { %4077 = vmatpush.bf16.msrb.mxu0 %v10154_v58  ;;  %3831 = vmatmul.bf16.vlgmr.msra.gmra.mxu3 %v3783_v44  ;;  %v5647_v9 = vmul.f32 -1.442695, %v3548_v5  ;;  %v10191_v58 = vld [vmem:[#allocation103_spill] sm:$0xff] }
 0x4f9   :  { %4103 = vmatpush.bf16.msrb.mxu2 %v10155_v26  ;;  %3854 = vmatpush.bf16.msrb.mxu1 %v10158_v18  ;;  %v10167_v18 = vld [vmem:[#allocation81_spill] sm:$0xff] }
 0x4fa   :  { %3881 = vmatpush.bf16.msrb.mxu3 %v10165_v27  ;;  %6083 = vpow2.f32 %v5647_v9  ;;  %v3531_v2 = vpop.f32.mrf.mxu2  ;;  %v10173_v27 = vld [vmem:[#allocation84_spill] sm:$0xff] }
 0x4fb   :  { %6085 = vpow2.f32 %v5648_v30  ;;  %v3544_v11 = vpop.f32.mrf.mxu3 }
 0x4fc   :  { %4078 = vmatpush.bf16.msrb.mxu0 %v10160_v51  ;;  %v3551_v52 = vadd.f32 %v3544_v11, %v10171_v46  ;;  %v3520_v17 = vpop.f32.mrf.mxu1  ;;  %v10178_v46 = vld [vmem:[#allocation91_spill] sm:$0xff] }
 0x4fd   :  { %4104 = vmatpush.bf16.msrb.mxu2 %v10161_v1  ;;  %3855 = vmatpush.bf16.msrb.mxu1 %v10164_v34  ;;  %v3507_v5 = vpop.f32.mrf.mxu0  ;;  %v10174_v34 = vld [vmem:[#allocation87_spill] sm:$0xff] }
 0x4fe   :  { %3882 = vmatpush.bf16.msrb.mxu3 %v10169_v48  ;;  %v5649_v9 = vmul.f32 -1.442695, %v3551_v52  ;;  %v10176_v48 = vld [vmem:[#allocation16_spill] sm:$0xff]  ;;  %v10179_v52 = vld [vmem:[#allocation18_spill] sm:$0xff] }
 0x500   :  { %4079 = vmatpush.bf16.msrb.mxu0 %v10166_v3  ;;  %v6084_v30 = vpop.eup %6083  ;;  %6087 = vpow2.f32 %v5649_v9  ;;  %v10181_v9 = vld [vmem:[#allocation94_spill] sm:$0xff] }
 0x501   :  { %4105 = vmatpush.bf16.msrb.mxu2 %v10167_v18  ;;  %3856 = vmatpush.bf16.msrb.mxu1 %v10168_v20  ;;  %v6086_v20 = vpop.eup %6085  ;;  %v3555_v18 = vadd.f32 1.0, %v6084_v30 }
 0x502   :  { %3996 = vmatpush.bf16.msra.mxu3 %v10172_v60  ;;  %v3574_v11 = vadd.f32 1.0, %v6086_v20  ;;  %v3533_v5 = vpop.f32.mrf.mxu2 }
 0x503   :  { %6089 = vrcp.f32 %v3555_v18  ;;  %v3546_v17 = vpop.f32.mrf.mxu3  ;;  %v10185_v5 = vld [vmem:[#allocation24_spill] sm:$0xff]  ;;  %v3567_v1 = vand.u32 2147483648, %v3555_v18  ;;  %v3565_v26 = vand.u32 2147483647, %v3555_v18  ;;  %vm3561_vm9 = vweird.f32 %v3555_v18 }
 0x504   :  { %4080 = vmatpush.bf16.msrb.mxu0 %v10173_v27  ;;  %6091 = vrcp.f32 %v3574_v11  ;;  %v10186_v17 = vld [vmem:[#allocation98_spill] sm:$0xff]  ;;  %vm3580_vm10 = vweird.f32 %v3574_v11 }
 0x505   :  { %3970 = vmatpush.bf16.msra.mxu1 %v10170_v56  ;;  %4106 = vmatpush.bf16.msrb.mxu2 %v10174_v34  ;;  %v10177_v56 = vld [vmem:[#allocation90_spill] sm:$0xff]  ;;  %v8390_v60 = vpop.f32.mrf.mxu0  ;;  %vm3566_vm13 = vcmp.eq.f32.partialorder %v3565_v26, 8.507059e+37  ;;  %v10196_v26 = vld [vmem:[#allocation39_spill] sm:$0xff] }
 0x506   :  { %3997 = vmatpush.bf16.msra.mxu3 %v10176_v48  ;;  %v10182_v48 = vld [vmem:[#allocation95_spill] sm:$0xff]  ;;  %v6088_v30 = vpop.eup %6087 }
 0x507   :  { %3857 = vmatmul.bf16.vlgmr.msrb.gmra.mxu1 %v3783_v44  ;;  %v8395_v20 = vadd.f32 1.0, %v6088_v30  ;;  %v10188_v30 = vld [vmem:[#allocation27_spill] sm:$0xff] }
 0x508   :  { %4081 = vmatpush.bf16.msrb.mxu0 %v10177_v56  ;;  %3883 = vmatmul.bf16.vlgmr.msrb.gmra.mxu3 %v3783_v44  ;;  %v10183_v56 = vld [vmem:[#allocation23_spill] sm:$0xff] }
 0x509   :  { %3971 = vmatpush.bf16.msra.mxu1 %v10175_v25  ;;  %4107 = vmatpush.bf16.msrb.mxu2 %v10178_v46  ;;  %v10180_v25 = vld [vmem:[#allocation20_spill] sm:$0xff]  ;;  %v6090_v46 = vpop.eup %6089  ;;  %v10184_v44 = vld [vmem:[#allocation75_spill] sm:$0xff]  ;;  %6093 = vrcp.f32 %v8395_v20  ;;  %vm3600_vm0 = vweird.f32 %v8395_v20 }
 0x50a   :  { %3998 = vmatpush.bf16.msra.mxu3 %v10180_v25  ;;  %v3550_v34 = vadd.f32 %v3531_v2, %v10184_v44  ;;  %v3557_v27 = vmul.f32 %v6090_v46, %v3555_v18  ;;  %v10187_v25 = vld [vmem:[#allocation99_spill] sm:$0xff]  ;;  %v8403_v3 = vpop.f32.mrf.mxu2  ;;  %v10189_v44 = vld [vmem:[#allocation29_spill] sm:$0xff]  ;;  %vm3562_vm7 = vweird.f32 %v6090_v46 }
 0x50b   :  { %vm3563_vm11 = vmor %vm3561_vm9, %vm3562_vm7 }
 0x50c   :  { %4082 = vmatpush.bf16.msrb.mxu0 %v10181_v9  ;;  %6095 = vtanh.f32 %v3550_v34  ;;  %v3568_v34 = vor.u32 1.1754944e-38, %v3567_v1 }
 0x50d   :  { %3972 = vmatpush.bf16.msra.mxu1 %v10179_v52  ;;  %4108 = vmatpush.bf16.msrb.mxu2 %v10182_v48  ;;  %v6092_v52 = vpop.eup %6091  ;;  %v3558_v48 = vsub.f32 1.0, %v3557_v27  ;;  %v3627_v2 = vpop.f32.mrf.mxu0  ;;  %v3584_v27 = vand.u32 2147483647, %v3574_v11 }
 0x50e   :  { %3999 = vmatpush.bf16.msra.mxu3 %v10185_v5  ;;  %v3576_v9 = vmul.f32 %v6092_v52, %v3574_v11  ;;  %v10190_v5 = vld [vmem:[#allocation102_spill] sm:$0xff]  ;;  %vm3581_vm8 = vweird.f32 %v6092_v52 }
 0x50f   :  { %v3559_v51 = vmul.f32 %v6090_v46, %v3558_v48  ;;  %v6094_v7 = vpop.eup %6093  ;;  %vm3582_vm12 = vmor %vm3580_vm10, %vm3581_vm8  ;;  %vm3585_vm14 = vcmp.eq.f32.partialorder %v3584_v27, 8.507059e+37 }
 0x510   :  { %4083 = vmatpush.bf16.msrb.mxu0 %v10186_v17  ;;  %v3586_v17 = vand.u32 2147483648, %v3574_v11  ;;  %v3596_v2 = vmul.f32 %v6094_v7, %v8395_v20  ;;  %v10194_v11 = vld [vmem:[#allocation35_spill] sm:$0xff]  ;;  %vm3601_vm15 = vweird.f32 %v6094_v7 }
 0x511   :  { %3973 = vmatpush.bf16.msra.mxu1 %v10183_v56  ;;  %4109 = vmatpush.bf16.msrb.mxu2 %v10187_v25  ;;  %v3577_v56 = vsub.f32 1.0, %v3576_v9  ;;  %v3560_v42 = vadd.f32 %v6090_v46, %v3559_v51  ;;  %v10192_v9 = vld [vmem:[#allocation31_spill] sm:$0xff]  ;;  %vm3602_vm1 = vmor %vm3600_vm0, %vm3601_vm15 }
 0x512   :  { %4000 = vmatpush.bf16.msra.mxu3 %v10189_v44  ;;  %v10193_v44 = vld [vmem:[#allocation33_spill] sm:$0xff]  ;;  %v3587_v48 = vor.u32 1.1754944e-38, %v3586_v17  ;;  %v3597_v51 = vsub.f32 1.0, %v3596_v2 }
 0x513   :  { %v3578_v25 = vmul.f32 %v6092_v52, %v3577_v56  ;;  %v6096_v56 = vpop.eup %6095 }
 0x514   :  { %4084 = vmatpush.bf16.msrb.mxu0 %v10190_v5  ;;  %v3564_v5 = vsel %vm3563_vm11, %v6090_v46, %v3560_v42  ;;  %v10198_v46 = vld [vmem:[#allocation71_spill] sm:$0xff] }
 0x515   :  { %3974 = vmatpush.bf16.msra.mxu1 %v10188_v30  ;;  %4110 = vmatpush.bf16.msrb.mxu2 %v10191_v58  ;;  %v3579_v30 = vadd.f32 %v6092_v52, %v3578_v25  ;;  %v3569_v58 = vsel %vm3566_vm13, %v3568_v34, %v3564_v5  ;;  %v3598_v25 = vmul.f32 %v6094_v7, %v3597_v51 }
 0x516   :  { %4001 = vmatpush.bf16.msra.mxu3 %v10193_v44  ;;  %v3611_v22 = vmul.f32 %v6096_v56, %v3569_v58  ;;  %v8415_v44 = vpop.f32.mrf.mxu0  ;;  %v10197_v58 = vld [vmem:[#allocation41_spill] sm:$0xff] }
 0x517   :  { %v3583_v21 = vsel %vm3582_vm12, %v6092_v52, %v3579_v30  ;;  %v3599_v42 = vadd.f32 %v6094_v7, %v3598_v25  ;;  %v10202_v25 = vld [vmem:[#allocation114_spill] sm:$0xff] }
 0x518   :  { %v3588_v18 = vsel %vm3585_vm14, %v3587_v48, %v3583_v21  ;;  %v3606_v21 = vand.u32 2147483648, %v8395_v20 }
 0x519   :  { %3975 = vmatpush.bf16.msra.mxu1 %v10192_v9  ;;  %v3653_v9 = vpop.f32.mrf.mxu2  ;;  %v3610_v1 = vmul.f32 %v3588_v18, %v8164_v47  ;;  %v10199_v47 = vld [vmem:[#allocation70_spill] sm:$0xff]  ;;  %v10200_v18 = vld [vmem:[#allocation129_spill] sm:$0xff] }
 0x51a   :  { %4002 = vmatpush.bf16.msra.mxu3 %v10195_v6  ;;  %v3604_v6 = vand.u32 2147483647, %v8395_v20  ;;  %v3607_v5 = vor.u32 1.1754944e-38, %v3606_v21  ;;  %v10205_v21 = vld [vmem:[#allocation133_spill] sm:$0xff] }
 0x51b   :  { %v8417_v17 = vadd.f32 %v3611_v22, %v3610_v1  ;;  %v3603_v22 = vsel %vm3602_vm1, %v6094_v7, %v3599_v42  ;;  %v3626_v7 = vadd.f32 %v8390_v60, %v9622_v29  ;;  %v10201_v1 = vld [vmem:[#allocation115_spill] sm:$0xff] }
 0x51c   :  { %vm3605_vm2 = vcmp.eq.f32.partialorder %v3604_v6, 8.507059e+37  ;;  %v10203_v42 = vld [vmem:[#allocation43_spill] sm:$0xff] }
 0x51d   :  { %3976 = vmatpush.bf16.msra.mxu1 %v10194_v11  ;;  %6097 = vtanh.f32 %v8417_v17  ;;  %v3608_v30 = vsel %vm3605_vm2, %v3607_v5, %v3603_v22  ;;  %v3652_v60 = vadd.f32 %v8403_v3, %v10203_v42  ;;  %v10206_v22 = vld [vmem:[#allocation107_spill] sm:$0xff]  ;;  %v10207_v5 = vld [vmem:[#allocation108_spill] sm:$0xff] }
 0x51e   :  { %4003 = vmatpush.bf16.msra.mxu3 %v10197_v58  ;;  %v3679_v27 = vpop.f32.mrf.mxu0 }
 0x521   :  { %3977 = vmatpush.bf16.msra.mxu1 %v10196_v26  ;;  %v8427_v52 = vpop.f32.mrf.mxu2  ;;  %v10204_v26 = vld [vmem:[#allocation132_spill] sm:$0xff] }
 0x522   :  { %4116 = vmatpush.bf16.msrb.mxu3 %v10199_v47 }
 0x523   :  { %v6098_v34 = vpop.eup %6097 }
 0x524   :  { %v3614_v2 = vmul.f32 %v6098_v34, %v3608_v30  ;;  %v10208_v30 = vld [vmem:[#allocation119_spill] sm:$0xff] }
 0x525   :  { %4090 = vmatpush.bf16.msrb.mxu1 %v10198_v46 }
 0x526   :  { %4117 = vmatpush.bf16.msrb.mxu3 %v10056_v32  ;;  %v3956_v48 = vpack.c.bf16 %v3614_v2, %v3614_v2  ;;  %v10209_v2 = vld [vmem:[#allocation118_spill] sm:$0xff] }
 0x528   :  { %3965 = vmatmul.bf16.vlgmr.msra.gmra.mxu0 %v3956_v48  ;;  %3978 = vmatmul.bf16.vlgmr.msra.gmra.mxu1 %v3956_v48 }
 0x529   :  { %4091 = vmatpush.bf16.msrb.mxu1 %v10055_v8  ;;  %v3705_v20 = vpop.f32.mrf.mxu2  ;;  %3991 = vmatmul.bf16.vlgmr.msra.gmra.mxu2 %v3956_v48 }
 0x52a   :  { %4118 = vmatpush.bf16.msrb.mxu3 %v10058_v4  ;;  %4129 = vmatpush.bf16.msra.mxu0 %v6751_v33 }
 0x52b   :  { %4004 = vmatmul.bf16.vlgmr.msra.gmra.mxu3 %v3956_v48  ;;  %4155 = vmatpush.bf16.msra.mxu2 %v6753_v24 }
 0x52d   :  { %4092 = vmatpush.bf16.msrb.mxu1 %v10057_v38 }
 0x52e   :  { %4119 = vmatpush.bf16.msrb.mxu3 %v10060_v63  ;;  %4130 = vmatpush.bf16.msra.mxu0 %v9492_v53 }
 0x52f   :  { %4156 = vmatpush.bf16.msra.mxu2 %v9493_v28 }
 0x531   :  { %4093 = vmatpush.bf16.msrb.mxu1 %v10059_v12 }
 0x532   :  { %4120 = vmatpush.bf16.msrb.mxu3 %v9913_v0  ;;  %4131 = vmatpush.bf16.msra.mxu0 %v9496_v41 }
 0x533   :  { %4157 = vmatpush.bf16.msra.mxu2 %v9497_v23 }
 0x535   :  { %4094 = vmatpush.bf16.msrb.mxu1 %v9912_v62 }
 0x536   :  { %4121 = vmatpush.bf16.msrb.mxu3 %v9915_v55  ;;  %4132 = vmatpush.bf16.msra.mxu0 %v9626_v57 }
 0x537   :  { %4158 = vmatpush.bf16.msra.mxu2 %v9627_v19 }
 0x538   :  { %4085 = vmatmul.bf16.vlgmr.msrb.gmra.mxu0 %v3956_v48 }
 0x539   :  { %4095 = vmatpush.bf16.msrb.mxu1 %v9914_v16  ;;  %4111 = vmatmul.bf16.vlgmr.msrb.gmra.mxu2 %v3956_v48 }
 0x53a   :  { %4122 = vmatpush.bf16.msrb.mxu3 %v9772_v40  ;;  %4133 = vmatpush.bf16.msra.mxu0 %v9917_v39 }
 0x53b   :  { %4159 = vmatpush.bf16.msra.mxu2 %v10061_v10 }
 0x53c   :  { %v3638_v56 = vpop.f32.mrf.mxu1 }
 0x53d   :  { %4096 = vmatpush.bf16.msrb.mxu1 %v9916_v31  ;;  %v3639_v51 = vadd.f32 %v3638_v56, %v3626_v7  ;;  %v10210_v56 = vld [vmem:[#allocation112_spill] sm:$0xff] }
 0x53e   :  { %4123 = vmatpush.bf16.msrb.mxu3 %v9774_v35  ;;  %4134 = vmatpush.bf16.msra.mxu0 %v10065_v14  ;;  %v8463_v9 = vpop.f32.mrf.mxu0 }
 0x53f   :  { %4160 = vmatpush.bf16.msra.mxu2 %v10066_v54  ;;  %v5650_v11 = vmul.f32 -1.442695, %v3639_v51  ;;  %v10211_v51 = vld [vmem:[#allocation113_spill] sm:$0xff] }
 0x541   :  { %4097 = vmatpush.bf16.msrb.mxu1 %v9773_v59  ;;  %6099 = vpow2.f32 %v5650_v11 }
 0x542   :  { %4168 = vmatpush.bf16.msra.mxu3 %v9488_v43  ;;  %4135 = vmatpush.bf16.msra.mxu0 %v9926_v15  ;;  %v3664_v58 = vpop.f32.mrf.mxu3 }
 0x543   :  { %4161 = vmatpush.bf16.msra.mxu2 %v10200_v18  ;;  %v3665_v6 = vadd.f32 %v3664_v58, %v3652_v60  ;;  %v8473_v27 = vpop.f32.mrf.mxu2  ;;  %v10212_v60 = vld [vmem:[#allocation123_spill] sm:$0xff]  ;;  %v10213_v58 = vld [vmem:[#allocation122_spill] sm:$0xff] }
 0x544   :  { %v3640_v34 = vpop.f32.mrf.mxu1 }
 0x545   :  { %4142 = vmatpush.bf16.msra.mxu1 %v9489_v45  ;;  %v5651_v3 = vmul.f32 -1.442695, %v3665_v6 }
 0x546   :  { %4169 = vmatpush.bf16.msra.mxu3 %v9494_v13  ;;  %4136 = vmatpush.bf16.msra.mxu0 %v10204_v26  ;;  %v3795_v20 = vpop.f32.mrf.mxu0 }
 0x547   :  { %4162 = vmatpush.bf16.msra.mxu2 %v10205_v21  ;;  %v6100_v7 = vpop.eup %6099  ;;  %6101 = vpow2.f32 %v5651_v3  ;;  %v10214_v20 = vld [vmem:[#allocation127_spill] sm:$0xff]  ;;  %v10215_v3 = vld [vmem:[#allocation126_spill] sm:$0xff] }
 0x548   :  { %v3723_v11 = vadd.f32 1.0, %v6100_v7  ;;  %v3678_v7 = vadd.f32 %v8415_v44, %v10080_v50  ;;  %v10220_v50 = vld [vmem:[#allocation146_spill] sm:$0xff] }
 0x549   :  { %4143 = vmatpush.bf16.msra.mxu1 %v9495_v61  ;;  %4137 = vmatmul.bf16.vlgmr.msra.gmra.mxu0 %v3956_v48 }
 0x54a   :  { %4170 = vmatpush.bf16.msra.mxu3 %v10202_v25  ;;  %4245 = vmatpush.bf16.msrb.mxu0 %v10206_v22  ;;  %6103 = vrcp.f32 %v3723_v11  ;;  %v3666_v34 = vpop.f32.mrf.mxu3  ;;  %vm3729_vm4 = vweird.f32 %v3723_v11 }
 0x54b   :  { %4271 = vmatpush.bf16.msrb.mxu2 %v10207_v5 }
 0x54c   :  { %4163 = vmatmul.bf16.vlgmr.msra.gmra.mxu2 %v3956_v48  ;;  %v3821_v48 = vpop.f32.mrf.mxu2  ;;  %v3690_v6 = vpop.f32.mrf.mxu1 }
 0x54d   :  { %4144 = vmatpush.bf16.msra.mxu1 %v10201_v1  ;;  %v6102_v42 = vpop.eup %6101  ;;  %v10217_v48 = vld [vmem:[#allocation131_spill] sm:$0xff] }
 0x54e   :  { %4171 = vmatpush.bf16.msra.mxu3 %v10209_v2  ;;  %4246 = vmatpush.bf16.msrb.mxu0 %v10210_v56  ;;  %v3742_v29 = vadd.f32 1.0, %v6102_v42  ;;  %v10218_v2 = vld [vmem:[#allocation130_spill] sm:$0xff] }
 0x54f   :  { %4272 = vmatpush.bf16.msrb.mxu2 %v10211_v51 }
 0x550   :  { %v6104_v34 = vpop.eup %6103  ;;  %6105 = vrcp.f32 %v3742_v29  ;;  %v3752_v56 = vand.u32 2147483647, %v3742_v29  ;;  %vm3748_vm8 = vweird.f32 %v3742_v29 }
 0x551   :  { %4145 = vmatpush.bf16.msra.mxu1 %v10208_v30  ;;  %v3725_v1 = vmul.f32 %v6104_v34, %v3723_v11  ;;  %vm3730_vm3 = vweird.f32 %v6104_v34 }
 0x552   :  { %4172 = vmatpush.bf16.msra.mxu3 %v10213_v58  ;;  %4247 = vmatpush.bf16.msrb.mxu0 %v9937_v49  ;;  %v3691_v58 = vadd.f32 %v3690_v6, %v3678_v7  ;;  %v10222_v7 = vld [vmem:[#allocation135_spill] sm:$0xff]  ;;  %v10223_v49 = vld [vmem:[#allocation134_spill] sm:$0xff]  ;;  %vm3731_vm5 = vmor %vm3729_vm4, %vm3730_vm3  ;;  %vm3753_vm10 = vcmp.eq.f32.partialorder %v3752_v56, 8.507059e+37 }
 0x553   :  { %4273 = vmatpush.bf16.msrb.mxu2 %v9938_v37  ;;  %v3716_v37 = vpop.f32.mrf.mxu3  ;;  %v3726_v44 = vsub.f32 1.0, %v3725_v1  ;;  %v10236_v56 = vld [vmem:[#allocation170_spill] sm:$0xff] }
 0x554   :  { %v8489_v30 = vpop.f32.mrf.mxu0  ;;  %6107 = vtanh.f32 %v3691_v58  ;;  %v3692_v6 = vpop.f32.mrf.mxu1 }
 0x555   :  { %4146 = vmatpush.bf16.msra.mxu1 %v10212_v60  ;;  %v10216_v60 = vld [vmem:[#allocation143_spill] sm:$0xff] }
 0x556   :  { %4173 = vmatpush.bf16.msra.mxu3 %v10215_v3  ;;  %4248 = vmatpush.bf16.msrb.mxu0 %v9803_v36  ;;  %v10221_v36 = vld [vmem:[#allocation147_spill] sm:$0xff] }
 0x557   :  { %4274 = vmatpush.bf16.msrb.mxu2 %v10216_v60  ;;  %v3735_v60 = vand.u32 2147483648, %v3723_v11 }
 0x559   :  { %4147 = vmatpush.bf16.msra.mxu1 %v10214_v20  ;;  %v10219_v20 = vld [vmem:[#allocation47_spill] sm:$0xff]  ;;  %v3736_v58 = vor.u32 1.1754944e-38, %v3735_v60 }
 0x55a   :  { %4174 = vmatpush.bf16.msra.mxu3 %v10218_v2  ;;  %v3704_v3 = vadd.f32 %v8427_v52, %v10219_v20  ;;  %4249 = vmatpush.bf16.msrb.mxu0 %v10220_v50  ;;  %v3733_v2 = vand.u32 2147483647, %v3723_v11  ;;  %v6106_v52 = vpop.eup %6105  ;;  %v3754_v50 = vand.u32 2147483648, %v3742_v29  ;;  %v10226_v11 = vld [vmem:[#allocation154_spill] sm:$0xff] }
 0x55b   :  { %4275 = vmatpush.bf16.msrb.mxu2 %v10221_v36  ;;  %v8499_v20 = vpop.f32.mrf.mxu2  ;;  %v3744_v1 = vmul.f32 %v6106_v52, %v3742_v29  ;;  %v10225_v36 = vld [vmem:[#allocation151_spill] sm:$0xff]  ;;  %v3718_v61 = vpop.f32.mrf.mxu3  ;;  %vm3749_vm7 = vweird.f32 %v6106_v52  ;;  %v10233_v29 = vld [vmem:[#allocation166_spill] sm:$0xff] }
 0x55c   :  { %v3717_v42 = vadd.f32 %v3716_v37, %v3704_v3  ;;  %v10224_v3 = vld [vmem:[#allocation150_spill] sm:$0xff]  ;;  %v3847_v6 = vpop.f32.mrf.mxu0  ;;  %vm3734_vm6 = vcmp.eq.f32.partialorder %v3733_v2, 8.507059e+37  ;;  %vm3750_vm9 = vmor %vm3748_vm8, %vm3749_vm7  ;;  %v3755_v60 = vor.u32 1.1754944e-38, %v3754_v50  ;;  %v10229_v61 = vld [vmem:[#allocation159_spill] sm:$0xff] }
 0x55d   :  { %4148 = vmatpush.bf16.msra.mxu1 %v10217_v48  ;;  %v3727_v48 = vmul.f32 %v6104_v34, %v3726_v44  ;;  %v6108_v44 = vpop.eup %6107  ;;  %v10232_v6 = vld [vmem:[#allocation105_spill] sm:$0xff] }
 0x55e   :  { %4175 = vmatpush.bf16.msra.mxu3 %v10223_v49  ;;  %v5652_v25 = vmul.f32 -1.442695, %v3717_v42  ;;  %4250 = vmatpush.bf16.msrb.mxu0 %v10224_v3 }
 0x55f   :  { %v3728_v37 = vadd.f32 %v6104_v34, %v3727_v48  ;;  %4276 = vmatpush.bf16.msrb.mxu2 %v10225_v36 }
 0x560   :  { %6109 = vpow2.f32 %v5652_v25  ;;  %v10227_v25 = vld [vmem:[#allocation155_spill] sm:$0xff] }
 0x561   :  { %4149 = vmatpush.bf16.msra.mxu1 %v10222_v7  ;;  %v3745_v7 = vsub.f32 1.0, %v3744_v1  ;;  %v3732_v49 = vsel %vm3731_vm5, %v6104_v34, %v3728_v37  ;;  %v10228_v37 = vld [vmem:[#allocation158_spill] sm:$0xff] }
 0x562   :  { %v3737_v42 = vsel %vm3734_vm6, %v3736_v58, %v3732_v49  ;;  %4251 = vmatpush.bf16.msrb.mxu0 %v10226_v11  ;;  %v10231_v58 = vld [vmem:[#allocation162_spill] sm:$0xff] }
 0x563   :  { %v3746_v51 = vmul.f32 %v6106_v52, %v3745_v7  ;;  %v3779_v48 = vmul.f32 %v6108_v44, %v3737_v42  ;;  %4277 = vmatpush.bf16.msrb.mxu2 %v10227_v25  ;;  %v3873_v34 = vpop.f32.mrf.mxu2  ;;  %v10230_v7 = vld [vmem:[#allocation161_spill] sm:$0xff] }
 0x565   :  { %v3747_v36 = vadd.f32 %v6106_v52, %v3746_v51  ;;  %v10234_v51 = vld [vmem:[#allocation167_spill] sm:$0xff] }
 0x566   :  { %v6110_v3 = vpop.eup %6109  ;;  %4252 = vmatpush.bf16.msrb.mxu0 %v10228_v37 }
 0x567   :  { %v3762_v1 = vadd.f32 1.0, %v6110_v3  ;;  %v3751_v2 = vsel %vm3750_vm9, %v6106_v52, %v3747_v36  ;;  %4278 = vmatpush.bf16.msrb.mxu2 %v10229_v61  ;;  %v10237_v52 = vld [vmem:[#allocation171_spill] sm:$0xff] }
 0x568   :  { %v3756_v49 = vsel %vm3753_vm10, %v3755_v60, %v3751_v2 }
 0x569   :  { %6111 = vrcp.f32 %v3762_v1  ;;  %v3778_v44 = vmul.f32 %v3756_v49, %v10232_v6  ;;  %v3774_v60 = vand.u32 2147483648, %v3762_v1  ;;  %v3772_v2 = vand.u32 2147483647, %v3762_v1  ;;  %v10238_v49 = vld [vmem:[#allocation174_spill] sm:$0xff]  ;;  %v10239_v6 = vld [vmem:[#allocation175_spill] sm:$0xff] }
 0x56a   :  { %4297 = vmatpush.bf16.msra.mxu0 %v10230_v7  ;;  %vm3768_vm12 = vweird.f32 %v3762_v1  ;;  %v10242_v7 = vld [vmem:[#allocation179_spill] sm:$0xff] }
 0x56b   :  { %4323 = vmatpush.bf16.msra.mxu2 %v10231_v58  ;;  %v8512_v3 = vadd.f32 %v3779_v48, %v3778_v44  ;;  %v10240_v48 = vld [vmem:[#allocation48_spill] sm:$0xff]  ;;  %vm3773_vm14 = vcmp.eq.f32.partialorder %v3772_v2, 8.507059e+37 }
 0x56c   :  { %v3794_v44 = vadd.f32 %v8463_v9, %v10240_v48  ;;  %v10245_v9 = vld [vmem:[#allocation49_spill] sm:$0xff] }
 0x56d   :  { %10235 = vst [vmem:[#allocation53_spill] sm:$0xff] %v8512_v3  ;;  %6113 = vtanh.f32 %v8512_v3 }
 0x56e   :  { %4298 = vmatpush.bf16.msra.mxu0 %v10233_v29 }
 0x56f   :  { %4324 = vmatpush.bf16.msra.mxu2 %v10234_v51  ;;  %v6112_v50 = vpop.eup %6111 }
 0x570   :  { %v3764_v36 = vmul.f32 %v6112_v50, %v3762_v1  ;;  %vm3769_vm11 = vweird.f32 %v6112_v50  ;;  %v10243_v1 = vld [vmem:[#allocation182_spill] sm:$0xff] }
 0x571   :  { %vm3770_vm13 = vmor %vm3768_vm12, %vm3769_vm11 }
 0x572   :  { %4299 = vmatpush.bf16.msra.mxu0 %v10236_v56  ;;  %v3765_v42 = vsub.f32 1.0, %v3764_v36  ;;  %v3775_v56 = vor.u32 1.1754944e-38, %v3774_v60  ;;  %v10246_v60 = vld [vmem:[#allocation110_spill] sm:$0xff] }
 0x573   :  { %4325 = vmatpush.bf16.msra.mxu2 %v10237_v52  ;;  %v6114_v52 = vpop.eup %6113 }
 0x574   :  { %v3766_v34 = vmul.f32 %v6112_v50, %v3765_v42  ;;  %v3806_v36 = vpop.f32.mrf.mxu1  ;;  %v10241_v42 = vld [vmem:[#allocation178_spill] sm:$0xff] }
 0x575   :  { %v3807_v58 = vadd.f32 %v3806_v36, %v3794_v44  ;;  %v10251_v44 = vld [vmem:[#allocation136_spill] sm:$0xff]  ;;  %v10252_v36 = vld [vmem:[#allocation190_spill] sm:$0xff] }
 0x576   :  { %4300 = vmatpush.bf16.msra.mxu0 %v10238_v49  ;;  %v3767_v51 = vadd.f32 %v6112_v50, %v3766_v34  ;;  %v10244_v34 = vld [vmem:[#allocation183_spill] sm:$0xff] }
 0x577   :  { %4326 = vmatpush.bf16.msra.mxu2 %v10239_v6  ;;  %v5653_v61 = vmul.f32 -1.442695, %v3807_v58  ;;  %v10248_v58 = vld [vmem:[#allocation186_spill] sm:$0xff] }
 0x578   :  { %v3771_v29 = vsel %vm3770_vm13, %v6112_v50, %v3767_v51  ;;  %v3820_v51 = vadd.f32 %v8473_v27, %v10245_v9  ;;  %v10250_v27 = vld [vmem:[#allocation137_spill] sm:$0xff] }
 0x579   :  { %v3776_v3 = vsel %vm3773_vm14, %v3775_v56, %v3771_v29  ;;  %6115 = vpow2.f32 %v5653_v61  ;;  %v10249_v61 = vld [vmem:[#allocation187_spill] sm:$0xff] }
 0x57a   :  { %4301 = vmatpush.bf16.msra.mxu0 %v10241_v42  ;;  %v3782_v49 = vmul.f32 %v6114_v52, %v3776_v3  ;;  %v10247_v3 = vld [vmem:[#allocation109_spill] sm:$0xff] }
 0x57b   :  { %4327 = vmatpush.bf16.msra.mxu2 %v10242_v7  ;;  %v3832_v50 = vpop.f32.mrf.mxu3 }
 0x57c   :  { %v4076_v6 = vpack.c.bf16 %v3782_v49, %v3782_v49  ;;  %v3833_v29 = vadd.f32 %v3832_v50, %v3820_v51  ;;  %v3808_v56 = vpop.f32.mrf.mxu1  ;;  %v10253_v51 = vld [vmem:[#allocation191_spill] sm:$0xff]  ;;  %v10254_v50 = vld [vmem:[#allocation68_spill] sm:$0xff] }
 0x57d   :  { %v10255_v56 = vld [vmem:[#allocation69_spill] sm:$0xff] }
 0x57e   :  { %4302 = vmatpush.bf16.msra.mxu0 %v10243_v1  ;;  %4098 = vmatmul.bf16.vlgmr.msrb.gmra.mxu1 %v4076_v6  ;;  %v5654_v52 = vmul.f32 -1.442695, %v3833_v29 }
 0x57f   :  { %4328 = vmatpush.bf16.msra.mxu2 %v10244_v34  ;;  %4124 = vmatmul.bf16.vlgmr.msrb.gmra.mxu3 %v4076_v6  ;;  %v6116_v2 = vpop.eup %6115 }
 0x580   :  { %4253 = vmatmul.bf16.vlgmr.msrb.gmra.mxu0 %v4076_v6  ;;  %4279 = vmatmul.bf16.vlgmr.msrb.gmra.mxu2 %v4076_v6  ;;  %v8531_v49 = vadd.f32 1.0, %v6116_v2  ;;  %6117 = vpow2.f32 %v5654_v52  ;;  %v10257_v2 = vld [vmem:[#allocation140_spill] sm:$0xff] }
 0x581   :  { %4258 = vmatpush.bf16.msrb.mxu1 %v10246_v60  ;;  %4284 = vmatpush.bf16.msrb.mxu3 %v10247_v3  ;;  %v10256_v60 = vld [vmem:[#allocation141_spill] sm:$0xff] }
 0x582   :  { %4303 = vmatpush.bf16.msra.mxu0 %v10248_v58  ;;  %6119 = vrcp.f32 %v8531_v49  ;;  %vm3897_vm1 = vweird.f32 %v8531_v49 }
 0x583   :  { %4329 = vmatpush.bf16.msra.mxu2 %v10249_v61  ;;  %v3834_v3 = vpop.f32.mrf.mxu3  ;;  %v10266_v61 = vld [vmem:[#allocation81_spill] sm:$0xff] }
 0x584   :  { %v3858_v29 = vpop.f32.mrf.mxu1 }
 0x585   :  { %4259 = vmatpush.bf16.msrb.mxu1 %v10250_v27  ;;  %4285 = vmatpush.bf16.msrb.mxu3 %v10251_v44  ;;  %v10258_v27 = vld [vmem:[#allocation72_spill] sm:$0xff]  ;;  %v10259_v44 = vld [vmem:[#allocation73_spill] sm:$0xff] }
 0x586   :  { %4304 = vmatpush.bf16.msra.mxu0 %v10252_v36  ;;  %v6118_v52 = vpop.eup %6117  ;;  %v10261_v36 = vld [vmem:[#allocation144_spill] sm:$0xff] }
 0x587   :  { %4330 = vmatpush.bf16.msra.mxu2 %v10253_v51  ;;  %v3910_v9 = vadd.f32 1.0, %v6118_v52  ;;  %v10260_v51 = vld [vmem:[#allocation145_spill] sm:$0xff] }
 0x588   :  { %v8544_v48 = vpop.eup %6119 }
 0x589   :  { %4260 = vmatpush.bf16.msrb.mxu1 %v10256_v60  ;;  %4286 = vmatpush.bf16.msrb.mxu3 %v10257_v2  ;;  %v3893_v3 = vmul.f32 %v8544_v48, %v8531_v49  ;;  %6121 = vrcp.f32 %v3910_v9  ;;  %v10263_v60 = vld [vmem:[#allocation149_spill] sm:$0xff]  ;;  %vm3898_vm15 = vweird.f32 %v8544_v48  ;;  %vm3916_vm2 = vweird.f32 %v3910_v9 }
 0x58a   :  { %4419 = vmatpush.bf16.msrb.mxu0 %v10254_v50  ;;  %v10262_v50 = vld [vmem:[#allocation116_spill] sm:$0xff]  ;;  %vm8572_vm3 = vmor %vm3897_vm1, %vm3898_vm15 }
 0x58b   :  { %4445 = vmatpush.bf16.msrb.mxu2 %v10255_v56  ;;  %v3872_v56 = vadd.f32 %v8499_v20, %v10262_v50  ;;  %v3894_v2 = vsub.f32 1.0, %v3893_v3  ;;  %v10267_v50 = vld [vmem:[#allocation52_spill] sm:$0xff] }
 0x58c   :  { %v3860_v52 = vpop.f32.mrf.mxu1  ;;  %v3846_v3 = vadd.f32 %v8489_v30, %v10267_v50  ;;  %v3903_v30 = vand.u32 2147483648, %v8531_v49  ;;  %v10272_v50 = vld [vmem:[#allocation157_spill] sm:$0xff] }
 0x58d   :  { %4261 = vmatpush.bf16.msrb.mxu1 %v10260_v51  ;;  %4287 = vmatpush.bf16.msrb.mxu3 %v10261_v36  ;;  %v10264_v51 = vld [vmem:[#allocation148_spill] sm:$0xff]  ;;  %v3895_v20 = vmul.f32 %v8544_v48, %v3894_v2  ;;  %v10271_v52 = vld [vmem:[#allocation87_spill] sm:$0xff] }
 0x58e   :  { %4420 = vmatpush.bf16.msrb.mxu0 %v10258_v27  ;;  %4150 = vmatmul.bf16.vlgmr.msra.gmra.mxu1 %v4076_v6  ;;  %v3884_v27 = vpop.f32.mrf.mxu3  ;;  %v10265_v36 = vld [vmem:[#allocation80_spill] sm:$0xff] }
 0x58f   :  { %4446 = vmatpush.bf16.msrb.mxu2 %v10259_v44  ;;  %4176 = vmatmul.bf16.vlgmr.msra.gmra.mxu3 %v4076_v6  ;;  %v3885_v44 = vadd.f32 %v3884_v27, %v3872_v56  ;;  %v6122_v34 = vpop.eup %6121  ;;  %v10269_v56 = vld [vmem:[#allocation152_spill] sm:$0xff] }
 0x590   :  { %4305 = vmatmul.bf16.vlgmr.msra.gmra.mxu0 %v4076_v6  ;;  %4331 = vmatmul.bf16.vlgmr.msra.gmra.mxu2 %v4076_v6  ;;  %v3912_v1 = vmul.f32 %v6122_v34, %v3910_v9  ;;  %v10268_v6 = vld [vmem:[#allocation153_spill] sm:$0xff]  ;;  %v10270_v27 = vld [vmem:[#allocation84_spill] sm:$0xff]  ;;  %vm3917_vm0 = vweird.f32 %v6122_v34 }
 0x591   :  { %4262 = vmatpush.bf16.msrb.mxu1 %v10263_v60  ;;  %4288 = vmatpush.bf16.msrb.mxu3 %v10264_v51  ;;  %v5655_v58 = vmul.f32 -1.442695, %v3885_v44  ;;  %v3859_v51 = vadd.f32 %v3858_v29, %v3846_v3  ;;  %v3896_v44 = vadd.f32 %v8544_v48, %v3895_v20  ;;  %v10274_v29 = vld [vmem:[#allocation90_spill] sm:$0xff]  ;;  %v10275_v3 = vld [vmem:[#allocation91_spill] sm:$0xff]  ;;  %vm3918_vm4 = vmor %vm3916_vm2, %vm3917_vm0 }
 0x592   :  { %4421 = vmatpush.bf16.msrb.mxu0 %v10265_v36  ;;  %v3913_v36 = vsub.f32 1.0, %v3912_v1  ;;  %v3901_v1 = vand.u32 2147483647, %v8531_v49  ;;  %v3904_v49 = vor.u32 1.1754944e-38, %v3903_v30 }
 0x593   :  { %4447 = vmatpush.bf16.msrb.mxu2 %v10266_v61  ;;  %6123 = vpow2.f32 %v5655_v58  ;;  %v3922_v61 = vand.u32 2147483648, %v3910_v9  ;;  %v3920_v58 = vand.u32 2147483647, %v3910_v9 }
 0x594   :  { %v3914_v60 = vmul.f32 %v6122_v34, %v3913_v36  ;;  %6125 = vtanh.f32 %v3859_v51  ;;  %vm3902_vm6 = vcmp.eq.f32.partialorder %v3901_v1, 8.507059e+37  ;;  %v10287_v1 = vld [vmem:[#allocation98_spill] sm:$0xff] }
 0x595   :  { %4263 = vmatpush.bf16.msrb.mxu1 %v10268_v6  ;;  %4289 = vmatpush.bf16.msrb.mxu3 %v10269_v56  ;;  %v10273_v56 = vld [vmem:[#allocation156_spill] sm:$0xff]  ;;  %v3923_v36 = vor.u32 1.1754944e-38, %v3922_v61  ;;  %vm3921_vm5 = vcmp.eq.f32.partialorder %v3920_v58, 8.507059e+37  ;;  %v10280_v6 = vld [vmem:[#allocation165_spill] sm:$0xff]  ;;  %v10282_v61 = vld [vmem:[#allocation94_spill] sm:$0xff] }
 0x596   :  { %4422 = vmatpush.bf16.msrb.mxu0 %v10270_v27  ;;  %v3886_v2 = vpop.f32.mrf.mxu3  ;;  %v10283_v27 = vld [vmem:[#allocation95_spill] sm:$0xff]  ;;  %v10285_v58 = vld [vmem:[#allocation169_spill] sm:$0xff] }
 0x597   :  { %4448 = vmatpush.bf16.msrb.mxu2 %v10271_v52  ;;  %v3915_v52 = vadd.f32 %v6122_v34, %v3914_v60  ;;  %v3900_v2 = vsel %vm8572_vm3, %v8544_v48, %v3896_v44  ;;  %v10281_v60 = vld [vmem:[#allocation163_spill] sm:$0xff]  ;;  %v10284_v48 = vld [vmem:[#allocation104_spill] sm:$0xff] }
 0x598   :  { %v3905_v51 = vsel %vm3902_vm6, %v3904_v49, %v3900_v2  ;;  %v10290_v49 = vld [vmem:[#allocation173_spill] sm:$0xff] }
 0x599   :  { %4264 = vmatpush.bf16.msrb.mxu1 %v10272_v50  ;;  %4290 = vmatpush.bf16.msrb.mxu3 %v10273_v56  ;;  %v6124_v20 = vpop.eup %6123  ;;  %v3919_v50 = vsel %vm3918_vm4, %v6122_v34, %v3915_v52 }
 0x59a   :  { %4423 = vmatpush.bf16.msrb.mxu0 %v10274_v29  ;;  %v3930_v56 = vadd.f32 1.0, %v6124_v20  ;;  %v10278_v29 = vld [vmem:[#allocation164_spill] sm:$0xff]  ;;  %v3924_v9 = vsel %vm3921_vm5, %v3923_v36, %v3919_v50  ;;  %v6126_v34 = vpop.eup %6125  ;;  %v10288_v50 = vld [vmem:[#allocation99_spill] sm:$0xff] }
 0x59b   :  { %4449 = vmatpush.bf16.msrb.mxu2 %v10275_v3  ;;  %v10279_v3 = vld [vmem:[#allocation160_spill] sm:$0xff]  ;;  %v3946_v44 = vmul.f32 %v3924_v9, %v10284_v48  ;;  %v3947_v30 = vmul.f32 %v6126_v34, %v3905_v51  ;;  %v10292_v9 = vld [vmem:[#allocation102_spill] sm:$0xff]  ;;  %v10293_v51 = vld [vmem:[#allocation103_spill] sm:$0xff] }
 0x59c   :  { %6127 = vrcp.f32 %v3930_v56  ;;  %v10286_v20 = vld [vmem:[#allocation168_spill] sm:$0xff]  ;;  %v3942_v48 = vand.u32 2147483648, %v3930_v56  ;;  %vm3936_vm8 = vweird.f32 %v3930_v56 }
 0x59d   :  { %4265 = vmatpush.bf16.msrb.mxu1 %v10278_v29  ;;  %4291 = vmatpush.bf16.msrb.mxu3 %v10279_v3  ;;  %v8590_v36 = vadd.f32 %v3947_v30, %v3946_v44  ;;  %v3940_v44 = vand.u32 2147483647, %v3930_v56  ;;  %v10294_v30 = vld [vmem:[#allocation44_spill] sm:$0xff] }
 0x59e   :  { %4424 = vmatpush.bf16.msrb.mxu0 %v10282_v61  ;;  %v10291_v61 = vld [vmem:[#allocation172_spill] sm:$0xff] }
 0x59f   :  { %4450 = vmatpush.bf16.msrb.mxu2 %v10283_v27  ;;  %10289 = vst [vmem:[#allocation117_spill] sm:$0xff] %v8590_v36  ;;  %6129 = vtanh.f32 %v8590_v36  ;;  %vm3941_vm10 = vcmp.eq.f32.partialorder %v3940_v44, 8.507059e+37 }
 0x5a1   :  { %4310 = vmatpush.bf16.msra.mxu1 %v10280_v6  ;;  %4336 = vmatpush.bf16.msra.mxu3 %v10281_v60 }
 0x5a2   :  { %4425 = vmatpush.bf16.msrb.mxu0 %v10287_v1  ;;  %v6128_v52 = vpop.eup %6127  ;;  %v10295_v1 = vld [vmem:[#allocation77_spill] sm:$0xff] }
 0x5a3   :  { %4451 = vmatpush.bf16.msrb.mxu2 %v10288_v50  ;;  %v3932_v2 = vmul.f32 %v6128_v52, %v3930_v56  ;;  %vm3937_vm7 = vweird.f32 %v6128_v52  ;;  %v356_v50 = vadd.f32 %v10295_v1, %v10294_v30 }
 0x5a4   :  { %vm3938_vm9 = vmor %vm3936_vm8, %vm3937_vm7 }
 0x5a5   :  { %4311 = vmatpush.bf16.msra.mxu1 %v10285_v58  ;;  %4337 = vmatpush.bf16.msra.mxu3 %v10286_v20  ;;  %v3933_v27 = vsub.f32 1.0, %v3932_v2  ;;  %v10298_v20 = vld [vmem:[#allocation177_spill] sm:$0xff]  ;;  %v3979_v58 = vpop.f32.mrf.mxu1  ;;  %v6130_v30 = vpop.eup %6129 }
 0x5a6   :  { %4426 = vmatpush.bf16.msrb.mxu0 %v10292_v9  ;;  %v10299_v9 = vld [vmem:[#allocation176_spill] sm:$0xff] }
 0x5a7   :  { %4452 = vmatpush.bf16.msrb.mxu2 %v10293_v51  ;;  %v3934_v34 = vmul.f32 %v6128_v52, %v3933_v27  ;;  %v3966_v51 = vpop.f32.mrf.mxu0 }
 0x5a9   :  { %4312 = vmatpush.bf16.msra.mxu1 %v10290_v49  ;;  %4338 = vmatpush.bf16.msra.mxu3 %v10291_v61  ;;  %v10296_v49 = vld [vmem:[#allocation45_spill] sm:$0xff]  ;;  %v10297_v61 = vld [vmem:[#allocation78_spill] sm:$0xff]  ;;  %v3935_v36 = vadd.f32 %v6128_v52, %v3934_v34 }
 0x5aa   :  { %4471 = vmatpush.bf16.msra.mxu0 %v6751_v33  ;;  %v385_v2 = vadd.f32 %v10297_v61, %v10296_v49  ;;  %v4009_v33 = vadd.f32 %v3966_v51, %v356_v50  ;;  %v8610_v49 = vld [vmem:[%s8933_s8] sm:$0xff] }
 0x5ab   :  { %4497 = vmatpush.bf16.msra.mxu2 %v6753_v24  ;;  %v3943_v24 = vor.u32 1.1754944e-38, %v3942_v48  ;;  %v3939_v27 = vsel %vm3938_vm9, %v6128_v52, %v3935_v36  ;;  %v3951_v61 = vperm.slane %v8610_v49, 4  ;;  %v10301_v48 = vld [vmem:[#allocation180_spill] sm:$0xff]  ;;  %v10303_v52 = vld [vmem:[#allocation86_spill] sm:$0xff] }
 0x5ac   :  { %v4010_v60 = vadd.f32 %v3979_v58, %v385_v2  ;;  %v5656_v34 = vmul.f32 -1.442695, %v4009_v33  ;;  %v10300_v58 = vld [vmem:[#allocation181_spill] sm:$0xff]  ;;  %v3992_v2 = vpop.f32.mrf.mxu2  ;;  %v10305_v33 = vld [vmem:[#allocation184_spill] sm:$0xff] }
 0x5ad   :  { %4313 = vmatpush.bf16.msra.mxu1 %v10298_v20  ;;  %4339 = vmatpush.bf16.msra.mxu3 %v10299_v9  ;;  %v3944_v1 = vsel %vm3941_vm10, %v3943_v24, %v3939_v27 }
 0x5ae   :  { %4472 = vmatpush.bf16.msra.mxu0 %v9492_v53  ;;  %v5657_v56 = vmul.f32 -1.442695, %v4010_v60  ;;  %v3950_v53 = vmul.f32 %v6130_v30, %v3944_v1  ;;  %6131 = vpow2.f32 %v5656_v34  ;;  %v4005_v51 = vpop.f32.mrf.mxu3  ;;  %v10304_v60 = vld [vmem:[#allocation185_spill] sm:$0xff]  ;;  %v3981_v30 = vpop.f32.mrf.mxu1  ;;  %v10307_v34 = vld [vmem:[#allocation188_spill] sm:$0xff] }
 0x5af   :  { %4498 = vmatpush.bf16.msra.mxu2 %v9493_v28  ;;  %v10302_v28 = vld [vmem:[#allocation51_spill] sm:$0xff]  ;;  %v3968_v27 = vpop.f32.mrf.mxu0 }
 0x5b0   :  { %v443_v36 = vadd.f32 %v10303_v52, %v10302_v28  ;;  %6133 = vpow2.f32 %v5657_v56  ;;  %v3952_v44 = vmul.f32 %v3951_v61, %v3950_v53  ;;  %v4244_v50 = vpack.c.bf16 %v3950_v53, %v3950_v53  ;;  %v10306_v61 = vld [vmem:[#allocation189_spill] sm:$0xff]  ;;  %v10309_v52 = vld [vmem:[#allocation192_spill] sm:$0xff] }
 0x5b1   :  { %4314 = vmatpush.bf16.msra.mxu1 %v10300_v58  ;;  %4340 = vmatpush.bf16.msra.mxu3 %v10301_v48 }
 0x5b2   :  { %4473 = vmatpush.bf16.msra.mxu0 %v9496_v41  ;;  %3953 = vadd.xlane.f32.xlu2 %v3952_v44  ;;  %v4012_v24 = vadd.f32 %v4005_v51, %v443_v36  ;;  %v10310_v44 = vld [vmem:[#allocation50_spill] sm:$0xff]  ;;  %v10311_v51 = vld [vmem:[#allocation85_spill] sm:$0xff] }
 0x5b3   :  { %4499 = vmatpush.bf16.msra.mxu2 %v9497_v23  ;;  %4266 = vmatmul.bf16.vlgmr.msrb.gmra.mxu1 %v4244_v50 }
 0x5b4   :  { %4292 = vmatmul.bf16.vlgmr.msrb.gmra.mxu3 %v4244_v50  ;;  %v5658_v41 = vmul.f32 -1.442695, %v4012_v24  ;;  %v6132_v23 = vpop.eup %6131 }
 0x5b5   :  { %4315 = vmatpush.bf16.msra.mxu1 %v10304_v60  ;;  %4341 = vmatpush.bf16.msra.mxu3 %v10305_v33  ;;  %v4016_v1 = vadd.f32 1.0, %v6132_v23 }
 0x5b6   :  { %4474 = vmatpush.bf16.msra.mxu0 %v9626_v57  ;;  %v6134_v56 = vpop.eup %6133  ;;  %6135 = vpow2.f32 %v5658_v41  ;;  %v3994_v57 = vpop.f32.mrf.mxu2 }
 0x5b7   :  { %4500 = vmatpush.bf16.msra.mxu2 %v9627_v19  ;;  %v8625_v53 = vadd.f32 1.0, %v6134_v56  ;;  %6137 = vrcp.f32 %v4016_v1  ;;  %v4007_v28 = vpop.f32.mrf.mxu3  ;;  %v10308_v19 = vld [vmem:[#allocation193_spill] sm:$0xff]  ;;  %v8632_v36 = vpop.f32.mrf.mxu0  ;;  %v4028_v56 = vand.u32 2147483648, %v4016_v1  ;;  %v4026_v57 = vand.u32 2147483647, %v4016_v1 }
 0x5b8   :  { %vm4022_vm13 = vweird.f32 %v4016_v1 }
 0x5b9   :  { %4316 = vmatpush.bf16.msra.mxu1 %v10306_v61  ;;  %4342 = vmatpush.bf16.msra.mxu3 %v10307_v34  ;;  %6139 = vrcp.f32 %v8625_v53  ;;  %vm4041_vm14 = vweird.f32 %v8625_v53  ;;  %vm4027_vm1 = vcmp.eq.f32.partialorder %v4026_v57, 8.507059e+37  ;;  %v10318_v57 = vld [vmem:[#allocation115_spill] sm:$0xff] }
 0x5ba   :  { %4475 = vmatpush.bf16.msra.mxu0 %v9917_v39 }
 0x5bb   :  { %4501 = vmatpush.bf16.msra.mxu2 %v10061_v10  ;;  %v414_v10 = vadd.f32 %v10311_v51, %v10310_v44 }
 0x5bc   :  { %v6136_v39 = vpop.eup %6135 }
 0x5bd   :  { %4317 = vmatpush.bf16.msra.mxu1 %v10308_v19  ;;  %4343 = vmatpush.bf16.msra.mxu3 %v10309_v52  ;;  %v8640_v24 = vadd.f32 1.0, %v6136_v39  ;;  %v6138_v27 = vpop.eup %6137  ;;  %v4011_v30 = vadd.f32 %v3992_v2, %v414_v10 }
 0x5be   :  { %4476 = vmatpush.bf16.msra.mxu0 %v10065_v14  ;;  %vm4023_vm11 = vweird.f32 %v6138_v27 }
 0x5bf   :  { %4502 = vmatpush.bf16.msra.mxu2 %v10066_v54  ;;  %v6140_v41 = vpop.eup %6139  ;;  %6141 = vrcp.f32 %v8640_v24  ;;  %v8648_v54 = vpop.f32.mrf.mxu2  ;;  %vm4024_vm15 = vmor %vm4022_vm13, %vm4023_vm11  ;;  %vm4061_vm4 = vweird.f32 %v8640_v24 }
 0x5c0   :  { %v4037_v14 = vmul.f32 %v6140_v41, %v8625_v53  ;;  %6143 = vtanh.f32 %v4011_v30  ;;  %vm4042_vm12 = vweird.f32 %v6140_v41 }
 0x5c1   :  { %4432 = vmatpush.bf16.msrb.mxu1 %v10198_v46  ;;  %4458 = vmatpush.bf16.msrb.mxu3 %v10199_v47  ;;  %v4018_v46 = vmul.f32 %v6138_v27, %v4016_v1  ;;  %vm4043_vm0 = vmor %vm4041_vm14, %vm4042_vm12 }
 0x5c2   :  { %4477 = vmatpush.bf16.msra.mxu0 %v9926_v15  ;;  %v4038_v23 = vsub.f32 1.0, %v4037_v14 }
 0x5c3   :  { %4503 = vmatpush.bf16.msra.mxu2 %v10200_v18  ;;  %v4019_v47 = vsub.f32 1.0, %v4018_v46  ;;  %4318 = vmatmul.bf16.vlgmr.msra.gmra.mxu1 %v4244_v50  ;;  %v4045_v18 = vand.u32 2147483647, %v8625_v53 }
 0x5c4   :  { %4344 = vmatmul.bf16.vlgmr.msra.gmra.mxu3 %v4244_v50  ;;  %v4039_v15 = vmul.f32 %v6140_v41, %v4038_v23 }
 0x5c5   :  { %4433 = vmatpush.bf16.msrb.mxu1 %v10055_v8  ;;  %4459 = vmatpush.bf16.msrb.mxu3 %v10056_v32  ;;  %v4088_v8 = vpop.f32.mrf.mxu0  ;;  %v4047_v32 = vand.u32 2147483648, %v8625_v53  ;;  %v4020_v2 = vmul.f32 %v6138_v27, %v4019_v47  ;;  %v6142_v28 = vpop.eup %6141  ;;  %vm4046_vm2 = vcmp.eq.f32.partialorder %v4045_v18, 8.507059e+37  ;;  %v10320_v18 = vld [vmem:[#allocation142_spill] sm:$0xff] }
 0x5c6   :  { %4478 = vmatpush.bf16.msra.mxu0 %v10204_v26  ;;  %v4040_v44 = vadd.f32 %v6140_v41, %v4039_v15  ;;  %v4057_v50 = vmul.f32 %v6142_v28, %v8640_v24  ;;  %v6144_v10 = vpop.eup %6143  ;;  %vm4062_vm3 = vweird.f32 %v6142_v28  ;;  %v10319_v15 = vld [vmem:[#allocation118_spill] sm:$0xff] }
 0x5c7   :  { %4504 = vmatpush.bf16.msra.mxu2 %v10205_v21  ;;  %v4021_v39 = vadd.f32 %v6138_v27, %v4020_v2  ;;  %v4048_v26 = vor.u32 1.1754944e-38, %v4047_v32  ;;  %v4114_v46 = vpop.f32.mrf.mxu2  ;;  %vm4063_vm5 = vmor %vm4061_vm4, %vm4062_vm3 }
 0x5c8   :  { %v4044_v30 = vsel %vm4043_vm0, %v6140_v41, %v4040_v44  ;;  %v4067_v41 = vand.u32 2147483648, %v8640_v24  ;;  %v10326_v44 = vld [vmem:[#allocation123_spill] sm:$0xff]  ;;  %v10336_v46 = vld [vmem:[#allocation162_spill] sm:$0xff] }
 0x5c9   :  { %4460 = vmatpush.bf16.msrb.mxu3 %v10058_v4  ;;  %4434 = vmatpush.bf16.msrb.mxu1 %v10057_v38  ;;  %v4029_v4 = vor.u32 1.1754944e-38, %v4028_v56  ;;  %v4025_v51 = vsel %vm4024_vm15, %v6138_v27, %v4021_v39  ;;  %v4058_v38 = vsub.f32 1.0, %v4057_v50  ;;  %v4049_v1 = vsel %vm4046_vm2, %v4048_v26, %v4044_v30  ;;  %v10324_v39 = vld [vmem:[#allocation146_spill] sm:$0xff]  ;;  %v10332_v30 = vld [vmem:[#allocation131_spill] sm:$0xff] }
 0x5ca   :  { %v4071_v14 = vmul.f32 %v4049_v1, %v8417_v17  ;;  %v4068_v56 = vor.u32 1.1754944e-38, %v4067_v41  ;;  %v10327_v50 = vld [vmem:[#allocation126_spill] sm:$0xff]  ;;  %v10334_v1 = vld [vmem:[#allocation159_spill] sm:$0xff] }
 0x5cb   :  { %v4030_v21 = vsel %vm4027_vm1, %v4029_v4, %v4025_v51  ;;  %v4059_v47 = vmul.f32 %v6142_v28, %v4058_v38  ;;  %v10325_v4 = vld [vmem:[#allocation147_spill] sm:$0xff]  ;;  %v10328_v26 = vld [vmem:[#allocation150_spill] sm:$0xff] }
 0x5cc   :  { %v4072_v53 = vmul.f32 %v6144_v10, %v4030_v21  ;;  %v10329_v51 = vld [vmem:[#allocation151_spill] sm:$0xff]  ;;  %v10331_v21 = vld [vmem:[#allocation130_spill] sm:$0xff] }
 0x5cd   :  { %4461 = vmatpush.bf16.msrb.mxu3 %v10060_v63  ;;  %4435 = vmatpush.bf16.msrb.mxu1 %v10059_v12  ;;  %v8662_v63 = vpop.f32.mrf.mxu0  ;;  %v4060_v27 = vadd.f32 %v6142_v28, %v4059_v47  ;;  %v4065_v12 = vand.u32 2147483647, %v8640_v24  ;;  %v10317_v24 = vld [vmem:[#allocation139_spill] sm:$0xff]  ;;  %v10333_v38 = vld [vmem:[#allocation134_spill] sm:$0xff] }
 0x5ce   :  { %v4073_v23 = vadd.f32 %v4072_v53, %v4071_v14  ;;  %v10330_v10 = vld [vmem:[#allocation127_spill] sm:$0xff]  ;;  %v10335_v53 = vld [vmem:[#allocation161_spill] sm:$0xff]  ;;  %v10338_v47 = vld [vmem:[#allocation42_spill] sm:$0xff] }
 0x5cf   :  { %v4064_v17 = vsel %vm4063_vm5, %v6142_v28, %v4060_v27  ;;  %vm4066_vm6 = vcmp.eq.f32.partialorder %v4065_v12, 8.507059e+37  ;;  %v10323_v28 = vld [vmem:[#allocation122_spill] sm:$0xff]  ;;  %v10337_v14 = vld [vmem:[#allocation135_spill] sm:$0xff] }
 0x5d0   :  { %6145 = vtanh.f32 %v4073_v23  ;;  %v4069_v32 = vsel %vm4066_vm6, %v4068_v56, %v4064_v17  ;;  %v4087_v23 = vadd.f32 %v8632_v36, %v10338_v47  ;;  %v10339_v41 = vld [vmem:[#allocation166_spill] sm:$0xff]  ;;  %v10340_v12 = vld [vmem:[#allocation167_spill] sm:$0xff] }
 0x5d1   :  { %4462 = vmatpush.bf16.msrb.mxu3 %v9913_v0  ;;  %4436 = vmatpush.bf16.msrb.mxu1 %v9912_v62  ;;  %v8670_v0 = vpop.f32.mrf.mxu2 }
 0x5d5   :  { %4463 = vmatpush.bf16.msrb.mxu3 %v9915_v55  ;;  %4437 = vmatpush.bf16.msrb.mxu1 %v9914_v16  ;;  %v4140_v62 = vpop.f32.mrf.mxu0 }
 0x5d6   :  { %v6146_v8 = vpop.eup %6145 }
 0x5d7   :  { %v4075_v55 = vmul.f32 %v6146_v8, %v4069_v32  ;;  %v10341_v8 = vld [vmem:[#allocation170_spill] sm:$0xff]  ;;  %v10342_v32 = vld [vmem:[#allocation171_spill] sm:$0xff] }
 0x5d9   :  { %4464 = vmatpush.bf16.msrb.mxu3 %v9772_v40  ;;  %4438 = vmatpush.bf16.msrb.mxu1 %v9916_v31  ;;  %v4417_v2 = vpack.c.bf16 %v4075_v55, %v4075_v55  ;;  %v4166_v16 = vpop.f32.mrf.mxu2  ;;  %v10312_v40 = vld [vmem:[#allocation112_spill] sm:$0xff]  ;;  %v10313_v31 = vld [vmem:[#allocation113_spill] sm:$0xff]  ;;  %v10343_v55 = vld [vmem:[#allocation43_spill] sm:$0xff] }
 0x5db   :  { %4427 = vmatmul.bf16.vlgmr.msrb.gmra.mxu0 %v4417_v2  ;;  %4453 = vmatmul.bf16.vlgmr.msrb.gmra.mxu2 %v4417_v2 }
 0x5dc   :  { %4587 = vmatpush.bf16.msrb.mxu0 %v10206_v22  ;;  %4613 = vmatpush.bf16.msrb.mxu2 %v10207_v5 }
 0x5dd   :  { %4465 = vmatpush.bf16.msrb.mxu3 %v9774_v35  ;;  %4439 = vmatpush.bf16.msrb.mxu1 %v9773_v59  ;;  %v10314_v35 = vld [vmem:[#allocation111_spill] sm:$0xff]  ;;  %v10316_v59 = vld [vmem:[#allocation138_spill] sm:$0xff] }
 0x5e0   :  { %4588 = vmatpush.bf16.msrb.mxu0 %v10312_v40  ;;  %4614 = vmatpush.bf16.msrb.mxu2 %v10313_v31 }
 0x5e1   :  { %4510 = vmatpush.bf16.msra.mxu3 %v9488_v43  ;;  %4484 = vmatpush.bf16.msra.mxu1 %v9489_v45  ;;  %v10315_v43 = vld [vmem:[#allocation114_spill] sm:$0xff]  ;;  %v10321_v45 = vld [vmem:[#allocation143_spill] sm:$0xff] }
 0x5e4   :  { %4589 = vmatpush.bf16.msrb.mxu0 %v10316_v59  ;;  %4615 = vmatpush.bf16.msrb.mxu2 %v10317_v24 }
 0x5e5   :  { %4511 = vmatpush.bf16.msra.mxu3 %v9494_v13  ;;  %4485 = vmatpush.bf16.msra.mxu1 %v10314_v35  ;;  %v10322_v13 = vld [vmem:[#allocation119_spill] sm:$0xff] }
 0x5e8   :  { %4590 = vmatpush.bf16.msrb.mxu0 %v10320_v18  ;;  %4616 = vmatpush.bf16.msrb.mxu2 %v10321_v45 }
 0x5e9   :  { %4512 = vmatpush.bf16.msra.mxu3 %v10315_v43  ;;  %4486 = vmatpush.bf16.msra.mxu1 %v10318_v57  ;;  %v10344_v57 = vld [vmem:[#allocation174_spill] sm:$0xff] }
 0x5eb   :  { %4479 = vmatmul.bf16.vlgmr.msra.gmra.mxu0 %v4417_v2  ;;  %4505 = vmatmul.bf16.vlgmr.msra.gmra.mxu2 %v4417_v2  ;;  %v4113_v2 = vadd.f32 %v8648_v54, %v10343_v55 }
 0x5ec   :  { %4591 = vmatpush.bf16.msrb.mxu0 %v10324_v39  ;;  %4617 = vmatpush.bf16.msrb.mxu2 %v10325_v4 }
 0x5ed   :  { %4513 = vmatpush.bf16.msra.mxu3 %v10319_v15  ;;  %4487 = vmatpush.bf16.msra.mxu1 %v10322_v13  ;;  %v10345_v15 = vld [vmem:[#allocation175_spill] sm:$0xff] }
 0x5f0   :  { %4592 = vmatpush.bf16.msrb.mxu0 %v10328_v26  ;;  %4618 = vmatpush.bf16.msrb.mxu2 %v10329_v51 }
 0x5f1   :  { %4514 = vmatpush.bf16.msra.mxu3 %v10323_v28  ;;  %4488 = vmatpush.bf16.msra.mxu1 %v10326_v44 }
 0x5f4   :  { %4593 = vmatpush.bf16.msrb.mxu0 %v10226_v11  ;;  %4619 = vmatpush.bf16.msrb.mxu2 %v10227_v25 }
 0x5f5   :  { %4515 = vmatpush.bf16.msra.mxu3 %v10327_v50  ;;  %4489 = vmatpush.bf16.msra.mxu1 %v10330_v10 }
 0x5f8   :  { %4594 = vmatpush.bf16.msrb.mxu0 %v10228_v37  ;;  %4620 = vmatpush.bf16.msrb.mxu2 %v10334_v1 }
 0x5f9   :  { %4516 = vmatpush.bf16.msra.mxu3 %v10331_v21  ;;  %4490 = vmatpush.bf16.msra.mxu1 %v10332_v30  ;;  %v10346_v30 = vld [vmem:[#allocation182_spill] sm:$0xff] }
 0x5fb   :  { %v4099_v27 = vpop.f32.mrf.mxu1 }
 0x5fc   :  { %4639 = vmatpush.bf16.msra.mxu0 %v10335_v53  ;;  %4665 = vmatpush.bf16.msra.mxu2 %v10336_v46  ;;  %v4100_v17 = vadd.f32 %v4099_v27, %v4087_v23  ;;  %v10348_v27 = vld [vmem:[#allocation46_spill] sm:$0xff] }
 0x5fd   :  { %4517 = vmatpush.bf16.msra.mxu3 %v10333_v38  ;;  %4491 = vmatpush.bf16.msra.mxu1 %v10337_v14  ;;  %v8714_v56 = vpop.f32.mrf.mxu0  ;;  %v10347_v38 = vld [vmem:[#allocation183_spill] sm:$0xff] }
 0x5fe   :  { %v5659_v62 = vmul.f32 -1.442695, %v4100_v17  ;;  %v4139_v17 = vadd.f32 %v8662_v63, %v10348_v27  ;;  %v10353_v27 = vld [vmem:[#allocation191_spill] sm:$0xff] }
 0x600   :  { %4640 = vmatpush.bf16.msra.mxu0 %v10339_v41  ;;  %4666 = vmatpush.bf16.msra.mxu2 %v10340_v12  ;;  %6147 = vpow2.f32 %v5659_v62 }
 0x602   :  { %v4125_v16 = vpop.f32.mrf.mxu3 }
 0x603   :  { %v4126_v35 = vadd.f32 %v4125_v16, %v4113_v2  ;;  %v8720_v36 = vpop.f32.mrf.mxu2  ;;  %v4101_v43 = vpop.f32.mrf.mxu1 }
 0x604   :  { %4641 = vmatpush.bf16.msra.mxu0 %v10341_v8  ;;  %4667 = vmatpush.bf16.msra.mxu2 %v10342_v32  ;;  %v10350_v43 = vld [vmem:[#allocation187_spill] sm:$0xff] }
 0x605   :  { %v5660_v13 = vmul.f32 -1.442695, %v4126_v35  ;;  %v4256_v28 = vpop.f32.mrf.mxu0  ;;  %v10349_v35 = vld [vmem:[#allocation186_spill] sm:$0xff] }
 0x606   :  { %v6148_v44 = vpop.eup %6147 }
 0x607   :  { %6149 = vpow2.f32 %v5660_v13  ;;  %v4184_v50 = vadd.f32 1.0, %v6148_v44  ;;  %v10351_v13 = vld [vmem:[#allocation47_spill] sm:$0xff] }
 0x608   :  { %4642 = vmatpush.bf16.msra.mxu0 %v10344_v57  ;;  %4668 = vmatpush.bf16.msra.mxu2 %v10345_v15  ;;  %v4165_v28 = vadd.f32 %v8670_v0, %v10351_v13 }
 0x609   :  { %6151 = vrcp.f32 %v4184_v50  ;;  %v4196_v52 = vand.u32 2147483648, %v4184_v50  ;;  %vm4190_vm8 = vweird.f32 %v4184_v50 }
 0x60a   :  { %v4127_v54 = vpop.f32.mrf.mxu3 }
 0x60b   :  { %v4282_v10 = vpop.f32.mrf.mxu2  ;;  %v4151_v21 = vpop.f32.mrf.mxu1 }
 0x60c   :  { %4643 = vmatpush.bf16.msra.mxu0 %v10241_v42  ;;  %4669 = vmatpush.bf16.msra.mxu2 %v10242_v7  ;;  %v4152_v16 = vadd.f32 %v4151_v21, %v4139_v17  ;;  %v4194_v17 = vand.u32 2147483647, %v4184_v50 }
 0x60d   :  { %v6150_v14 = vpop.eup %6149  ;;  %v8728_v23 = vpop.f32.mrf.mxu0 }
 0x60e   :  { %v4203_v62 = vadd.f32 1.0, %v6150_v14  ;;  %v10352_v14 = vld [vmem:[#allocation190_spill] sm:$0xff]  ;;  %vm4195_vm10 = vcmp.eq.f32.partialorder %v4194_v17, 8.507059e+37 }
 0x60f   :  { %v6152_v2 = vpop.eup %6151 }
 0x610   :  { %4644 = vmatpush.bf16.msra.mxu0 %v10346_v30  ;;  %4670 = vmatpush.bf16.msra.mxu2 %v10347_v38  ;;  %6153 = vrcp.f32 %v4203_v62  ;;  %v4186_v44 = vmul.f32 %v6152_v2, %v4184_v50  ;;  %vm4191_vm7 = vweird.f32 %v6152_v2  ;;  %vm4209_vm12 = vweird.f32 %v4203_v62 }
 0x611   :  { %6155 = vtanh.f32 %v4152_v16  ;;  %vm4192_vm9 = vmor %vm4190_vm8, %vm4191_vm7 }
 0x612   :  { %v4177_v54 = vpop.f32.mrf.mxu3  ;;  %v4187_v10 = vsub.f32 1.0, %v4186_v44 }
 0x613   :  { %v4178_v55 = vadd.f32 %v4177_v54, %v4165_v28  ;;  %v8736_v47 = vpop.f32.mrf.mxu2  ;;  %v4153_v63 = vpop.f32.mrf.mxu1  ;;  %v4197_v28 = vor.u32 1.1754944e-38, %v4196_v52 }
 0x614   :  { %4645 = vmatpush.bf16.msra.mxu0 %v10349_v35  ;;  %4671 = vmatpush.bf16.msra.mxu2 %v10350_v43  ;;  %v4188_v21 = vmul.f32 %v6152_v2, %v4187_v10  ;;  %v4215_v63 = vand.u32 2147483648, %v4203_v62  ;;  %v4213_v10 = vand.u32 2147483647, %v4203_v62 }
 0x615   :  { %v5661_v43 = vmul.f32 -1.442695, %v4178_v55  ;;  %v4308_v19 = vpop.f32.mrf.mxu0 }
 0x616   :  { %v6154_v35 = vpop.eup %6153  ;;  %v4189_v13 = vadd.f32 %v6152_v2, %v4188_v21  ;;  %v4216_v50 = vor.u32 1.1754944e-38, %v4215_v63  ;;  %vm4214_vm14 = vcmp.eq.f32.partialorder %v4213_v10, 8.507059e+37 }
 0x617   :  { %v4205_v0 = vmul.f32 %v6154_v35, %v4203_v62  ;;  %6157 = vpow2.f32 %v5661_v43  ;;  %v6156_v16 = vpop.eup %6155  ;;  %vm4210_vm11 = vweird.f32 %v6154_v35 }
 0x618   :  { %4646 = vmatpush.bf16.msra.mxu0 %v10352_v14  ;;  %4672 = vmatpush.bf16.msra.mxu2 %v10353_v27  ;;  %v4193_v54 = vsel %vm4192_vm9, %v6152_v2, %v4189_v13  ;;  %vm4211_vm13 = vmor %vm4209_vm12, %vm4210_vm11  ;;  %v10354_v2 = vld [vmem:[#allocation53_spill] sm:$0xff] }
 0x619   :  { %v4206_v44 = vsub.f32 1.0, %v4205_v0  ;;  %v4198_v14 = vsel %vm4195_vm10, %v4197_v28, %v4193_v54 }
 0x61a   :  { %v4179_v38 = vpop.f32.mrf.mxu3  ;;  %v4240_v34 = vmul.f32 %v6156_v16, %v4198_v14 }
 0x61b   :  { %v4207_v27 = vmul.f32 %v6154_v35, %v4206_v44  ;;  %v4334_v55 = vpop.f32.mrf.mxu2 }
 0x61d   :  { %v6158_v19 = vpop.eup %6157  ;;  %v4208_v61 = vadd.f32 %v6154_v35, %v4207_v27 }
 0x61e   :  { %v4223_v43 = vadd.f32 1.0, %v6158_v19 }
 0x61f   :  { %v4212_v21 = vsel %vm4211_vm13, %v6154_v35, %v4208_v61  ;;  %v10355_v35 = vld [vmem:[#allocation48_spill] sm:$0xff] }
 0x620   :  { %v4217_v52 = vsel %vm4214_vm14, %v4216_v50, %v4212_v21  ;;  %6159 = vrcp.f32 %v4223_v43  ;;  %v4235_v14 = vand.u32 2147483648, %v4223_v43  ;;  %v4233_v27 = vand.u32 2147483647, %v4223_v43 }
 0x621   :  { %v4239_v13 = vmul.f32 %v4217_v52, %v10354_v2  ;;  %vm4229_vm0 = vweird.f32 %v4223_v43  ;;  %v4255_v54 = vadd.f32 %v8714_v56, %v10355_v35  ;;  %v10356_v52 = vld [vmem:[#allocation49_spill] sm:$0xff] }
 0x622   :  { %v4236_v61 = vor.u32 1.1754944e-38, %v4235_v14  ;;  %vm4234_vm2 = vcmp.eq.f32.partialorder %v4233_v27, 8.507059e+37  ;;  %v10358_v56 = vld [vmem:[#allocation109_spill] sm:$0xff]  ;;  %v10360_v27 = vld [vmem:[#allocation136_spill] sm:$0xff] }
 0x623   :  { %v8741_v17 = vadd.f32 %v4240_v34, %v4239_v13  ;;  %v10357_v13 = vld [vmem:[#allocation110_spill] sm:$0xff] }
 0x625   :  { %6161 = vtanh.f32 %v8741_v17 }
 0x626   :  { %v6160_v38 = vpop.eup %6159 }
 0x627   :  { %v4225_v0 = vmul.f32 %v6160_v38, %v4223_v43  ;;  %vm4230_vm15 = vweird.f32 %v6160_v38  ;;  %v4281_v43 = vadd.f32 %v8720_v36, %v10356_v52 }
 0x628   :  { %vm4231_vm1 = vmor %vm4229_vm0, %vm4230_vm15 }
 0x629   :  { %v4226_v28 = vsub.f32 1.0, %v4225_v0 }
 0x62b   :  { %v4227_v44 = vmul.f32 %v6160_v38, %v4226_v28  ;;  %v6162_v34 = vpop.eup %6161 }
 0x62d   :  { %v4228_v62 = vadd.f32 %v6160_v38, %v4227_v44  ;;  %v10359_v44 = vld [vmem:[#allocation137_spill] sm:$0xff] }
 0x62f   :  { %v4232_v16 = vsel %vm4231_vm1, %v6160_v38, %v4228_v62 }
 0x630   :  { %v4237_v63 = vsel %vm4234_vm2, %v4236_v61, %v4232_v16  ;;  %v4267_v10 = vpop.f32.mrf.mxu1  ;;  %v10361_v61 = vld [vmem:[#allocation141_spill] sm:$0xff] }
 0x631   :  { %v4243_v55 = vmul.f32 %v6162_v34, %v4237_v63  ;;  %v4268_v19 = vadd.f32 %v4267_v10, %v4255_v54  ;;  %v10363_v34 = vld [vmem:[#allocation145_spill] sm:$0xff]  ;;  %v10364_v63 = vld [vmem:[#allocation144_spill] sm:$0xff] }
 0x633   :  { %v4418_v50 = vpack.c.bf16 %v4243_v55, %v4243_v55  ;;  %v5662_v21 = vmul.f32 -1.442695, %v4268_v19  ;;  %v10366_v19 = vld [vmem:[#allocation149_spill] sm:$0xff] }
 0x635   :  { %6163 = vpow2.f32 %v5662_v21  ;;  %4440 = vmatmul.bf16.vlgmr.msrb.gmra.mxu1 %v4418_v50  ;;  %4466 = vmatmul.bf16.vlgmr.msrb.gmra.mxu3 %v4418_v50  ;;  %v10367_v21 = vld [vmem:[#allocation148_spill] sm:$0xff] }
 0x636   :  { %4595 = vmatmul.bf16.vlgmr.msrb.gmra.mxu0 %v4418_v50  ;;  %4621 = vmatmul.bf16.vlgmr.msrb.gmra.mxu2 %v4418_v50 }
 0x637   :  { %v4293_v2 = vpop.f32.mrf.mxu3  ;;  %4600 = vmatpush.bf16.msrb.mxu1 %v10357_v13  ;;  %4626 = vmatpush.bf16.msrb.mxu3 %v10358_v56 }
 0x638   :  { %v4294_v38 = vadd.f32 %v4293_v2, %v4281_v43  ;;  %v4269_v0 = vpop.f32.mrf.mxu1  ;;  %4761 = vmatpush.bf16.msrb.mxu0 %v10206_v22  ;;  %4787 = vmatpush.bf16.msrb.mxu2 %v10207_v5  ;;  %v10362_v22 = vld [vmem:[#allocation140_spill] sm:$0xff] }
 0x639   :  { %v10368_v0 = vld [vmem:[#allocation153_spill] sm:$0xff] }
 0x63a   :  { %v5663_v28 = vmul.f32 -1.442695, %v4294_v38 }
 0x63b   :  { %v6164_v14 = vpop.eup %6163  ;;  %4601 = vmatpush.bf16.msrb.mxu1 %v10359_v44  ;;  %4627 = vmatpush.bf16.msrb.mxu3 %v10360_v27 }
 0x63c   :  { %v8754_v36 = vadd.f32 1.0, %v6164_v14  ;;  %6165 = vpow2.f32 %v5663_v28  ;;  %4762 = vmatpush.bf16.msrb.mxu0 %v10312_v40  ;;  %4788 = vmatpush.bf16.msrb.mxu2 %v10313_v31 }
 0x63e   :  { %6167 = vrcp.f32 %v8754_v36  ;;  %vm4358_vm5 = vweird.f32 %v8754_v36 }
 0x63f   :  { %v4295_v62 = vpop.f32.mrf.mxu3  ;;  %4602 = vmatpush.bf16.msrb.mxu1 %v10361_v61  ;;  %4628 = vmatpush.bf16.msrb.mxu3 %v10362_v22 }
 0x640   :  { %v4319_v5 = vpop.f32.mrf.mxu1  ;;  %4763 = vmatpush.bf16.msrb.mxu0 %v10316_v59  ;;  %4789 = vmatpush.bf16.msrb.mxu2 %v10317_v24  ;;  %v10365_v59 = vld [vmem:[#allocation116_spill] sm:$0xff] }
 0x641   :  { %v4333_v24 = vadd.f32 %v8736_v47, %v10365_v59  ;;  %v10369_v47 = vld [vmem:[#allocation152_spill] sm:$0xff] }
 0x642   :  { %v6166_v54 = vpop.eup %6165 }
 0x643   :  { %v4371_v16 = vadd.f32 1.0, %v6166_v54  ;;  %4603 = vmatpush.bf16.msrb.mxu1 %v10363_v34  ;;  %4629 = vmatpush.bf16.msrb.mxu3 %v10364_v63 }
 0x644   :  { %v8765_v40 = vpop.eup %6167  ;;  %4764 = vmatpush.bf16.msrb.mxu0 %v10320_v18  ;;  %4790 = vmatpush.bf16.msrb.mxu2 %v10321_v45 }
 0x645   :  { %v4354_v31 = vmul.f32 %v8765_v40, %v8754_v36  ;;  %6169 = vrcp.f32 %v4371_v16  ;;  %4492 = vmatmul.bf16.vlgmr.msra.gmra.mxu1 %v4418_v50  ;;  %4518 = vmatmul.bf16.vlgmr.msra.gmra.mxu3 %v4418_v50  ;;  %vm4359_vm3 = vweird.f32 %v8765_v40  ;;  %vm4377_vm6 = vweird.f32 %v4371_v16 }
 0x646   :  { %4647 = vmatmul.bf16.vlgmr.msra.gmra.mxu0 %v4418_v50  ;;  %4673 = vmatmul.bf16.vlgmr.msra.gmra.mxu2 %v4418_v50  ;;  %v10370_v50 = vld [vmem:[#allocation52_spill] sm:$0xff]  ;;  %vm8793_vm7 = vmor %vm4358_vm5, %vm4359_vm3 }
 0x647   :  { %v4355_v10 = vsub.f32 1.0, %v4354_v31  ;;  %v4345_v55 = vpop.f32.mrf.mxu3  ;;  %4604 = vmatpush.bf16.msrb.mxu1 %v10366_v19  ;;  %4630 = vmatpush.bf16.msrb.mxu3 %v10367_v21  ;;  %v4307_v28 = vadd.f32 %v8728_v23, %v10370_v50  ;;  %v4364_v23 = vand.u32 2147483648, %v8754_v36 }
 0x648   :  { %v4346_v18 = vadd.f32 %v4345_v55, %v4333_v24  ;;  %v4321_v43 = vpop.f32.mrf.mxu1  ;;  %4765 = vmatpush.bf16.msrb.mxu0 %v10324_v39  ;;  %4791 = vmatpush.bf16.msrb.mxu2 %v10325_v4  ;;  %v4383_v4 = vand.u32 2147483648, %v4371_v16  ;;  %v10371_v24 = vld [vmem:[#allocation157_spill] sm:$0xff] }
 0x649   :  { %v4356_v38 = vmul.f32 %v8765_v40, %v4355_v10  ;;  %v4320_v62 = vadd.f32 %v4319_v5, %v4307_v28  ;;  %v10372_v10 = vld [vmem:[#allocation156_spill] sm:$0xff] }
 0x64a   :  { %v5664_v45 = vmul.f32 -1.442695, %v4346_v18  ;;  %v4381_v18 = vand.u32 2147483647, %v4371_v16 }
 0x64b   :  { %v6170_v2 = vpop.eup %6169  ;;  %4605 = vmatpush.bf16.msrb.mxu1 %v10368_v0  ;;  %4631 = vmatpush.bf16.msrb.mxu3 %v10369_v47  ;;  %v4357_v54 = vadd.f32 %v8765_v40, %v4356_v38 }
 0x64c   :  { %v4373_v14 = vmul.f32 %v6170_v2, %v4371_v16  ;;  %6171 = vpow2.f32 %v5664_v45  ;;  %4766 = vmatpush.bf16.msrb.mxu0 %v10328_v26  ;;  %4792 = vmatpush.bf16.msrb.mxu2 %v10329_v51  ;;  %vm4378_vm4 = vweird.f32 %v6170_v2  ;;  %v4362_v26 = vand.u32 2147483647, %v8754_v36  ;;  %v10375_v16 = vld [vmem:[#allocation163_spill] sm:$0xff] }
 0x64d   :  { %6173 = vtanh.f32 %v4320_v62  ;;  %vm4379_vm8 = vmor %vm4377_vm6, %vm4378_vm4  ;;  %v4384_v45 = vor.u32 1.1754944e-38, %v4383_v4  ;;  %vm4382_vm9 = vcmp.eq.f32.partialorder %v4381_v18, 8.507059e+37  ;;  %v10377_v4 = vld [vmem:[#allocation169_spill] sm:$0xff] }
 0x64e   :  { %v4374_v39 = vsub.f32 1.0, %v4373_v14  ;;  %vm4363_vm10 = vcmp.eq.f32.partialorder %v4362_v26, 8.507059e+37  ;;  %v10376_v14 = vld [vmem:[#allocation117_spill] sm:$0xff] }
 0x64f   :  { %v4347_v31 = vpop.f32.mrf.mxu3  ;;  %4606 = vmatpush.bf16.msrb.mxu1 %v10371_v24  ;;  %4632 = vmatpush.bf16.msrb.mxu3 %v10372_v10 }
 0x650   :  { %v4375_v55 = vmul.f32 %v6170_v2, %v4374_v39  ;;  %4767 = vmatpush.bf16.msrb.mxu0 %v10226_v11  ;;  %4793 = vmatpush.bf16.msrb.mxu2 %v10227_v25  ;;  %v4361_v11 = vsel %vm8793_vm7, %v8765_v40, %v4357_v54  ;;  %v4365_v25 = vor.u32 1.1754944e-38, %v4364_v23  ;;  %v10378_v54 = vld [vmem:[#allocation168_spill] sm:$0xff] }
 0x652   :  { %v6172_v51 = vpop.eup %6171  ;;  %v4376_v43 = vadd.f32 %v6170_v2, %v4375_v55  ;;  %v4366_v40 = vsel %vm4363_vm10, %v4365_v25, %v4361_v11 }
 0x653   :  { %v4391_v38 = vadd.f32 1.0, %v6172_v51  ;;  %4607 = vmatpush.bf16.msrb.mxu1 %v10278_v29  ;;  %4633 = vmatpush.bf16.msrb.mxu3 %v10279_v3  ;;  %v6174_v62 = vpop.eup %6173 }
 0x654   :  { %v4380_v36 = vsel %vm4379_vm8, %v6170_v2, %v4376_v43  ;;  %4768 = vmatpush.bf16.msrb.mxu0 %v10228_v37  ;;  %4794 = vmatpush.bf16.msrb.mxu2 %v10334_v1  ;;  %v4408_v31 = vmul.f32 %v6174_v62, %v4366_v40  ;;  %v4412_v43 = vperm.slane %v8610_v49, 5  ;;  %v10381_v49 = vld [vmem:[#allocation189_spill] sm:$0xff]  ;;  %v10386_v62 = vld [vmem:[#allocation192_spill] sm:$0xff] }
 0x655   :  { %v4385_v28 = vsel %vm4382_vm9, %v4384_v45, %v4380_v36  ;;  %6175 = vrcp.f32 %v4391_v38  ;;  %v4403_v51 = vand.u32 2147483648, %v4391_v38  ;;  %vm4397_vm12 = vweird.f32 %v4391_v38 }
 0x656   :  { %v4407_v39 = vmul.f32 %v4385_v28, %v10376_v14  ;;  %v10382_v28 = vld [vmem:[#allocation188_spill] sm:$0xff]  ;;  %v10384_v14 = vld [vmem:[#allocation186_spill] sm:$0xff] }
 0x657   :  { %4652 = vmatpush.bf16.msra.mxu1 %v10280_v6  ;;  %4678 = vmatpush.bf16.msra.mxu3 %v10375_v16 }
 0x658   :  { %4813 = vmatpush.bf16.msra.mxu0 %v10335_v53  ;;  %4839 = vmatpush.bf16.msra.mxu2 %v10336_v46  ;;  %v8809_v2 = vpop.f32.mrf.mxu0  ;;  %v8815_v1 = vadd.f32 %v4408_v31, %v4407_v39  ;;  %v10379_v53 = vld [vmem:[#allocation173_spill] sm:$0xff]  ;;  %v10380_v46 = vld [vmem:[#allocation172_spill] sm:$0xff]  ;;  %v10388_v31 = vld [vmem:[#allocation190_spill] sm:$0xff] }
 0x659   :  { %v10385_v39 = vld [vmem:[#allocation193_spill] sm:$0xff] }
 0x65a   :  { %6177 = vtanh.f32 %v8815_v1 }
 0x65b   :  { %4653 = vmatpush.bf16.msra.mxu1 %v10377_v4  ;;  %4679 = vmatpush.bf16.msra.mxu3 %v10378_v54  ;;  %v6176_v37 = vpop.eup %6175 }
 0x65c   :  { %4814 = vmatpush.bf16.msra.mxu0 %v10339_v41  ;;  %4840 = vmatpush.bf16.msra.mxu2 %v10340_v12  ;;  %v4393_v55 = vmul.f32 %v6176_v37, %v4391_v38  ;;  %vm4398_vm11 = vweird.f32 %v6176_v37  ;;  %v4401_v12 = vand.u32 2147483647, %v4391_v38 }
 0x65d   :  { %vm4399_vm13 = vmor %vm4397_vm12, %vm4398_vm11 }
 0x65e   :  { %v8819_v23 = vpop.f32.mrf.mxu2  ;;  %v4394_v18 = vsub.f32 1.0, %v4393_v55  ;;  %vm4402_vm14 = vcmp.eq.f32.partialorder %v4401_v12, 8.507059e+37  ;;  %v10389_v55 = vld [vmem:[#allocation191_spill] sm:$0xff] }
 0x65f   :  { %4654 = vmatpush.bf16.msra.mxu1 %v10379_v53  ;;  %4680 = vmatpush.bf16.msra.mxu3 %v10380_v46 }
 0x660   :  { %4815 = vmatpush.bf16.msra.mxu0 %v10341_v8  ;;  %4841 = vmatpush.bf16.msra.mxu2 %v10342_v32  ;;  %v4430_v26 = vpop.f32.mrf.mxu0  ;;  %v4395_v41 = vmul.f32 %v6176_v37, %v4394_v18  ;;  %v4404_v8 = vor.u32 1.1754944e-38, %v4403_v51  ;;  %v6178_v45 = vpop.eup %6177 }
 0x662   :  { %v4396_v5 = vadd.f32 %v6176_v37, %v4395_v41 }
 0x663   :  { %4655 = vmatpush.bf16.msra.mxu1 %v10298_v20  ;;  %4681 = vmatpush.bf16.msra.mxu3 %v10299_v9 }
 0x664   :  { %4816 = vmatpush.bf16.msra.mxu0 %v10344_v57  ;;  %4842 = vmatpush.bf16.msra.mxu2 %v10345_v15  ;;  %v4400_v32 = vsel %vm4399_vm13, %v6176_v37, %v4396_v5 }
 0x665   :  { %v4405_v25 = vsel %vm4402_vm14, %v4404_v8, %v4400_v32 }
 0x666   :  { %v4456_v11 = vpop.f32.mrf.mxu2  ;;  %v4411_v36 = vmul.f32 %v6178_v45, %v4405_v25 }
 0x667   :  { %4656 = vmatpush.bf16.msra.mxu1 %v10300_v58  ;;  %4682 = vmatpush.bf16.msra.mxu3 %v10301_v48 }
 0x668   :  { %4817 = vmatpush.bf16.msra.mxu0 %v10241_v42  ;;  %4843 = vmatpush.bf16.msra.mxu2 %v10242_v7  ;;  %v8833_v57 = vpop.f32.mrf.mxu0  ;;  %v4413_v15 = vmul.f32 %v4412_v43, %v4411_v36  ;;  %v4586_v38 = vpack.c.bf16 %v4411_v36, %v4411_v36  ;;  %v10383_v7 = vld [vmem:[#allocation183_spill] sm:$0xff] }
 0x66a   :  { %4414 = vadd.xlane.f32.xlu2 %v4413_v15  ;;  %4608 = vmatmul.bf16.vlgmr.msrb.gmra.mxu1 %v4586_v38 }
 0x66b   :  { %4657 = vmatpush.bf16.msra.mxu1 %v10304_v60  ;;  %4683 = vmatpush.bf16.msra.mxu3 %v10305_v33 }
 0x66c   :  { %4634 = vmatmul.bf16.vlgmr.msrb.gmra.mxu3 %v4586_v38  ;;  %4818 = vmatpush.bf16.msra.mxu0 %v10346_v30  ;;  %v10387_v30 = vld [vmem:[#allocation187_spill] sm:$0xff] }
 0x66d   :  { %4844 = vmatpush.bf16.msra.mxu2 %v10383_v7 }
 0x66e   :  { %v8840_v42 = vpop.f32.mrf.mxu2 }
 0x66f   :  { %4658 = vmatpush.bf16.msra.mxu1 %v10381_v49  ;;  %4684 = vmatpush.bf16.msra.mxu3 %v10382_v28 }
 0x670   :  { %v4482_v40 = vpop.f32.mrf.mxu0  ;;  %4819 = vmatpush.bf16.msra.mxu0 %v10384_v14 }
 0x671   :  { %4845 = vmatpush.bf16.msra.mxu2 %v10387_v30 }
 0x673   :  { %4659 = vmatpush.bf16.msra.mxu1 %v10385_v39  ;;  %4685 = vmatpush.bf16.msra.mxu3 %v10386_v62 }
 0x674   :  { %4820 = vmatpush.bf16.msra.mxu0 %v10388_v31 }
 0x675   :  { %4846 = vmatpush.bf16.msra.mxu2 %v10389_v55 }
 0x676   :  { %v4508_v37 = vpop.f32.mrf.mxu2 }
 0x677   :  { %4774 = vmatpush.bf16.msrb.mxu1 %v10357_v13  ;;  %4800 = vmatpush.bf16.msrb.mxu3 %v10358_v56 }
 0x67a   :  { %4660 = vmatmul.bf16.vlgmr.msra.gmra.mxu1 %v4586_v38 }
 0x67b   :  { %4775 = vmatpush.bf16.msrb.mxu1 %v10359_v44  ;;  %4801 = vmatpush.bf16.msrb.mxu3 %v10360_v27 }
 0x67c   :  { %4686 = vmatmul.bf16.vlgmr.msra.gmra.mxu3 %v4586_v38 }
 0x67f   :  { %4776 = vmatpush.bf16.msrb.mxu1 %v10361_v61  ;;  %4802 = vmatpush.bf16.msrb.mxu3 %v10362_v22 }
 0x683   :  { %4777 = vmatpush.bf16.msrb.mxu1 %v10363_v34  ;;  %4803 = vmatpush.bf16.msrb.mxu3 %v10364_v63 }
 0x687   :  { %4778 = vmatpush.bf16.msrb.mxu1 %v10366_v19  ;;  %4804 = vmatpush.bf16.msrb.mxu3 %v10367_v21 }
 0x68b   :  { %4779 = vmatpush.bf16.msrb.mxu1 %v10368_v0  ;;  %4805 = vmatpush.bf16.msrb.mxu3 %v10369_v47 }
 0x68f   :  { %4780 = vmatpush.bf16.msrb.mxu1 %v10371_v24  ;;  %4806 = vmatpush.bf16.msrb.mxu3 %v10372_v10  ;;  %v10392_v24 = vld [vmem:[#allocation46_spill] sm:$0xff] }
 0x690   :  { %v4481_v10 = vadd.f32 %v8833_v57, %v10392_v24 }
 0x693   :  { %4781 = vmatpush.bf16.msrb.mxu1 %v10278_v29  ;;  %4807 = vmatpush.bf16.msrb.mxu3 %v10279_v3 }
 0x697   :  { %4826 = vmatpush.bf16.msra.mxu1 %v10280_v6  ;;  %4852 = vmatpush.bf16.msra.mxu3 %v10375_v16  ;;  %v10390_v6 = vld [vmem:[#allocation42_spill] sm:$0xff] }
 0x698   :  { %v4429_v29 = vadd.f32 %v8809_v2, %v10390_v6 }
 0x69b   :  { %4827 = vmatpush.bf16.msra.mxu1 %v10377_v4  ;;  %4853 = vmatpush.bf16.msra.mxu3 %v10378_v54  ;;  %v10393_v54 = vld [vmem:[#allocation47_spill] sm:$0xff] }
 0x69f   :  { %4828 = vmatpush.bf16.msra.mxu1 %v10379_v53  ;;  %4854 = vmatpush.bf16.msra.mxu3 %v10380_v46  ;;  %v4507_v53 = vadd.f32 %v8840_v42, %v10393_v54 }
 0x6a3   :  { %4829 = vmatpush.bf16.msra.mxu1 %v10298_v20  ;;  %4855 = vmatpush.bf16.msra.mxu3 %v10299_v9 }
 0x6a7   :  { %4830 = vmatpush.bf16.msra.mxu1 %v10300_v58  ;;  %4856 = vmatpush.bf16.msra.mxu3 %v10301_v48  ;;  %v10391_v48 = vld [vmem:[#allocation43_spill] sm:$0xff] }
 0x6ab   :  { %4831 = vmatpush.bf16.msra.mxu1 %v10304_v60  ;;  %4857 = vmatpush.bf16.msra.mxu3 %v10305_v33  ;;  %v4455_v60 = vadd.f32 %v8819_v23, %v10391_v48 }
 0x6af   :  { %4832 = vmatpush.bf16.msra.mxu1 %v10381_v49  ;;  %4858 = vmatpush.bf16.msra.mxu3 %v10382_v28 }
 0x6b2   :  { %v4441_v3 = vpop.f32.mrf.mxu1 }
 0x6b3   :  { %4833 = vmatpush.bf16.msra.mxu1 %v10385_v39  ;;  %4859 = vmatpush.bf16.msra.mxu3 %v10386_v62  ;;  %v4442_v20 = vadd.f32 %v4441_v3, %v4429_v29  ;;  %v8883_v9 = vpop.f32.mrf.mxu0 }
 0x6b5   :  { %v5665_v58 = vmul.f32 -1.442695, %v4442_v20 }
 0x6b7   :  { %6179 = vpow2.f32 %v5665_v58 }
 0x6b8   :  { %v4467_v33 = vpop.f32.mrf.mxu3 }
 0x6b9   :  { %v4468_v13 = vadd.f32 %v4467_v33, %v4455_v60  ;;  %v8887_v56 = vpop.f32.mrf.mxu2 }
 0x6ba   :  { %v4443_v44 = vpop.f32.mrf.mxu1 }
 0x6bb   :  { %v5666_v27 = vmul.f32 -1.442695, %v4468_v13  ;;  %v4598_v61 = vpop.f32.mrf.mxu0 }
 0x6bd   :  { %v6180_v22 = vpop.eup %6179  ;;  %6181 = vpow2.f32 %v5666_v27 }
 0x6be   :  { %v4526_v34 = vadd.f32 1.0, %v6180_v22 }
 0x6c0   :  { %6183 = vrcp.f32 %v4526_v34  ;;  %v4469_v63 = vpop.f32.mrf.mxu3  ;;  %v4538_v41 = vand.u32 2147483648, %v4526_v34  ;;  %v4536_v8 = vand.u32 2147483647, %v4526_v34  ;;  %vm4532_vm0 = vweird.f32 %v4526_v34 }
 0x6c1   :  { %v4624_v19 = vpop.f32.mrf.mxu2 }
 0x6c2   :  { %v4493_v21 = vpop.f32.mrf.mxu1  ;;  %v4539_v36 = vor.u32 1.1754944e-38, %v4538_v41  ;;  %vm4537_vm2 = vcmp.eq.f32.partialorder %v4536_v8, 8.507059e+37 }
 0x6c3   :  { %v6182_v0 = vpop.eup %6181  ;;  %v8889_v47 = vpop.f32.mrf.mxu0  ;;  %v4494_v4 = vadd.f32 %v4493_v21, %v4481_v10  ;;  %v4623_v10 = vadd.f32 %v8887_v56, %v10356_v52 }
 0x6c4   :  { %v4545_v16 = vadd.f32 1.0, %v6182_v0 }
 0x6c6   :  { %v6184_v2 = vpop.eup %6183  ;;  %6185 = vrcp.f32 %v4545_v16  ;;  %v4557_v49 = vand.u32 2147483648, %v4545_v16  ;;  %v4555_v40 = vand.u32 2147483647, %v4545_v16  ;;  %vm4551_vm4 = vweird.f32 %v4545_v16 }
 0x6c7   :  { %v4528_v46 = vmul.f32 %v6184_v2, %v4526_v34  ;;  %6187 = vtanh.f32 %v4494_v4  ;;  %vm4533_vm15 = vweird.f32 %v6184_v2  ;;  %v4597_v34 = vadd.f32 %v8883_v9, %v10355_v35 }
 0x6c8   :  { %v4519_v23 = vpop.f32.mrf.mxu3  ;;  %vm4534_vm1 = vmor %vm4532_vm0, %vm4533_vm15  ;;  %v4558_v31 = vor.u32 1.1754944e-38, %v4557_v49  ;;  %vm4556_vm6 = vcmp.eq.f32.partialorder %v4555_v40, 8.507059e+37 }
 0x6c9   :  { %v4529_v18 = vsub.f32 1.0, %v4528_v46  ;;  %v4520_v26 = vadd.f32 %v4519_v23, %v4507_v53  ;;  %v8895_v51 = vpop.f32.mrf.mxu2 }
 0x6ca   :  { %v4495_v12 = vpop.f32.mrf.mxu1  ;;  %v4675_v56 = vadd.f32 %v8895_v51, %v10365_v59 }
 0x6cb   :  { %v4530_v5 = vmul.f32 %v6184_v2, %v4529_v18  ;;  %v5667_v32 = vmul.f32 -1.442695, %v4520_v26  ;;  %v4650_v43 = vpop.f32.mrf.mxu0 }
 0x6cc   :  { %v6186_v45 = vpop.eup %6185 }
 0x6cd   :  { %v4547_v11 = vmul.f32 %v6186_v45, %v4545_v16  ;;  %v4531_v25 = vadd.f32 %v6184_v2, %v4530_v5  ;;  %6189 = vpow2.f32 %v5667_v32  ;;  %v6188_v38 = vpop.eup %6187  ;;  %vm4552_vm3 = vweird.f32 %v6186_v45 }
 0x6ce   :  { %vm4553_vm5 = vmor %vm4551_vm4, %vm4552_vm3 }
 0x6cf   :  { %v4548_v57 = vsub.f32 1.0, %v4547_v11  ;;  %v4535_v15 = vsel %vm4534_vm1, %v6184_v2, %v4531_v25 }
 0x6d0   :  { %v4540_v28 = vsel %vm4537_vm2, %v4539_v36, %v4535_v15  ;;  %v4521_v42 = vpop.f32.mrf.mxu3  ;;  %v4649_v36 = vadd.f32 %v8889_v47, %v10370_v50 }
 0x6d1   :  { %v4549_v7 = vmul.f32 %v6186_v45, %v4548_v57  ;;  %v4582_v14 = vmul.f32 %v6188_v38, %v4540_v28  ;;  %v4676_v39 = vpop.f32.mrf.mxu2 }
 0x6d3   :  { %v6190_v62 = vpop.eup %6189  ;;  %v4550_v30 = vadd.f32 %v6186_v45, %v4549_v7 }
 0x6d4   :  { %v4565_v37 = vadd.f32 1.0, %v6190_v62 }
 0x6d5   :  { %v4554_v55 = vsel %vm4553_vm5, %v6186_v45, %v4550_v30 }
 0x6d6   :  { %v4559_v6 = vsel %vm4556_vm6, %v4558_v31, %v4554_v55  ;;  %6191 = vrcp.f32 %v4565_v37  ;;  %v4577_v60 = vand.u32 2147483648, %v4565_v37  ;;  %v4575_v13 = vand.u32 2147483647, %v4565_v37 }
 0x6d7   :  { %v4581_v29 = vmul.f32 %v4559_v6, %v8741_v17  ;;  %vm4571_vm8 = vweird.f32 %v4565_v37 }
 0x6d8   :  { %v4578_v27 = vor.u32 1.1754944e-38, %v4577_v60  ;;  %vm4576_vm10 = vcmp.eq.f32.partialorder %v4575_v13, 8.507059e+37 }
 0x6d9   :  { %v4583_v3 = vadd.f32 %v4582_v14, %v4581_v29 }
 0x6db   :  { %6193 = vtanh.f32 %v4583_v3 }
 0x6dc   :  { %v6192_v20 = vpop.eup %6191 }
 0x6dd   :  { %v4567_v58 = vmul.f32 %v6192_v20, %v4565_v37  ;;  %vm4572_vm7 = vweird.f32 %v6192_v20 }
 0x6de   :  { %vm4573_vm9 = vmor %vm4571_vm8, %vm4572_vm7 }
 0x6df   :  { %v4568_v48 = vsub.f32 1.0, %v4567_v58 }
 0x6e1   :  { %v4569_v33 = vmul.f32 %v6192_v20, %v4568_v48  ;;  %v6194_v22 = vpop.eup %6193 }
 0x6e3   :  { %v4570_v44 = vadd.f32 %v6192_v20, %v4569_v33 }
 0x6e5   :  { %v4574_v61 = vsel %vm4573_vm9, %v6192_v20, %v4570_v44 }
 0x6e6   :  { %v4579_v17 = vsel %vm4576_vm10, %v4578_v27, %v4574_v61 }
 0x6e7   :  { %v4609_v63 = vpop.f32.mrf.mxu1  ;;  %v4585_v19 = vmul.f32 %v6194_v22, %v4579_v17 }
 0x6e8   :  { %v4610_v21 = vadd.f32 %v4609_v63, %v4597_v34 }
 0x6e9   :  { %v4759_v0 = vpack.c.bf16 %v4585_v19, %v4585_v19 }
 0x6ea   :  { %v5668_v24 = vmul.f32 -1.442695, %v4610_v21 }
 0x6eb   :  { %4769 = vmatmul.bf16.vlgmr.msrb.gmra.mxu0 %v4759_v0  ;;  %4795 = vmatmul.bf16.vlgmr.msrb.gmra.mxu2 %v4759_v0 }
 0x6ec   :  { %6195 = vpow2.f32 %v5668_v24 }
 0x6ef   :  { %v4635_v16 = vpop.f32.mrf.mxu3  ;;  %v4611_v4 = vpop.f32.mrf.mxu1 }
 0x6f0   :  { %v4636_v2 = vadd.f32 %v4635_v16, %v4623_v10 }
 0x6f2   :  { %v5669_v54 = vmul.f32 -1.442695, %v4636_v2  ;;  %v6196_v53 = vpop.eup %6195 }
 0x6f3   :  { %v4694_v46 = vadd.f32 1.0, %v6196_v53 }
 0x6f4   :  { %6197 = vpow2.f32 %v5669_v54 }
 0x6f5   :  { %6199 = vrcp.f32 %v4694_v46  ;;  %v4706_v51 = vand.u32 2147483648, %v4694_v46  ;;  %vm4700_vm13 = vweird.f32 %v4694_v46  ;;  %v4704_v14 = vand.u32 2147483647, %v4694_v46 }
 0x6f7   :  { %v4637_v9 = vpop.f32.mrf.mxu3  ;;  %v4661_v23 = vpop.f32.mrf.mxu1  ;;  %v4707_v37 = vor.u32 1.1754944e-38, %v4706_v51  ;;  %vm4705_vm2 = vcmp.eq.f32.partialorder %v4704_v14, 8.507059e+37 }
 0x6f8   :  { %v4662_v38 = vadd.f32 %v4661_v23, %v4649_v36 }
 0x6fa   :  { %v6198_v18 = vpop.eup %6197 }
 0x6fb   :  { %v4713_v26 = vadd.f32 1.0, %v6198_v18  ;;  %v6200_v41 = vpop.eup %6199  ;;  %4821 = vmatmul.bf16.vlgmr.msra.gmra.mxu0 %v4759_v0  ;;  %4847 = vmatmul.bf16.vlgmr.msra.gmra.mxu2 %v4759_v0 }
 0x6fc   :  { %v4696_v12 = vmul.f32 %v6200_v41, %v4694_v46  ;;  %vm4701_vm11 = vweird.f32 %v6200_v41 }
 0x6fd   :  { %6201 = vrcp.f32 %v4713_v26  ;;  %v4725_v49 = vand.u32 2147483648, %v4713_v26  ;;  %v4723_v40 = vand.u32 2147483647, %v4713_v26  ;;  %vm4719_vm14 = vweird.f32 %v4713_v26  ;;  %vm4702_vm15 = vmor %vm4700_vm13, %vm4701_vm11 }
 0x6fe   :  { %v4697_v5 = vsub.f32 1.0, %v4696_v12 }
 0x6ff   :  { %v4687_v8 = vpop.f32.mrf.mxu3  ;;  %v4663_v43 = vpop.f32.mrf.mxu1  ;;  %v4726_v47 = vor.u32 1.1754944e-38, %v4725_v49  ;;  %vm4724_vm1 = vcmp.eq.f32.partialorder %v4723_v40, 8.507059e+37 }
 0x700   :  { %v4688_v32 = vadd.f32 %v4687_v8, %v4675_v56  ;;  %v4698_v25 = vmul.f32 %v6200_v41, %v4697_v5 }
 0x702   :  { %v5670_v45 = vmul.f32 -1.442695, %v4688_v32  ;;  %v4699_v28 = vadd.f32 %v6200_v41, %v4698_v25 }
 0x703   :  { %v6202_v11 = vpop.eup %6201 }
 0x704   :  { %v4715_v57 = vmul.f32 %v6202_v11, %v4713_v26  ;;  %6203 = vpow2.f32 %v5670_v45  ;;  %vm4720_vm12 = vweird.f32 %v6202_v11  ;;  %v4703_v30 = vsel %vm4702_vm15, %v6200_v41, %v4699_v28 }
 0x705   :  { %6205 = vtanh.f32 %v4662_v38  ;;  %vm4721_vm0 = vmor %vm4719_vm14, %vm4720_vm12  ;;  %v4708_v29 = vsel %vm4705_vm2, %v4707_v37, %v4703_v30 }
 0x706   :  { %v4716_v15 = vsub.f32 1.0, %v4715_v57 }
 0x707   :  { %v4689_v42 = vpop.f32.mrf.mxu3 }
 0x708   :  { %v4717_v7 = vmul.f32 %v6202_v11, %v4716_v15 }
 0x70a   :  { %v6204_v39 = vpop.eup %6203  ;;  %v4718_v62 = vadd.f32 %v6202_v11, %v4717_v7 }
 0x70b   :  { %v4733_v31 = vadd.f32 1.0, %v6204_v39  ;;  %v6206_v20 = vpop.eup %6205 }
 0x70c   :  { %v4722_v55 = vsel %vm4721_vm0, %v6202_v11, %v4718_v62  ;;  %v4750_v58 = vmul.f32 %v6206_v20, %v4708_v29 }
 0x70d   :  { %v4727_v6 = vsel %vm4724_vm1, %v4726_v47, %v4722_v55  ;;  %6207 = vrcp.f32 %v4733_v31  ;;  %v4745_v44 = vand.u32 2147483648, %v4733_v31  ;;  %v4743_v61 = vand.u32 2147483647, %v4733_v31 }
 0x70e   :  { %v4749_v3 = vmul.f32 %v4727_v6, %v8815_v1  ;;  %vm4739_vm4 = vweird.f32 %v4733_v31  ;;  %v8913_v1 = vld [vmem:[%s8933_s8] sm:$0xff] }
 0x70f   :  { %v4746_v34 = vor.u32 1.1754944e-38, %v4745_v44  ;;  %vm4744_vm6 = vcmp.eq.f32.partialorder %v4743_v61, 8.507059e+37  ;;  %v4754_v63 = vperm.slane %v8913_v1, 6 }
 0x710   :  { %v8907_v60 = vadd.f32 %v4750_v58, %v4749_v3 }
 0x712   :  { %6209 = vtanh.f32 %v8907_v60 }
 0x713   :  { %v6208_v48 = vpop.eup %6207 }
 0x714   :  { %v4735_v33 = vmul.f32 %v6208_v48, %v4733_v31  ;;  %vm4740_vm3 = vweird.f32 %v6208_v48 }
 0x715   :  { %vm4741_vm5 = vmor %vm4739_vm4, %vm4740_vm3  ;;  %vm4938_vm3 = vcmask 7168  }
 0x716   :  { %v4736_v13 = vsub.f32 1.0, %v4735_v33 }
 0x718   :  { %v4737_v27 = vmul.f32 %v6208_v48, %v4736_v13  ;;  %v6210_v19 = vpop.eup %6209 }
 0x71a   :  { %v4738_v22 = vadd.f32 %v6208_v48, %v4737_v27 }
 0x71c   :  { %v4742_v17 = vsel %vm4741_vm5, %v6208_v48, %v4738_v22 }
 0x71d   :  { %v4747_v21 = vsel %vm4744_vm6, %v4746_v34, %v4742_v17 }
 0x71e   :  { %v4753_v0 = vmul.f32 %v6210_v19, %v4747_v21 }
 0x720   :  { %v4760_v24 = vpack.c.bf16 %v4753_v0, %v4753_v0  ;;  %v4755_v10 = vmul.f32 %v4754_v63, %v4753_v0 }
 0x722   :  { %4782 = vmatmul.bf16.vlgmr.msrb.gmra.mxu1 %v4760_v24  ;;  %4808 = vmatmul.bf16.vlgmr.msrb.gmra.mxu3 %v4760_v24 }
 0x723   :  { %4756 = vadd.xlane.f32.xlu0 %v4755_v10 }
 0x732   :  { %4834 = vmatmul.bf16.vlgmr.msra.gmra.mxu1 %v4760_v24  ;;  %4860 = vmatmul.bf16.vlgmr.msra.gmra.mxu3 %v4760_v24 }
 0x768   :  { %v4770_v16 = vpop.f32.mrf.mxu0 }
 0x769   :  { %v4771_v18 = vadd.f32 %v4770_v16, %v10355_v35 }
 0x76e   :  { %v4796_v2 = vpop.f32.mrf.mxu2 }
 0x76f   :  { %v4797_v56 = vadd.f32 %v4796_v2, %v10356_v52 }
 0x770   :  { %v4772_v4 = vpop.f32.mrf.mxu0 }
 0x776   :  { %v4798_v54 = vpop.f32.mrf.mxu2 }
 0x778   :  { %v4822_v53 = vpop.f32.mrf.mxu0 }
 0x779   :  { %v4823_v39 = vadd.f32 %v4822_v53, %v10370_v50  ;;  %v4928_v53 = vperm.slane %v8913_v1, 7 }
 0x77e   :  { %v4848_v46 = vpop.f32.mrf.mxu2 }
 0x77f   :  { %v4849_v35 = vadd.f32 %v4848_v46, %v10365_v59 }
 0x780   :  { %v4824_v9 = vpop.f32.mrf.mxu0 }
 0x786   :  { %v4850_v23 = vpop.f32.mrf.mxu2 }
 0x79f   :  { %v4783_v26 = vpop.f32.mrf.mxu1 }
 0x7a0   :  { %v4784_v41 = vadd.f32 %v4783_v26, %v4771_v18  ;;  %v2110_v18 = vpop.xlane.xlu0 %2109  ;;  %v3032_v26 = vpop.xlane.xlu1 %3031 }
 0x7a2   :  { %v5671_v12 = vmul.f32 -1.442695, %v4784_v41 }
 0x7a4   :  { %6211 = vpow2.f32 %v5671_v12  ;;  %v3954_v12 = vpop.xlane.xlu2 %3953 }
 0x7a5   :  { %v4809_v5 = vpop.f32.mrf.mxu3 }
 0x7a6   :  { %v4810_v8 = vadd.f32 %v4809_v5, %v4797_v56 }
 0x7a7   :  { %v4785_v32 = vpop.f32.mrf.mxu1 }
 0x7a8   :  { %v5672_v43 = vmul.f32 -1.442695, %v4810_v8  ;;  %v2571_v41 = vpop.xlane.xlu0 %2570  ;;  %v3493_v5 = vpop.xlane.xlu1 %3492 }
 0x7a9   :  { %v2572_v56 = vadd.f32 %v2571_v41, %v2110_v18 }
 0x7aa   :  { %v6212_v45 = vpop.eup %6211  ;;  %6213 = vpow2.f32 %v5672_v43 }
 0x7ab   :  { %v4868_v11 = vadd.f32 1.0, %v6212_v45  ;;  %v3033_v8 = vadd.f32 %v3032_v26, %v2572_v56 }
 0x7ac   :  { %v4415_v43 = vpop.xlane.xlu2 %4414 }
 0x7ad   :  { %6215 = vrcp.f32 %v4868_v11  ;;  %v4811_v25 = vpop.f32.mrf.mxu3  ;;  %v4880_v59 = vand.u32 2147483648, %v4868_v11  ;;  %vm4874_vm9 = vweird.f32 %v4868_v11  ;;  %v4878_v3 = vand.u32 2147483647, %v4868_v11 }
 0x7ae   :  { %v3494_v32 = vadd.f32 %v3493_v5, %v3033_v8 }
 0x7af   :  { %v4835_v36 = vpop.f32.mrf.mxu1  ;;  %v4881_v13 = vor.u32 1.1754944e-38, %v4880_v59  ;;  %vm4879_vm14 = vcmp.eq.f32.partialorder %v4878_v3, 8.507059e+37 }
 0x7b0   :  { %v6214_v57 = vpop.eup %6213  ;;  %v4836_v30 = vadd.f32 %v4835_v36, %v4823_v39  ;;  %v3955_v45 = vadd.f32 %v3954_v12, %v3494_v32 }
 0x7b1   :  { %v4887_v15 = vadd.f32 1.0, %v6214_v57  ;;  %v5842_v57 = vld [vmem:[#allocation2] ss:$0 sm:$0xff] }
 0x7b2   :  { %v4416_v25 = vadd.f32 %v4415_v43, %v3955_v45 }
 0x7b3   :  { %v6216_v38 = vpop.eup %6215  ;;  %6217 = vrcp.f32 %v4887_v15  ;;  %v4899_v31 = vand.u32 2147483648, %v4887_v15  ;;  %v4897_v29 = vand.u32 2147483647, %v4887_v15  ;;  %vm4893_vm10 = vweird.f32 %v4887_v15 }
 0x7b4   :  { %v4870_v49 = vmul.f32 %v6216_v38, %v4868_v11  ;;  %vm4875_vm7 = vweird.f32 %v6216_v38  ;;  %v4757_v11 = vpop.xlane.xlu0 %4756 }
 0x7b5   :  { %v4861_v28 = vpop.f32.mrf.mxu3  ;;  %vm4876_vm11 = vmor %vm4874_vm9, %vm4875_vm7  ;;  %v4900_v50 = vor.u32 1.1754944e-38, %v4899_v31  ;;  %vm4898_vm13 = vcmp.eq.f32.partialorder %v4897_v29, 8.507059e+37  ;;  %v4758_v36 = vadd.f32 %v4757_v11, %v4416_v25 }
 0x7b6   :  { %v4871_v52 = vsub.f32 1.0, %v4870_v49  ;;  %v4862_v42 = vadd.f32 %v4861_v28, %v4849_v35 }
 0x7b7   :  { %v4837_v7 = vpop.f32.mrf.mxu1 }
 0x7b8   :  { %v5673_v51 = vmul.f32 -1.442695, %v4862_v42  ;;  %v4872_v14 = vmul.f32 %v6216_v38, %v4871_v52 }
 0x7b9   :  { %v6218_v40 = vpop.eup %6217 }
 0x7ba   :  { %v4889_v62 = vmul.f32 %v6218_v40, %v4887_v15  ;;  %6219 = vpow2.f32 %v5673_v51  ;;  %v4873_v37 = vadd.f32 %v6216_v38, %v4872_v14  ;;  %vm4894_vm8 = vweird.f32 %v6218_v40 }
 0x7bb   :  { %6221 = vtanh.f32 %v4836_v30  ;;  %vm4895_vm12 = vmor %vm4893_vm10, %vm4894_vm8 }
 0x7bc   :  { %v4890_v47 = vsub.f32 1.0, %v4889_v62  ;;  %v4877_v48 = vsel %vm4876_vm11, %v6216_v38, %v4873_v37 }
 0x7bd   :  { %v4863_v55 = vpop.f32.mrf.mxu3  ;;  %v4882_v61 = vsel %vm4879_vm14, %v4881_v13, %v4877_v48 }
 0x7be   :  { %v4891_v6 = vmul.f32 %v6218_v40, %v4890_v47 }
 0x7c0   :  { %v6220_v20 = vpop.eup %6219  ;;  %v4892_v58 = vadd.f32 %v6218_v40, %v4891_v6 }
 0x7c1   :  { %v4907_v33 = vadd.f32 1.0, %v6220_v20  ;;  %v6222_v34 = vpop.eup %6221 }
 0x7c2   :  { %v4896_v44 = vsel %vm4895_vm12, %v6218_v40, %v4892_v58  ;;  %v4924_v17 = vmul.f32 %v6222_v34, %v4882_v61 }
 0x7c3   :  { %v4901_v27 = vsel %vm4898_vm13, %v4900_v50, %v4896_v44  ;;  %6223 = vrcp.f32 %v4907_v33  ;;  %v4919_v24 = vand.u32 2147483648, %v4907_v33  ;;  %v4917_v16 = vand.u32 2147483647, %v4907_v33 }
 0x7c4   :  { %v4923_v22 = vmul.f32 %v4901_v27, %v8907_v60  ;;  %vm4913_vm0 = vweird.f32 %v4907_v33 }
 0x7c5   :  { %v4920_v4 = vor.u32 1.1754944e-38, %v4919_v24  ;;  %vm4918_vm2 = vcmp.eq.f32.partialorder %v4917_v16, 8.507059e+37 }
 0x7c6   :  { %v4925_v19 = vadd.f32 %v4924_v17, %v4923_v22 }
 0x7c8   :  { %6225 = vtanh.f32 %v4925_v19 }
 0x7c9   :  { %v6224_v63 = vpop.eup %6223 }
 0x7ca   :  { %v4909_v21 = vmul.f32 %v6224_v63, %v4907_v33  ;;  %vm4914_vm15 = vweird.f32 %v6224_v63 }
 0x7cb   :  { %vm4915_vm1 = vmor %vm4913_vm0, %vm4914_vm15 }
 0x7cc   :  { %v4910_v0 = vsub.f32 1.0, %v4909_v21 }
 0x7ce   :  { %v4911_v10 = vmul.f32 %v6224_v63, %v4910_v0  ;;  %v6226_v60 = vpop.eup %6225 }
 0x7d0   :  { %v4912_v2 = vadd.f32 %v6224_v63, %v4911_v10 }
 0x7d2   :  { %v4916_v54 = vsel %vm4915_vm1, %v6224_v63, %v4912_v2 }
 0x7d3   :  { %v4921_v46 = vsel %vm4918_vm2, %v4920_v4, %v4916_v54 }
 0x7d4   :  { %v4927_v9 = vmul.f32 %v6226_v60, %v4921_v46 }
 0x7d6   :  { %v4929_v23 = vmul.f32 %v4928_v53, %v4927_v9 }
 0x7d8   :  { %4930 = vadd.xlane.f32.xlu1 %v4929_v23 }
 0x84b   :  { %v4931_v1 = vpop.xlane.xlu1 %4930 }
 0x84c   :  { %v4932_v15 = vadd.f32 %v4931_v1, %v4758_v36 }
 0x84e   :  { %v4937_v38 = vadd.f32 %v5842_v57, %v4932_v15 }
 0x850   :  { %4939 = vst.msk [vmem:[%s8935_s10] sm:$0xff] %vm4938_vm3, %v4937_v38 }
 0x851   :  { %4944 = vsyncpa [#allocation4], 1 }
 0x852   :  { %4945 = vsyncpa [#allocation6], 1 }

</bundles_post_ra>
